<compile_context>
chip_gen: v7x
topology: tpu7x:2x2x1
jax: 0.10.0
libtpu: 0.0.40
codegen_flags: <defaults>
</compile_context>

<pallas_src>
import functools
import math

import jax
import jax.numpy as jnp
from jax.experimental import pallas as pl
from jax.experimental.pallas import tpu as pltpu

# ----------------------------- configuration ------------------------------
VOCAB_SIZE = 64
PADDING_TOKEN = 1
EMB_SIZE = 32
NHEAD = 4
NUM_ENC_LAYERS = 2
NUM_DEC_LAYERS = 2
DIM_FF = 64
MAXLEN = 64
LN_EPS = 1e-5

BATCH = 2
SRC_LEN = 8
TGT_LEN = 6

# Compiler-params class (newer JAX: CompilerParams; keep a fallback for older).
_CompilerParams = getattr(pltpu, "CompilerParams", None)
if _CompilerParams is None:  # pragma: no cover
    _CompilerParams = getattr(pltpu, "TPUCompilerParams")


def _approx_recip(x):
    if hasattr(pl, "reciprocal"):
        return pl.reciprocal(x, approx=True)
    return 1.0 / x


# ------------------------------ fused kernel -------------------------------
def _fused_kernel(
    # per-batch inputs (block = one batch element)
    src_row_ref,   # (1, 1, Ss)  int32 tokens, row layout  -> key-padding masks
    src_col_ref,   # (1, Ss, 1)  int32 tokens, col layout  -> one-hot embedding
    tgt_row_ref,   # (1, 1, St)  int32
    tgt_col_ref,   # (1, St, 1)  int32
    pe_ref,        # (1, 1, E)   positional vector for this batch (quirk: pe[:B])
    # VMEM-resident weights (same block every grid step)
    emb_ref,       # (2, V, E)   [0]=src table, [1]=tgt table (f32)
    e_wqkv_ref,    # (Le*3*H, E, Dh)  bf16
    e_bqkv_ref,    # (Le*3*H, 1, Dh)  f32
    e_wo_ref,      # (Le*H, Dh, E)    bf16
    e_bo_ref,      # (Le, 1, E)       f32
    e_lng_ref,     # (2*Le, 1, E)
    e_lnb_ref,     # (2*Le, 1, E)
    e_w1_ref,      # (Le, E, FF)  bf16
    e_b1_ref,      # (Le, 1, FF)
    e_w2_ref,      # (Le, FF, E)  bf16
    e_b2_ref,      # (Le, 1, E)
    d_wqkv_ref,    # (Ld*2*3*H, E, Dh) bf16   (self-attn block, then cross-attn block per layer)
    d_bqkv_ref,    # (Ld*2*3*H, 1, Dh)
    d_wo_ref,      # (Ld*2*H, Dh, E)   bf16
    d_bo_ref,      # (Ld*2, 1, E)
    d_lng_ref,     # (3*Ld, 1, E)
    d_lnb_ref,     # (3*Ld, 1, E)
    d_w1_ref,      # (Ld, E, FF)  bf16
    d_b1_ref,      # (Ld, 1, FF)
    d_w2_ref,      # (Ld, FF, E)  bf16
    d_b2_ref,      # (Ld, 1, E)
    f_lng_ref,     # (2, 1, E)   [0]=encoder final norm, [1]=decoder final norm
    f_lnb_ref,     # (2, 1, E)
    gen_w_ref,     # (E, V)  bf16
    gen_b_ref,     # (1, V)
    # output
    out_ref,       # (1, St, V) f32
    *, nhead, n_enc, n_dec,
):
    E = pe_ref.shape[-1]
    H = nhead
    sqrt_e = jnp.float32(math.sqrt(E))

    # ---------------- helpers (all plain jnp on VMEM-resident values) -------
    def mm(a, b):
        # bf16 MXU inputs, f32 accumulation
        return jnp.dot(a.astype(jnp.bfloat16), b.astype(jnp.bfloat16),
                       preferred_element_type=jnp.float32)

    def layer_norm(x, g, b):
        mu = jnp.mean(x, axis=-1, keepdims=True)
        c = x - mu
        var = jnp.mean(c * c, axis=-1, keepdims=True)
        return c * jax.lax.rsqrt(var + LN_EPS) * g + b

    def embed(tok_col, table):
        # one-hot (S, V) @ table (V, E); kept in f32 so the row selection is exact
        s_len = tok_col.shape[0]
        v_sz = table.shape[0]
        iota_v = jax.lax.broadcasted_iota(jnp.int32, (s_len, v_sz), 1)
        onehot = (tok_col == iota_v).astype(jnp.float32)
        return jnp.dot(onehot, table, preferred_element_type=jnp.float32)

    def mha(xq, xkv, wqkv_ref, bqkv_ref, wo_ref, bo_ref, a_id, mask):
        # Per-head projections with pre-split weights; 1/sqrt(Dh) is folded
        # into the Q weights/bias at pack time.
        sq = xq.shape[0]
        base = a_id * 3 * H
        out = jnp.zeros((sq, E), dtype=jnp.float32)
        for h in range(H):
            q = mm(xq, wqkv_ref[base + 0 * H + h]) + bqkv_ref[base + 0 * H + h]
            k = mm(xkv, wqkv_ref[base + 1 * H + h]) + bqkv_ref[base + 1 * H + h]
            v = mm(xkv, wqkv_ref[base + 2 * H + h]) + bqkv_ref[base + 2 * H + h]
            s = jax.lax.dot_general(
                q.astype(jnp.bfloat16), k.astype(jnp.bfloat16),
                (((1,), (1,)), ((), ())),
                preferred_element_type=jnp.float32)            # (Sq, Sk)
            if mask is not None:                                # additive float mask
                s = s + mask
            mx = jnp.max(s, axis=-1, keepdims=True)
            p = jnp.exp(s - mx)
            denom = jnp.sum(p, axis=-1, keepdims=True)
            inv = _approx_recip(jnp.maximum(denom, 1e-30))      # guarded, EUP recip
            o = mm(p, v) * inv                                  # (Sq, Dh)
            out = out + mm(o, wo_ref[a_id * H + h])             # sum_h head @ Wo_h
        return out + bo_ref[a_id]

    # ---------------- masks (in-kernel, PyTorch float-mask semantics) -------
    src_tok = src_row_ref[0]                                    # (1, Ss) int32
    tgt_tok = tgt_row_ref[0]                                    # (1, St) int32
    src_kpm = (src_tok == PADDING_TOKEN).astype(jnp.float32)    # +1.0 at PAD keys
    tgt_kpm = (tgt_tok == PADDING_TOKEN).astype(jnp.float32)
    st = tgt_tok.shape[-1]
    qi = jax.lax.broadcasted_iota(jnp.int32, (st, st), 0)
    ki = jax.lax.broadcasted_iota(jnp.int32, (st, st), 1)
    causal = jnp.where(qi >= ki, 0.0, -jnp.inf).astype(jnp.float32)
    enc_mask = src_kpm                   # (1, Ss) broadcast over query rows
    dec_self_mask = causal + tgt_kpm     # (St, St)
    cross_mask = None                    # memory_key_padding_mask is not passed

    pe_b = pe_ref[0]                     # (1, E): same vector at every position (quirk)

    # -------------------------------- encoder -------------------------------
    x = embed(src_col_ref[0], emb_ref[0]) * sqrt_e + pe_b       # (Ss, E)
    for l in range(n_enc):
        sa = mha(x, x, e_wqkv_ref, e_bqkv_ref, e_wo_ref, e_bo_ref, l, enc_mask)
        x = layer_norm(x + sa, e_lng_ref[2 * l], e_lnb_ref[2 * l])
        h1 = jnp.maximum(mm(x, e_w1_ref[l]) + e_b1_ref[l], 0.0)
        ff = mm(h1, e_w2_ref[l]) + e_b2_ref[l]
        x = layer_norm(x + ff, e_lng_ref[2 * l + 1], e_lnb_ref[2 * l + 1])
    memory = layer_norm(x, f_lng_ref[0], f_lnb_ref[0])

    # -------------------------------- decoder -------------------------------
    y = embed(tgt_col_ref[0], emb_ref[1]) * sqrt_e + pe_b       # (St, E)
    for l in range(n_dec):
        sa = mha(y, y, d_wqkv_ref, d_bqkv_ref, d_wo_ref, d_bo_ref,
                 2 * l, dec_self_mask)
        y = layer_norm(y + sa, d_lng_ref[3 * l], d_lnb_ref[3 * l])
        ca = mha(y, memory, d_wqkv_ref, d_bqkv_ref, d_wo_ref, d_bo_ref,
                 2 * l + 1, cross_mask)
        y = layer_norm(y + ca, d_lng_ref[3 * l + 1], d_lnb_ref[3 * l + 1])
        h1 = jnp.maximum(mm(y, d_w1_ref[l]) + d_b1_ref[l], 0.0)
        ff = mm(h1, d_w2_ref[l]) + d_b2_ref[l]
        y = layer_norm(y + ff, d_lng_ref[3 * l + 2], d_lnb_ref[3 * l + 2])
    y = layer_norm(y, f_lng_ref[1], f_lnb_ref[1])

    # ------------------------------- generator ------------------------------
    logits = mm(y, gen_w_ref[...]) + gen_b_ref[...]             # (St, V)
    out_ref[0] = logits.astype(out_ref.dtype)


# ------------------------------ block specs --------------------------------
def _batch_block_spec(arr):
    nd = arr.ndim
    block = (1,) + tuple(arr.shape[1:])

    def index_map(b, _nd=nd):
        return (b,) + (0,) * (_nd - 1)

    return pl.BlockSpec(block, index_map)


def _resident_block_spec(arr):
    nd = arr.ndim

    def index_map(b, _nd=nd):
        return (0,) * _nd

    return pl.BlockSpec(tuple(arr.shape), index_map)


_RESIDENT_KEYS = (
    "emb_tabs",
    "e_wqkv", "e_bqkv", "e_wo", "e_bo", "e_lng", "e_lnb",
    "e_w1", "e_b1", "e_w2", "e_b2",
    "d_wqkv", "d_bqkv", "d_wo", "d_bo", "d_lng", "d_lnb",
    "d_w1", "d_b1", "d_w2", "d_b2",
    "f_lng", "f_lnb", "gen_w", "gen_b",
)


# ------------------------------- forward -----------------------------------
def seq2seq_forward(packed, src, trg):
    B, _ = src.shape
    _, St = trg.shape
    V = packed["gen_w"].shape[-1]

    src = src.astype(jnp.int32)
    trg = trg.astype(jnp.int32)

    per_batch = [
        src[:, None, :],                    # (B, 1, Ss) row layout -> masks
        src[:, :, None],                    # (B, Ss, 1) col layout -> embedding
        trg[:, None, :],                    # (B, 1, St)
        trg[:, :, None],                    # (B, St, 1)
        packed["pe"][:B][:, None, :],       # (B, 1, E): pos_embedding[:B] quirk
    ]
    resident = [packed[k] for k in _RESIDENT_KEYS]
    args = per_batch + resident

    kernel = functools.partial(
        _fused_kernel, nhead=NHEAD, n_enc=NUM_ENC_LAYERS, n_dec=NUM_DEC_LAYERS)

    out = pl.pallas_call(
        kernel,
        out_shape=jax.ShapeDtypeStruct((B, St, V), jnp.float32),
        grid=(B,),
        in_specs=[_batch_block_spec(a) for a in per_batch]
                 + [_resident_block_spec(a) for a in resident],
        out_specs=pl.BlockSpec((1, St, V), lambda b: (b, 0, 0)),
        compiler_params=_CompilerParams(
            dimension_semantics=("parallel",)),   # shards batches across v7x's 2 TCs
    )(*args)
    return out


# --------------------------- parameter packing ------------------------------
def pack_params(params):
    """Repack the PyTorch-layout params into kernel-friendly stacked arrays."""
    E, H = EMB_SIZE, NHEAD
    Dh = E // H
    qscale = 1.0 / math.sqrt(Dh)   # attention scale folded into Q weights/bias

    def split_proj(w, b, scale=1.0):
        # w: (E, E) torch (out_features, in_features).  Returns (H, E, Dh) and
        # (H, 1, Dh) so that x @ w_h + b_h == (x @ w.T + b)[:, h*Dh:(h+1)*Dh].
        wh = (w.T * scale).reshape(E, H, Dh).transpose(1, 0, 2)
        bh = (b * scale).reshape(H, 1, Dh)
        return wh, bh

    def attn_pack(p):
        in_w, in_b = p["in_w"], p["in_b"]            # (3E, E), (3E,)
        wq, bq = split_proj(in_w[:E], in_b[:E], qscale)
        wk, bk = split_proj(in_w[E:2 * E], in_b[E:2 * E])
        wv, bv = split_proj(in_w[2 * E:], in_b[2 * E:])
        wqkv = jnp.stack([wq, wk, wv]).reshape(3 * H, E, Dh)
        bqkv = jnp.stack([bq, bk, bv]).reshape(3 * H, 1, Dh)
        wo = p["out_w"].T.reshape(H, Dh, E)          # per-head rows of out_proj.T
        bo = p["out_b"].reshape(1, E)
        return wqkv, bqkv, wo, bo

    def cat_attn(blocks):
        return (jnp.concatenate([b[0] for b in blocks], axis=0),
                jnp.concatenate([b[1] for b in blocks], axis=0),
                jnp.concatenate([b[2] for b in blocks], axis=0),
                jnp.stack([b[3] for b in blocks], axis=0))

    def ln_rows(lns):
        g = jnp.stack([ln["g"].reshape(1, E) for ln in lns], axis=0)
        b = jnp.stack([ln["b"].reshape(1, E) for ln in lns], axis=0)
        return g, b

    def b16(x):
        return x.astype(jnp.bfloat16)

    enc, dec = params["enc_layers"], params["dec_layers"]

    e_wqkv, e_bqkv, e_wo, e_bo = cat_attn([attn_pack(l["sa"]) for l in enc])
    e_lng, e_lnb = ln_rows([ln for l in enc for ln in (l["ln1"], l["ln2"])])
    e_w1 = jnp.stack([l["ff1_w"].T for l in enc])
    e_b1 = jnp.stack([l["ff1_b"].reshape(1, -1) for l in enc])
    e_w2 = jnp.stack([l["ff2_w"].T for l in enc])
    e_b2 = jnp.stack([l["ff2_b"].reshape(1, -1) for l in enc])

    dec_attn = []
    for l in dec:
        dec_attn.append(attn_pack(l["sa"]))     # a_id = 2*l
        dec_attn.append(attn_pack(l["ca"]))     # a_id = 2*l + 1
    d_wqkv, d_bqkv, d_wo, d_bo = cat_attn(dec_attn)
    d_lng, d_lnb = ln_rows([ln for l in dec for ln in (l["ln1"], l["ln2"], l["ln3"])])
    d_w1 = jnp.stack([l["ff1_w"].T for l in dec])
    d_b1 = jnp.stack([l["ff1_b"].reshape(1, -1) for l in dec])
    d_w2 = jnp.stack([l["ff2_w"].T for l in dec])
    d_b2 = jnp.stack([l["ff2_b"].reshape(1, -1) for l in dec])

    f_lng, f_lnb = ln_rows([params["enc_norm"], params["dec_norm"]])

    return dict(
        emb_tabs=jnp.stack([params["src_emb"], params["tgt_emb"]]),  # (2, V, E) f32
        pe=params["pos_embedding"][:, 0, :],                          # (MAXLEN, E)
        e_wqkv=b16(e_wqkv), e_bqkv=e_bqkv, e_wo=b16(e_wo), e_bo=e_bo,
        e_lng=e_lng, e_lnb=e_lnb,
        e_w1=b16(e_w1), e_b1=e_b1, e_w2=b16(e_w2), e_b2=e_b2,
        d_wqkv=b16(d_wqkv), d_bqkv=d_bqkv, d_wo=b16(d_wo), d_bo=d_bo,
        d_lng=d_lng, d_lnb=d_lnb,
        d_w1=b16(d_w1), d_b1=d_b1, d_w2=b16(d_w2), d_b2=d_b2,
        f_lng=f_lng, f_lnb=f_lnb,
        gen_w=b16(params["gen_w"].T), gen_b=params["gen_b"].reshape(1, -1),
    )


# ---------------------------- parameter init --------------------------------
def init_params(key):
    keys = iter(jax.random.split(key, 256))

    def xn(shape):  # xavier_normal_ (matches normalize_weights for dim>1 params)
        fan_out, fan_in = shape[0], shape[1]
        std = math.sqrt(2.0 / (fan_in + fan_out))
        return std * jax.random.normal(next(keys), shape, dtype=jnp.float32)

    zeros = lambda s: jnp.zeros(s, jnp.float32)
    ones = lambda s: jnp.ones(s, jnp.float32)

    def attn_p():
        return dict(in_w=xn((3 * EMB_SIZE, EMB_SIZE)), in_b=zeros((3 * EMB_SIZE,)),
                    out_w=xn((EMB_SIZE, EMB_SIZE)), out_b=zeros((EMB_SIZE,)))

    def ln_p():
        return dict(g=ones((EMB_SIZE,)), b=zeros((EMB_SIZE,)))

    def ff_p():
        return dict(ff1_w=xn((DIM_FF, EMB_SIZE)), ff1_b=zeros((DIM_FF,)),
                    ff2_w=xn((EMB_SIZE, DIM_FF)), ff2_b=zeros((EMB_SIZE,)))

    enc_layers = [dict(sa=attn_p(), ln1=ln_p(), ln2=ln_p(), **ff_p())
                  for _ in range(NUM_ENC_LAYERS)]
    dec_layers = [dict(sa=attn_p(), ca=attn_p(), ln1=ln_p(), ln2=ln_p(),
                       ln3=ln_p(), **ff_p())
                  for _ in range(NUM_DEC_LAYERS)]

    # positional encoding buffer (same formula as the PyTorch module)
    den = jnp.exp(-jnp.arange(0, EMB_SIZE, 2, dtype=jnp.float32)
                  * math.log(10000.0) / EMB_SIZE)
    pos = jnp.arange(0, MAXLEN, dtype=jnp.float32).reshape(MAXLEN, 1)
    pe = jnp.zeros((MAXLEN, EMB_SIZE), jnp.float32)
    pe = pe.at[:, 0::2].set(jnp.sin(pos * den))
    pe = pe.at[:, 1::2].set(jnp.cos(pos * den))
    pe = pe[:, None, :]                                  # (MAXLEN, 1, E)

    return dict(
        src_emb=xn((VOCAB_SIZE, EMB_SIZE)),
        tgt_emb=xn((VOCAB_SIZE, EMB_SIZE)),
        pos_embedding=pe,
        enc_layers=enc_layers,
        dec_layers=dec_layers,
        enc_norm=ln_p(),
        dec_norm=ln_p(),
        gen_w=xn((VOCAB_SIZE, EMB_SIZE)),
        gen_b=zeros((VOCAB_SIZE,)),
    )


# ---------------------------------- main ------------------------------------
if __name__ == "__main__":
    key = jax.random.PRNGKey(0)
    k_src, k_trg, k_par = jax.random.split(key, 3)

    src = jax.random.randint(k_src, (BATCH, SRC_LEN), 0, VOCAB_SIZE,
                             dtype=jnp.int32)
    trg = jax.random.randint(k_trg, (BATCH, TGT_LEN), 0, VOCAB_SIZE,
                             dtype=jnp.int32)
    # force some padding positions so the padding-mask path is exercised
    src = src.at[:, -2:].set(PADDING_TOKEN)
    trg = trg.at[:, -1:].set(PADDING_TOKEN)

    params = init_params(k_par)
    packed = pack_params(params)

    fwd = jax.jit(seq2seq_forward)
    out = fwd(packed, src, trg)
    jax.block_until_ready(out)

    assert out.shape == (BATCH, TGT_LEN, VOCAB_SIZE)
    assert out.dtype == jnp.float32
    assert bool(jnp.all(jnp.isfinite(out)))
    print("KERNEL_OK")
</pallas_src>

<mosaic_0001>
module attributes {stable_mosaic.version = 11 : i64} {
  func.func @_fused_kernel(%arg0: i32, %arg1: memref<1x1x8xi32, #tpu.memory_space<vmem>>, %arg2: memref<1x8x1xi32, #tpu.memory_space<vmem>>, %arg3: memref<1x1x6xi32, #tpu.memory_space<vmem>>, %arg4: memref<1x6x1xi32, #tpu.memory_space<vmem>>, %arg5: memref<1x1x32xf32, #tpu.memory_space<vmem>>, %arg6: memref<2x64x32xf32, #tpu.memory_space<vmem>>, %arg7: memref<24x32x8xbf16, #tpu.memory_space<vmem>>, %arg8: memref<24x1x8xf32, #tpu.memory_space<vmem>>, %arg9: memref<8x8x32xbf16, #tpu.memory_space<vmem>>, %arg10: memref<2x1x32xf32, #tpu.memory_space<vmem>>, %arg11: memref<4x1x32xf32, #tpu.memory_space<vmem>>, %arg12: memref<4x1x32xf32, #tpu.memory_space<vmem>>, %arg13: memref<2x32x64xbf16, #tpu.memory_space<vmem>>, %arg14: memref<2x1x64xf32, #tpu.memory_space<vmem>>, %arg15: memref<2x64x32xbf16, #tpu.memory_space<vmem>>, %arg16: memref<2x1x32xf32, #tpu.memory_space<vmem>>, %arg17: memref<48x32x8xbf16, #tpu.memory_space<vmem>>, %arg18: memref<48x1x8xf32, #tpu.memory_space<vmem>>, %arg19: memref<16x8x32xbf16, #tpu.memory_space<vmem>>, %arg20: memref<4x1x32xf32, #tpu.memory_space<vmem>>, %arg21: memref<6x1x32xf32, #tpu.memory_space<vmem>>, %arg22: memref<6x1x32xf32, #tpu.memory_space<vmem>>, %arg23: memref<2x32x64xbf16, #tpu.memory_space<vmem>>, %arg24: memref<2x1x64xf32, #tpu.memory_space<vmem>>, %arg25: memref<2x64x32xbf16, #tpu.memory_space<vmem>>, %arg26: memref<2x1x32xf32, #tpu.memory_space<vmem>>, %arg27: memref<2x1x32xf32, #tpu.memory_space<vmem>>, %arg28: memref<2x1x32xf32, #tpu.memory_space<vmem>>, %arg29: memref<32x64xbf16, #tpu.memory_space<vmem>>, %arg30: memref<1x64xf32, #tpu.memory_space<vmem>>, %arg31: memref<1x6x64xf32, #tpu.memory_space<vmem>>) attributes {dimension_semantics = [#tpu.dimension_semantics<parallel>], iteration_bounds = array<i64: 2>, scalar_prefetch = 0 : i64, scratch_operands = 0 : i64, tpu.core_type = #tpu.core_type<tc>, window_params = [{transform_indices = @transform_0, window_bounds = array<i64: 1, 1, 8>}, {transform_indices = @transform_1, window_bounds = array<i64: 1, 8, 1>}, {transform_indices = @transform_2, window_bounds = array<i64: 1, 1, 6>}, {transform_indices = @transform_3, window_bounds = array<i64: 1, 6, 1>}, {transform_indices = @transform_4, window_bounds = array<i64: 1, 1, 32>}, {pipeline_mode = #tpu.pipeline_mode<synchronous>, transform_indices = @transform_5, window_bounds = array<i64: 2, 64, 32>}, {pipeline_mode = #tpu.pipeline_mode<synchronous>, transform_indices = @transform_6, window_bounds = array<i64: 24, 32, 8>}, {pipeline_mode = #tpu.pipeline_mode<synchronous>, transform_indices = @transform_7, window_bounds = array<i64: 24, 1, 8>}, {pipeline_mode = #tpu.pipeline_mode<synchronous>, transform_indices = @transform_8, window_bounds = array<i64: 8, 8, 32>}, {pipeline_mode = #tpu.pipeline_mode<synchronous>, transform_indices = @transform_9, window_bounds = array<i64: 2, 1, 32>}, {pipeline_mode = #tpu.pipeline_mode<synchronous>, transform_indices = @transform_10, window_bounds = array<i64: 4, 1, 32>}, {pipeline_mode = #tpu.pipeline_mode<synchronous>, transform_indices = @transform_11, window_bounds = array<i64: 4, 1, 32>}, {pipeline_mode = #tpu.pipeline_mode<synchronous>, transform_indices = @transform_12, window_bounds = array<i64: 2, 32, 64>}, {pipeline_mode = #tpu.pipeline_mode<synchronous>, transform_indices = @transform_13, window_bounds = array<i64: 2, 1, 64>}, {pipeline_mode = #tpu.pipeline_mode<synchronous>, transform_indices = @transform_14, window_bounds = array<i64: 2, 64, 32>}, {pipeline_mode = #tpu.pipeline_mode<synchronous>, transform_indices = @transform_15, window_bounds = array<i64: 2, 1, 32>}, {pipeline_mode = #tpu.pipeline_mode<synchronous>, transform_indices = @transform_16, window_bounds = array<i64: 48, 32, 8>}, {pipeline_mode = #tpu.pipeline_mode<synchronous>, transform_indices = @transform_17, window_bounds = array<i64: 48, 1, 8>}, {pipeline_mode = #tpu.pipeline_mode<synchronous>, transform_indices = @transform_18, window_bounds = array<i64: 16, 8, 32>}, {pipeline_mode = #tpu.pipeline_mode<synchronous>, transform_indices = @transform_19, window_bounds = array<i64: 4, 1, 32>}, {pipeline_mode = #tpu.pipeline_mode<synchronous>, transform_indices = @transform_20, window_bounds = array<i64: 6, 1, 32>}, {pipeline_mode = #tpu.pipeline_mode<synchronous>, transform_indices = @transform_21, window_bounds = array<i64: 6, 1, 32>}, {pipeline_mode = #tpu.pipeline_mode<synchronous>, transform_indices = @transform_22, window_bounds = array<i64: 2, 32, 64>}, {pipeline_mode = #tpu.pipeline_mode<synchronous>, transform_indices = @transform_23, window_bounds = array<i64: 2, 1, 64>}, {pipeline_mode = #tpu.pipeline_mode<synchronous>, transform_indices = @transform_24, window_bounds = array<i64: 2, 64, 32>}, {pipeline_mode = #tpu.pipeline_mode<synchronous>, transform_indices = @transform_25, window_bounds = array<i64: 2, 1, 32>}, {pipeline_mode = #tpu.pipeline_mode<synchronous>, transform_indices = @transform_26, window_bounds = array<i64: 2, 1, 32>}, {pipeline_mode = #tpu.pipeline_mode<synchronous>, transform_indices = @transform_27, window_bounds = array<i64: 2, 1, 32>}, {pipeline_mode = #tpu.pipeline_mode<synchronous>, transform_indices = @transform_28, window_bounds = array<i64: 32, 64>}, {pipeline_mode = #tpu.pipeline_mode<synchronous>, transform_indices = @transform_29, window_bounds = array<i64: 1, 64>}, {transform_indices = @transform_30, window_bounds = array<i64: 1, 6, 64>}]} {
    %c0 = arith.constant 0 : index
    %c0_0 = arith.constant 0 : index
    %c0_1 = arith.constant 0 : index
    %0 = vector.load %arg1[%c0, %c0_0, %c0_1] : memref<1x1x8xi32, #tpu.memory_space<vmem>>, vector<1x1x8xi32>
    %1 = vector.shape_cast %0 : vector<1x1x8xi32> to vector<1x8xi32>
    %c0_2 = arith.constant 0 : index
    %c0_3 = arith.constant 0 : index
    %c0_4 = arith.constant 0 : index
    %2 = vector.load %arg3[%c0_2, %c0_3, %c0_4] : memref<1x1x6xi32, #tpu.memory_space<vmem>>, vector<1x1x6xi32>
    %3 = vector.shape_cast %2 : vector<1x1x6xi32> to vector<1x6xi32>
    %c1_i32 = arith.constant 1 : i32
    %4 = vector.broadcast %c1_i32 : i32 to vector<1x8xi32>
    %5 = arith.cmpi eq, %1, %4 : vector<1x8xi32>
    %6 = arith.extui %5 : vector<1x8xi1> to vector<1x8xi32>
    %7 = arith.sitofp %6 : vector<1x8xi32> to vector<1x8xf32>
    %c1_i32_5 = arith.constant 1 : i32
    %8 = vector.broadcast %c1_i32_5 : i32 to vector<1x6xi32>
    %9 = arith.cmpi eq, %3, %8 : vector<1x6xi32>
    %10 = arith.extui %9 : vector<1x6xi1> to vector<1x6xi32>
    %11 = arith.sitofp %10 : vector<1x6xi32> to vector<1x6xf32>
    %12 = tpu.iota {dimensions = array<i32: 0>} : vector<6x6xi32>
    %13 = tpu.iota {dimensions = array<i32: 1>} : vector<6x6xi32>
    %14 = arith.cmpi sge, %12, %13 : vector<6x6xi32>
    %cst = arith.constant 0.000000e+00 : f32
    %cst_6 = arith.constant 0xFF800000 : f32
    %15 = vector.broadcast %cst : f32 to vector<6x6xf32>
    %16 = vector.broadcast %cst_6 : f32 to vector<6x6xf32>
    %17 = arith.select %14, %15, %16 : vector<6x6xi1>, vector<6x6xf32>
    %18 = vector.broadcast %11 : vector<1x6xf32> to vector<6x6xf32>
    %19 = arith.addf %17, %18 : vector<6x6xf32>
    %c0_7 = arith.constant 0 : index
    %c0_8 = arith.constant 0 : index
    %c0_9 = arith.constant 0 : index
    %20 = vector.load %arg5[%c0_7, %c0_8, %c0_9] : memref<1x1x32xf32, #tpu.memory_space<vmem>>, vector<1x1x32xf32>
    %21 = vector.shape_cast %20 : vector<1x1x32xf32> to vector<1x32xf32>
    %c0_10 = arith.constant 0 : index
    %c0_11 = arith.constant 0 : index
    %c0_12 = arith.constant 0 : index
    %22 = vector.load %arg2[%c0_10, %c0_11, %c0_12] : memref<1x8x1xi32, #tpu.memory_space<vmem>>, vector<1x8x1xi32>
    %23 = vector.shape_cast %22 : vector<1x8x1xi32> to vector<8x1xi32>
    %c0_13 = arith.constant 0 : index
    %c0_14 = arith.constant 0 : index
    %c0_15 = arith.constant 0 : index
    %24 = vector.load %arg6[%c0_13, %c0_14, %c0_15] : memref<2x64x32xf32, #tpu.memory_space<vmem>>, vector<1x64x32xf32>
    %25 = vector.shape_cast %24 : vector<1x64x32xf32> to vector<64x32xf32>
    %26 = tpu.iota {dimensions = array<i32: 1>} : vector<8x64xi32>
    %27 = vector.broadcast %23 : vector<8x1xi32> to vector<8x64xi32>
    %28 = arith.cmpi eq, %27, %26 : vector<8x64xi32>
    %29 = arith.extui %28 : vector<8x64xi1> to vector<8x64xi32>
    %30 = arith.sitofp %29 : vector<8x64xi32> to vector<8x64xf32>
    %cst_16 = arith.constant dense<0.000000e+00> : vector<8x32xf32>
    %31 = tpu.matmul %30, %25, %cst_16 {dimension_numbers = #tpu.dot_dimension_numbers<[1], [0], [0], [1], [0, 0, 1, 1], [], []>} : vector<8x64xf32>, vector<64x32xf32>, vector<8x32xf32> -> vector<8x32xf32>
    %cst_17 = arith.constant 5.65685415 : f32
    %32 = vector.broadcast %cst_17 : f32 to vector<8x32xf32>
    %33 = arith.mulf %31, %32 : vector<8x32xf32>
    %34 = vector.broadcast %21 : vector<1x32xf32> to vector<8x32xf32>
    %35 = arith.addf %33, %34 : vector<8x32xf32>
    %cst_18 = arith.constant 0.000000e+00 : f32
    %36 = vector.broadcast %cst_18 : f32 to vector<8x32xf32>
    %c0_19 = arith.constant 0 : index
    %c0_20 = arith.constant 0 : index
    %c0_21 = arith.constant 0 : index
    %37 = vector.load %arg7[%c0_19, %c0_20, %c0_21] : memref<24x32x8xbf16, #tpu.memory_space<vmem>>, vector<1x32x8xbf16>
    %38 = vector.shape_cast %37 : vector<1x32x8xbf16> to vector<32x8xbf16>
    %39 = arith.truncf %35 : vector<8x32xf32> to vector<8x32xbf16>
    %cst_22 = arith.constant dense<0.000000e+00> : vector<8x8xf32>
    %40 = tpu.matmul %39, %38, %cst_22 {dimension_numbers = #tpu.dot_dimension_numbers<[1], [0], [0], [1], [0, 0, 1, 1], [], []>} : vector<8x32xbf16>, vector<32x8xbf16>, vector<8x8xf32> -> vector<8x8xf32>
    %c0_23 = arith.constant 0 : index
    %c0_24 = arith.constant 0 : index
    %c0_25 = arith.constant 0 : index
    %41 = vector.load %arg8[%c0_23, %c0_24, %c0_25] : memref<24x1x8xf32, #tpu.memory_space<vmem>>, vector<1x1x8xf32>
    %42 = vector.shape_cast %41 : vector<1x1x8xf32> to vector<1x8xf32>
    %43 = vector.broadcast %42 : vector<1x8xf32> to vector<8x8xf32>
    %44 = arith.addf %40, %43 : vector<8x8xf32>
    %c4 = arith.constant 4 : index
    %c0_26 = arith.constant 0 : index
    %c0_27 = arith.constant 0 : index
    %45 = vector.load %arg7[%c4, %c0_26, %c0_27] : memref<24x32x8xbf16, #tpu.memory_space<vmem>>, vector<1x32x8xbf16>
    %46 = vector.shape_cast %45 : vector<1x32x8xbf16> to vector<32x8xbf16>
    %47 = arith.truncf %35 : vector<8x32xf32> to vector<8x32xbf16>
    %cst_28 = arith.constant dense<0.000000e+00> : vector<8x8xf32>
    %48 = tpu.matmul %47, %46, %cst_28 {dimension_numbers = #tpu.dot_dimension_numbers<[1], [0], [0], [1], [0, 0, 1, 1], [], []>} : vector<8x32xbf16>, vector<32x8xbf16>, vector<8x8xf32> -> vector<8x8xf32>
    %c4_29 = arith.constant 4 : index
    %c0_30 = arith.constant 0 : index
    %c0_31 = arith.constant 0 : index
    %49 = vector.load %arg8[%c4_29, %c0_30, %c0_31] : memref<24x1x8xf32, #tpu.memory_space<vmem>>, vector<1x1x8xf32>
    %50 = vector.shape_cast %49 : vector<1x1x8xf32> to vector<1x8xf32>
    %51 = vector.broadcast %50 : vector<1x8xf32> to vector<8x8xf32>
    %52 = arith.addf %48, %51 : vector<8x8xf32>
    %c8 = arith.constant 8 : index
    %c0_32 = arith.constant 0 : index
    %c0_33 = arith.constant 0 : index
    %53 = vector.load %arg7[%c8, %c0_32, %c0_33] : memref<24x32x8xbf16, #tpu.memory_space<vmem>>, vector<1x32x8xbf16>
    %54 = vector.shape_cast %53 : vector<1x32x8xbf16> to vector<32x8xbf16>
    %55 = arith.truncf %35 : vector<8x32xf32> to vector<8x32xbf16>
    %cst_34 = arith.constant dense<0.000000e+00> : vector<8x8xf32>
    %56 = tpu.matmul %55, %54, %cst_34 {dimension_numbers = #tpu.dot_dimension_numbers<[1], [0], [0], [1], [0, 0, 1, 1], [], []>} : vector<8x32xbf16>, vector<32x8xbf16>, vector<8x8xf32> -> vector<8x8xf32>
    %c8_35 = arith.constant 8 : index
    %c0_36 = arith.constant 0 : index
    %c0_37 = arith.constant 0 : index
    %57 = vector.load %arg8[%c8_35, %c0_36, %c0_37] : memref<24x1x8xf32, #tpu.memory_space<vmem>>, vector<1x1x8xf32>
    %58 = vector.shape_cast %57 : vector<1x1x8xf32> to vector<1x8xf32>
    %59 = vector.broadcast %58 : vector<1x8xf32> to vector<8x8xf32>
    %60 = arith.addf %56, %59 : vector<8x8xf32>
    %61 = arith.truncf %44 : vector<8x8xf32> to vector<8x8xbf16>
    %62 = arith.truncf %52 : vector<8x8xf32> to vector<8x8xbf16>
    %cst_38 = arith.constant dense<0.000000e+00> : vector<8x8xf32>
    %63 = tpu.matmul %61, %62, %cst_38 {dimension_numbers = #tpu.dot_dimension_numbers<[1], [1], [0], [0], [0, 0, 1, 0], [], []>} : vector<8x8xbf16>, vector<8x8xbf16>, vector<8x8xf32> -> vector<8x8xf32>
    %64 = vector.broadcast %7 : vector<1x8xf32> to vector<8x8xf32>
    %65 = arith.addf %63, %64 : vector<8x8xf32>
    %cst_39 = arith.constant dense<0xFF800000> : vector<8xf32>
    %66 = vector.multi_reduction <maximumf>, %65, %cst_39 [1] : vector<8x8xf32> to vector<8xf32>
    %67 = vector.shape_cast %66 : vector<8xf32> to vector<8x1xf32>
    %68 = vector.broadcast %67 : vector<8x1xf32> to vector<8x8xf32>
    %69 = arith.subf %65, %68 : vector<8x8xf32>
    %70 = math.exp %69 : vector<8x8xf32>
    %cst_40 = arith.constant dense<0.000000e+00> : vector<8xf32>
    %71 = vector.multi_reduction <add>, %70, %cst_40 [1] : vector<8x8xf32> to vector<8xf32>
    %72 = vector.shape_cast %71 : vector<8xf32> to vector<8x1xf32>
    %cst_41 = arith.constant 1.000000e-30 : f32
    %73 = vector.broadcast %cst_41 : f32 to vector<8x1xf32>
    %74 = arith.maximumf %72, %73 : vector<8x1xf32>
    %75 = tpu.reciprocal %74 {approx = true} : vector<8x1xf32> -> vector<8x1xf32>
    %76 = arith.truncf %70 : vector<8x8xf32> to vector<8x8xbf16>
    %77 = arith.truncf %60 : vector<8x8xf32> to vector<8x8xbf16>
    %cst_42 = arith.constant dense<0.000000e+00> : vector<8x8xf32>
    %78 = tpu.matmul %76, %77, %cst_42 {dimension_numbers = #tpu.dot_dimension_numbers<[1], [0], [0], [1], [0, 0, 1, 1], [], []>} : vector<8x8xbf16>, vector<8x8xbf16>, vector<8x8xf32> -> vector<8x8xf32>
    %79 = vector.broadcast %75 : vector<8x1xf32> to vector<8x8xf32>
    %80 = arith.mulf %78, %79 : vector<8x8xf32>
    %c0_43 = arith.constant 0 : index
    %c0_44 = arith.constant 0 : index
    %c0_45 = arith.constant 0 : index
    %81 = vector.load %arg9[%c0_43, %c0_44, %c0_45] : memref<8x8x32xbf16, #tpu.memory_space<vmem>>, vector<1x8x32xbf16>
    %82 = vector.shape_cast %81 : vector<1x8x32xbf16> to vector<8x32xbf16>
    %83 = arith.truncf %80 : vector<8x8xf32> to vector<8x8xbf16>
    %cst_46 = arith.constant dense<0.000000e+00> : vector<8x32xf32>
    %84 = tpu.matmul %83, %82, %cst_46 {dimension_numbers = #tpu.dot_dimension_numbers<[1], [0], [0], [1], [0, 0, 1, 1], [], []>} : vector<8x8xbf16>, vector<8x32xbf16>, vector<8x32xf32> -> vector<8x32xf32>
    %85 = arith.addf %36, %84 : vector<8x32xf32>
    %c1 = arith.constant 1 : index
    %c0_47 = arith.constant 0 : index
    %c0_48 = arith.constant 0 : index
    %86 = vector.load %arg7[%c1, %c0_47, %c0_48] : memref<24x32x8xbf16, #tpu.memory_space<vmem>>, vector<1x32x8xbf16>
    %87 = vector.shape_cast %86 : vector<1x32x8xbf16> to vector<32x8xbf16>
    %88 = arith.truncf %35 : vector<8x32xf32> to vector<8x32xbf16>
    %cst_49 = arith.constant dense<0.000000e+00> : vector<8x8xf32>
    %89 = tpu.matmul %88, %87, %cst_49 {dimension_numbers = #tpu.dot_dimension_numbers<[1], [0], [0], [1], [0, 0, 1, 1], [], []>} : vector<8x32xbf16>, vector<32x8xbf16>, vector<8x8xf32> -> vector<8x8xf32>
    %c1_50 = arith.constant 1 : index
    %c0_51 = arith.constant 0 : index
    %c0_52 = arith.constant 0 : index
    %90 = vector.load %arg8[%c1_50, %c0_51, %c0_52] : memref<24x1x8xf32, #tpu.memory_space<vmem>>, vector<1x1x8xf32>
    %91 = vector.shape_cast %90 : vector<1x1x8xf32> to vector<1x8xf32>
    %92 = vector.broadcast %91 : vector<1x8xf32> to vector<8x8xf32>
    %93 = arith.addf %89, %92 : vector<8x8xf32>
    %c5 = arith.constant 5 : index
    %c0_53 = arith.constant 0 : index
    %c0_54 = arith.constant 0 : index
    %94 = vector.load %arg7[%c5, %c0_53, %c0_54] : memref<24x32x8xbf16, #tpu.memory_space<vmem>>, vector<1x32x8xbf16>
    %95 = vector.shape_cast %94 : vector<1x32x8xbf16> to vector<32x8xbf16>
    %96 = arith.truncf %35 : vector<8x32xf32> to vector<8x32xbf16>
    %cst_55 = arith.constant dense<0.000000e+00> : vector<8x8xf32>
    %97 = tpu.matmul %96, %95, %cst_55 {dimension_numbers = #tpu.dot_dimension_numbers<[1], [0], [0], [1], [0, 0, 1, 1], [], []>} : vector<8x32xbf16>, vector<32x8xbf16>, vector<8x8xf32> -> vector<8x8xf32>
    %c5_56 = arith.constant 5 : index
    %c0_57 = arith.constant 0 : index
    %c0_58 = arith.constant 0 : index
    %98 = vector.load %arg8[%c5_56, %c0_57, %c0_58] : memref<24x1x8xf32, #tpu.memory_space<vmem>>, vector<1x1x8xf32>
    %99 = vector.shape_cast %98 : vector<1x1x8xf32> to vector<1x8xf32>
    %100 = vector.broadcast %99 : vector<1x8xf32> to vector<8x8xf32>
    %101 = arith.addf %97, %100 : vector<8x8xf32>
    %c9 = arith.constant 9 : index
    %c0_59 = arith.constant 0 : index
    %c0_60 = arith.constant 0 : index
    %102 = vector.load %arg7[%c9, %c0_59, %c0_60] : memref<24x32x8xbf16, #tpu.memory_space<vmem>>, vector<1x32x8xbf16>
    %103 = vector.shape_cast %102 : vector<1x32x8xbf16> to vector<32x8xbf16>
    %104 = arith.truncf %35 : vector<8x32xf32> to vector<8x32xbf16>
    %cst_61 = arith.constant dense<0.000000e+00> : vector<8x8xf32>
    %105 = tpu.matmul %104, %103, %cst_61 {dimension_numbers = #tpu.dot_dimension_numbers<[1], [0], [0], [1], [0, 0, 1, 1], [], []>} : vector<8x32xbf16>, vector<32x8xbf16>, vector<8x8xf32> -> vector<8x8xf32>
    %c9_62 = arith.constant 9 : index
    %c0_63 = arith.constant 0 : index
    %c0_64 = arith.constant 0 : index
    %106 = vector.load %arg8[%c9_62, %c0_63, %c0_64] : memref<24x1x8xf32, #tpu.memory_space<vmem>>, vector<1x1x8xf32>
    %107 = vector.shape_cast %106 : vector<1x1x8xf32> to vector<1x8xf32>
    %108 = vector.broadcast %107 : vector<1x8xf32> to vector<8x8xf32>
    %109 = arith.addf %105, %108 : vector<8x8xf32>
    %110 = arith.truncf %93 : vector<8x8xf32> to vector<8x8xbf16>
    %111 = arith.truncf %101 : vector<8x8xf32> to vector<8x8xbf16>
    %cst_65 = arith.constant dense<0.000000e+00> : vector<8x8xf32>
    %112 = tpu.matmul %110, %111, %cst_65 {dimension_numbers = #tpu.dot_dimension_numbers<[1], [1], [0], [0], [0, 0, 1, 0], [], []>} : vector<8x8xbf16>, vector<8x8xbf16>, vector<8x8xf32> -> vector<8x8xf32>
    %113 = vector.broadcast %7 : vector<1x8xf32> to vector<8x8xf32>
    %114 = arith.addf %112, %113 : vector<8x8xf32>
    %cst_66 = arith.constant dense<0xFF800000> : vector<8xf32>
    %115 = vector.multi_reduction <maximumf>, %114, %cst_66 [1] : vector<8x8xf32> to vector<8xf32>
    %116 = vector.shape_cast %115 : vector<8xf32> to vector<8x1xf32>
    %117 = vector.broadcast %116 : vector<8x1xf32> to vector<8x8xf32>
    %118 = arith.subf %114, %117 : vector<8x8xf32>
    %119 = math.exp %118 : vector<8x8xf32>
    %cst_67 = arith.constant dense<0.000000e+00> : vector<8xf32>
    %120 = vector.multi_reduction <add>, %119, %cst_67 [1] : vector<8x8xf32> to vector<8xf32>
    %121 = vector.shape_cast %120 : vector<8xf32> to vector<8x1xf32>
    %cst_68 = arith.constant 1.000000e-30 : f32
    %122 = vector.broadcast %cst_68 : f32 to vector<8x1xf32>
    %123 = arith.maximumf %121, %122 : vector<8x1xf32>
    %124 = tpu.reciprocal %123 {approx = true} : vector<8x1xf32> -> vector<8x1xf32>
    %125 = arith.truncf %119 : vector<8x8xf32> to vector<8x8xbf16>
    %126 = arith.truncf %109 : vector<8x8xf32> to vector<8x8xbf16>
    %cst_69 = arith.constant dense<0.000000e+00> : vector<8x8xf32>
    %127 = tpu.matmul %125, %126, %cst_69 {dimension_numbers = #tpu.dot_dimension_numbers<[1], [0], [0], [1], [0, 0, 1, 1], [], []>} : vector<8x8xbf16>, vector<8x8xbf16>, vector<8x8xf32> -> vector<8x8xf32>
    %128 = vector.broadcast %124 : vector<8x1xf32> to vector<8x8xf32>
    %129 = arith.mulf %127, %128 : vector<8x8xf32>
    %c1_70 = arith.constant 1 : index
    %c0_71 = arith.constant 0 : index
    %c0_72 = arith.constant 0 : index
    %130 = vector.load %arg9[%c1_70, %c0_71, %c0_72] : memref<8x8x32xbf16, #tpu.memory_space<vmem>>, vector<1x8x32xbf16>
    %131 = vector.shape_cast %130 : vector<1x8x32xbf16> to vector<8x32xbf16>
    %132 = arith.truncf %129 : vector<8x8xf32> to vector<8x8xbf16>
    %cst_73 = arith.constant dense<0.000000e+00> : vector<8x32xf32>
    %133 = tpu.matmul %132, %131, %cst_73 {dimension_numbers = #tpu.dot_dimension_numbers<[1], [0], [0], [1], [0, 0, 1, 1], [], []>} : vector<8x8xbf16>, vector<8x32xbf16>, vector<8x32xf32> -> vector<8x32xf32>
    %134 = arith.addf %85, %133 : vector<8x32xf32>
    %c2 = arith.constant 2 : index
    %c0_74 = arith.constant 0 : index
    %c0_75 = arith.constant 0 : index
    %135 = vector.load %arg7[%c2, %c0_74, %c0_75] : memref<24x32x8xbf16, #tpu.memory_space<vmem>>, vector<1x32x8xbf16>
    %136 = vector.shape_cast %135 : vector<1x32x8xbf16> to vector<32x8xbf16>
    %137 = arith.truncf %35 : vector<8x32xf32> to vector<8x32xbf16>
    %cst_76 = arith.constant dense<0.000000e+00> : vector<8x8xf32>
    %138 = tpu.matmul %137, %136, %cst_76 {dimension_numbers = #tpu.dot_dimension_numbers<[1], [0], [0], [1], [0, 0, 1, 1], [], []>} : vector<8x32xbf16>, vector<32x8xbf16>, vector<8x8xf32> -> vector<8x8xf32>
    %c2_77 = arith.constant 2 : index
    %c0_78 = arith.constant 0 : index
    %c0_79 = arith.constant 0 : index
    %139 = vector.load %arg8[%c2_77, %c0_78, %c0_79] : memref<24x1x8xf32, #tpu.memory_space<vmem>>, vector<1x1x8xf32>
    %140 = vector.shape_cast %139 : vector<1x1x8xf32> to vector<1x8xf32>
    %141 = vector.broadcast %140 : vector<1x8xf32> to vector<8x8xf32>
    %142 = arith.addf %138, %141 : vector<8x8xf32>
    %c6 = arith.constant 6 : index
    %c0_80 = arith.constant 0 : index
    %c0_81 = arith.constant 0 : index
    %143 = vector.load %arg7[%c6, %c0_80, %c0_81] : memref<24x32x8xbf16, #tpu.memory_space<vmem>>, vector<1x32x8xbf16>
    %144 = vector.shape_cast %143 : vector<1x32x8xbf16> to vector<32x8xbf16>
    %145 = arith.truncf %35 : vector<8x32xf32> to vector<8x32xbf16>
    %cst_82 = arith.constant dense<0.000000e+00> : vector<8x8xf32>
    %146 = tpu.matmul %145, %144, %cst_82 {dimension_numbers = #tpu.dot_dimension_numbers<[1], [0], [0], [1], [0, 0, 1, 1], [], []>} : vector<8x32xbf16>, vector<32x8xbf16>, vector<8x8xf32> -> vector<8x8xf32>
    %c6_83 = arith.constant 6 : index
    %c0_84 = arith.constant 0 : index
    %c0_85 = arith.constant 0 : index
    %147 = vector.load %arg8[%c6_83, %c0_84, %c0_85] : memref<24x1x8xf32, #tpu.memory_space<vmem>>, vector<1x1x8xf32>
    %148 = vector.shape_cast %147 : vector<1x1x8xf32> to vector<1x8xf32>
    %149 = vector.broadcast %148 : vector<1x8xf32> to vector<8x8xf32>
    %150 = arith.addf %146, %149 : vector<8x8xf32>
    %c10 = arith.constant 10 : index
    %c0_86 = arith.constant 0 : index
    %c0_87 = arith.constant 0 : index
    %151 = vector.load %arg7[%c10, %c0_86, %c0_87] : memref<24x32x8xbf16, #tpu.memory_space<vmem>>, vector<1x32x8xbf16>
    %152 = vector.shape_cast %151 : vector<1x32x8xbf16> to vector<32x8xbf16>
    %153 = arith.truncf %35 : vector<8x32xf32> to vector<8x32xbf16>
    %cst_88 = arith.constant dense<0.000000e+00> : vector<8x8xf32>
    %154 = tpu.matmul %153, %152, %cst_88 {dimension_numbers = #tpu.dot_dimension_numbers<[1], [0], [0], [1], [0, 0, 1, 1], [], []>} : vector<8x32xbf16>, vector<32x8xbf16>, vector<8x8xf32> -> vector<8x8xf32>
    %c10_89 = arith.constant 10 : index
    %c0_90 = arith.constant 0 : index
    %c0_91 = arith.constant 0 : index
    %155 = vector.load %arg8[%c10_89, %c0_90, %c0_91] : memref<24x1x8xf32, #tpu.memory_space<vmem>>, vector<1x1x8xf32>
    %156 = vector.shape_cast %155 : vector<1x1x8xf32> to vector<1x8xf32>
    %157 = vector.broadcast %156 : vector<1x8xf32> to vector<8x8xf32>
    %158 = arith.addf %154, %157 : vector<8x8xf32>
    %159 = arith.truncf %142 : vector<8x8xf32> to vector<8x8xbf16>
    %160 = arith.truncf %150 : vector<8x8xf32> to vector<8x8xbf16>
    %cst_92 = arith.constant dense<0.000000e+00> : vector<8x8xf32>
    %161 = tpu.matmul %159, %160, %cst_92 {dimension_numbers = #tpu.dot_dimension_numbers<[1], [1], [0], [0], [0, 0, 1, 0], [], []>} : vector<8x8xbf16>, vector<8x8xbf16>, vector<8x8xf32> -> vector<8x8xf32>
    %162 = vector.broadcast %7 : vector<1x8xf32> to vector<8x8xf32>
    %163 = arith.addf %161, %162 : vector<8x8xf32>
    %cst_93 = arith.constant dense<0xFF800000> : vector<8xf32>
    %164 = vector.multi_reduction <maximumf>, %163, %cst_93 [1] : vector<8x8xf32> to vector<8xf32>
    %165 = vector.shape_cast %164 : vector<8xf32> to vector<8x1xf32>
    %166 = vector.broadcast %165 : vector<8x1xf32> to vector<8x8xf32>
    %167 = arith.subf %163, %166 : vector<8x8xf32>
    %168 = math.exp %167 : vector<8x8xf32>
    %cst_94 = arith.constant dense<0.000000e+00> : vector<8xf32>
    %169 = vector.multi_reduction <add>, %168, %cst_94 [1] : vector<8x8xf32> to vector<8xf32>
    %170 = vector.shape_cast %169 : vector<8xf32> to vector<8x1xf32>
    %cst_95 = arith.constant 1.000000e-30 : f32
    %171 = vector.broadcast %cst_95 : f32 to vector<8x1xf32>
    %172 = arith.maximumf %170, %171 : vector<8x1xf32>
    %173 = tpu.reciprocal %172 {approx = true} : vector<8x1xf32> -> vector<8x1xf32>
    %174 = arith.truncf %168 : vector<8x8xf32> to vector<8x8xbf16>
    %175 = arith.truncf %158 : vector<8x8xf32> to vector<8x8xbf16>
    %cst_96 = arith.constant dense<0.000000e+00> : vector<8x8xf32>
    %176 = tpu.matmul %174, %175, %cst_96 {dimension_numbers = #tpu.dot_dimension_numbers<[1], [0], [0], [1], [0, 0, 1, 1], [], []>} : vector<8x8xbf16>, vector<8x8xbf16>, vector<8x8xf32> -> vector<8x8xf32>
    %177 = vector.broadcast %173 : vector<8x1xf32> to vector<8x8xf32>
    %178 = arith.mulf %176, %177 : vector<8x8xf32>
    %c2_97 = arith.constant 2 : index
    %c0_98 = arith.constant 0 : index
    %c0_99 = arith.constant 0 : index
    %179 = vector.load %arg9[%c2_97, %c0_98, %c0_99] : memref<8x8x32xbf16, #tpu.memory_space<vmem>>, vector<1x8x32xbf16>
    %180 = vector.shape_cast %179 : vector<1x8x32xbf16> to vector<8x32xbf16>
    %181 = arith.truncf %178 : vector<8x8xf32> to vector<8x8xbf16>
    %cst_100 = arith.constant dense<0.000000e+00> : vector<8x32xf32>
    %182 = tpu.matmul %181, %180, %cst_100 {dimension_numbers = #tpu.dot_dimension_numbers<[1], [0], [0], [1], [0, 0, 1, 1], [], []>} : vector<8x8xbf16>, vector<8x32xbf16>, vector<8x32xf32> -> vector<8x32xf32>
    %183 = arith.addf %134, %182 : vector<8x32xf32>
    %c3 = arith.constant 3 : index
    %c0_101 = arith.constant 0 : index
    %c0_102 = arith.constant 0 : index
    %184 = vector.load %arg7[%c3, %c0_101, %c0_102] : memref<24x32x8xbf16, #tpu.memory_space<vmem>>, vector<1x32x8xbf16>
    %185 = vector.shape_cast %184 : vector<1x32x8xbf16> to vector<32x8xbf16>
    %186 = arith.truncf %35 : vector<8x32xf32> to vector<8x32xbf16>
    %cst_103 = arith.constant dense<0.000000e+00> : vector<8x8xf32>
    %187 = tpu.matmul %186, %185, %cst_103 {dimension_numbers = #tpu.dot_dimension_numbers<[1], [0], [0], [1], [0, 0, 1, 1], [], []>} : vector<8x32xbf16>, vector<32x8xbf16>, vector<8x8xf32> -> vector<8x8xf32>
    %c3_104 = arith.constant 3 : index
    %c0_105 = arith.constant 0 : index
    %c0_106 = arith.constant 0 : index
    %188 = vector.load %arg8[%c3_104, %c0_105, %c0_106] : memref<24x1x8xf32, #tpu.memory_space<vmem>>, vector<1x1x8xf32>
    %189 = vector.shape_cast %188 : vector<1x1x8xf32> to vector<1x8xf32>
    %190 = vector.broadcast %189 : vector<1x8xf32> to vector<8x8xf32>
    %191 = arith.addf %187, %190 : vector<8x8xf32>
    %c7 = arith.constant 7 : index
    %c0_107 = arith.constant 0 : index
    %c0_108 = arith.constant 0 : index
    %192 = vector.load %arg7[%c7, %c0_107, %c0_108] : memref<24x32x8xbf16, #tpu.memory_space<vmem>>, vector<1x32x8xbf16>
    %193 = vector.shape_cast %192 : vector<1x32x8xbf16> to vector<32x8xbf16>
    %194 = arith.truncf %35 : vector<8x32xf32> to vector<8x32xbf16>
    %cst_109 = arith.constant dense<0.000000e+00> : vector<8x8xf32>
    %195 = tpu.matmul %194, %193, %cst_109 {dimension_numbers = #tpu.dot_dimension_numbers<[1], [0], [0], [1], [0, 0, 1, 1], [], []>} : vector<8x32xbf16>, vector<32x8xbf16>, vector<8x8xf32> -> vector<8x8xf32>
    %c7_110 = arith.constant 7 : index
    %c0_111 = arith.constant 0 : index
    %c0_112 = arith.constant 0 : index
    %196 = vector.load %arg8[%c7_110, %c0_111, %c0_112] : memref<24x1x8xf32, #tpu.memory_space<vmem>>, vector<1x1x8xf32>
    %197 = vector.shape_cast %196 : vector<1x1x8xf32> to vector<1x8xf32>
    %198 = vector.broadcast %197 : vector<1x8xf32> to vector<8x8xf32>
    %199 = arith.addf %195, %198 : vector<8x8xf32>
    %c11 = arith.constant 11 : index
    %c0_113 = arith.constant 0 : index
    %c0_114 = arith.constant 0 : index
    %200 = vector.load %arg7[%c11, %c0_113, %c0_114] : memref<24x32x8xbf16, #tpu.memory_space<vmem>>, vector<1x32x8xbf16>
    %201 = vector.shape_cast %200 : vector<1x32x8xbf16> to vector<32x8xbf16>
    %202 = arith.truncf %35 : vector<8x32xf32> to vector<8x32xbf16>
    %cst_115 = arith.constant dense<0.000000e+00> : vector<8x8xf32>
    %203 = tpu.matmul %202, %201, %cst_115 {dimension_numbers = #tpu.dot_dimension_numbers<[1], [0], [0], [1], [0, 0, 1, 1], [], []>} : vector<8x32xbf16>, vector<32x8xbf16>, vector<8x8xf32> -> vector<8x8xf32>
    %c11_116 = arith.constant 11 : index
    %c0_117 = arith.constant 0 : index
    %c0_118 = arith.constant 0 : index
    %204 = vector.load %arg8[%c11_116, %c0_117, %c0_118] : memref<24x1x8xf32, #tpu.memory_space<vmem>>, vector<1x1x8xf32>
    %205 = vector.shape_cast %204 : vector<1x1x8xf32> to vector<1x8xf32>
    %206 = vector.broadcast %205 : vector<1x8xf32> to vector<8x8xf32>
    %207 = arith.addf %203, %206 : vector<8x8xf32>
    %208 = arith.truncf %191 : vector<8x8xf32> to vector<8x8xbf16>
    %209 = arith.truncf %199 : vector<8x8xf32> to vector<8x8xbf16>
    %cst_119 = arith.constant dense<0.000000e+00> : vector<8x8xf32>
    %210 = tpu.matmul %208, %209, %cst_119 {dimension_numbers = #tpu.dot_dimension_numbers<[1], [1], [0], [0], [0, 0, 1, 0], [], []>} : vector<8x8xbf16>, vector<8x8xbf16>, vector<8x8xf32> -> vector<8x8xf32>
    %211 = vector.broadcast %7 : vector<1x8xf32> to vector<8x8xf32>
    %212 = arith.addf %210, %211 : vector<8x8xf32>
    %cst_120 = arith.constant dense<0xFF800000> : vector<8xf32>
    %213 = vector.multi_reduction <maximumf>, %212, %cst_120 [1] : vector<8x8xf32> to vector<8xf32>
    %214 = vector.shape_cast %213 : vector<8xf32> to vector<8x1xf32>
    %215 = vector.broadcast %214 : vector<8x1xf32> to vector<8x8xf32>
    %216 = arith.subf %212, %215 : vector<8x8xf32>
    %217 = math.exp %216 : vector<8x8xf32>
    %cst_121 = arith.constant dense<0.000000e+00> : vector<8xf32>
    %218 = vector.multi_reduction <add>, %217, %cst_121 [1] : vector<8x8xf32> to vector<8xf32>
    %219 = vector.shape_cast %218 : vector<8xf32> to vector<8x1xf32>
    %cst_122 = arith.constant 1.000000e-30 : f32
    %220 = vector.broadcast %cst_122 : f32 to vector<8x1xf32>
    %221 = arith.maximumf %219, %220 : vector<8x1xf32>
    %222 = tpu.reciprocal %221 {approx = true} : vector<8x1xf32> -> vector<8x1xf32>
    %223 = arith.truncf %217 : vector<8x8xf32> to vector<8x8xbf16>
    %224 = arith.truncf %207 : vector<8x8xf32> to vector<8x8xbf16>
    %cst_123 = arith.constant dense<0.000000e+00> : vector<8x8xf32>
    %225 = tpu.matmul %223, %224, %cst_123 {dimension_numbers = #tpu.dot_dimension_numbers<[1], [0], [0], [1], [0, 0, 1, 1], [], []>} : vector<8x8xbf16>, vector<8x8xbf16>, vector<8x8xf32> -> vector<8x8xf32>
    %226 = vector.broadcast %222 : vector<8x1xf32> to vector<8x8xf32>
    %227 = arith.mulf %225, %226 : vector<8x8xf32>
    %c3_124 = arith.constant 3 : index
    %c0_125 = arith.constant 0 : index
    %c0_126 = arith.constant 0 : index
    %228 = vector.load %arg9[%c3_124, %c0_125, %c0_126] : memref<8x8x32xbf16, #tpu.memory_space<vmem>>, vector<1x8x32xbf16>
    %229 = vector.shape_cast %228 : vector<1x8x32xbf16> to vector<8x32xbf16>
    %230 = arith.truncf %227 : vector<8x8xf32> to vector<8x8xbf16>
    %cst_127 = arith.constant dense<0.000000e+00> : vector<8x32xf32>
    %231 = tpu.matmul %230, %229, %cst_127 {dimension_numbers = #tpu.dot_dimension_numbers<[1], [0], [0], [1], [0, 0, 1, 1], [], []>} : vector<8x8xbf16>, vector<8x32xbf16>, vector<8x32xf32> -> vector<8x32xf32>
    %232 = arith.addf %183, %231 : vector<8x32xf32>
    %c0_128 = arith.constant 0 : index
    %c0_129 = arith.constant 0 : index
    %c0_130 = arith.constant 0 : index
    %233 = vector.load %arg10[%c0_128, %c0_129, %c0_130] : memref<2x1x32xf32, #tpu.memory_space<vmem>>, vector<1x1x32xf32>
    %234 = vector.shape_cast %233 : vector<1x1x32xf32> to vector<1x32xf32>
    %235 = vector.broadcast %234 : vector<1x32xf32> to vector<8x32xf32>
    %236 = arith.addf %232, %235 : vector<8x32xf32>
    %237 = arith.addf %35, %236 : vector<8x32xf32>
    %c0_131 = arith.constant 0 : index
    %c0_132 = arith.constant 0 : index
    %c0_133 = arith.constant 0 : index
    %238 = vector.load %arg11[%c0_131, %c0_132, %c0_133] : memref<4x1x32xf32, #tpu.memory_space<vmem>>, vector<1x1x32xf32>
    %239 = vector.shape_cast %238 : vector<1x1x32xf32> to vector<1x32xf32>
    %c0_134 = arith.constant 0 : index
    %c0_135 = arith.constant 0 : index
    %c0_136 = arith.constant 0 : index
    %240 = vector.load %arg12[%c0_134, %c0_135, %c0_136] : memref<4x1x32xf32, #tpu.memory_space<vmem>>, vector<1x1x32xf32>
    %241 = vector.shape_cast %240 : vector<1x1x32xf32> to vector<1x32xf32>
    %cst_137 = arith.constant dense<0.000000e+00> : vector<8xf32>
    %242 = vector.multi_reduction <add>, %237, %cst_137 [1] : vector<8x32xf32> to vector<8xf32>
    %243 = vector.shape_cast %242 : vector<8xf32> to vector<8x1xf32>
    %cst_138 = arith.constant 3.200000e+01 : f32
    %244 = vector.broadcast %cst_138 : f32 to vector<8x1xf32>
    %245 = arith.divf %243, %244 : vector<8x1xf32>
    %246 = vector.broadcast %245 : vector<8x1xf32> to vector<8x32xf32>
    %247 = arith.subf %237, %246 : vector<8x32xf32>
    %248 = arith.mulf %247, %247 : vector<8x32xf32>
    %cst_139 = arith.constant dense<0.000000e+00> : vector<8xf32>
    %249 = vector.multi_reduction <add>, %248, %cst_139 [1] : vector<8x32xf32> to vector<8xf32>
    %250 = vector.shape_cast %249 : vector<8xf32> to vector<8x1xf32>
    %cst_140 = arith.constant 3.200000e+01 : f32
    %251 = vector.broadcast %cst_140 : f32 to vector<8x1xf32>
    %252 = arith.divf %250, %251 : vector<8x1xf32>
    %cst_141 = arith.constant 9.99999974E-6 : f32
    %253 = vector.broadcast %cst_141 : f32 to vector<8x1xf32>
    %254 = arith.addf %252, %253 : vector<8x1xf32>
    %255 = math.rsqrt %254 : vector<8x1xf32>
    %256 = vector.broadcast %255 : vector<8x1xf32> to vector<8x32xf32>
    %257 = arith.mulf %247, %256 : vector<8x32xf32>
    %258 = vector.broadcast %239 : vector<1x32xf32> to vector<8x32xf32>
    %259 = arith.mulf %257, %258 : vector<8x32xf32>
    %260 = vector.broadcast %241 : vector<1x32xf32> to vector<8x32xf32>
    %261 = arith.addf %259, %260 : vector<8x32xf32>
    %c0_142 = arith.constant 0 : index
    %c0_143 = arith.constant 0 : index
    %c0_144 = arith.constant 0 : index
    %262 = vector.load %arg13[%c0_142, %c0_143, %c0_144] : memref<2x32x64xbf16, #tpu.memory_space<vmem>>, vector<1x32x64xbf16>
    %263 = vector.shape_cast %262 : vector<1x32x64xbf16> to vector<32x64xbf16>
    %264 = arith.truncf %261 : vector<8x32xf32> to vector<8x32xbf16>
    %cst_145 = arith.constant dense<0.000000e+00> : vector<8x64xf32>
    %265 = tpu.matmul %264, %263, %cst_145 {dimension_numbers = #tpu.dot_dimension_numbers<[1], [0], [0], [1], [0, 0, 1, 1], [], []>} : vector<8x32xbf16>, vector<32x64xbf16>, vector<8x64xf32> -> vector<8x64xf32>
    %c0_146 = arith.constant 0 : index
    %c0_147 = arith.constant 0 : index
    %c0_148 = arith.constant 0 : index
    %266 = vector.load %arg14[%c0_146, %c0_147, %c0_148] : memref<2x1x64xf32, #tpu.memory_space<vmem>>, vector<1x1x64xf32>
    %267 = vector.shape_cast %266 : vector<1x1x64xf32> to vector<1x64xf32>
    %268 = vector.broadcast %267 : vector<1x64xf32> to vector<8x64xf32>
    %269 = arith.addf %265, %268 : vector<8x64xf32>
    %cst_149 = arith.constant 0.000000e+00 : f32
    %270 = vector.broadcast %cst_149 : f32 to vector<8x64xf32>
    %271 = arith.maximumf %269, %270 : vector<8x64xf32>
    %c0_150 = arith.constant 0 : index
    %c0_151 = arith.constant 0 : index
    %c0_152 = arith.constant 0 : index
    %272 = vector.load %arg15[%c0_150, %c0_151, %c0_152] : memref<2x64x32xbf16, #tpu.memory_space<vmem>>, vector<1x64x32xbf16>
    %273 = vector.shape_cast %272 : vector<1x64x32xbf16> to vector<64x32xbf16>
    %274 = arith.truncf %271 : vector<8x64xf32> to vector<8x64xbf16>
    %cst_153 = arith.constant dense<0.000000e+00> : vector<8x32xf32>
    %275 = tpu.matmul %274, %273, %cst_153 {dimension_numbers = #tpu.dot_dimension_numbers<[1], [0], [0], [1], [0, 0, 1, 1], [], []>} : vector<8x64xbf16>, vector<64x32xbf16>, vector<8x32xf32> -> vector<8x32xf32>
    %c0_154 = arith.constant 0 : index
    %c0_155 = arith.constant 0 : index
    %c0_156 = arith.constant 0 : index
    %276 = vector.load %arg16[%c0_154, %c0_155, %c0_156] : memref<2x1x32xf32, #tpu.memory_space<vmem>>, vector<1x1x32xf32>
    %277 = vector.shape_cast %276 : vector<1x1x32xf32> to vector<1x32xf32>
    %278 = vector.broadcast %277 : vector<1x32xf32> to vector<8x32xf32>
    %279 = arith.addf %275, %278 : vector<8x32xf32>
    %280 = arith.addf %261, %279 : vector<8x32xf32>
    %c1_157 = arith.constant 1 : index
    %c0_158 = arith.constant 0 : index
    %c0_159 = arith.constant 0 : index
    %281 = vector.load %arg11[%c1_157, %c0_158, %c0_159] : memref<4x1x32xf32, #tpu.memory_space<vmem>>, vector<1x1x32xf32>
    %282 = vector.shape_cast %281 : vector<1x1x32xf32> to vector<1x32xf32>
    %c1_160 = arith.constant 1 : index
    %c0_161 = arith.constant 0 : index
    %c0_162 = arith.constant 0 : index
    %283 = vector.load %arg12[%c1_160, %c0_161, %c0_162] : memref<4x1x32xf32, #tpu.memory_space<vmem>>, vector<1x1x32xf32>
    %284 = vector.shape_cast %283 : vector<1x1x32xf32> to vector<1x32xf32>
    %cst_163 = arith.constant dense<0.000000e+00> : vector<8xf32>
    %285 = vector.multi_reduction <add>, %280, %cst_163 [1] : vector<8x32xf32> to vector<8xf32>
    %286 = vector.shape_cast %285 : vector<8xf32> to vector<8x1xf32>
    %cst_164 = arith.constant 3.200000e+01 : f32
    %287 = vector.broadcast %cst_164 : f32 to vector<8x1xf32>
    %288 = arith.divf %286, %287 : vector<8x1xf32>
    %289 = vector.broadcast %288 : vector<8x1xf32> to vector<8x32xf32>
    %290 = arith.subf %280, %289 : vector<8x32xf32>
    %291 = arith.mulf %290, %290 : vector<8x32xf32>
    %cst_165 = arith.constant dense<0.000000e+00> : vector<8xf32>
    %292 = vector.multi_reduction <add>, %291, %cst_165 [1] : vector<8x32xf32> to vector<8xf32>
    %293 = vector.shape_cast %292 : vector<8xf32> to vector<8x1xf32>
    %cst_166 = arith.constant 3.200000e+01 : f32
    %294 = vector.broadcast %cst_166 : f32 to vector<8x1xf32>
    %295 = arith.divf %293, %294 : vector<8x1xf32>
    %cst_167 = arith.constant 9.99999974E-6 : f32
    %296 = vector.broadcast %cst_167 : f32 to vector<8x1xf32>
    %297 = arith.addf %295, %296 : vector<8x1xf32>
    %298 = math.rsqrt %297 : vector<8x1xf32>
    %299 = vector.broadcast %298 : vector<8x1xf32> to vector<8x32xf32>
    %300 = arith.mulf %290, %299 : vector<8x32xf32>
    %301 = vector.broadcast %282 : vector<1x32xf32> to vector<8x32xf32>
    %302 = arith.mulf %300, %301 : vector<8x32xf32>
    %303 = vector.broadcast %284 : vector<1x32xf32> to vector<8x32xf32>
    %304 = arith.addf %302, %303 : vector<8x32xf32>
    %cst_168 = arith.constant 0.000000e+00 : f32
    %305 = vector.broadcast %cst_168 : f32 to vector<8x32xf32>
    %c12 = arith.constant 12 : index
    %c0_169 = arith.constant 0 : index
    %c0_170 = arith.constant 0 : index
    %306 = vector.load %arg7[%c12, %c0_169, %c0_170] : memref<24x32x8xbf16, #tpu.memory_space<vmem>>, vector<1x32x8xbf16>
    %307 = vector.shape_cast %306 : vector<1x32x8xbf16> to vector<32x8xbf16>
    %308 = arith.truncf %304 : vector<8x32xf32> to vector<8x32xbf16>
    %cst_171 = arith.constant dense<0.000000e+00> : vector<8x8xf32>
    %309 = tpu.matmul %308, %307, %cst_171 {dimension_numbers = #tpu.dot_dimension_numbers<[1], [0], [0], [1], [0, 0, 1, 1], [], []>} : vector<8x32xbf16>, vector<32x8xbf16>, vector<8x8xf32> -> vector<8x8xf32>
    %c12_172 = arith.constant 12 : index
    %c0_173 = arith.constant 0 : index
    %c0_174 = arith.constant 0 : index
    %310 = vector.load %arg8[%c12_172, %c0_173, %c0_174] : memref<24x1x8xf32, #tpu.memory_space<vmem>>, vector<1x1x8xf32>
    %311 = vector.shape_cast %310 : vector<1x1x8xf32> to vector<1x8xf32>
    %312 = vector.broadcast %311 : vector<1x8xf32> to vector<8x8xf32>
    %313 = arith.addf %309, %312 : vector<8x8xf32>
    %c16 = arith.constant 16 : index
    %c0_175 = arith.constant 0 : index
    %c0_176 = arith.constant 0 : index
    %314 = vector.load %arg7[%c16, %c0_175, %c0_176] : memref<24x32x8xbf16, #tpu.memory_space<vmem>>, vector<1x32x8xbf16>
    %315 = vector.shape_cast %314 : vector<1x32x8xbf16> to vector<32x8xbf16>
    %316 = arith.truncf %304 : vector<8x32xf32> to vector<8x32xbf16>
    %cst_177 = arith.constant dense<0.000000e+00> : vector<8x8xf32>
    %317 = tpu.matmul %316, %315, %cst_177 {dimension_numbers = #tpu.dot_dimension_numbers<[1], [0], [0], [1], [0, 0, 1, 1], [], []>} : vector<8x32xbf16>, vector<32x8xbf16>, vector<8x8xf32> -> vector<8x8xf32>
    %c16_178 = arith.constant 16 : index
    %c0_179 = arith.constant 0 : index
    %c0_180 = arith.constant 0 : index
    %318 = vector.load %arg8[%c16_178, %c0_179, %c0_180] : memref<24x1x8xf32, #tpu.memory_space<vmem>>, vector<1x1x8xf32>
    %319 = vector.shape_cast %318 : vector<1x1x8xf32> to vector<1x8xf32>
    %320 = vector.broadcast %319 : vector<1x8xf32> to vector<8x8xf32>
    %321 = arith.addf %317, %320 : vector<8x8xf32>
    %c20 = arith.constant 20 : index
    %c0_181 = arith.constant 0 : index
    %c0_182 = arith.constant 0 : index
    %322 = vector.load %arg7[%c20, %c0_181, %c0_182] : memref<24x32x8xbf16, #tpu.memory_space<vmem>>, vector<1x32x8xbf16>
    %323 = vector.shape_cast %322 : vector<1x32x8xbf16> to vector<32x8xbf16>
    %324 = arith.truncf %304 : vector<8x32xf32> to vector<8x32xbf16>
    %cst_183 = arith.constant dense<0.000000e+00> : vector<8x8xf32>
    %325 = tpu.matmul %324, %323, %cst_183 {dimension_numbers = #tpu.dot_dimension_numbers<[1], [0], [0], [1], [0, 0, 1, 1], [], []>} : vector<8x32xbf16>, vector<32x8xbf16>, vector<8x8xf32> -> vector<8x8xf32>
    %c20_184 = arith.constant 20 : index
    %c0_185 = arith.constant 0 : index
    %c0_186 = arith.constant 0 : index
    %326 = vector.load %arg8[%c20_184, %c0_185, %c0_186] : memref<24x1x8xf32, #tpu.memory_space<vmem>>, vector<1x1x8xf32>
    %327 = vector.shape_cast %326 : vector<1x1x8xf32> to vector<1x8xf32>
    %328 = vector.broadcast %327 : vector<1x8xf32> to vector<8x8xf32>
    %329 = arith.addf %325, %328 : vector<8x8xf32>
    %330 = arith.truncf %313 : vector<8x8xf32> to vector<8x8xbf16>
    %331 = arith.truncf %321 : vector<8x8xf32> to vector<8x8xbf16>
    %cst_187 = arith.constant dense<0.000000e+00> : vector<8x8xf32>
    %332 = tpu.matmul %330, %331, %cst_187 {dimension_numbers = #tpu.dot_dimension_numbers<[1], [1], [0], [0], [0, 0, 1, 0], [], []>} : vector<8x8xbf16>, vector<8x8xbf16>, vector<8x8xf32> -> vector<8x8xf32>
    %333 = vector.broadcast %7 : vector<1x8xf32> to vector<8x8xf32>
    %334 = arith.addf %332, %333 : vector<8x8xf32>
    %cst_188 = arith.constant dense<0xFF800000> : vector<8xf32>
    %335 = vector.multi_reduction <maximumf>, %334, %cst_188 [1] : vector<8x8xf32> to vector<8xf32>
    %336 = vector.shape_cast %335 : vector<8xf32> to vector<8x1xf32>
    %337 = vector.broadcast %336 : vector<8x1xf32> to vector<8x8xf32>
    %338 = arith.subf %334, %337 : vector<8x8xf32>
    %339 = math.exp %338 : vector<8x8xf32>
    %cst_189 = arith.constant dense<0.000000e+00> : vector<8xf32>
    %340 = vector.multi_reduction <add>, %339, %cst_189 [1] : vector<8x8xf32> to vector<8xf32>
    %341 = vector.shape_cast %340 : vector<8xf32> to vector<8x1xf32>
    %cst_190 = arith.constant 1.000000e-30 : f32
    %342 = vector.broadcast %cst_190 : f32 to vector<8x1xf32>
    %343 = arith.maximumf %341, %342 : vector<8x1xf32>
    %344 = tpu.reciprocal %343 {approx = true} : vector<8x1xf32> -> vector<8x1xf32>
    %345 = arith.truncf %339 : vector<8x8xf32> to vector<8x8xbf16>
    %346 = arith.truncf %329 : vector<8x8xf32> to vector<8x8xbf16>
    %cst_191 = arith.constant dense<0.000000e+00> : vector<8x8xf32>
    %347 = tpu.matmul %345, %346, %cst_191 {dimension_numbers = #tpu.dot_dimension_numbers<[1], [0], [0], [1], [0, 0, 1, 1], [], []>} : vector<8x8xbf16>, vector<8x8xbf16>, vector<8x8xf32> -> vector<8x8xf32>
    %348 = vector.broadcast %344 : vector<8x1xf32> to vector<8x8xf32>
    %349 = arith.mulf %347, %348 : vector<8x8xf32>
    %c4_192 = arith.constant 4 : index
    %c0_193 = arith.constant 0 : index
    %c0_194 = arith.constant 0 : index
    %350 = vector.load %arg9[%c4_192, %c0_193, %c0_194] : memref<8x8x32xbf16, #tpu.memory_space<vmem>>, vector<1x8x32xbf16>
    %351 = vector.shape_cast %350 : vector<1x8x32xbf16> to vector<8x32xbf16>
    %352 = arith.truncf %349 : vector<8x8xf32> to vector<8x8xbf16>
    %cst_195 = arith.constant dense<0.000000e+00> : vector<8x32xf32>
    %353 = tpu.matmul %352, %351, %cst_195 {dimension_numbers = #tpu.dot_dimension_numbers<[1], [0], [0], [1], [0, 0, 1, 1], [], []>} : vector<8x8xbf16>, vector<8x32xbf16>, vector<8x32xf32> -> vector<8x32xf32>
    %354 = arith.addf %305, %353 : vector<8x32xf32>
    %c13 = arith.constant 13 : index
    %c0_196 = arith.constant 0 : index
    %c0_197 = arith.constant 0 : index
    %355 = vector.load %arg7[%c13, %c0_196, %c0_197] : memref<24x32x8xbf16, #tpu.memory_space<vmem>>, vector<1x32x8xbf16>
    %356 = vector.shape_cast %355 : vector<1x32x8xbf16> to vector<32x8xbf16>
    %357 = arith.truncf %304 : vector<8x32xf32> to vector<8x32xbf16>
    %cst_198 = arith.constant dense<0.000000e+00> : vector<8x8xf32>
    %358 = tpu.matmul %357, %356, %cst_198 {dimension_numbers = #tpu.dot_dimension_numbers<[1], [0], [0], [1], [0, 0, 1, 1], [], []>} : vector<8x32xbf16>, vector<32x8xbf16>, vector<8x8xf32> -> vector<8x8xf32>
    %c13_199 = arith.constant 13 : index
    %c0_200 = arith.constant 0 : index
    %c0_201 = arith.constant 0 : index
    %359 = vector.load %arg8[%c13_199, %c0_200, %c0_201] : memref<24x1x8xf32, #tpu.memory_space<vmem>>, vector<1x1x8xf32>
    %360 = vector.shape_cast %359 : vector<1x1x8xf32> to vector<1x8xf32>
    %361 = vector.broadcast %360 : vector<1x8xf32> to vector<8x8xf32>
    %362 = arith.addf %358, %361 : vector<8x8xf32>
    %c17 = arith.constant 17 : index
    %c0_202 = arith.constant 0 : index
    %c0_203 = arith.constant 0 : index
    %363 = vector.load %arg7[%c17, %c0_202, %c0_203] : memref<24x32x8xbf16, #tpu.memory_space<vmem>>, vector<1x32x8xbf16>
    %364 = vector.shape_cast %363 : vector<1x32x8xbf16> to vector<32x8xbf16>
    %365 = arith.truncf %304 : vector<8x32xf32> to vector<8x32xbf16>
    %cst_204 = arith.constant dense<0.000000e+00> : vector<8x8xf32>
    %366 = tpu.matmul %365, %364, %cst_204 {dimension_numbers = #tpu.dot_dimension_numbers<[1], [0], [0], [1], [0, 0, 1, 1], [], []>} : vector<8x32xbf16>, vector<32x8xbf16>, vector<8x8xf32> -> vector<8x8xf32>
    %c17_205 = arith.constant 17 : index
    %c0_206 = arith.constant 0 : index
    %c0_207 = arith.constant 0 : index
    %367 = vector.load %arg8[%c17_205, %c0_206, %c0_207] : memref<24x1x8xf32, #tpu.memory_space<vmem>>, vector<1x1x8xf32>
    %368 = vector.shape_cast %367 : vector<1x1x8xf32> to vector<1x8xf32>
    %369 = vector.broadcast %368 : vector<1x8xf32> to vector<8x8xf32>
    %370 = arith.addf %366, %369 : vector<8x8xf32>
    %c21 = arith.constant 21 : index
    %c0_208 = arith.constant 0 : index
    %c0_209 = arith.constant 0 : index
    %371 = vector.load %arg7[%c21, %c0_208, %c0_209] : memref<24x32x8xbf16, #tpu.memory_space<vmem>>, vector<1x32x8xbf16>
    %372 = vector.shape_cast %371 : vector<1x32x8xbf16> to vector<32x8xbf16>
    %373 = arith.truncf %304 : vector<8x32xf32> to vector<8x32xbf16>
    %cst_210 = arith.constant dense<0.000000e+00> : vector<8x8xf32>
    %374 = tpu.matmul %373, %372, %cst_210 {dimension_numbers = #tpu.dot_dimension_numbers<[1], [0], [0], [1], [0, 0, 1, 1], [], []>} : vector<8x32xbf16>, vector<32x8xbf16>, vector<8x8xf32> -> vector<8x8xf32>
    %c21_211 = arith.constant 21 : index
    %c0_212 = arith.constant 0 : index
    %c0_213 = arith.constant 0 : index
    %375 = vector.load %arg8[%c21_211, %c0_212, %c0_213] : memref<24x1x8xf32, #tpu.memory_space<vmem>>, vector<1x1x8xf32>
    %376 = vector.shape_cast %375 : vector<1x1x8xf32> to vector<1x8xf32>
    %377 = vector.broadcast %376 : vector<1x8xf32> to vector<8x8xf32>
    %378 = arith.addf %374, %377 : vector<8x8xf32>
    %379 = arith.truncf %362 : vector<8x8xf32> to vector<8x8xbf16>
    %380 = arith.truncf %370 : vector<8x8xf32> to vector<8x8xbf16>
    %cst_214 = arith.constant dense<0.000000e+00> : vector<8x8xf32>
    %381 = tpu.matmul %379, %380, %cst_214 {dimension_numbers = #tpu.dot_dimension_numbers<[1], [1], [0], [0], [0, 0, 1, 0], [], []>} : vector<8x8xbf16>, vector<8x8xbf16>, vector<8x8xf32> -> vector<8x8xf32>
    %382 = vector.broadcast %7 : vector<1x8xf32> to vector<8x8xf32>
    %383 = arith.addf %381, %382 : vector<8x8xf32>
    %cst_215 = arith.constant dense<0xFF800000> : vector<8xf32>
    %384 = vector.multi_reduction <maximumf>, %383, %cst_215 [1] : vector<8x8xf32> to vector<8xf32>
    %385 = vector.shape_cast %384 : vector<8xf32> to vector<8x1xf32>
    %386 = vector.broadcast %385 : vector<8x1xf32> to vector<8x8xf32>
    %387 = arith.subf %383, %386 : vector<8x8xf32>
    %388 = math.exp %387 : vector<8x8xf32>
    %cst_216 = arith.constant dense<0.000000e+00> : vector<8xf32>
    %389 = vector.multi_reduction <add>, %388, %cst_216 [1] : vector<8x8xf32> to vector<8xf32>
    %390 = vector.shape_cast %389 : vector<8xf32> to vector<8x1xf32>
    %cst_217 = arith.constant 1.000000e-30 : f32
    %391 = vector.broadcast %cst_217 : f32 to vector<8x1xf32>
    %392 = arith.maximumf %390, %391 : vector<8x1xf32>
    %393 = tpu.reciprocal %392 {approx = true} : vector<8x1xf32> -> vector<8x1xf32>
    %394 = arith.truncf %388 : vector<8x8xf32> to vector<8x8xbf16>
    %395 = arith.truncf %378 : vector<8x8xf32> to vector<8x8xbf16>
    %cst_218 = arith.constant dense<0.000000e+00> : vector<8x8xf32>
    %396 = tpu.matmul %394, %395, %cst_218 {dimension_numbers = #tpu.dot_dimension_numbers<[1], [0], [0], [1], [0, 0, 1, 1], [], []>} : vector<8x8xbf16>, vector<8x8xbf16>, vector<8x8xf32> -> vector<8x8xf32>
    %397 = vector.broadcast %393 : vector<8x1xf32> to vector<8x8xf32>
    %398 = arith.mulf %396, %397 : vector<8x8xf32>
    %c5_219 = arith.constant 5 : index
    %c0_220 = arith.constant 0 : index
    %c0_221 = arith.constant 0 : index
    %399 = vector.load %arg9[%c5_219, %c0_220, %c0_221] : memref<8x8x32xbf16, #tpu.memory_space<vmem>>, vector<1x8x32xbf16>
    %400 = vector.shape_cast %399 : vector<1x8x32xbf16> to vector<8x32xbf16>
    %401 = arith.truncf %398 : vector<8x8xf32> to vector<8x8xbf16>
    %cst_222 = arith.constant dense<0.000000e+00> : vector<8x32xf32>
    %402 = tpu.matmul %401, %400, %cst_222 {dimension_numbers = #tpu.dot_dimension_numbers<[1], [0], [0], [1], [0, 0, 1, 1], [], []>} : vector<8x8xbf16>, vector<8x32xbf16>, vector<8x32xf32> -> vector<8x32xf32>
    %403 = arith.addf %354, %402 : vector<8x32xf32>
    %c14 = arith.constant 14 : index
    %c0_223 = arith.constant 0 : index
    %c0_224 = arith.constant 0 : index
    %404 = vector.load %arg7[%c14, %c0_223, %c0_224] : memref<24x32x8xbf16, #tpu.memory_space<vmem>>, vector<1x32x8xbf16>
    %405 = vector.shape_cast %404 : vector<1x32x8xbf16> to vector<32x8xbf16>
    %406 = arith.truncf %304 : vector<8x32xf32> to vector<8x32xbf16>
    %cst_225 = arith.constant dense<0.000000e+00> : vector<8x8xf32>
    %407 = tpu.matmul %406, %405, %cst_225 {dimension_numbers = #tpu.dot_dimension_numbers<[1], [0], [0], [1], [0, 0, 1, 1], [], []>} : vector<8x32xbf16>, vector<32x8xbf16>, vector<8x8xf32> -> vector<8x8xf32>
    %c14_226 = arith.constant 14 : index
    %c0_227 = arith.constant 0 : index
    %c0_228 = arith.constant 0 : index
    %408 = vector.load %arg8[%c14_226, %c0_227, %c0_228] : memref<24x1x8xf32, #tpu.memory_space<vmem>>, vector<1x1x8xf32>
    %409 = vector.shape_cast %408 : vector<1x1x8xf32> to vector<1x8xf32>
    %410 = vector.broadcast %409 : vector<1x8xf32> to vector<8x8xf32>
    %411 = arith.addf %407, %410 : vector<8x8xf32>
    %c18 = arith.constant 18 : index
    %c0_229 = arith.constant 0 : index
    %c0_230 = arith.constant 0 : index
    %412 = vector.load %arg7[%c18, %c0_229, %c0_230] : memref<24x32x8xbf16, #tpu.memory_space<vmem>>, vector<1x32x8xbf16>
    %413 = vector.shape_cast %412 : vector<1x32x8xbf16> to vector<32x8xbf16>
    %414 = arith.truncf %304 : vector<8x32xf32> to vector<8x32xbf16>
    %cst_231 = arith.constant dense<0.000000e+00> : vector<8x8xf32>
    %415 = tpu.matmul %414, %413, %cst_231 {dimension_numbers = #tpu.dot_dimension_numbers<[1], [0], [0], [1], [0, 0, 1, 1], [], []>} : vector<8x32xbf16>, vector<32x8xbf16>, vector<8x8xf32> -> vector<8x8xf32>
    %c18_232 = arith.constant 18 : index
    %c0_233 = arith.constant 0 : index
    %c0_234 = arith.constant 0 : index
    %416 = vector.load %arg8[%c18_232, %c0_233, %c0_234] : memref<24x1x8xf32, #tpu.memory_space<vmem>>, vector<1x1x8xf32>
    %417 = vector.shape_cast %416 : vector<1x1x8xf32> to vector<1x8xf32>
    %418 = vector.broadcast %417 : vector<1x8xf32> to vector<8x8xf32>
    %419 = arith.addf %415, %418 : vector<8x8xf32>
    %c22 = arith.constant 22 : index
    %c0_235 = arith.constant 0 : index
    %c0_236 = arith.constant 0 : index
    %420 = vector.load %arg7[%c22, %c0_235, %c0_236] : memref<24x32x8xbf16, #tpu.memory_space<vmem>>, vector<1x32x8xbf16>
    %421 = vector.shape_cast %420 : vector<1x32x8xbf16> to vector<32x8xbf16>
    %422 = arith.truncf %304 : vector<8x32xf32> to vector<8x32xbf16>
    %cst_237 = arith.constant dense<0.000000e+00> : vector<8x8xf32>
    %423 = tpu.matmul %422, %421, %cst_237 {dimension_numbers = #tpu.dot_dimension_numbers<[1], [0], [0], [1], [0, 0, 1, 1], [], []>} : vector<8x32xbf16>, vector<32x8xbf16>, vector<8x8xf32> -> vector<8x8xf32>
    %c22_238 = arith.constant 22 : index
    %c0_239 = arith.constant 0 : index
    %c0_240 = arith.constant 0 : index
    %424 = vector.load %arg8[%c22_238, %c0_239, %c0_240] : memref<24x1x8xf32, #tpu.memory_space<vmem>>, vector<1x1x8xf32>
    %425 = vector.shape_cast %424 : vector<1x1x8xf32> to vector<1x8xf32>
    %426 = vector.broadcast %425 : vector<1x8xf32> to vector<8x8xf32>
    %427 = arith.addf %423, %426 : vector<8x8xf32>
    %428 = arith.truncf %411 : vector<8x8xf32> to vector<8x8xbf16>
    %429 = arith.truncf %419 : vector<8x8xf32> to vector<8x8xbf16>
    %cst_241 = arith.constant dense<0.000000e+00> : vector<8x8xf32>
    %430 = tpu.matmul %428, %429, %cst_241 {dimension_numbers = #tpu.dot_dimension_numbers<[1], [1], [0], [0], [0, 0, 1, 0], [], []>} : vector<8x8xbf16>, vector<8x8xbf16>, vector<8x8xf32> -> vector<8x8xf32>
    %431 = vector.broadcast %7 : vector<1x8xf32> to vector<8x8xf32>
    %432 = arith.addf %430, %431 : vector<8x8xf32>
    %cst_242 = arith.constant dense<0xFF800000> : vector<8xf32>
    %433 = vector.multi_reduction <maximumf>, %432, %cst_242 [1] : vector<8x8xf32> to vector<8xf32>
    %434 = vector.shape_cast %433 : vector<8xf32> to vector<8x1xf32>
    %435 = vector.broadcast %434 : vector<8x1xf32> to vector<8x8xf32>
    %436 = arith.subf %432, %435 : vector<8x8xf32>
    %437 = math.exp %436 : vector<8x8xf32>
    %cst_243 = arith.constant dense<0.000000e+00> : vector<8xf32>
    %438 = vector.multi_reduction <add>, %437, %cst_243 [1] : vector<8x8xf32> to vector<8xf32>
    %439 = vector.shape_cast %438 : vector<8xf32> to vector<8x1xf32>
    %cst_244 = arith.constant 1.000000e-30 : f32
    %440 = vector.broadcast %cst_244 : f32 to vector<8x1xf32>
    %441 = arith.maximumf %439, %440 : vector<8x1xf32>
    %442 = tpu.reciprocal %441 {approx = true} : vector<8x1xf32> -> vector<8x1xf32>
    %443 = arith.truncf %437 : vector<8x8xf32> to vector<8x8xbf16>
    %444 = arith.truncf %427 : vector<8x8xf32> to vector<8x8xbf16>
    %cst_245 = arith.constant dense<0.000000e+00> : vector<8x8xf32>
    %445 = tpu.matmul %443, %444, %cst_245 {dimension_numbers = #tpu.dot_dimension_numbers<[1], [0], [0], [1], [0, 0, 1, 1], [], []>} : vector<8x8xbf16>, vector<8x8xbf16>, vector<8x8xf32> -> vector<8x8xf32>
    %446 = vector.broadcast %442 : vector<8x1xf32> to vector<8x8xf32>
    %447 = arith.mulf %445, %446 : vector<8x8xf32>
    %c6_246 = arith.constant 6 : index
    %c0_247 = arith.constant 0 : index
    %c0_248 = arith.constant 0 : index
    %448 = vector.load %arg9[%c6_246, %c0_247, %c0_248] : memref<8x8x32xbf16, #tpu.memory_space<vmem>>, vector<1x8x32xbf16>
    %449 = vector.shape_cast %448 : vector<1x8x32xbf16> to vector<8x32xbf16>
    %450 = arith.truncf %447 : vector<8x8xf32> to vector<8x8xbf16>
    %cst_249 = arith.constant dense<0.000000e+00> : vector<8x32xf32>
    %451 = tpu.matmul %450, %449, %cst_249 {dimension_numbers = #tpu.dot_dimension_numbers<[1], [0], [0], [1], [0, 0, 1, 1], [], []>} : vector<8x8xbf16>, vector<8x32xbf16>, vector<8x32xf32> -> vector<8x32xf32>
    %452 = arith.addf %403, %451 : vector<8x32xf32>
    %c15 = arith.constant 15 : index
    %c0_250 = arith.constant 0 : index
    %c0_251 = arith.constant 0 : index
    %453 = vector.load %arg7[%c15, %c0_250, %c0_251] : memref<24x32x8xbf16, #tpu.memory_space<vmem>>, vector<1x32x8xbf16>
    %454 = vector.shape_cast %453 : vector<1x32x8xbf16> to vector<32x8xbf16>
    %455 = arith.truncf %304 : vector<8x32xf32> to vector<8x32xbf16>
    %cst_252 = arith.constant dense<0.000000e+00> : vector<8x8xf32>
    %456 = tpu.matmul %455, %454, %cst_252 {dimension_numbers = #tpu.dot_dimension_numbers<[1], [0], [0], [1], [0, 0, 1, 1], [], []>} : vector<8x32xbf16>, vector<32x8xbf16>, vector<8x8xf32> -> vector<8x8xf32>
    %c15_253 = arith.constant 15 : index
    %c0_254 = arith.constant 0 : index
    %c0_255 = arith.constant 0 : index
    %457 = vector.load %arg8[%c15_253, %c0_254, %c0_255] : memref<24x1x8xf32, #tpu.memory_space<vmem>>, vector<1x1x8xf32>
    %458 = vector.shape_cast %457 : vector<1x1x8xf32> to vector<1x8xf32>
    %459 = vector.broadcast %458 : vector<1x8xf32> to vector<8x8xf32>
    %460 = arith.addf %456, %459 : vector<8x8xf32>
    %c19 = arith.constant 19 : index
    %c0_256 = arith.constant 0 : index
    %c0_257 = arith.constant 0 : index
    %461 = vector.load %arg7[%c19, %c0_256, %c0_257] : memref<24x32x8xbf16, #tpu.memory_space<vmem>>, vector<1x32x8xbf16>
    %462 = vector.shape_cast %461 : vector<1x32x8xbf16> to vector<32x8xbf16>
    %463 = arith.truncf %304 : vector<8x32xf32> to vector<8x32xbf16>
    %cst_258 = arith.constant dense<0.000000e+00> : vector<8x8xf32>
    %464 = tpu.matmul %463, %462, %cst_258 {dimension_numbers = #tpu.dot_dimension_numbers<[1], [0], [0], [1], [0, 0, 1, 1], [], []>} : vector<8x32xbf16>, vector<32x8xbf16>, vector<8x8xf32> -> vector<8x8xf32>
    %c19_259 = arith.constant 19 : index
    %c0_260 = arith.constant 0 : index
    %c0_261 = arith.constant 0 : index
    %465 = vector.load %arg8[%c19_259, %c0_260, %c0_261] : memref<24x1x8xf32, #tpu.memory_space<vmem>>, vector<1x1x8xf32>
    %466 = vector.shape_cast %465 : vector<1x1x8xf32> to vector<1x8xf32>
    %467 = vector.broadcast %466 : vector<1x8xf32> to vector<8x8xf32>
    %468 = arith.addf %464, %467 : vector<8x8xf32>
    %c23 = arith.constant 23 : index
    %c0_262 = arith.constant 0 : index
    %c0_263 = arith.constant 0 : index
    %469 = vector.load %arg7[%c23, %c0_262, %c0_263] : memref<24x32x8xbf16, #tpu.memory_space<vmem>>, vector<1x32x8xbf16>
    %470 = vector.shape_cast %469 : vector<1x32x8xbf16> to vector<32x8xbf16>
    %471 = arith.truncf %304 : vector<8x32xf32> to vector<8x32xbf16>
    %cst_264 = arith.constant dense<0.000000e+00> : vector<8x8xf32>
    %472 = tpu.matmul %471, %470, %cst_264 {dimension_numbers = #tpu.dot_dimension_numbers<[1], [0], [0], [1], [0, 0, 1, 1], [], []>} : vector<8x32xbf16>, vector<32x8xbf16>, vector<8x8xf32> -> vector<8x8xf32>
    %c23_265 = arith.constant 23 : index
    %c0_266 = arith.constant 0 : index
    %c0_267 = arith.constant 0 : index
    %473 = vector.load %arg8[%c23_265, %c0_266, %c0_267] : memref<24x1x8xf32, #tpu.memory_space<vmem>>, vector<1x1x8xf32>
    %474 = vector.shape_cast %473 : vector<1x1x8xf32> to vector<1x8xf32>
    %475 = vector.broadcast %474 : vector<1x8xf32> to vector<8x8xf32>
    %476 = arith.addf %472, %475 : vector<8x8xf32>
    %477 = arith.truncf %460 : vector<8x8xf32> to vector<8x8xbf16>
    %478 = arith.truncf %468 : vector<8x8xf32> to vector<8x8xbf16>
    %cst_268 = arith.constant dense<0.000000e+00> : vector<8x8xf32>
    %479 = tpu.matmul %477, %478, %cst_268 {dimension_numbers = #tpu.dot_dimension_numbers<[1], [1], [0], [0], [0, 0, 1, 0], [], []>} : vector<8x8xbf16>, vector<8x8xbf16>, vector<8x8xf32> -> vector<8x8xf32>
    %480 = vector.broadcast %7 : vector<1x8xf32> to vector<8x8xf32>
    %481 = arith.addf %479, %480 : vector<8x8xf32>
    %cst_269 = arith.constant dense<0xFF800000> : vector<8xf32>
    %482 = vector.multi_reduction <maximumf>, %481, %cst_269 [1] : vector<8x8xf32> to vector<8xf32>
    %483 = vector.shape_cast %482 : vector<8xf32> to vector<8x1xf32>
    %484 = vector.broadcast %483 : vector<8x1xf32> to vector<8x8xf32>
    %485 = arith.subf %481, %484 : vector<8x8xf32>
    %486 = math.exp %485 : vector<8x8xf32>
    %cst_270 = arith.constant dense<0.000000e+00> : vector<8xf32>
    %487 = vector.multi_reduction <add>, %486, %cst_270 [1] : vector<8x8xf32> to vector<8xf32>
    %488 = vector.shape_cast %487 : vector<8xf32> to vector<8x1xf32>
    %cst_271 = arith.constant 1.000000e-30 : f32
    %489 = vector.broadcast %cst_271 : f32 to vector<8x1xf32>
    %490 = arith.maximumf %488, %489 : vector<8x1xf32>
    %491 = tpu.reciprocal %490 {approx = true} : vector<8x1xf32> -> vector<8x1xf32>
    %492 = arith.truncf %486 : vector<8x8xf32> to vector<8x8xbf16>
    %493 = arith.truncf %476 : vector<8x8xf32> to vector<8x8xbf16>
    %cst_272 = arith.constant dense<0.000000e+00> : vector<8x8xf32>
    %494 = tpu.matmul %492, %493, %cst_272 {dimension_numbers = #tpu.dot_dimension_numbers<[1], [0], [0], [1], [0, 0, 1, 1], [], []>} : vector<8x8xbf16>, vector<8x8xbf16>, vector<8x8xf32> -> vector<8x8xf32>
    %495 = vector.broadcast %491 : vector<8x1xf32> to vector<8x8xf32>
    %496 = arith.mulf %494, %495 : vector<8x8xf32>
    %c7_273 = arith.constant 7 : index
    %c0_274 = arith.constant 0 : index
    %c0_275 = arith.constant 0 : index
    %497 = vector.load %arg9[%c7_273, %c0_274, %c0_275] : memref<8x8x32xbf16, #tpu.memory_space<vmem>>, vector<1x8x32xbf16>
    %498 = vector.shape_cast %497 : vector<1x8x32xbf16> to vector<8x32xbf16>
    %499 = arith.truncf %496 : vector<8x8xf32> to vector<8x8xbf16>
    %cst_276 = arith.constant dense<0.000000e+00> : vector<8x32xf32>
    %500 = tpu.matmul %499, %498, %cst_276 {dimension_numbers = #tpu.dot_dimension_numbers<[1], [0], [0], [1], [0, 0, 1, 1], [], []>} : vector<8x8xbf16>, vector<8x32xbf16>, vector<8x32xf32> -> vector<8x32xf32>
    %501 = arith.addf %452, %500 : vector<8x32xf32>
    %c1_277 = arith.constant 1 : index
    %c0_278 = arith.constant 0 : index
    %c0_279 = arith.constant 0 : index
    %502 = vector.load %arg10[%c1_277, %c0_278, %c0_279] : memref<2x1x32xf32, #tpu.memory_space<vmem>>, vector<1x1x32xf32>
    %503 = vector.shape_cast %502 : vector<1x1x32xf32> to vector<1x32xf32>
    %504 = vector.broadcast %503 : vector<1x32xf32> to vector<8x32xf32>
    %505 = arith.addf %501, %504 : vector<8x32xf32>
    %506 = arith.addf %304, %505 : vector<8x32xf32>
    %c2_280 = arith.constant 2 : index
    %c0_281 = arith.constant 0 : index
    %c0_282 = arith.constant 0 : index
    %507 = vector.load %arg11[%c2_280, %c0_281, %c0_282] : memref<4x1x32xf32, #tpu.memory_space<vmem>>, vector<1x1x32xf32>
    %508 = vector.shape_cast %507 : vector<1x1x32xf32> to vector<1x32xf32>
    %c2_283 = arith.constant 2 : index
    %c0_284 = arith.constant 0 : index
    %c0_285 = arith.constant 0 : index
    %509 = vector.load %arg12[%c2_283, %c0_284, %c0_285] : memref<4x1x32xf32, #tpu.memory_space<vmem>>, vector<1x1x32xf32>
    %510 = vector.shape_cast %509 : vector<1x1x32xf32> to vector<1x32xf32>
    %cst_286 = arith.constant dense<0.000000e+00> : vector<8xf32>
    %511 = vector.multi_reduction <add>, %506, %cst_286 [1] : vector<8x32xf32> to vector<8xf32>
    %512 = vector.shape_cast %511 : vector<8xf32> to vector<8x1xf32>
    %cst_287 = arith.constant 3.200000e+01 : f32
    %513 = vector.broadcast %cst_287 : f32 to vector<8x1xf32>
    %514 = arith.divf %512, %513 : vector<8x1xf32>
    %515 = vector.broadcast %514 : vector<8x1xf32> to vector<8x32xf32>
    %516 = arith.subf %506, %515 : vector<8x32xf32>
    %517 = arith.mulf %516, %516 : vector<8x32xf32>
    %cst_288 = arith.constant dense<0.000000e+00> : vector<8xf32>
    %518 = vector.multi_reduction <add>, %517, %cst_288 [1] : vector<8x32xf32> to vector<8xf32>
    %519 = vector.shape_cast %518 : vector<8xf32> to vector<8x1xf32>
    %cst_289 = arith.constant 3.200000e+01 : f32
    %520 = vector.broadcast %cst_289 : f32 to vector<8x1xf32>
    %521 = arith.divf %519, %520 : vector<8x1xf32>
    %cst_290 = arith.constant 9.99999974E-6 : f32
    %522 = vector.broadcast %cst_290 : f32 to vector<8x1xf32>
    %523 = arith.addf %521, %522 : vector<8x1xf32>
    %524 = math.rsqrt %523 : vector<8x1xf32>
    %525 = vector.broadcast %524 : vector<8x1xf32> to vector<8x32xf32>
    %526 = arith.mulf %516, %525 : vector<8x32xf32>
    %527 = vector.broadcast %508 : vector<1x32xf32> to vector<8x32xf32>
    %528 = arith.mulf %526, %527 : vector<8x32xf32>
    %529 = vector.broadcast %510 : vector<1x32xf32> to vector<8x32xf32>
    %530 = arith.addf %528, %529 : vector<8x32xf32>
    %c1_291 = arith.constant 1 : index
    %c0_292 = arith.constant 0 : index
    %c0_293 = arith.constant 0 : index
    %531 = vector.load %arg13[%c1_291, %c0_292, %c0_293] : memref<2x32x64xbf16, #tpu.memory_space<vmem>>, vector<1x32x64xbf16>
    %532 = vector.shape_cast %531 : vector<1x32x64xbf16> to vector<32x64xbf16>
    %533 = arith.truncf %530 : vector<8x32xf32> to vector<8x32xbf16>
    %cst_294 = arith.constant dense<0.000000e+00> : vector<8x64xf32>
    %534 = tpu.matmul %533, %532, %cst_294 {dimension_numbers = #tpu.dot_dimension_numbers<[1], [0], [0], [1], [0, 0, 1, 1], [], []>} : vector<8x32xbf16>, vector<32x64xbf16>, vector<8x64xf32> -> vector<8x64xf32>
    %c1_295 = arith.constant 1 : index
    %c0_296 = arith.constant 0 : index
    %c0_297 = arith.constant 0 : index
    %535 = vector.load %arg14[%c1_295, %c0_296, %c0_297] : memref<2x1x64xf32, #tpu.memory_space<vmem>>, vector<1x1x64xf32>
    %536 = vector.shape_cast %535 : vector<1x1x64xf32> to vector<1x64xf32>
    %537 = vector.broadcast %536 : vector<1x64xf32> to vector<8x64xf32>
    %538 = arith.addf %534, %537 : vector<8x64xf32>
    %cst_298 = arith.constant 0.000000e+00 : f32
    %539 = vector.broadcast %cst_298 : f32 to vector<8x64xf32>
    %540 = arith.maximumf %538, %539 : vector<8x64xf32>
    %c1_299 = arith.constant 1 : index
    %c0_300 = arith.constant 0 : index
    %c0_301 = arith.constant 0 : index
    %541 = vector.load %arg15[%c1_299, %c0_300, %c0_301] : memref<2x64x32xbf16, #tpu.memory_space<vmem>>, vector<1x64x32xbf16>
    %542 = vector.shape_cast %541 : vector<1x64x32xbf16> to vector<64x32xbf16>
    %543 = arith.truncf %540 : vector<8x64xf32> to vector<8x64xbf16>
    %cst_302 = arith.constant dense<0.000000e+00> : vector<8x32xf32>
    %544 = tpu.matmul %543, %542, %cst_302 {dimension_numbers = #tpu.dot_dimension_numbers<[1], [0], [0], [1], [0, 0, 1, 1], [], []>} : vector<8x64xbf16>, vector<64x32xbf16>, vector<8x32xf32> -> vector<8x32xf32>
    %c1_303 = arith.constant 1 : index
    %c0_304 = arith.constant 0 : index
    %c0_305 = arith.constant 0 : index
    %545 = vector.load %arg16[%c1_303, %c0_304, %c0_305] : memref<2x1x32xf32, #tpu.memory_space<vmem>>, vector<1x1x32xf32>
    %546 = vector.shape_cast %545 : vector<1x1x32xf32> to vector<1x32xf32>
    %547 = vector.broadcast %546 : vector<1x32xf32> to vector<8x32xf32>
    %548 = arith.addf %544, %547 : vector<8x32xf32>
    %549 = arith.addf %530, %548 : vector<8x32xf32>
    %c3_306 = arith.constant 3 : index
    %c0_307 = arith.constant 0 : index
    %c0_308 = arith.constant 0 : index
    %550 = vector.load %arg11[%c3_306, %c0_307, %c0_308] : memref<4x1x32xf32, #tpu.memory_space<vmem>>, vector<1x1x32xf32>
    %551 = vector.shape_cast %550 : vector<1x1x32xf32> to vector<1x32xf32>
    %c3_309 = arith.constant 3 : index
    %c0_310 = arith.constant 0 : index
    %c0_311 = arith.constant 0 : index
    %552 = vector.load %arg12[%c3_309, %c0_310, %c0_311] : memref<4x1x32xf32, #tpu.memory_space<vmem>>, vector<1x1x32xf32>
    %553 = vector.shape_cast %552 : vector<1x1x32xf32> to vector<1x32xf32>
    %cst_312 = arith.constant dense<0.000000e+00> : vector<8xf32>
    %554 = vector.multi_reduction <add>, %549, %cst_312 [1] : vector<8x32xf32> to vector<8xf32>
    %555 = vector.shape_cast %554 : vector<8xf32> to vector<8x1xf32>
    %cst_313 = arith.constant 3.200000e+01 : f32
    %556 = vector.broadcast %cst_313 : f32 to vector<8x1xf32>
    %557 = arith.divf %555, %556 : vector<8x1xf32>
    %558 = vector.broadcast %557 : vector<8x1xf32> to vector<8x32xf32>
    %559 = arith.subf %549, %558 : vector<8x32xf32>
    %560 = arith.mulf %559, %559 : vector<8x32xf32>
    %cst_314 = arith.constant dense<0.000000e+00> : vector<8xf32>
    %561 = vector.multi_reduction <add>, %560, %cst_314 [1] : vector<8x32xf32> to vector<8xf32>
    %562 = vector.shape_cast %561 : vector<8xf32> to vector<8x1xf32>
    %cst_315 = arith.constant 3.200000e+01 : f32
    %563 = vector.broadcast %cst_315 : f32 to vector<8x1xf32>
    %564 = arith.divf %562, %563 : vector<8x1xf32>
    %cst_316 = arith.constant 9.99999974E-6 : f32
    %565 = vector.broadcast %cst_316 : f32 to vector<8x1xf32>
    %566 = arith.addf %564, %565 : vector<8x1xf32>
    %567 = math.rsqrt %566 : vector<8x1xf32>
    %568 = vector.broadcast %567 : vector<8x1xf32> to vector<8x32xf32>
    %569 = arith.mulf %559, %568 : vector<8x32xf32>
    %570 = vector.broadcast %551 : vector<1x32xf32> to vector<8x32xf32>
    %571 = arith.mulf %569, %570 : vector<8x32xf32>
    %572 = vector.broadcast %553 : vector<1x32xf32> to vector<8x32xf32>
    %573 = arith.addf %571, %572 : vector<8x32xf32>
    %c0_317 = arith.constant 0 : index
    %c0_318 = arith.constant 0 : index
    %c0_319 = arith.constant 0 : index
    %574 = vector.load %arg27[%c0_317, %c0_318, %c0_319] : memref<2x1x32xf32, #tpu.memory_space<vmem>>, vector<1x1x32xf32>
    %575 = vector.shape_cast %574 : vector<1x1x32xf32> to vector<1x32xf32>
    %c0_320 = arith.constant 0 : index
    %c0_321 = arith.constant 0 : index
    %c0_322 = arith.constant 0 : index
    %576 = vector.load %arg28[%c0_320, %c0_321, %c0_322] : memref<2x1x32xf32, #tpu.memory_space<vmem>>, vector<1x1x32xf32>
    %577 = vector.shape_cast %576 : vector<1x1x32xf32> to vector<1x32xf32>
    %cst_323 = arith.constant dense<0.000000e+00> : vector<8xf32>
    %578 = vector.multi_reduction <add>, %573, %cst_323 [1] : vector<8x32xf32> to vector<8xf32>
    %579 = vector.shape_cast %578 : vector<8xf32> to vector<8x1xf32>
    %cst_324 = arith.constant 3.200000e+01 : f32
    %580 = vector.broadcast %cst_324 : f32 to vector<8x1xf32>
    %581 = arith.divf %579, %580 : vector<8x1xf32>
    %582 = vector.broadcast %581 : vector<8x1xf32> to vector<8x32xf32>
    %583 = arith.subf %573, %582 : vector<8x32xf32>
    %584 = arith.mulf %583, %583 : vector<8x32xf32>
    %cst_325 = arith.constant dense<0.000000e+00> : vector<8xf32>
    %585 = vector.multi_reduction <add>, %584, %cst_325 [1] : vector<8x32xf32> to vector<8xf32>
    %586 = vector.shape_cast %585 : vector<8xf32> to vector<8x1xf32>
    %cst_326 = arith.constant 3.200000e+01 : f32
    %587 = vector.broadcast %cst_326 : f32 to vector<8x1xf32>
    %588 = arith.divf %586, %587 : vector<8x1xf32>
    %cst_327 = arith.constant 9.99999974E-6 : f32
    %589 = vector.broadcast %cst_327 : f32 to vector<8x1xf32>
    %590 = arith.addf %588, %589 : vector<8x1xf32>
    %591 = math.rsqrt %590 : vector<8x1xf32>
    %592 = vector.broadcast %591 : vector<8x1xf32> to vector<8x32xf32>
    %593 = arith.mulf %583, %592 : vector<8x32xf32>
    %594 = vector.broadcast %575 : vector<1x32xf32> to vector<8x32xf32>
    %595 = arith.mulf %593, %594 : vector<8x32xf32>
    %596 = vector.broadcast %577 : vector<1x32xf32> to vector<8x32xf32>
    %597 = arith.addf %595, %596 : vector<8x32xf32>
    %c0_328 = arith.constant 0 : index
    %c0_329 = arith.constant 0 : index
    %c0_330 = arith.constant 0 : index
    %598 = vector.load %arg4[%c0_328, %c0_329, %c0_330] : memref<1x6x1xi32, #tpu.memory_space<vmem>>, vector<1x6x1xi32>
    %599 = vector.shape_cast %598 : vector<1x6x1xi32> to vector<6x1xi32>
    %c1_331 = arith.constant 1 : index
    %c0_332 = arith.constant 0 : index
    %c0_333 = arith.constant 0 : index
    %600 = vector.load %arg6[%c1_331, %c0_332, %c0_333] : memref<2x64x32xf32, #tpu.memory_space<vmem>>, vector<1x64x32xf32>
    %601 = vector.shape_cast %600 : vector<1x64x32xf32> to vector<64x32xf32>
    %602 = tpu.iota {dimensions = array<i32: 1>} : vector<6x64xi32>
    %603 = vector.broadcast %599 : vector<6x1xi32> to vector<6x64xi32>
    %604 = arith.cmpi eq, %603, %602 : vector<6x64xi32>
    %605 = arith.extui %604 : vector<6x64xi1> to vector<6x64xi32>
    %606 = arith.sitofp %605 : vector<6x64xi32> to vector<6x64xf32>
    %cst_334 = arith.constant dense<0.000000e+00> : vector<6x32xf32>
    %607 = tpu.matmul %606, %601, %cst_334 {dimension_numbers = #tpu.dot_dimension_numbers<[1], [0], [0], [1], [0, 0, 1, 1], [], []>} : vector<6x64xf32>, vector<64x32xf32>, vector<6x32xf32> -> vector<6x32xf32>
    %cst_335 = arith.constant 5.65685415 : f32
    %608 = vector.broadcast %cst_335 : f32 to vector<6x32xf32>
    %609 = arith.mulf %607, %608 : vector<6x32xf32>
    %610 = vector.broadcast %21 : vector<1x32xf32> to vector<6x32xf32>
    %611 = arith.addf %609, %610 : vector<6x32xf32>
    %cst_336 = arith.constant 0.000000e+00 : f32
    %612 = vector.broadcast %cst_336 : f32 to vector<6x32xf32>
    %c0_337 = arith.constant 0 : index
    %c0_338 = arith.constant 0 : index
    %c0_339 = arith.constant 0 : index
    %613 = vector.load %arg17[%c0_337, %c0_338, %c0_339] : memref<48x32x8xbf16, #tpu.memory_space<vmem>>, vector<1x32x8xbf16>
    %614 = vector.shape_cast %613 : vector<1x32x8xbf16> to vector<32x8xbf16>
    %615 = arith.truncf %611 : vector<6x32xf32> to vector<6x32xbf16>
    %cst_340 = arith.constant dense<0.000000e+00> : vector<6x8xf32>
    %616 = tpu.matmul %615, %614, %cst_340 {dimension_numbers = #tpu.dot_dimension_numbers<[1], [0], [0], [1], [0, 0, 1, 1], [], []>} : vector<6x32xbf16>, vector<32x8xbf16>, vector<6x8xf32> -> vector<6x8xf32>
    %c0_341 = arith.constant 0 : index
    %c0_342 = arith.constant 0 : index
    %c0_343 = arith.constant 0 : index
    %617 = vector.load %arg18[%c0_341, %c0_342, %c0_343] : memref<48x1x8xf32, #tpu.memory_space<vmem>>, vector<1x1x8xf32>
    %618 = vector.shape_cast %617 : vector<1x1x8xf32> to vector<1x8xf32>
    %619 = vector.broadcast %618 : vector<1x8xf32> to vector<6x8xf32>
    %620 = arith.addf %616, %619 : vector<6x8xf32>
    %c4_344 = arith.constant 4 : index
    %c0_345 = arith.constant 0 : index
    %c0_346 = arith.constant 0 : index
    %621 = vector.load %arg17[%c4_344, %c0_345, %c0_346] : memref<48x32x8xbf16, #tpu.memory_space<vmem>>, vector<1x32x8xbf16>
    %622 = vector.shape_cast %621 : vector<1x32x8xbf16> to vector<32x8xbf16>
    %623 = arith.truncf %611 : vector<6x32xf32> to vector<6x32xbf16>
    %cst_347 = arith.constant dense<0.000000e+00> : vector<6x8xf32>
    %624 = tpu.matmul %623, %622, %cst_347 {dimension_numbers = #tpu.dot_dimension_numbers<[1], [0], [0], [1], [0, 0, 1, 1], [], []>} : vector<6x32xbf16>, vector<32x8xbf16>, vector<6x8xf32> -> vector<6x8xf32>
    %c4_348 = arith.constant 4 : index
    %c0_349 = arith.constant 0 : index
    %c0_350 = arith.constant 0 : index
    %625 = vector.load %arg18[%c4_348, %c0_349, %c0_350] : memref<48x1x8xf32, #tpu.memory_space<vmem>>, vector<1x1x8xf32>
    %626 = vector.shape_cast %625 : vector<1x1x8xf32> to vector<1x8xf32>
    %627 = vector.broadcast %626 : vector<1x8xf32> to vector<6x8xf32>
    %628 = arith.addf %624, %627 : vector<6x8xf32>
    %c8_351 = arith.constant 8 : index
    %c0_352 = arith.constant 0 : index
    %c0_353 = arith.constant 0 : index
    %629 = vector.load %arg17[%c8_351, %c0_352, %c0_353] : memref<48x32x8xbf16, #tpu.memory_space<vmem>>, vector<1x32x8xbf16>
    %630 = vector.shape_cast %629 : vector<1x32x8xbf16> to vector<32x8xbf16>
    %631 = arith.truncf %611 : vector<6x32xf32> to vector<6x32xbf16>
    %cst_354 = arith.constant dense<0.000000e+00> : vector<6x8xf32>
    %632 = tpu.matmul %631, %630, %cst_354 {dimension_numbers = #tpu.dot_dimension_numbers<[1], [0], [0], [1], [0, 0, 1, 1], [], []>} : vector<6x32xbf16>, vector<32x8xbf16>, vector<6x8xf32> -> vector<6x8xf32>
    %c8_355 = arith.constant 8 : index
    %c0_356 = arith.constant 0 : index
    %c0_357 = arith.constant 0 : index
    %633 = vector.load %arg18[%c8_355, %c0_356, %c0_357] : memref<48x1x8xf32, #tpu.memory_space<vmem>>, vector<1x1x8xf32>
    %634 = vector.shape_cast %633 : vector<1x1x8xf32> to vector<1x8xf32>
    %635 = vector.broadcast %634 : vector<1x8xf32> to vector<6x8xf32>
    %636 = arith.addf %632, %635 : vector<6x8xf32>
    %637 = arith.truncf %620 : vector<6x8xf32> to vector<6x8xbf16>
    %638 = arith.truncf %628 : vector<6x8xf32> to vector<6x8xbf16>
    %cst_358 = arith.constant dense<0.000000e+00> : vector<6x6xf32>
    %639 = tpu.matmul %637, %638, %cst_358 {dimension_numbers = #tpu.dot_dimension_numbers<[1], [1], [0], [0], [0, 0, 1, 0], [], []>} : vector<6x8xbf16>, vector<6x8xbf16>, vector<6x6xf32> -> vector<6x6xf32>
    %640 = arith.addf %639, %19 : vector<6x6xf32>
    %cst_359 = arith.constant dense<0xFF800000> : vector<6xf32>
    %641 = vector.multi_reduction <maximumf>, %640, %cst_359 [1] : vector<6x6xf32> to vector<6xf32>
    %642 = vector.shape_cast %641 : vector<6xf32> to vector<6x1xf32>
    %643 = vector.broadcast %642 : vector<6x1xf32> to vector<6x6xf32>
    %644 = arith.subf %640, %643 : vector<6x6xf32>
    %645 = math.exp %644 : vector<6x6xf32>
    %cst_360 = arith.constant dense<0.000000e+00> : vector<6xf32>
    %646 = vector.multi_reduction <add>, %645, %cst_360 [1] : vector<6x6xf32> to vector<6xf32>
    %647 = vector.shape_cast %646 : vector<6xf32> to vector<6x1xf32>
    %cst_361 = arith.constant 1.000000e-30 : f32
    %648 = vector.broadcast %cst_361 : f32 to vector<6x1xf32>
    %649 = arith.maximumf %647, %648 : vector<6x1xf32>
    %650 = tpu.reciprocal %649 {approx = true} : vector<6x1xf32> -> vector<6x1xf32>
    %651 = arith.truncf %645 : vector<6x6xf32> to vector<6x6xbf16>
    %652 = arith.truncf %636 : vector<6x8xf32> to vector<6x8xbf16>
    %cst_362 = arith.constant dense<0.000000e+00> : vector<6x8xf32>
    %653 = tpu.matmul %651, %652, %cst_362 {dimension_numbers = #tpu.dot_dimension_numbers<[1], [0], [0], [1], [0, 0, 1, 1], [], []>} : vector<6x6xbf16>, vector<6x8xbf16>, vector<6x8xf32> -> vector<6x8xf32>
    %654 = vector.broadcast %650 : vector<6x1xf32> to vector<6x8xf32>
    %655 = arith.mulf %653, %654 : vector<6x8xf32>
    %c0_363 = arith.constant 0 : index
    %c0_364 = arith.constant 0 : index
    %c0_365 = arith.constant 0 : index
    %656 = vector.load %arg19[%c0_363, %c0_364, %c0_365] : memref<16x8x32xbf16, #tpu.memory_space<vmem>>, vector<1x8x32xbf16>
    %657 = vector.shape_cast %656 : vector<1x8x32xbf16> to vector<8x32xbf16>
    %658 = arith.truncf %655 : vector<6x8xf32> to vector<6x8xbf16>
    %cst_366 = arith.constant dense<0.000000e+00> : vector<6x32xf32>
    %659 = tpu.matmul %658, %657, %cst_366 {dimension_numbers = #tpu.dot_dimension_numbers<[1], [0], [0], [1], [0, 0, 1, 1], [], []>} : vector<6x8xbf16>, vector<8x32xbf16>, vector<6x32xf32> -> vector<6x32xf32>
    %660 = arith.addf %612, %659 : vector<6x32xf32>
    %c1_367 = arith.constant 1 : index
    %c0_368 = arith.constant 0 : index
    %c0_369 = arith.constant 0 : index
    %661 = vector.load %arg17[%c1_367, %c0_368, %c0_369] : memref<48x32x8xbf16, #tpu.memory_space<vmem>>, vector<1x32x8xbf16>
    %662 = vector.shape_cast %661 : vector<1x32x8xbf16> to vector<32x8xbf16>
    %663 = arith.truncf %611 : vector<6x32xf32> to vector<6x32xbf16>
    %cst_370 = arith.constant dense<0.000000e+00> : vector<6x8xf32>
    %664 = tpu.matmul %663, %662, %cst_370 {dimension_numbers = #tpu.dot_dimension_numbers<[1], [0], [0], [1], [0, 0, 1, 1], [], []>} : vector<6x32xbf16>, vector<32x8xbf16>, vector<6x8xf32> -> vector<6x8xf32>
    %c1_371 = arith.constant 1 : index
    %c0_372 = arith.constant 0 : index
    %c0_373 = arith.constant 0 : index
    %665 = vector.load %arg18[%c1_371, %c0_372, %c0_373] : memref<48x1x8xf32, #tpu.memory_space<vmem>>, vector<1x1x8xf32>
    %666 = vector.shape_cast %665 : vector<1x1x8xf32> to vector<1x8xf32>
    %667 = vector.broadcast %666 : vector<1x8xf32> to vector<6x8xf32>
    %668 = arith.addf %664, %667 : vector<6x8xf32>
    %c5_374 = arith.constant 5 : index
    %c0_375 = arith.constant 0 : index
    %c0_376 = arith.constant 0 : index
    %669 = vector.load %arg17[%c5_374, %c0_375, %c0_376] : memref<48x32x8xbf16, #tpu.memory_space<vmem>>, vector<1x32x8xbf16>
    %670 = vector.shape_cast %669 : vector<1x32x8xbf16> to vector<32x8xbf16>
    %671 = arith.truncf %611 : vector<6x32xf32> to vector<6x32xbf16>
    %cst_377 = arith.constant dense<0.000000e+00> : vector<6x8xf32>
    %672 = tpu.matmul %671, %670, %cst_377 {dimension_numbers = #tpu.dot_dimension_numbers<[1], [0], [0], [1], [0, 0, 1, 1], [], []>} : vector<6x32xbf16>, vector<32x8xbf16>, vector<6x8xf32> -> vector<6x8xf32>
    %c5_378 = arith.constant 5 : index
    %c0_379 = arith.constant 0 : index
    %c0_380 = arith.constant 0 : index
    %673 = vector.load %arg18[%c5_378, %c0_379, %c0_380] : memref<48x1x8xf32, #tpu.memory_space<vmem>>, vector<1x1x8xf32>
    %674 = vector.shape_cast %673 : vector<1x1x8xf32> to vector<1x8xf32>
    %675 = vector.broadcast %674 : vector<1x8xf32> to vector<6x8xf32>
    %676 = arith.addf %672, %675 : vector<6x8xf32>
    %c9_381 = arith.constant 9 : index
    %c0_382 = arith.constant 0 : index
    %c0_383 = arith.constant 0 : index
    %677 = vector.load %arg17[%c9_381, %c0_382, %c0_383] : memref<48x32x8xbf16, #tpu.memory_space<vmem>>, vector<1x32x8xbf16>
    %678 = vector.shape_cast %677 : vector<1x32x8xbf16> to vector<32x8xbf16>
    %679 = arith.truncf %611 : vector<6x32xf32> to vector<6x32xbf16>
    %cst_384 = arith.constant dense<0.000000e+00> : vector<6x8xf32>
    %680 = tpu.matmul %679, %678, %cst_384 {dimension_numbers = #tpu.dot_dimension_numbers<[1], [0], [0], [1], [0, 0, 1, 1], [], []>} : vector<6x32xbf16>, vector<32x8xbf16>, vector<6x8xf32> -> vector<6x8xf32>
    %c9_385 = arith.constant 9 : index
    %c0_386 = arith.constant 0 : index
    %c0_387 = arith.constant 0 : index
    %681 = vector.load %arg18[%c9_385, %c0_386, %c0_387] : memref<48x1x8xf32, #tpu.memory_space<vmem>>, vector<1x1x8xf32>
    %682 = vector.shape_cast %681 : vector<1x1x8xf32> to vector<1x8xf32>
    %683 = vector.broadcast %682 : vector<1x8xf32> to vector<6x8xf32>
    %684 = arith.addf %680, %683 : vector<6x8xf32>
    %685 = arith.truncf %668 : vector<6x8xf32> to vector<6x8xbf16>
    %686 = arith.truncf %676 : vector<6x8xf32> to vector<6x8xbf16>
    %cst_388 = arith.constant dense<0.000000e+00> : vector<6x6xf32>
    %687 = tpu.matmul %685, %686, %cst_388 {dimension_numbers = #tpu.dot_dimension_numbers<[1], [1], [0], [0], [0, 0, 1, 0], [], []>} : vector<6x8xbf16>, vector<6x8xbf16>, vector<6x6xf32> -> vector<6x6xf32>
    %688 = arith.addf %687, %19 : vector<6x6xf32>
    %cst_389 = arith.constant dense<0xFF800000> : vector<6xf32>
    %689 = vector.multi_reduction <maximumf>, %688, %cst_389 [1] : vector<6x6xf32> to vector<6xf32>
    %690 = vector.shape_cast %689 : vector<6xf32> to vector<6x1xf32>
    %691 = vector.broadcast %690 : vector<6x1xf32> to vector<6x6xf32>
    %692 = arith.subf %688, %691 : vector<6x6xf32>
    %693 = math.exp %692 : vector<6x6xf32>
    %cst_390 = arith.constant dense<0.000000e+00> : vector<6xf32>
    %694 = vector.multi_reduction <add>, %693, %cst_390 [1] : vector<6x6xf32> to vector<6xf32>
    %695 = vector.shape_cast %694 : vector<6xf32> to vector<6x1xf32>
    %cst_391 = arith.constant 1.000000e-30 : f32
    %696 = vector.broadcast %cst_391 : f32 to vector<6x1xf32>
    %697 = arith.maximumf %695, %696 : vector<6x1xf32>
    %698 = tpu.reciprocal %697 {approx = true} : vector<6x1xf32> -> vector<6x1xf32>
    %699 = arith.truncf %693 : vector<6x6xf32> to vector<6x6xbf16>
    %700 = arith.truncf %684 : vector<6x8xf32> to vector<6x8xbf16>
    %cst_392 = arith.constant dense<0.000000e+00> : vector<6x8xf32>
    %701 = tpu.matmul %699, %700, %cst_392 {dimension_numbers = #tpu.dot_dimension_numbers<[1], [0], [0], [1], [0, 0, 1, 1], [], []>} : vector<6x6xbf16>, vector<6x8xbf16>, vector<6x8xf32> -> vector<6x8xf32>
    %702 = vector.broadcast %698 : vector<6x1xf32> to vector<6x8xf32>
    %703 = arith.mulf %701, %702 : vector<6x8xf32>
    %c1_393 = arith.constant 1 : index
    %c0_394 = arith.constant 0 : index
    %c0_395 = arith.constant 0 : index
    %704 = vector.load %arg19[%c1_393, %c0_394, %c0_395] : memref<16x8x32xbf16, #tpu.memory_space<vmem>>, vector<1x8x32xbf16>
    %705 = vector.shape_cast %704 : vector<1x8x32xbf16> to vector<8x32xbf16>
    %706 = arith.truncf %703 : vector<6x8xf32> to vector<6x8xbf16>
    %cst_396 = arith.constant dense<0.000000e+00> : vector<6x32xf32>
    %707 = tpu.matmul %706, %705, %cst_396 {dimension_numbers = #tpu.dot_dimension_numbers<[1], [0], [0], [1], [0, 0, 1, 1], [], []>} : vector<6x8xbf16>, vector<8x32xbf16>, vector<6x32xf32> -> vector<6x32xf32>
    %708 = arith.addf %660, %707 : vector<6x32xf32>
    %c2_397 = arith.constant 2 : index
    %c0_398 = arith.constant 0 : index
    %c0_399 = arith.constant 0 : index
    %709 = vector.load %arg17[%c2_397, %c0_398, %c0_399] : memref<48x32x8xbf16, #tpu.memory_space<vmem>>, vector<1x32x8xbf16>
    %710 = vector.shape_cast %709 : vector<1x32x8xbf16> to vector<32x8xbf16>
    %711 = arith.truncf %611 : vector<6x32xf32> to vector<6x32xbf16>
    %cst_400 = arith.constant dense<0.000000e+00> : vector<6x8xf32>
    %712 = tpu.matmul %711, %710, %cst_400 {dimension_numbers = #tpu.dot_dimension_numbers<[1], [0], [0], [1], [0, 0, 1, 1], [], []>} : vector<6x32xbf16>, vector<32x8xbf16>, vector<6x8xf32> -> vector<6x8xf32>
    %c2_401 = arith.constant 2 : index
    %c0_402 = arith.constant 0 : index
    %c0_403 = arith.constant 0 : index
    %713 = vector.load %arg18[%c2_401, %c0_402, %c0_403] : memref<48x1x8xf32, #tpu.memory_space<vmem>>, vector<1x1x8xf32>
    %714 = vector.shape_cast %713 : vector<1x1x8xf32> to vector<1x8xf32>
    %715 = vector.broadcast %714 : vector<1x8xf32> to vector<6x8xf32>
    %716 = arith.addf %712, %715 : vector<6x8xf32>
    %c6_404 = arith.constant 6 : index
    %c0_405 = arith.constant 0 : index
    %c0_406 = arith.constant 0 : index
    %717 = vector.load %arg17[%c6_404, %c0_405, %c0_406] : memref<48x32x8xbf16, #tpu.memory_space<vmem>>, vector<1x32x8xbf16>
    %718 = vector.shape_cast %717 : vector<1x32x8xbf16> to vector<32x8xbf16>
    %719 = arith.truncf %611 : vector<6x32xf32> to vector<6x32xbf16>
    %cst_407 = arith.constant dense<0.000000e+00> : vector<6x8xf32>
    %720 = tpu.matmul %719, %718, %cst_407 {dimension_numbers = #tpu.dot_dimension_numbers<[1], [0], [0], [1], [0, 0, 1, 1], [], []>} : vector<6x32xbf16>, vector<32x8xbf16>, vector<6x8xf32> -> vector<6x8xf32>
    %c6_408 = arith.constant 6 : index
    %c0_409 = arith.constant 0 : index
    %c0_410 = arith.constant 0 : index
    %721 = vector.load %arg18[%c6_408, %c0_409, %c0_410] : memref<48x1x8xf32, #tpu.memory_space<vmem>>, vector<1x1x8xf32>
    %722 = vector.shape_cast %721 : vector<1x1x8xf32> to vector<1x8xf32>
    %723 = vector.broadcast %722 : vector<1x8xf32> to vector<6x8xf32>
    %724 = arith.addf %720, %723 : vector<6x8xf32>
    %c10_411 = arith.constant 10 : index
    %c0_412 = arith.constant 0 : index
    %c0_413 = arith.constant 0 : index
    %725 = vector.load %arg17[%c10_411, %c0_412, %c0_413] : memref<48x32x8xbf16, #tpu.memory_space<vmem>>, vector<1x32x8xbf16>
    %726 = vector.shape_cast %725 : vector<1x32x8xbf16> to vector<32x8xbf16>
    %727 = arith.truncf %611 : vector<6x32xf32> to vector<6x32xbf16>
    %cst_414 = arith.constant dense<0.000000e+00> : vector<6x8xf32>
    %728 = tpu.matmul %727, %726, %cst_414 {dimension_numbers = #tpu.dot_dimension_numbers<[1], [0], [0], [1], [0, 0, 1, 1], [], []>} : vector<6x32xbf16>, vector<32x8xbf16>, vector<6x8xf32> -> vector<6x8xf32>
    %c10_415 = arith.constant 10 : index
    %c0_416 = arith.constant 0 : index
    %c0_417 = arith.constant 0 : index
    %729 = vector.load %arg18[%c10_415, %c0_416, %c0_417] : memref<48x1x8xf32, #tpu.memory_space<vmem>>, vector<1x1x8xf32>
    %730 = vector.shape_cast %729 : vector<1x1x8xf32> to vector<1x8xf32>
    %731 = vector.broadcast %730 : vector<1x8xf32> to vector<6x8xf32>
    %732 = arith.addf %728, %731 : vector<6x8xf32>
    %733 = arith.truncf %716 : vector<6x8xf32> to vector<6x8xbf16>
    %734 = arith.truncf %724 : vector<6x8xf32> to vector<6x8xbf16>
    %cst_418 = arith.constant dense<0.000000e+00> : vector<6x6xf32>
    %735 = tpu.matmul %733, %734, %cst_418 {dimension_numbers = #tpu.dot_dimension_numbers<[1], [1], [0], [0], [0, 0, 1, 0], [], []>} : vector<6x8xbf16>, vector<6x8xbf16>, vector<6x6xf32> -> vector<6x6xf32>
    %736 = arith.addf %735, %19 : vector<6x6xf32>
    %cst_419 = arith.constant dense<0xFF800000> : vector<6xf32>
    %737 = vector.multi_reduction <maximumf>, %736, %cst_419 [1] : vector<6x6xf32> to vector<6xf32>
    %738 = vector.shape_cast %737 : vector<6xf32> to vector<6x1xf32>
    %739 = vector.broadcast %738 : vector<6x1xf32> to vector<6x6xf32>
    %740 = arith.subf %736, %739 : vector<6x6xf32>
    %741 = math.exp %740 : vector<6x6xf32>
    %cst_420 = arith.constant dense<0.000000e+00> : vector<6xf32>
    %742 = vector.multi_reduction <add>, %741, %cst_420 [1] : vector<6x6xf32> to vector<6xf32>
    %743 = vector.shape_cast %742 : vector<6xf32> to vector<6x1xf32>
    %cst_421 = arith.constant 1.000000e-30 : f32
    %744 = vector.broadcast %cst_421 : f32 to vector<6x1xf32>
    %745 = arith.maximumf %743, %744 : vector<6x1xf32>
    %746 = tpu.reciprocal %745 {approx = true} : vector<6x1xf32> -> vector<6x1xf32>
    %747 = arith.truncf %741 : vector<6x6xf32> to vector<6x6xbf16>
    %748 = arith.truncf %732 : vector<6x8xf32> to vector<6x8xbf16>
    %cst_422 = arith.constant dense<0.000000e+00> : vector<6x8xf32>
    %749 = tpu.matmul %747, %748, %cst_422 {dimension_numbers = #tpu.dot_dimension_numbers<[1], [0], [0], [1], [0, 0, 1, 1], [], []>} : vector<6x6xbf16>, vector<6x8xbf16>, vector<6x8xf32> -> vector<6x8xf32>
    %750 = vector.broadcast %746 : vector<6x1xf32> to vector<6x8xf32>
    %751 = arith.mulf %749, %750 : vector<6x8xf32>
    %c2_423 = arith.constant 2 : index
    %c0_424 = arith.constant 0 : index
    %c0_425 = arith.constant 0 : index
    %752 = vector.load %arg19[%c2_423, %c0_424, %c0_425] : memref<16x8x32xbf16, #tpu.memory_space<vmem>>, vector<1x8x32xbf16>
    %753 = vector.shape_cast %752 : vector<1x8x32xbf16> to vector<8x32xbf16>
    %754 = arith.truncf %751 : vector<6x8xf32> to vector<6x8xbf16>
    %cst_426 = arith.constant dense<0.000000e+00> : vector<6x32xf32>
    %755 = tpu.matmul %754, %753, %cst_426 {dimension_numbers = #tpu.dot_dimension_numbers<[1], [0], [0], [1], [0, 0, 1, 1], [], []>} : vector<6x8xbf16>, vector<8x32xbf16>, vector<6x32xf32> -> vector<6x32xf32>
    %756 = arith.addf %708, %755 : vector<6x32xf32>
    %c3_427 = arith.constant 3 : index
    %c0_428 = arith.constant 0 : index
    %c0_429 = arith.constant 0 : index
    %757 = vector.load %arg17[%c3_427, %c0_428, %c0_429] : memref<48x32x8xbf16, #tpu.memory_space<vmem>>, vector<1x32x8xbf16>
    %758 = vector.shape_cast %757 : vector<1x32x8xbf16> to vector<32x8xbf16>
    %759 = arith.truncf %611 : vector<6x32xf32> to vector<6x32xbf16>
    %cst_430 = arith.constant dense<0.000000e+00> : vector<6x8xf32>
    %760 = tpu.matmul %759, %758, %cst_430 {dimension_numbers = #tpu.dot_dimension_numbers<[1], [0], [0], [1], [0, 0, 1, 1], [], []>} : vector<6x32xbf16>, vector<32x8xbf16>, vector<6x8xf32> -> vector<6x8xf32>
    %c3_431 = arith.constant 3 : index
    %c0_432 = arith.constant 0 : index
    %c0_433 = arith.constant 0 : index
    %761 = vector.load %arg18[%c3_431, %c0_432, %c0_433] : memref<48x1x8xf32, #tpu.memory_space<vmem>>, vector<1x1x8xf32>
    %762 = vector.shape_cast %761 : vector<1x1x8xf32> to vector<1x8xf32>
    %763 = vector.broadcast %762 : vector<1x8xf32> to vector<6x8xf32>
    %764 = arith.addf %760, %763 : vector<6x8xf32>
    %c7_434 = arith.constant 7 : index
    %c0_435 = arith.constant 0 : index
    %c0_436 = arith.constant 0 : index
    %765 = vector.load %arg17[%c7_434, %c0_435, %c0_436] : memref<48x32x8xbf16, #tpu.memory_space<vmem>>, vector<1x32x8xbf16>
    %766 = vector.shape_cast %765 : vector<1x32x8xbf16> to vector<32x8xbf16>
    %767 = arith.truncf %611 : vector<6x32xf32> to vector<6x32xbf16>
    %cst_437 = arith.constant dense<0.000000e+00> : vector<6x8xf32>
    %768 = tpu.matmul %767, %766, %cst_437 {dimension_numbers = #tpu.dot_dimension_numbers<[1], [0], [0], [1], [0, 0, 1, 1], [], []>} : vector<6x32xbf16>, vector<32x8xbf16>, vector<6x8xf32> -> vector<6x8xf32>
    %c7_438 = arith.constant 7 : index
    %c0_439 = arith.constant 0 : index
    %c0_440 = arith.constant 0 : index
    %769 = vector.load %arg18[%c7_438, %c0_439, %c0_440] : memref<48x1x8xf32, #tpu.memory_space<vmem>>, vector<1x1x8xf32>
    %770 = vector.shape_cast %769 : vector<1x1x8xf32> to vector<1x8xf32>
    %771 = vector.broadcast %770 : vector<1x8xf32> to vector<6x8xf32>
    %772 = arith.addf %768, %771 : vector<6x8xf32>
    %c11_441 = arith.constant 11 : index
    %c0_442 = arith.constant 0 : index
    %c0_443 = arith.constant 0 : index
    %773 = vector.load %arg17[%c11_441, %c0_442, %c0_443] : memref<48x32x8xbf16, #tpu.memory_space<vmem>>, vector<1x32x8xbf16>
    %774 = vector.shape_cast %773 : vector<1x32x8xbf16> to vector<32x8xbf16>
    %775 = arith.truncf %611 : vector<6x32xf32> to vector<6x32xbf16>
    %cst_444 = arith.constant dense<0.000000e+00> : vector<6x8xf32>
    %776 = tpu.matmul %775, %774, %cst_444 {dimension_numbers = #tpu.dot_dimension_numbers<[1], [0], [0], [1], [0, 0, 1, 1], [], []>} : vector<6x32xbf16>, vector<32x8xbf16>, vector<6x8xf32> -> vector<6x8xf32>
    %c11_445 = arith.constant 11 : index
    %c0_446 = arith.constant 0 : index
    %c0_447 = arith.constant 0 : index
    %777 = vector.load %arg18[%c11_445, %c0_446, %c0_447] : memref<48x1x8xf32, #tpu.memory_space<vmem>>, vector<1x1x8xf32>
    %778 = vector.shape_cast %777 : vector<1x1x8xf32> to vector<1x8xf32>
    %779 = vector.broadcast %778 : vector<1x8xf32> to vector<6x8xf32>
    %780 = arith.addf %776, %779 : vector<6x8xf32>
    %781 = arith.truncf %764 : vector<6x8xf32> to vector<6x8xbf16>
    %782 = arith.truncf %772 : vector<6x8xf32> to vector<6x8xbf16>
    %cst_448 = arith.constant dense<0.000000e+00> : vector<6x6xf32>
    %783 = tpu.matmul %781, %782, %cst_448 {dimension_numbers = #tpu.dot_dimension_numbers<[1], [1], [0], [0], [0, 0, 1, 0], [], []>} : vector<6x8xbf16>, vector<6x8xbf16>, vector<6x6xf32> -> vector<6x6xf32>
    %784 = arith.addf %783, %19 : vector<6x6xf32>
    %cst_449 = arith.constant dense<0xFF800000> : vector<6xf32>
    %785 = vector.multi_reduction <maximumf>, %784, %cst_449 [1] : vector<6x6xf32> to vector<6xf32>
    %786 = vector.shape_cast %785 : vector<6xf32> to vector<6x1xf32>
    %787 = vector.broadcast %786 : vector<6x1xf32> to vector<6x6xf32>
    %788 = arith.subf %784, %787 : vector<6x6xf32>
    %789 = math.exp %788 : vector<6x6xf32>
    %cst_450 = arith.constant dense<0.000000e+00> : vector<6xf32>
    %790 = vector.multi_reduction <add>, %789, %cst_450 [1] : vector<6x6xf32> to vector<6xf32>
    %791 = vector.shape_cast %790 : vector<6xf32> to vector<6x1xf32>
    %cst_451 = arith.constant 1.000000e-30 : f32
    %792 = vector.broadcast %cst_451 : f32 to vector<6x1xf32>
    %793 = arith.maximumf %791, %792 : vector<6x1xf32>
    %794 = tpu.reciprocal %793 {approx = true} : vector<6x1xf32> -> vector<6x1xf32>
    %795 = arith.truncf %789 : vector<6x6xf32> to vector<6x6xbf16>
    %796 = arith.truncf %780 : vector<6x8xf32> to vector<6x8xbf16>
    %cst_452 = arith.constant dense<0.000000e+00> : vector<6x8xf32>
    %797 = tpu.matmul %795, %796, %cst_452 {dimension_numbers = #tpu.dot_dimension_numbers<[1], [0], [0], [1], [0, 0, 1, 1], [], []>} : vector<6x6xbf16>, vector<6x8xbf16>, vector<6x8xf32> -> vector<6x8xf32>
    %798 = vector.broadcast %794 : vector<6x1xf32> to vector<6x8xf32>
    %799 = arith.mulf %797, %798 : vector<6x8xf32>
    %c3_453 = arith.constant 3 : index
    %c0_454 = arith.constant 0 : index
    %c0_455 = arith.constant 0 : index
    %800 = vector.load %arg19[%c3_453, %c0_454, %c0_455] : memref<16x8x32xbf16, #tpu.memory_space<vmem>>, vector<1x8x32xbf16>
    %801 = vector.shape_cast %800 : vector<1x8x32xbf16> to vector<8x32xbf16>
    %802 = arith.truncf %799 : vector<6x8xf32> to vector<6x8xbf16>
    %cst_456 = arith.constant dense<0.000000e+00> : vector<6x32xf32>
    %803 = tpu.matmul %802, %801, %cst_456 {dimension_numbers = #tpu.dot_dimension_numbers<[1], [0], [0], [1], [0, 0, 1, 1], [], []>} : vector<6x8xbf16>, vector<8x32xbf16>, vector<6x32xf32> -> vector<6x32xf32>
    %804 = arith.addf %756, %803 : vector<6x32xf32>
    %c0_457 = arith.constant 0 : index
    %c0_458 = arith.constant 0 : index
    %c0_459 = arith.constant 0 : index
    %805 = vector.load %arg20[%c0_457, %c0_458, %c0_459] : memref<4x1x32xf32, #tpu.memory_space<vmem>>, vector<1x1x32xf32>
    %806 = vector.shape_cast %805 : vector<1x1x32xf32> to vector<1x32xf32>
    %807 = vector.broadcast %806 : vector<1x32xf32> to vector<6x32xf32>
    %808 = arith.addf %804, %807 : vector<6x32xf32>
    %809 = arith.addf %611, %808 : vector<6x32xf32>
    %c0_460 = arith.constant 0 : index
    %c0_461 = arith.constant 0 : index
    %c0_462 = arith.constant 0 : index
    %810 = vector.load %arg21[%c0_460, %c0_461, %c0_462] : memref<6x1x32xf32, #tpu.memory_space<vmem>>, vector<1x1x32xf32>
    %811 = vector.shape_cast %810 : vector<1x1x32xf32> to vector<1x32xf32>
    %c0_463 = arith.constant 0 : index
    %c0_464 = arith.constant 0 : index
    %c0_465 = arith.constant 0 : index
    %812 = vector.load %arg22[%c0_463, %c0_464, %c0_465] : memref<6x1x32xf32, #tpu.memory_space<vmem>>, vector<1x1x32xf32>
    %813 = vector.shape_cast %812 : vector<1x1x32xf32> to vector<1x32xf32>
    %cst_466 = arith.constant dense<0.000000e+00> : vector<6xf32>
    %814 = vector.multi_reduction <add>, %809, %cst_466 [1] : vector<6x32xf32> to vector<6xf32>
    %815 = vector.shape_cast %814 : vector<6xf32> to vector<6x1xf32>
    %cst_467 = arith.constant 3.200000e+01 : f32
    %816 = vector.broadcast %cst_467 : f32 to vector<6x1xf32>
    %817 = arith.divf %815, %816 : vector<6x1xf32>
    %818 = vector.broadcast %817 : vector<6x1xf32> to vector<6x32xf32>
    %819 = arith.subf %809, %818 : vector<6x32xf32>
    %820 = arith.mulf %819, %819 : vector<6x32xf32>
    %cst_468 = arith.constant dense<0.000000e+00> : vector<6xf32>
    %821 = vector.multi_reduction <add>, %820, %cst_468 [1] : vector<6x32xf32> to vector<6xf32>
    %822 = vector.shape_cast %821 : vector<6xf32> to vector<6x1xf32>
    %cst_469 = arith.constant 3.200000e+01 : f32
    %823 = vector.broadcast %cst_469 : f32 to vector<6x1xf32>
    %824 = arith.divf %822, %823 : vector<6x1xf32>
    %cst_470 = arith.constant 9.99999974E-6 : f32
    %825 = vector.broadcast %cst_470 : f32 to vector<6x1xf32>
    %826 = arith.addf %824, %825 : vector<6x1xf32>
    %827 = math.rsqrt %826 : vector<6x1xf32>
    %828 = vector.broadcast %827 : vector<6x1xf32> to vector<6x32xf32>
    %829 = arith.mulf %819, %828 : vector<6x32xf32>
    %830 = vector.broadcast %811 : vector<1x32xf32> to vector<6x32xf32>
    %831 = arith.mulf %829, %830 : vector<6x32xf32>
    %832 = vector.broadcast %813 : vector<1x32xf32> to vector<6x32xf32>
    %833 = arith.addf %831, %832 : vector<6x32xf32>
    %cst_471 = arith.constant 0.000000e+00 : f32
    %834 = vector.broadcast %cst_471 : f32 to vector<6x32xf32>
    %c12_472 = arith.constant 12 : index
    %c0_473 = arith.constant 0 : index
    %c0_474 = arith.constant 0 : index
    %835 = vector.load %arg17[%c12_472, %c0_473, %c0_474] : memref<48x32x8xbf16, #tpu.memory_space<vmem>>, vector<1x32x8xbf16>
    %836 = vector.shape_cast %835 : vector<1x32x8xbf16> to vector<32x8xbf16>
    %837 = arith.truncf %833 : vector<6x32xf32> to vector<6x32xbf16>
    %cst_475 = arith.constant dense<0.000000e+00> : vector<6x8xf32>
    %838 = tpu.matmul %837, %836, %cst_475 {dimension_numbers = #tpu.dot_dimension_numbers<[1], [0], [0], [1], [0, 0, 1, 1], [], []>} : vector<6x32xbf16>, vector<32x8xbf16>, vector<6x8xf32> -> vector<6x8xf32>
    %c12_476 = arith.constant 12 : index
    %c0_477 = arith.constant 0 : index
    %c0_478 = arith.constant 0 : index
    %839 = vector.load %arg18[%c12_476, %c0_477, %c0_478] : memref<48x1x8xf32, #tpu.memory_space<vmem>>, vector<1x1x8xf32>
    %840 = vector.shape_cast %839 : vector<1x1x8xf32> to vector<1x8xf32>
    %841 = vector.broadcast %840 : vector<1x8xf32> to vector<6x8xf32>
    %842 = arith.addf %838, %841 : vector<6x8xf32>
    %c16_479 = arith.constant 16 : index
    %c0_480 = arith.constant 0 : index
    %c0_481 = arith.constant 0 : index
    %843 = vector.load %arg17[%c16_479, %c0_480, %c0_481] : memref<48x32x8xbf16, #tpu.memory_space<vmem>>, vector<1x32x8xbf16>
    %844 = vector.shape_cast %843 : vector<1x32x8xbf16> to vector<32x8xbf16>
    %845 = arith.truncf %597 : vector<8x32xf32> to vector<8x32xbf16>
    %cst_482 = arith.constant dense<0.000000e+00> : vector<8x8xf32>
    %846 = tpu.matmul %845, %844, %cst_482 {dimension_numbers = #tpu.dot_dimension_numbers<[1], [0], [0], [1], [0, 0, 1, 1], [], []>} : vector<8x32xbf16>, vector<32x8xbf16>, vector<8x8xf32> -> vector<8x8xf32>
    %c16_483 = arith.constant 16 : index
    %c0_484 = arith.constant 0 : index
    %c0_485 = arith.constant 0 : index
    %847 = vector.load %arg18[%c16_483, %c0_484, %c0_485] : memref<48x1x8xf32, #tpu.memory_space<vmem>>, vector<1x1x8xf32>
    %848 = vector.shape_cast %847 : vector<1x1x8xf32> to vector<1x8xf32>
    %849 = vector.broadcast %848 : vector<1x8xf32> to vector<8x8xf32>
    %850 = arith.addf %846, %849 : vector<8x8xf32>
    %c20_486 = arith.constant 20 : index
    %c0_487 = arith.constant 0 : index
    %c0_488 = arith.constant 0 : index
    %851 = vector.load %arg17[%c20_486, %c0_487, %c0_488] : memref<48x32x8xbf16, #tpu.memory_space<vmem>>, vector<1x32x8xbf16>
    %852 = vector.shape_cast %851 : vector<1x32x8xbf16> to vector<32x8xbf16>
    %853 = arith.truncf %597 : vector<8x32xf32> to vector<8x32xbf16>
    %cst_489 = arith.constant dense<0.000000e+00> : vector<8x8xf32>
    %854 = tpu.matmul %853, %852, %cst_489 {dimension_numbers = #tpu.dot_dimension_numbers<[1], [0], [0], [1], [0, 0, 1, 1], [], []>} : vector<8x32xbf16>, vector<32x8xbf16>, vector<8x8xf32> -> vector<8x8xf32>
    %c20_490 = arith.constant 20 : index
    %c0_491 = arith.constant 0 : index
    %c0_492 = arith.constant 0 : index
    %855 = vector.load %arg18[%c20_490, %c0_491, %c0_492] : memref<48x1x8xf32, #tpu.memory_space<vmem>>, vector<1x1x8xf32>
    %856 = vector.shape_cast %855 : vector<1x1x8xf32> to vector<1x8xf32>
    %857 = vector.broadcast %856 : vector<1x8xf32> to vector<8x8xf32>
    %858 = arith.addf %854, %857 : vector<8x8xf32>
    %859 = arith.truncf %842 : vector<6x8xf32> to vector<6x8xbf16>
    %860 = arith.truncf %850 : vector<8x8xf32> to vector<8x8xbf16>
    %cst_493 = arith.constant dense<0.000000e+00> : vector<6x8xf32>
    %861 = tpu.matmul %859, %860, %cst_493 {dimension_numbers = #tpu.dot_dimension_numbers<[1], [1], [0], [0], [0, 0, 1, 0], [], []>} : vector<6x8xbf16>, vector<8x8xbf16>, vector<6x8xf32> -> vector<6x8xf32>
    %cst_494 = arith.constant dense<0xFF800000> : vector<6xf32>
    %862 = vector.multi_reduction <maximumf>, %861, %cst_494 [1] : vector<6x8xf32> to vector<6xf32>
    %863 = vector.shape_cast %862 : vector<6xf32> to vector<6x1xf32>
    %864 = vector.broadcast %863 : vector<6x1xf32> to vector<6x8xf32>
    %865 = arith.subf %861, %864 : vector<6x8xf32>
    %866 = math.exp %865 : vector<6x8xf32>
    %cst_495 = arith.constant dense<0.000000e+00> : vector<6xf32>
    %867 = vector.multi_reduction <add>, %866, %cst_495 [1] : vector<6x8xf32> to vector<6xf32>
    %868 = vector.shape_cast %867 : vector<6xf32> to vector<6x1xf32>
    %cst_496 = arith.constant 1.000000e-30 : f32
    %869 = vector.broadcast %cst_496 : f32 to vector<6x1xf32>
    %870 = arith.maximumf %868, %869 : vector<6x1xf32>
    %871 = tpu.reciprocal %870 {approx = true} : vector<6x1xf32> -> vector<6x1xf32>
    %872 = arith.truncf %866 : vector<6x8xf32> to vector<6x8xbf16>
    %873 = arith.truncf %858 : vector<8x8xf32> to vector<8x8xbf16>
    %cst_497 = arith.constant dense<0.000000e+00> : vector<6x8xf32>
    %874 = tpu.matmul %872, %873, %cst_497 {dimension_numbers = #tpu.dot_dimension_numbers<[1], [0], [0], [1], [0, 0, 1, 1], [], []>} : vector<6x8xbf16>, vector<8x8xbf16>, vector<6x8xf32> -> vector<6x8xf32>
    %875 = vector.broadcast %871 : vector<6x1xf32> to vector<6x8xf32>
    %876 = arith.mulf %874, %875 : vector<6x8xf32>
    %c4_498 = arith.constant 4 : index
    %c0_499 = arith.constant 0 : index
    %c0_500 = arith.constant 0 : index
    %877 = vector.load %arg19[%c4_498, %c0_499, %c0_500] : memref<16x8x32xbf16, #tpu.memory_space<vmem>>, vector<1x8x32xbf16>
    %878 = vector.shape_cast %877 : vector<1x8x32xbf16> to vector<8x32xbf16>
    %879 = arith.truncf %876 : vector<6x8xf32> to vector<6x8xbf16>
    %cst_501 = arith.constant dense<0.000000e+00> : vector<6x32xf32>
    %880 = tpu.matmul %879, %878, %cst_501 {dimension_numbers = #tpu.dot_dimension_numbers<[1], [0], [0], [1], [0, 0, 1, 1], [], []>} : vector<6x8xbf16>, vector<8x32xbf16>, vector<6x32xf32> -> vector<6x32xf32>
    %881 = arith.addf %834, %880 : vector<6x32xf32>
    %c13_502 = arith.constant 13 : index
    %c0_503 = arith.constant 0 : index
    %c0_504 = arith.constant 0 : index
    %882 = vector.load %arg17[%c13_502, %c0_503, %c0_504] : memref<48x32x8xbf16, #tpu.memory_space<vmem>>, vector<1x32x8xbf16>
    %883 = vector.shape_cast %882 : vector<1x32x8xbf16> to vector<32x8xbf16>
    %884 = arith.truncf %833 : vector<6x32xf32> to vector<6x32xbf16>
    %cst_505 = arith.constant dense<0.000000e+00> : vector<6x8xf32>
    %885 = tpu.matmul %884, %883, %cst_505 {dimension_numbers = #tpu.dot_dimension_numbers<[1], [0], [0], [1], [0, 0, 1, 1], [], []>} : vector<6x32xbf16>, vector<32x8xbf16>, vector<6x8xf32> -> vector<6x8xf32>
    %c13_506 = arith.constant 13 : index
    %c0_507 = arith.constant 0 : index
    %c0_508 = arith.constant 0 : index
    %886 = vector.load %arg18[%c13_506, %c0_507, %c0_508] : memref<48x1x8xf32, #tpu.memory_space<vmem>>, vector<1x1x8xf32>
    %887 = vector.shape_cast %886 : vector<1x1x8xf32> to vector<1x8xf32>
    %888 = vector.broadcast %887 : vector<1x8xf32> to vector<6x8xf32>
    %889 = arith.addf %885, %888 : vector<6x8xf32>
    %c17_509 = arith.constant 17 : index
    %c0_510 = arith.constant 0 : index
    %c0_511 = arith.constant 0 : index
    %890 = vector.load %arg17[%c17_509, %c0_510, %c0_511] : memref<48x32x8xbf16, #tpu.memory_space<vmem>>, vector<1x32x8xbf16>
    %891 = vector.shape_cast %890 : vector<1x32x8xbf16> to vector<32x8xbf16>
    %892 = arith.truncf %597 : vector<8x32xf32> to vector<8x32xbf16>
    %cst_512 = arith.constant dense<0.000000e+00> : vector<8x8xf32>
    %893 = tpu.matmul %892, %891, %cst_512 {dimension_numbers = #tpu.dot_dimension_numbers<[1], [0], [0], [1], [0, 0, 1, 1], [], []>} : vector<8x32xbf16>, vector<32x8xbf16>, vector<8x8xf32> -> vector<8x8xf32>
    %c17_513 = arith.constant 17 : index
    %c0_514 = arith.constant 0 : index
    %c0_515 = arith.constant 0 : index
    %894 = vector.load %arg18[%c17_513, %c0_514, %c0_515] : memref<48x1x8xf32, #tpu.memory_space<vmem>>, vector<1x1x8xf32>
    %895 = vector.shape_cast %894 : vector<1x1x8xf32> to vector<1x8xf32>
    %896 = vector.broadcast %895 : vector<1x8xf32> to vector<8x8xf32>
    %897 = arith.addf %893, %896 : vector<8x8xf32>
    %c21_516 = arith.constant 21 : index
    %c0_517 = arith.constant 0 : index
    %c0_518 = arith.constant 0 : index
    %898 = vector.load %arg17[%c21_516, %c0_517, %c0_518] : memref<48x32x8xbf16, #tpu.memory_space<vmem>>, vector<1x32x8xbf16>
    %899 = vector.shape_cast %898 : vector<1x32x8xbf16> to vector<32x8xbf16>
    %900 = arith.truncf %597 : vector<8x32xf32> to vector<8x32xbf16>
    %cst_519 = arith.constant dense<0.000000e+00> : vector<8x8xf32>
    %901 = tpu.matmul %900, %899, %cst_519 {dimension_numbers = #tpu.dot_dimension_numbers<[1], [0], [0], [1], [0, 0, 1, 1], [], []>} : vector<8x32xbf16>, vector<32x8xbf16>, vector<8x8xf32> -> vector<8x8xf32>
    %c21_520 = arith.constant 21 : index
    %c0_521 = arith.constant 0 : index
    %c0_522 = arith.constant 0 : index
    %902 = vector.load %arg18[%c21_520, %c0_521, %c0_522] : memref<48x1x8xf32, #tpu.memory_space<vmem>>, vector<1x1x8xf32>
    %903 = vector.shape_cast %902 : vector<1x1x8xf32> to vector<1x8xf32>
    %904 = vector.broadcast %903 : vector<1x8xf32> to vector<8x8xf32>
    %905 = arith.addf %901, %904 : vector<8x8xf32>
    %906 = arith.truncf %889 : vector<6x8xf32> to vector<6x8xbf16>
    %907 = arith.truncf %897 : vector<8x8xf32> to vector<8x8xbf16>
    %cst_523 = arith.constant dense<0.000000e+00> : vector<6x8xf32>
    %908 = tpu.matmul %906, %907, %cst_523 {dimension_numbers = #tpu.dot_dimension_numbers<[1], [1], [0], [0], [0, 0, 1, 0], [], []>} : vector<6x8xbf16>, vector<8x8xbf16>, vector<6x8xf32> -> vector<6x8xf32>
    %cst_524 = arith.constant dense<0xFF800000> : vector<6xf32>
    %909 = vector.multi_reduction <maximumf>, %908, %cst_524 [1] : vector<6x8xf32> to vector<6xf32>
    %910 = vector.shape_cast %909 : vector<6xf32> to vector<6x1xf32>
    %911 = vector.broadcast %910 : vector<6x1xf32> to vector<6x8xf32>
    %912 = arith.subf %908, %911 : vector<6x8xf32>
    %913 = math.exp %912 : vector<6x8xf32>
    %cst_525 = arith.constant dense<0.000000e+00> : vector<6xf32>
    %914 = vector.multi_reduction <add>, %913, %cst_525 [1] : vector<6x8xf32> to vector<6xf32>
    %915 = vector.shape_cast %914 : vector<6xf32> to vector<6x1xf32>
    %cst_526 = arith.constant 1.000000e-30 : f32
    %916 = vector.broadcast %cst_526 : f32 to vector<6x1xf32>
    %917 = arith.maximumf %915, %916 : vector<6x1xf32>
    %918 = tpu.reciprocal %917 {approx = true} : vector<6x1xf32> -> vector<6x1xf32>
    %919 = arith.truncf %913 : vector<6x8xf32> to vector<6x8xbf16>
    %920 = arith.truncf %905 : vector<8x8xf32> to vector<8x8xbf16>
    %cst_527 = arith.constant dense<0.000000e+00> : vector<6x8xf32>
    %921 = tpu.matmul %919, %920, %cst_527 {dimension_numbers = #tpu.dot_dimension_numbers<[1], [0], [0], [1], [0, 0, 1, 1], [], []>} : vector<6x8xbf16>, vector<8x8xbf16>, vector<6x8xf32> -> vector<6x8xf32>
    %922 = vector.broadcast %918 : vector<6x1xf32> to vector<6x8xf32>
    %923 = arith.mulf %921, %922 : vector<6x8xf32>
    %c5_528 = arith.constant 5 : index
    %c0_529 = arith.constant 0 : index
    %c0_530 = arith.constant 0 : index
    %924 = vector.load %arg19[%c5_528, %c0_529, %c0_530] : memref<16x8x32xbf16, #tpu.memory_space<vmem>>, vector<1x8x32xbf16>
    %925 = vector.shape_cast %924 : vector<1x8x32xbf16> to vector<8x32xbf16>
    %926 = arith.truncf %923 : vector<6x8xf32> to vector<6x8xbf16>
    %cst_531 = arith.constant dense<0.000000e+00> : vector<6x32xf32>
    %927 = tpu.matmul %926, %925, %cst_531 {dimension_numbers = #tpu.dot_dimension_numbers<[1], [0], [0], [1], [0, 0, 1, 1], [], []>} : vector<6x8xbf16>, vector<8x32xbf16>, vector<6x32xf32> -> vector<6x32xf32>
    %928 = arith.addf %881, %927 : vector<6x32xf32>
    %c14_532 = arith.constant 14 : index
    %c0_533 = arith.constant 0 : index
    %c0_534 = arith.constant 0 : index
    %929 = vector.load %arg17[%c14_532, %c0_533, %c0_534] : memref<48x32x8xbf16, #tpu.memory_space<vmem>>, vector<1x32x8xbf16>
    %930 = vector.shape_cast %929 : vector<1x32x8xbf16> to vector<32x8xbf16>
    %931 = arith.truncf %833 : vector<6x32xf32> to vector<6x32xbf16>
    %cst_535 = arith.constant dense<0.000000e+00> : vector<6x8xf32>
    %932 = tpu.matmul %931, %930, %cst_535 {dimension_numbers = #tpu.dot_dimension_numbers<[1], [0], [0], [1], [0, 0, 1, 1], [], []>} : vector<6x32xbf16>, vector<32x8xbf16>, vector<6x8xf32> -> vector<6x8xf32>
    %c14_536 = arith.constant 14 : index
    %c0_537 = arith.constant 0 : index
    %c0_538 = arith.constant 0 : index
    %933 = vector.load %arg18[%c14_536, %c0_537, %c0_538] : memref<48x1x8xf32, #tpu.memory_space<vmem>>, vector<1x1x8xf32>
    %934 = vector.shape_cast %933 : vector<1x1x8xf32> to vector<1x8xf32>
    %935 = vector.broadcast %934 : vector<1x8xf32> to vector<6x8xf32>
    %936 = arith.addf %932, %935 : vector<6x8xf32>
    %c18_539 = arith.constant 18 : index
    %c0_540 = arith.constant 0 : index
    %c0_541 = arith.constant 0 : index
    %937 = vector.load %arg17[%c18_539, %c0_540, %c0_541] : memref<48x32x8xbf16, #tpu.memory_space<vmem>>, vector<1x32x8xbf16>
    %938 = vector.shape_cast %937 : vector<1x32x8xbf16> to vector<32x8xbf16>
    %939 = arith.truncf %597 : vector<8x32xf32> to vector<8x32xbf16>
    %cst_542 = arith.constant dense<0.000000e+00> : vector<8x8xf32>
    %940 = tpu.matmul %939, %938, %cst_542 {dimension_numbers = #tpu.dot_dimension_numbers<[1], [0], [0], [1], [0, 0, 1, 1], [], []>} : vector<8x32xbf16>, vector<32x8xbf16>, vector<8x8xf32> -> vector<8x8xf32>
    %c18_543 = arith.constant 18 : index
    %c0_544 = arith.constant 0 : index
    %c0_545 = arith.constant 0 : index
    %941 = vector.load %arg18[%c18_543, %c0_544, %c0_545] : memref<48x1x8xf32, #tpu.memory_space<vmem>>, vector<1x1x8xf32>
    %942 = vector.shape_cast %941 : vector<1x1x8xf32> to vector<1x8xf32>
    %943 = vector.broadcast %942 : vector<1x8xf32> to vector<8x8xf32>
    %944 = arith.addf %940, %943 : vector<8x8xf32>
    %c22_546 = arith.constant 22 : index
    %c0_547 = arith.constant 0 : index
    %c0_548 = arith.constant 0 : index
    %945 = vector.load %arg17[%c22_546, %c0_547, %c0_548] : memref<48x32x8xbf16, #tpu.memory_space<vmem>>, vector<1x32x8xbf16>
    %946 = vector.shape_cast %945 : vector<1x32x8xbf16> to vector<32x8xbf16>
    %947 = arith.truncf %597 : vector<8x32xf32> to vector<8x32xbf16>
    %cst_549 = arith.constant dense<0.000000e+00> : vector<8x8xf32>
    %948 = tpu.matmul %947, %946, %cst_549 {dimension_numbers = #tpu.dot_dimension_numbers<[1], [0], [0], [1], [0, 0, 1, 1], [], []>} : vector<8x32xbf16>, vector<32x8xbf16>, vector<8x8xf32> -> vector<8x8xf32>
    %c22_550 = arith.constant 22 : index
    %c0_551 = arith.constant 0 : index
    %c0_552 = arith.constant 0 : index
    %949 = vector.load %arg18[%c22_550, %c0_551, %c0_552] : memref<48x1x8xf32, #tpu.memory_space<vmem>>, vector<1x1x8xf32>
    %950 = vector.shape_cast %949 : vector<1x1x8xf32> to vector<1x8xf32>
    %951 = vector.broadcast %950 : vector<1x8xf32> to vector<8x8xf32>
    %952 = arith.addf %948, %951 : vector<8x8xf32>
    %953 = arith.truncf %936 : vector<6x8xf32> to vector<6x8xbf16>
    %954 = arith.truncf %944 : vector<8x8xf32> to vector<8x8xbf16>
    %cst_553 = arith.constant dense<0.000000e+00> : vector<6x8xf32>
    %955 = tpu.matmul %953, %954, %cst_553 {dimension_numbers = #tpu.dot_dimension_numbers<[1], [1], [0], [0], [0, 0, 1, 0], [], []>} : vector<6x8xbf16>, vector<8x8xbf16>, vector<6x8xf32> -> vector<6x8xf32>
    %cst_554 = arith.constant dense<0xFF800000> : vector<6xf32>
    %956 = vector.multi_reduction <maximumf>, %955, %cst_554 [1] : vector<6x8xf32> to vector<6xf32>
    %957 = vector.shape_cast %956 : vector<6xf32> to vector<6x1xf32>
    %958 = vector.broadcast %957 : vector<6x1xf32> to vector<6x8xf32>
    %959 = arith.subf %955, %958 : vector<6x8xf32>
    %960 = math.exp %959 : vector<6x8xf32>
    %cst_555 = arith.constant dense<0.000000e+00> : vector<6xf32>
    %961 = vector.multi_reduction <add>, %960, %cst_555 [1] : vector<6x8xf32> to vector<6xf32>
    %962 = vector.shape_cast %961 : vector<6xf32> to vector<6x1xf32>
    %cst_556 = arith.constant 1.000000e-30 : f32
    %963 = vector.broadcast %cst_556 : f32 to vector<6x1xf32>
    %964 = arith.maximumf %962, %963 : vector<6x1xf32>
    %965 = tpu.reciprocal %964 {approx = true} : vector<6x1xf32> -> vector<6x1xf32>
    %966 = arith.truncf %960 : vector<6x8xf32> to vector<6x8xbf16>
    %967 = arith.truncf %952 : vector<8x8xf32> to vector<8x8xbf16>
    %cst_557 = arith.constant dense<0.000000e+00> : vector<6x8xf32>
    %968 = tpu.matmul %966, %967, %cst_557 {dimension_numbers = #tpu.dot_dimension_numbers<[1], [0], [0], [1], [0, 0, 1, 1], [], []>} : vector<6x8xbf16>, vector<8x8xbf16>, vector<6x8xf32> -> vector<6x8xf32>
    %969 = vector.broadcast %965 : vector<6x1xf32> to vector<6x8xf32>
    %970 = arith.mulf %968, %969 : vector<6x8xf32>
    %c6_558 = arith.constant 6 : index
    %c0_559 = arith.constant 0 : index
    %c0_560 = arith.constant 0 : index
    %971 = vector.load %arg19[%c6_558, %c0_559, %c0_560] : memref<16x8x32xbf16, #tpu.memory_space<vmem>>, vector<1x8x32xbf16>
    %972 = vector.shape_cast %971 : vector<1x8x32xbf16> to vector<8x32xbf16>
    %973 = arith.truncf %970 : vector<6x8xf32> to vector<6x8xbf16>
    %cst_561 = arith.constant dense<0.000000e+00> : vector<6x32xf32>
    %974 = tpu.matmul %973, %972, %cst_561 {dimension_numbers = #tpu.dot_dimension_numbers<[1], [0], [0], [1], [0, 0, 1, 1], [], []>} : vector<6x8xbf16>, vector<8x32xbf16>, vector<6x32xf32> -> vector<6x32xf32>
    %975 = arith.addf %928, %974 : vector<6x32xf32>
    %c15_562 = arith.constant 15 : index
    %c0_563 = arith.constant 0 : index
    %c0_564 = arith.constant 0 : index
    %976 = vector.load %arg17[%c15_562, %c0_563, %c0_564] : memref<48x32x8xbf16, #tpu.memory_space<vmem>>, vector<1x32x8xbf16>
    %977 = vector.shape_cast %976 : vector<1x32x8xbf16> to vector<32x8xbf16>
    %978 = arith.truncf %833 : vector<6x32xf32> to vector<6x32xbf16>
    %cst_565 = arith.constant dense<0.000000e+00> : vector<6x8xf32>
    %979 = tpu.matmul %978, %977, %cst_565 {dimension_numbers = #tpu.dot_dimension_numbers<[1], [0], [0], [1], [0, 0, 1, 1], [], []>} : vector<6x32xbf16>, vector<32x8xbf16>, vector<6x8xf32> -> vector<6x8xf32>
    %c15_566 = arith.constant 15 : index
    %c0_567 = arith.constant 0 : index
    %c0_568 = arith.constant 0 : index
    %980 = vector.load %arg18[%c15_566, %c0_567, %c0_568] : memref<48x1x8xf32, #tpu.memory_space<vmem>>, vector<1x1x8xf32>
    %981 = vector.shape_cast %980 : vector<1x1x8xf32> to vector<1x8xf32>
    %982 = vector.broadcast %981 : vector<1x8xf32> to vector<6x8xf32>
    %983 = arith.addf %979, %982 : vector<6x8xf32>
    %c19_569 = arith.constant 19 : index
    %c0_570 = arith.constant 0 : index
    %c0_571 = arith.constant 0 : index
    %984 = vector.load %arg17[%c19_569, %c0_570, %c0_571] : memref<48x32x8xbf16, #tpu.memory_space<vmem>>, vector<1x32x8xbf16>
    %985 = vector.shape_cast %984 : vector<1x32x8xbf16> to vector<32x8xbf16>
    %986 = arith.truncf %597 : vector<8x32xf32> to vector<8x32xbf16>
    %cst_572 = arith.constant dense<0.000000e+00> : vector<8x8xf32>
    %987 = tpu.matmul %986, %985, %cst_572 {dimension_numbers = #tpu.dot_dimension_numbers<[1], [0], [0], [1], [0, 0, 1, 1], [], []>} : vector<8x32xbf16>, vector<32x8xbf16>, vector<8x8xf32> -> vector<8x8xf32>
    %c19_573 = arith.constant 19 : index
    %c0_574 = arith.constant 0 : index
    %c0_575 = arith.constant 0 : index
    %988 = vector.load %arg18[%c19_573, %c0_574, %c0_575] : memref<48x1x8xf32, #tpu.memory_space<vmem>>, vector<1x1x8xf32>
    %989 = vector.shape_cast %988 : vector<1x1x8xf32> to vector<1x8xf32>
    %990 = vector.broadcast %989 : vector<1x8xf32> to vector<8x8xf32>
    %991 = arith.addf %987, %990 : vector<8x8xf32>
    %c23_576 = arith.constant 23 : index
    %c0_577 = arith.constant 0 : index
    %c0_578 = arith.constant 0 : index
    %992 = vector.load %arg17[%c23_576, %c0_577, %c0_578] : memref<48x32x8xbf16, #tpu.memory_space<vmem>>, vector<1x32x8xbf16>
    %993 = vector.shape_cast %992 : vector<1x32x8xbf16> to vector<32x8xbf16>
    %994 = arith.truncf %597 : vector<8x32xf32> to vector<8x32xbf16>
    %cst_579 = arith.constant dense<0.000000e+00> : vector<8x8xf32>
    %995 = tpu.matmul %994, %993, %cst_579 {dimension_numbers = #tpu.dot_dimension_numbers<[1], [0], [0], [1], [0, 0, 1, 1], [], []>} : vector<8x32xbf16>, vector<32x8xbf16>, vector<8x8xf32> -> vector<8x8xf32>
    %c23_580 = arith.constant 23 : index
    %c0_581 = arith.constant 0 : index
    %c0_582 = arith.constant 0 : index
    %996 = vector.load %arg18[%c23_580, %c0_581, %c0_582] : memref<48x1x8xf32, #tpu.memory_space<vmem>>, vector<1x1x8xf32>
    %997 = vector.shape_cast %996 : vector<1x1x8xf32> to vector<1x8xf32>
    %998 = vector.broadcast %997 : vector<1x8xf32> to vector<8x8xf32>
    %999 = arith.addf %995, %998 : vector<8x8xf32>
    %1000 = arith.truncf %983 : vector<6x8xf32> to vector<6x8xbf16>
    %1001 = arith.truncf %991 : vector<8x8xf32> to vector<8x8xbf16>
    %cst_583 = arith.constant dense<0.000000e+00> : vector<6x8xf32>
    %1002 = tpu.matmul %1000, %1001, %cst_583 {dimension_numbers = #tpu.dot_dimension_numbers<[1], [1], [0], [0], [0, 0, 1, 0], [], []>} : vector<6x8xbf16>, vector<8x8xbf16>, vector<6x8xf32> -> vector<6x8xf32>
    %cst_584 = arith.constant dense<0xFF800000> : vector<6xf32>
    %1003 = vector.multi_reduction <maximumf>, %1002, %cst_584 [1] : vector<6x8xf32> to vector<6xf32>
    %1004 = vector.shape_cast %1003 : vector<6xf32> to vector<6x1xf32>
    %1005 = vector.broadcast %1004 : vector<6x1xf32> to vector<6x8xf32>
    %1006 = arith.subf %1002, %1005 : vector<6x8xf32>
    %1007 = math.exp %1006 : vector<6x8xf32>
    %cst_585 = arith.constant dense<0.000000e+00> : vector<6xf32>
    %1008 = vector.multi_reduction <add>, %1007, %cst_585 [1] : vector<6x8xf32> to vector<6xf32>
    %1009 = vector.shape_cast %1008 : vector<6xf32> to vector<6x1xf32>
    %cst_586 = arith.constant 1.000000e-30 : f32
    %1010 = vector.broadcast %cst_586 : f32 to vector<6x1xf32>
    %1011 = arith.maximumf %1009, %1010 : vector<6x1xf32>
    %1012 = tpu.reciprocal %1011 {approx = true} : vector<6x1xf32> -> vector<6x1xf32>
    %1013 = arith.truncf %1007 : vector<6x8xf32> to vector<6x8xbf16>
    %1014 = arith.truncf %999 : vector<8x8xf32> to vector<8x8xbf16>
    %cst_587 = arith.constant dense<0.000000e+00> : vector<6x8xf32>
    %1015 = tpu.matmul %1013, %1014, %cst_587 {dimension_numbers = #tpu.dot_dimension_numbers<[1], [0], [0], [1], [0, 0, 1, 1], [], []>} : vector<6x8xbf16>, vector<8x8xbf16>, vector<6x8xf32> -> vector<6x8xf32>
    %1016 = vector.broadcast %1012 : vector<6x1xf32> to vector<6x8xf32>
    %1017 = arith.mulf %1015, %1016 : vector<6x8xf32>
    %c7_588 = arith.constant 7 : index
    %c0_589 = arith.constant 0 : index
    %c0_590 = arith.constant 0 : index
    %1018 = vector.load %arg19[%c7_588, %c0_589, %c0_590] : memref<16x8x32xbf16, #tpu.memory_space<vmem>>, vector<1x8x32xbf16>
    %1019 = vector.shape_cast %1018 : vector<1x8x32xbf16> to vector<8x32xbf16>
    %1020 = arith.truncf %1017 : vector<6x8xf32> to vector<6x8xbf16>
    %cst_591 = arith.constant dense<0.000000e+00> : vector<6x32xf32>
    %1021 = tpu.matmul %1020, %1019, %cst_591 {dimension_numbers = #tpu.dot_dimension_numbers<[1], [0], [0], [1], [0, 0, 1, 1], [], []>} : vector<6x8xbf16>, vector<8x32xbf16>, vector<6x32xf32> -> vector<6x32xf32>
    %1022 = arith.addf %975, %1021 : vector<6x32xf32>
    %c1_592 = arith.constant 1 : index
    %c0_593 = arith.constant 0 : index
    %c0_594 = arith.constant 0 : index
    %1023 = vector.load %arg20[%c1_592, %c0_593, %c0_594] : memref<4x1x32xf32, #tpu.memory_space<vmem>>, vector<1x1x32xf32>
    %1024 = vector.shape_cast %1023 : vector<1x1x32xf32> to vector<1x32xf32>
    %1025 = vector.broadcast %1024 : vector<1x32xf32> to vector<6x32xf32>
    %1026 = arith.addf %1022, %1025 : vector<6x32xf32>
    %1027 = arith.addf %833, %1026 : vector<6x32xf32>
    %c1_595 = arith.constant 1 : index
    %c0_596 = arith.constant 0 : index
    %c0_597 = arith.constant 0 : index
    %1028 = vector.load %arg21[%c1_595, %c0_596, %c0_597] : memref<6x1x32xf32, #tpu.memory_space<vmem>>, vector<1x1x32xf32>
    %1029 = vector.shape_cast %1028 : vector<1x1x32xf32> to vector<1x32xf32>
    %c1_598 = arith.constant 1 : index
    %c0_599 = arith.constant 0 : index
    %c0_600 = arith.constant 0 : index
    %1030 = vector.load %arg22[%c1_598, %c0_599, %c0_600] : memref<6x1x32xf32, #tpu.memory_space<vmem>>, vector<1x1x32xf32>
    %1031 = vector.shape_cast %1030 : vector<1x1x32xf32> to vector<1x32xf32>
    %cst_601 = arith.constant dense<0.000000e+00> : vector<6xf32>
    %1032 = vector.multi_reduction <add>, %1027, %cst_601 [1] : vector<6x32xf32> to vector<6xf32>
    %1033 = vector.shape_cast %1032 : vector<6xf32> to vector<6x1xf32>
    %cst_602 = arith.constant 3.200000e+01 : f32
    %1034 = vector.broadcast %cst_602 : f32 to vector<6x1xf32>
    %1035 = arith.divf %1033, %1034 : vector<6x1xf32>
    %1036 = vector.broadcast %1035 : vector<6x1xf32> to vector<6x32xf32>
    %1037 = arith.subf %1027, %1036 : vector<6x32xf32>
    %1038 = arith.mulf %1037, %1037 : vector<6x32xf32>
    %cst_603 = arith.constant dense<0.000000e+00> : vector<6xf32>
    %1039 = vector.multi_reduction <add>, %1038, %cst_603 [1] : vector<6x32xf32> to vector<6xf32>
    %1040 = vector.shape_cast %1039 : vector<6xf32> to vector<6x1xf32>
    %cst_604 = arith.constant 3.200000e+01 : f32
    %1041 = vector.broadcast %cst_604 : f32 to vector<6x1xf32>
    %1042 = arith.divf %1040, %1041 : vector<6x1xf32>
    %cst_605 = arith.constant 9.99999974E-6 : f32
    %1043 = vector.broadcast %cst_605 : f32 to vector<6x1xf32>
    %1044 = arith.addf %1042, %1043 : vector<6x1xf32>
    %1045 = math.rsqrt %1044 : vector<6x1xf32>
    %1046 = vector.broadcast %1045 : vector<6x1xf32> to vector<6x32xf32>
    %1047 = arith.mulf %1037, %1046 : vector<6x32xf32>
    %1048 = vector.broadcast %1029 : vector<1x32xf32> to vector<6x32xf32>
    %1049 = arith.mulf %1047, %1048 : vector<6x32xf32>
    %1050 = vector.broadcast %1031 : vector<1x32xf32> to vector<6x32xf32>
    %1051 = arith.addf %1049, %1050 : vector<6x32xf32>
    %c0_606 = arith.constant 0 : index
    %c0_607 = arith.constant 0 : index
    %c0_608 = arith.constant 0 : index
    %1052 = vector.load %arg23[%c0_606, %c0_607, %c0_608] : memref<2x32x64xbf16, #tpu.memory_space<vmem>>, vector<1x32x64xbf16>
    %1053 = vector.shape_cast %1052 : vector<1x32x64xbf16> to vector<32x64xbf16>
    %1054 = arith.truncf %1051 : vector<6x32xf32> to vector<6x32xbf16>
    %cst_609 = arith.constant dense<0.000000e+00> : vector<6x64xf32>
    %1055 = tpu.matmul %1054, %1053, %cst_609 {dimension_numbers = #tpu.dot_dimension_numbers<[1], [0], [0], [1], [0, 0, 1, 1], [], []>} : vector<6x32xbf16>, vector<32x64xbf16>, vector<6x64xf32> -> vector<6x64xf32>
    %c0_610 = arith.constant 0 : index
    %c0_611 = arith.constant 0 : index
    %c0_612 = arith.constant 0 : index
    %1056 = vector.load %arg24[%c0_610, %c0_611, %c0_612] : memref<2x1x64xf32, #tpu.memory_space<vmem>>, vector<1x1x64xf32>
    %1057 = vector.shape_cast %1056 : vector<1x1x64xf32> to vector<1x64xf32>
    %1058 = vector.broadcast %1057 : vector<1x64xf32> to vector<6x64xf32>
    %1059 = arith.addf %1055, %1058 : vector<6x64xf32>
    %cst_613 = arith.constant 0.000000e+00 : f32
    %1060 = vector.broadcast %cst_613 : f32 to vector<6x64xf32>
    %1061 = arith.maximumf %1059, %1060 : vector<6x64xf32>
    %c0_614 = arith.constant 0 : index
    %c0_615 = arith.constant 0 : index
    %c0_616 = arith.constant 0 : index
    %1062 = vector.load %arg25[%c0_614, %c0_615, %c0_616] : memref<2x64x32xbf16, #tpu.memory_space<vmem>>, vector<1x64x32xbf16>
    %1063 = vector.shape_cast %1062 : vector<1x64x32xbf16> to vector<64x32xbf16>
    %1064 = arith.truncf %1061 : vector<6x64xf32> to vector<6x64xbf16>
    %cst_617 = arith.constant dense<0.000000e+00> : vector<6x32xf32>
    %1065 = tpu.matmul %1064, %1063, %cst_617 {dimension_numbers = #tpu.dot_dimension_numbers<[1], [0], [0], [1], [0, 0, 1, 1], [], []>} : vector<6x64xbf16>, vector<64x32xbf16>, vector<6x32xf32> -> vector<6x32xf32>
    %c0_618 = arith.constant 0 : index
    %c0_619 = arith.constant 0 : index
    %c0_620 = arith.constant 0 : index
    %1066 = vector.load %arg26[%c0_618, %c0_619, %c0_620] : memref<2x1x32xf32, #tpu.memory_space<vmem>>, vector<1x1x32xf32>
    %1067 = vector.shape_cast %1066 : vector<1x1x32xf32> to vector<1x32xf32>
    %1068 = vector.broadcast %1067 : vector<1x32xf32> to vector<6x32xf32>
    %1069 = arith.addf %1065, %1068 : vector<6x32xf32>
    %1070 = arith.addf %1051, %1069 : vector<6x32xf32>
    %c2_621 = arith.constant 2 : index
    %c0_622 = arith.constant 0 : index
    %c0_623 = arith.constant 0 : index
    %1071 = vector.load %arg21[%c2_621, %c0_622, %c0_623] : memref<6x1x32xf32, #tpu.memory_space<vmem>>, vector<1x1x32xf32>
    %1072 = vector.shape_cast %1071 : vector<1x1x32xf32> to vector<1x32xf32>
    %c2_624 = arith.constant 2 : index
    %c0_625 = arith.constant 0 : index
    %c0_626 = arith.constant 0 : index
    %1073 = vector.load %arg22[%c2_624, %c0_625, %c0_626] : memref<6x1x32xf32, #tpu.memory_space<vmem>>, vector<1x1x32xf32>
    %1074 = vector.shape_cast %1073 : vector<1x1x32xf32> to vector<1x32xf32>
    %cst_627 = arith.constant dense<0.000000e+00> : vector<6xf32>
    %1075 = vector.multi_reduction <add>, %1070, %cst_627 [1] : vector<6x32xf32> to vector<6xf32>
    %1076 = vector.shape_cast %1075 : vector<6xf32> to vector<6x1xf32>
    %cst_628 = arith.constant 3.200000e+01 : f32
    %1077 = vector.broadcast %cst_628 : f32 to vector<6x1xf32>
    %1078 = arith.divf %1076, %1077 : vector<6x1xf32>
    %1079 = vector.broadcast %1078 : vector<6x1xf32> to vector<6x32xf32>
    %1080 = arith.subf %1070, %1079 : vector<6x32xf32>
    %1081 = arith.mulf %1080, %1080 : vector<6x32xf32>
    %cst_629 = arith.constant dense<0.000000e+00> : vector<6xf32>
    %1082 = vector.multi_reduction <add>, %1081, %cst_629 [1] : vector<6x32xf32> to vector<6xf32>
    %1083 = vector.shape_cast %1082 : vector<6xf32> to vector<6x1xf32>
    %cst_630 = arith.constant 3.200000e+01 : f32
    %1084 = vector.broadcast %cst_630 : f32 to vector<6x1xf32>
    %1085 = arith.divf %1083, %1084 : vector<6x1xf32>
    %cst_631 = arith.constant 9.99999974E-6 : f32
    %1086 = vector.broadcast %cst_631 : f32 to vector<6x1xf32>
    %1087 = arith.addf %1085, %1086 : vector<6x1xf32>
    %1088 = math.rsqrt %1087 : vector<6x1xf32>
    %1089 = vector.broadcast %1088 : vector<6x1xf32> to vector<6x32xf32>
    %1090 = arith.mulf %1080, %1089 : vector<6x32xf32>
    %1091 = vector.broadcast %1072 : vector<1x32xf32> to vector<6x32xf32>
    %1092 = arith.mulf %1090, %1091 : vector<6x32xf32>
    %1093 = vector.broadcast %1074 : vector<1x32xf32> to vector<6x32xf32>
    %1094 = arith.addf %1092, %1093 : vector<6x32xf32>
    %cst_632 = arith.constant 0.000000e+00 : f32
    %1095 = vector.broadcast %cst_632 : f32 to vector<6x32xf32>
    %c24 = arith.constant 24 : index
    %c0_633 = arith.constant 0 : index
    %c0_634 = arith.constant 0 : index
    %1096 = vector.load %arg17[%c24, %c0_633, %c0_634] : memref<48x32x8xbf16, #tpu.memory_space<vmem>>, vector<1x32x8xbf16>
    %1097 = vector.shape_cast %1096 : vector<1x32x8xbf16> to vector<32x8xbf16>
    %1098 = arith.truncf %1094 : vector<6x32xf32> to vector<6x32xbf16>
    %cst_635 = arith.constant dense<0.000000e+00> : vector<6x8xf32>
    %1099 = tpu.matmul %1098, %1097, %cst_635 {dimension_numbers = #tpu.dot_dimension_numbers<[1], [0], [0], [1], [0, 0, 1, 1], [], []>} : vector<6x32xbf16>, vector<32x8xbf16>, vector<6x8xf32> -> vector<6x8xf32>
    %c24_636 = arith.constant 24 : index
    %c0_637 = arith.constant 0 : index
    %c0_638 = arith.constant 0 : index
    %1100 = vector.load %arg18[%c24_636, %c0_637, %c0_638] : memref<48x1x8xf32, #tpu.memory_space<vmem>>, vector<1x1x8xf32>
    %1101 = vector.shape_cast %1100 : vector<1x1x8xf32> to vector<1x8xf32>
    %1102 = vector.broadcast %1101 : vector<1x8xf32> to vector<6x8xf32>
    %1103 = arith.addf %1099, %1102 : vector<6x8xf32>
    %c28 = arith.constant 28 : index
    %c0_639 = arith.constant 0 : index
    %c0_640 = arith.constant 0 : index
    %1104 = vector.load %arg17[%c28, %c0_639, %c0_640] : memref<48x32x8xbf16, #tpu.memory_space<vmem>>, vector<1x32x8xbf16>
    %1105 = vector.shape_cast %1104 : vector<1x32x8xbf16> to vector<32x8xbf16>
    %1106 = arith.truncf %1094 : vector<6x32xf32> to vector<6x32xbf16>
    %cst_641 = arith.constant dense<0.000000e+00> : vector<6x8xf32>
    %1107 = tpu.matmul %1106, %1105, %cst_641 {dimension_numbers = #tpu.dot_dimension_numbers<[1], [0], [0], [1], [0, 0, 1, 1], [], []>} : vector<6x32xbf16>, vector<32x8xbf16>, vector<6x8xf32> -> vector<6x8xf32>
    %c28_642 = arith.constant 28 : index
    %c0_643 = arith.constant 0 : index
    %c0_644 = arith.constant 0 : index
    %1108 = vector.load %arg18[%c28_642, %c0_643, %c0_644] : memref<48x1x8xf32, #tpu.memory_space<vmem>>, vector<1x1x8xf32>
    %1109 = vector.shape_cast %1108 : vector<1x1x8xf32> to vector<1x8xf32>
    %1110 = vector.broadcast %1109 : vector<1x8xf32> to vector<6x8xf32>
    %1111 = arith.addf %1107, %1110 : vector<6x8xf32>
    %c32 = arith.constant 32 : index
    %c0_645 = arith.constant 0 : index
    %c0_646 = arith.constant 0 : index
    %1112 = vector.load %arg17[%c32, %c0_645, %c0_646] : memref<48x32x8xbf16, #tpu.memory_space<vmem>>, vector<1x32x8xbf16>
    %1113 = vector.shape_cast %1112 : vector<1x32x8xbf16> to vector<32x8xbf16>
    %1114 = arith.truncf %1094 : vector<6x32xf32> to vector<6x32xbf16>
    %cst_647 = arith.constant dense<0.000000e+00> : vector<6x8xf32>
    %1115 = tpu.matmul %1114, %1113, %cst_647 {dimension_numbers = #tpu.dot_dimension_numbers<[1], [0], [0], [1], [0, 0, 1, 1], [], []>} : vector<6x32xbf16>, vector<32x8xbf16>, vector<6x8xf32> -> vector<6x8xf32>
    %c32_648 = arith.constant 32 : index
    %c0_649 = arith.constant 0 : index
    %c0_650 = arith.constant 0 : index
    %1116 = vector.load %arg18[%c32_648, %c0_649, %c0_650] : memref<48x1x8xf32, #tpu.memory_space<vmem>>, vector<1x1x8xf32>
    %1117 = vector.shape_cast %1116 : vector<1x1x8xf32> to vector<1x8xf32>
    %1118 = vector.broadcast %1117 : vector<1x8xf32> to vector<6x8xf32>
    %1119 = arith.addf %1115, %1118 : vector<6x8xf32>
    %1120 = arith.truncf %1103 : vector<6x8xf32> to vector<6x8xbf16>
    %1121 = arith.truncf %1111 : vector<6x8xf32> to vector<6x8xbf16>
    %cst_651 = arith.constant dense<0.000000e+00> : vector<6x6xf32>
    %1122 = tpu.matmul %1120, %1121, %cst_651 {dimension_numbers = #tpu.dot_dimension_numbers<[1], [1], [0], [0], [0, 0, 1, 0], [], []>} : vector<6x8xbf16>, vector<6x8xbf16>, vector<6x6xf32> -> vector<6x6xf32>
    %1123 = arith.addf %1122, %19 : vector<6x6xf32>
    %cst_652 = arith.constant dense<0xFF800000> : vector<6xf32>
    %1124 = vector.multi_reduction <maximumf>, %1123, %cst_652 [1] : vector<6x6xf32> to vector<6xf32>
    %1125 = vector.shape_cast %1124 : vector<6xf32> to vector<6x1xf32>
    %1126 = vector.broadcast %1125 : vector<6x1xf32> to vector<6x6xf32>
    %1127 = arith.subf %1123, %1126 : vector<6x6xf32>
    %1128 = math.exp %1127 : vector<6x6xf32>
    %cst_653 = arith.constant dense<0.000000e+00> : vector<6xf32>
    %1129 = vector.multi_reduction <add>, %1128, %cst_653 [1] : vector<6x6xf32> to vector<6xf32>
    %1130 = vector.shape_cast %1129 : vector<6xf32> to vector<6x1xf32>
    %cst_654 = arith.constant 1.000000e-30 : f32
    %1131 = vector.broadcast %cst_654 : f32 to vector<6x1xf32>
    %1132 = arith.maximumf %1130, %1131 : vector<6x1xf32>
    %1133 = tpu.reciprocal %1132 {approx = true} : vector<6x1xf32> -> vector<6x1xf32>
    %1134 = arith.truncf %1128 : vector<6x6xf32> to vector<6x6xbf16>
    %1135 = arith.truncf %1119 : vector<6x8xf32> to vector<6x8xbf16>
    %cst_655 = arith.constant dense<0.000000e+00> : vector<6x8xf32>
    %1136 = tpu.matmul %1134, %1135, %cst_655 {dimension_numbers = #tpu.dot_dimension_numbers<[1], [0], [0], [1], [0, 0, 1, 1], [], []>} : vector<6x6xbf16>, vector<6x8xbf16>, vector<6x8xf32> -> vector<6x8xf32>
    %1137 = vector.broadcast %1133 : vector<6x1xf32> to vector<6x8xf32>
    %1138 = arith.mulf %1136, %1137 : vector<6x8xf32>
    %c8_656 = arith.constant 8 : index
    %c0_657 = arith.constant 0 : index
    %c0_658 = arith.constant 0 : index
    %1139 = vector.load %arg19[%c8_656, %c0_657, %c0_658] : memref<16x8x32xbf16, #tpu.memory_space<vmem>>, vector<1x8x32xbf16>
    %1140 = vector.shape_cast %1139 : vector<1x8x32xbf16> to vector<8x32xbf16>
    %1141 = arith.truncf %1138 : vector<6x8xf32> to vector<6x8xbf16>
    %cst_659 = arith.constant dense<0.000000e+00> : vector<6x32xf32>
    %1142 = tpu.matmul %1141, %1140, %cst_659 {dimension_numbers = #tpu.dot_dimension_numbers<[1], [0], [0], [1], [0, 0, 1, 1], [], []>} : vector<6x8xbf16>, vector<8x32xbf16>, vector<6x32xf32> -> vector<6x32xf32>
    %1143 = arith.addf %1095, %1142 : vector<6x32xf32>
    %c25 = arith.constant 25 : index
    %c0_660 = arith.constant 0 : index
    %c0_661 = arith.constant 0 : index
    %1144 = vector.load %arg17[%c25, %c0_660, %c0_661] : memref<48x32x8xbf16, #tpu.memory_space<vmem>>, vector<1x32x8xbf16>
    %1145 = vector.shape_cast %1144 : vector<1x32x8xbf16> to vector<32x8xbf16>
    %1146 = arith.truncf %1094 : vector<6x32xf32> to vector<6x32xbf16>
    %cst_662 = arith.constant dense<0.000000e+00> : vector<6x8xf32>
    %1147 = tpu.matmul %1146, %1145, %cst_662 {dimension_numbers = #tpu.dot_dimension_numbers<[1], [0], [0], [1], [0, 0, 1, 1], [], []>} : vector<6x32xbf16>, vector<32x8xbf16>, vector<6x8xf32> -> vector<6x8xf32>
    %c25_663 = arith.constant 25 : index
    %c0_664 = arith.constant 0 : index
    %c0_665 = arith.constant 0 : index
    %1148 = vector.load %arg18[%c25_663, %c0_664, %c0_665] : memref<48x1x8xf32, #tpu.memory_space<vmem>>, vector<1x1x8xf32>
    %1149 = vector.shape_cast %1148 : vector<1x1x8xf32> to vector<1x8xf32>
    %1150 = vector.broadcast %1149 : vector<1x8xf32> to vector<6x8xf32>
    %1151 = arith.addf %1147, %1150 : vector<6x8xf32>
    %c29 = arith.constant 29 : index
    %c0_666 = arith.constant 0 : index
    %c0_667 = arith.constant 0 : index
    %1152 = vector.load %arg17[%c29, %c0_666, %c0_667] : memref<48x32x8xbf16, #tpu.memory_space<vmem>>, vector<1x32x8xbf16>
    %1153 = vector.shape_cast %1152 : vector<1x32x8xbf16> to vector<32x8xbf16>
    %1154 = arith.truncf %1094 : vector<6x32xf32> to vector<6x32xbf16>
    %cst_668 = arith.constant dense<0.000000e+00> : vector<6x8xf32>
    %1155 = tpu.matmul %1154, %1153, %cst_668 {dimension_numbers = #tpu.dot_dimension_numbers<[1], [0], [0], [1], [0, 0, 1, 1], [], []>} : vector<6x32xbf16>, vector<32x8xbf16>, vector<6x8xf32> -> vector<6x8xf32>
    %c29_669 = arith.constant 29 : index
    %c0_670 = arith.constant 0 : index
    %c0_671 = arith.constant 0 : index
    %1156 = vector.load %arg18[%c29_669, %c0_670, %c0_671] : memref<48x1x8xf32, #tpu.memory_space<vmem>>, vector<1x1x8xf32>
    %1157 = vector.shape_cast %1156 : vector<1x1x8xf32> to vector<1x8xf32>
    %1158 = vector.broadcast %1157 : vector<1x8xf32> to vector<6x8xf32>
    %1159 = arith.addf %1155, %1158 : vector<6x8xf32>
    %c33 = arith.constant 33 : index
    %c0_672 = arith.constant 0 : index
    %c0_673 = arith.constant 0 : index
    %1160 = vector.load %arg17[%c33, %c0_672, %c0_673] : memref<48x32x8xbf16, #tpu.memory_space<vmem>>, vector<1x32x8xbf16>
    %1161 = vector.shape_cast %1160 : vector<1x32x8xbf16> to vector<32x8xbf16>
    %1162 = arith.truncf %1094 : vector<6x32xf32> to vector<6x32xbf16>
    %cst_674 = arith.constant dense<0.000000e+00> : vector<6x8xf32>
    %1163 = tpu.matmul %1162, %1161, %cst_674 {dimension_numbers = #tpu.dot_dimension_numbers<[1], [0], [0], [1], [0, 0, 1, 1], [], []>} : vector<6x32xbf16>, vector<32x8xbf16>, vector<6x8xf32> -> vector<6x8xf32>
    %c33_675 = arith.constant 33 : index
    %c0_676 = arith.constant 0 : index
    %c0_677 = arith.constant 0 : index
    %1164 = vector.load %arg18[%c33_675, %c0_676, %c0_677] : memref<48x1x8xf32, #tpu.memory_space<vmem>>, vector<1x1x8xf32>
    %1165 = vector.shape_cast %1164 : vector<1x1x8xf32> to vector<1x8xf32>
    %1166 = vector.broadcast %1165 : vector<1x8xf32> to vector<6x8xf32>
    %1167 = arith.addf %1163, %1166 : vector<6x8xf32>
    %1168 = arith.truncf %1151 : vector<6x8xf32> to vector<6x8xbf16>
    %1169 = arith.truncf %1159 : vector<6x8xf32> to vector<6x8xbf16>
    %cst_678 = arith.constant dense<0.000000e+00> : vector<6x6xf32>
    %1170 = tpu.matmul %1168, %1169, %cst_678 {dimension_numbers = #tpu.dot_dimension_numbers<[1], [1], [0], [0], [0, 0, 1, 0], [], []>} : vector<6x8xbf16>, vector<6x8xbf16>, vector<6x6xf32> -> vector<6x6xf32>
    %1171 = arith.addf %1170, %19 : vector<6x6xf32>
    %cst_679 = arith.constant dense<0xFF800000> : vector<6xf32>
    %1172 = vector.multi_reduction <maximumf>, %1171, %cst_679 [1] : vector<6x6xf32> to vector<6xf32>
    %1173 = vector.shape_cast %1172 : vector<6xf32> to vector<6x1xf32>
    %1174 = vector.broadcast %1173 : vector<6x1xf32> to vector<6x6xf32>
    %1175 = arith.subf %1171, %1174 : vector<6x6xf32>
    %1176 = math.exp %1175 : vector<6x6xf32>
    %cst_680 = arith.constant dense<0.000000e+00> : vector<6xf32>
    %1177 = vector.multi_reduction <add>, %1176, %cst_680 [1] : vector<6x6xf32> to vector<6xf32>
    %1178 = vector.shape_cast %1177 : vector<6xf32> to vector<6x1xf32>
    %cst_681 = arith.constant 1.000000e-30 : f32
    %1179 = vector.broadcast %cst_681 : f32 to vector<6x1xf32>
    %1180 = arith.maximumf %1178, %1179 : vector<6x1xf32>
    %1181 = tpu.reciprocal %1180 {approx = true} : vector<6x1xf32> -> vector<6x1xf32>
    %1182 = arith.truncf %1176 : vector<6x6xf32> to vector<6x6xbf16>
    %1183 = arith.truncf %1167 : vector<6x8xf32> to vector<6x8xbf16>
    %cst_682 = arith.constant dense<0.000000e+00> : vector<6x8xf32>
    %1184 = tpu.matmul %1182, %1183, %cst_682 {dimension_numbers = #tpu.dot_dimension_numbers<[1], [0], [0], [1], [0, 0, 1, 1], [], []>} : vector<6x6xbf16>, vector<6x8xbf16>, vector<6x8xf32> -> vector<6x8xf32>
    %1185 = vector.broadcast %1181 : vector<6x1xf32> to vector<6x8xf32>
    %1186 = arith.mulf %1184, %1185 : vector<6x8xf32>
    %c9_683 = arith.constant 9 : index
    %c0_684 = arith.constant 0 : index
    %c0_685 = arith.constant 0 : index
    %1187 = vector.load %arg19[%c9_683, %c0_684, %c0_685] : memref<16x8x32xbf16, #tpu.memory_space<vmem>>, vector<1x8x32xbf16>
    %1188 = vector.shape_cast %1187 : vector<1x8x32xbf16> to vector<8x32xbf16>
    %1189 = arith.truncf %1186 : vector<6x8xf32> to vector<6x8xbf16>
    %cst_686 = arith.constant dense<0.000000e+00> : vector<6x32xf32>
    %1190 = tpu.matmul %1189, %1188, %cst_686 {dimension_numbers = #tpu.dot_dimension_numbers<[1], [0], [0], [1], [0, 0, 1, 1], [], []>} : vector<6x8xbf16>, vector<8x32xbf16>, vector<6x32xf32> -> vector<6x32xf32>
    %1191 = arith.addf %1143, %1190 : vector<6x32xf32>
    %c26 = arith.constant 26 : index
    %c0_687 = arith.constant 0 : index
    %c0_688 = arith.constant 0 : index
    %1192 = vector.load %arg17[%c26, %c0_687, %c0_688] : memref<48x32x8xbf16, #tpu.memory_space<vmem>>, vector<1x32x8xbf16>
    %1193 = vector.shape_cast %1192 : vector<1x32x8xbf16> to vector<32x8xbf16>
    %1194 = arith.truncf %1094 : vector<6x32xf32> to vector<6x32xbf16>
    %cst_689 = arith.constant dense<0.000000e+00> : vector<6x8xf32>
    %1195 = tpu.matmul %1194, %1193, %cst_689 {dimension_numbers = #tpu.dot_dimension_numbers<[1], [0], [0], [1], [0, 0, 1, 1], [], []>} : vector<6x32xbf16>, vector<32x8xbf16>, vector<6x8xf32> -> vector<6x8xf32>
    %c26_690 = arith.constant 26 : index
    %c0_691 = arith.constant 0 : index
    %c0_692 = arith.constant 0 : index
    %1196 = vector.load %arg18[%c26_690, %c0_691, %c0_692] : memref<48x1x8xf32, #tpu.memory_space<vmem>>, vector<1x1x8xf32>
    %1197 = vector.shape_cast %1196 : vector<1x1x8xf32> to vector<1x8xf32>
    %1198 = vector.broadcast %1197 : vector<1x8xf32> to vector<6x8xf32>
    %1199 = arith.addf %1195, %1198 : vector<6x8xf32>
    %c30 = arith.constant 30 : index
    %c0_693 = arith.constant 0 : index
    %c0_694 = arith.constant 0 : index
    %1200 = vector.load %arg17[%c30, %c0_693, %c0_694] : memref<48x32x8xbf16, #tpu.memory_space<vmem>>, vector<1x32x8xbf16>
    %1201 = vector.shape_cast %1200 : vector<1x32x8xbf16> to vector<32x8xbf16>
    %1202 = arith.truncf %1094 : vector<6x32xf32> to vector<6x32xbf16>
    %cst_695 = arith.constant dense<0.000000e+00> : vector<6x8xf32>
    %1203 = tpu.matmul %1202, %1201, %cst_695 {dimension_numbers = #tpu.dot_dimension_numbers<[1], [0], [0], [1], [0, 0, 1, 1], [], []>} : vector<6x32xbf16>, vector<32x8xbf16>, vector<6x8xf32> -> vector<6x8xf32>
    %c30_696 = arith.constant 30 : index
    %c0_697 = arith.constant 0 : index
    %c0_698 = arith.constant 0 : index
    %1204 = vector.load %arg18[%c30_696, %c0_697, %c0_698] : memref<48x1x8xf32, #tpu.memory_space<vmem>>, vector<1x1x8xf32>
    %1205 = vector.shape_cast %1204 : vector<1x1x8xf32> to vector<1x8xf32>
    %1206 = vector.broadcast %1205 : vector<1x8xf32> to vector<6x8xf32>
    %1207 = arith.addf %1203, %1206 : vector<6x8xf32>
    %c34 = arith.constant 34 : index
    %c0_699 = arith.constant 0 : index
    %c0_700 = arith.constant 0 : index
    %1208 = vector.load %arg17[%c34, %c0_699, %c0_700] : memref<48x32x8xbf16, #tpu.memory_space<vmem>>, vector<1x32x8xbf16>
    %1209 = vector.shape_cast %1208 : vector<1x32x8xbf16> to vector<32x8xbf16>
    %1210 = arith.truncf %1094 : vector<6x32xf32> to vector<6x32xbf16>
    %cst_701 = arith.constant dense<0.000000e+00> : vector<6x8xf32>
    %1211 = tpu.matmul %1210, %1209, %cst_701 {dimension_numbers = #tpu.dot_dimension_numbers<[1], [0], [0], [1], [0, 0, 1, 1], [], []>} : vector<6x32xbf16>, vector<32x8xbf16>, vector<6x8xf32> -> vector<6x8xf32>
    %c34_702 = arith.constant 34 : index
    %c0_703 = arith.constant 0 : index
    %c0_704 = arith.constant 0 : index
    %1212 = vector.load %arg18[%c34_702, %c0_703, %c0_704] : memref<48x1x8xf32, #tpu.memory_space<vmem>>, vector<1x1x8xf32>
    %1213 = vector.shape_cast %1212 : vector<1x1x8xf32> to vector<1x8xf32>
    %1214 = vector.broadcast %1213 : vector<1x8xf32> to vector<6x8xf32>
    %1215 = arith.addf %1211, %1214 : vector<6x8xf32>
    %1216 = arith.truncf %1199 : vector<6x8xf32> to vector<6x8xbf16>
    %1217 = arith.truncf %1207 : vector<6x8xf32> to vector<6x8xbf16>
    %cst_705 = arith.constant dense<0.000000e+00> : vector<6x6xf32>
    %1218 = tpu.matmul %1216, %1217, %cst_705 {dimension_numbers = #tpu.dot_dimension_numbers<[1], [1], [0], [0], [0, 0, 1, 0], [], []>} : vector<6x8xbf16>, vector<6x8xbf16>, vector<6x6xf32> -> vector<6x6xf32>
    %1219 = arith.addf %1218, %19 : vector<6x6xf32>
    %cst_706 = arith.constant dense<0xFF800000> : vector<6xf32>
    %1220 = vector.multi_reduction <maximumf>, %1219, %cst_706 [1] : vector<6x6xf32> to vector<6xf32>
    %1221 = vector.shape_cast %1220 : vector<6xf32> to vector<6x1xf32>
    %1222 = vector.broadcast %1221 : vector<6x1xf32> to vector<6x6xf32>
    %1223 = arith.subf %1219, %1222 : vector<6x6xf32>
    %1224 = math.exp %1223 : vector<6x6xf32>
    %cst_707 = arith.constant dense<0.000000e+00> : vector<6xf32>
    %1225 = vector.multi_reduction <add>, %1224, %cst_707 [1] : vector<6x6xf32> to vector<6xf32>
    %1226 = vector.shape_cast %1225 : vector<6xf32> to vector<6x1xf32>
    %cst_708 = arith.constant 1.000000e-30 : f32
    %1227 = vector.broadcast %cst_708 : f32 to vector<6x1xf32>
    %1228 = arith.maximumf %1226, %1227 : vector<6x1xf32>
    %1229 = tpu.reciprocal %1228 {approx = true} : vector<6x1xf32> -> vector<6x1xf32>
    %1230 = arith.truncf %1224 : vector<6x6xf32> to vector<6x6xbf16>
    %1231 = arith.truncf %1215 : vector<6x8xf32> to vector<6x8xbf16>
    %cst_709 = arith.constant dense<0.000000e+00> : vector<6x8xf32>
    %1232 = tpu.matmul %1230, %1231, %cst_709 {dimension_numbers = #tpu.dot_dimension_numbers<[1], [0], [0], [1], [0, 0, 1, 1], [], []>} : vector<6x6xbf16>, vector<6x8xbf16>, vector<6x8xf32> -> vector<6x8xf32>
    %1233 = vector.broadcast %1229 : vector<6x1xf32> to vector<6x8xf32>
    %1234 = arith.mulf %1232, %1233 : vector<6x8xf32>
    %c10_710 = arith.constant 10 : index
    %c0_711 = arith.constant 0 : index
    %c0_712 = arith.constant 0 : index
    %1235 = vector.load %arg19[%c10_710, %c0_711, %c0_712] : memref<16x8x32xbf16, #tpu.memory_space<vmem>>, vector<1x8x32xbf16>
    %1236 = vector.shape_cast %1235 : vector<1x8x32xbf16> to vector<8x32xbf16>
    %1237 = arith.truncf %1234 : vector<6x8xf32> to vector<6x8xbf16>
    %cst_713 = arith.constant dense<0.000000e+00> : vector<6x32xf32>
    %1238 = tpu.matmul %1237, %1236, %cst_713 {dimension_numbers = #tpu.dot_dimension_numbers<[1], [0], [0], [1], [0, 0, 1, 1], [], []>} : vector<6x8xbf16>, vector<8x32xbf16>, vector<6x32xf32> -> vector<6x32xf32>
    %1239 = arith.addf %1191, %1238 : vector<6x32xf32>
    %c27 = arith.constant 27 : index
    %c0_714 = arith.constant 0 : index
    %c0_715 = arith.constant 0 : index
    %1240 = vector.load %arg17[%c27, %c0_714, %c0_715] : memref<48x32x8xbf16, #tpu.memory_space<vmem>>, vector<1x32x8xbf16>
    %1241 = vector.shape_cast %1240 : vector<1x32x8xbf16> to vector<32x8xbf16>
    %1242 = arith.truncf %1094 : vector<6x32xf32> to vector<6x32xbf16>
    %cst_716 = arith.constant dense<0.000000e+00> : vector<6x8xf32>
    %1243 = tpu.matmul %1242, %1241, %cst_716 {dimension_numbers = #tpu.dot_dimension_numbers<[1], [0], [0], [1], [0, 0, 1, 1], [], []>} : vector<6x32xbf16>, vector<32x8xbf16>, vector<6x8xf32> -> vector<6x8xf32>
    %c27_717 = arith.constant 27 : index
    %c0_718 = arith.constant 0 : index
    %c0_719 = arith.constant 0 : index
    %1244 = vector.load %arg18[%c27_717, %c0_718, %c0_719] : memref<48x1x8xf32, #tpu.memory_space<vmem>>, vector<1x1x8xf32>
    %1245 = vector.shape_cast %1244 : vector<1x1x8xf32> to vector<1x8xf32>
    %1246 = vector.broadcast %1245 : vector<1x8xf32> to vector<6x8xf32>
    %1247 = arith.addf %1243, %1246 : vector<6x8xf32>
    %c31 = arith.constant 31 : index
    %c0_720 = arith.constant 0 : index
    %c0_721 = arith.constant 0 : index
    %1248 = vector.load %arg17[%c31, %c0_720, %c0_721] : memref<48x32x8xbf16, #tpu.memory_space<vmem>>, vector<1x32x8xbf16>
    %1249 = vector.shape_cast %1248 : vector<1x32x8xbf16> to vector<32x8xbf16>
    %1250 = arith.truncf %1094 : vector<6x32xf32> to vector<6x32xbf16>
    %cst_722 = arith.constant dense<0.000000e+00> : vector<6x8xf32>
    %1251 = tpu.matmul %1250, %1249, %cst_722 {dimension_numbers = #tpu.dot_dimension_numbers<[1], [0], [0], [1], [0, 0, 1, 1], [], []>} : vector<6x32xbf16>, vector<32x8xbf16>, vector<6x8xf32> -> vector<6x8xf32>
    %c31_723 = arith.constant 31 : index
    %c0_724 = arith.constant 0 : index
    %c0_725 = arith.constant 0 : index
    %1252 = vector.load %arg18[%c31_723, %c0_724, %c0_725] : memref<48x1x8xf32, #tpu.memory_space<vmem>>, vector<1x1x8xf32>
    %1253 = vector.shape_cast %1252 : vector<1x1x8xf32> to vector<1x8xf32>
    %1254 = vector.broadcast %1253 : vector<1x8xf32> to vector<6x8xf32>
    %1255 = arith.addf %1251, %1254 : vector<6x8xf32>
    %c35 = arith.constant 35 : index
    %c0_726 = arith.constant 0 : index
    %c0_727 = arith.constant 0 : index
    %1256 = vector.load %arg17[%c35, %c0_726, %c0_727] : memref<48x32x8xbf16, #tpu.memory_space<vmem>>, vector<1x32x8xbf16>
    %1257 = vector.shape_cast %1256 : vector<1x32x8xbf16> to vector<32x8xbf16>
    %1258 = arith.truncf %1094 : vector<6x32xf32> to vector<6x32xbf16>
    %cst_728 = arith.constant dense<0.000000e+00> : vector<6x8xf32>
    %1259 = tpu.matmul %1258, %1257, %cst_728 {dimension_numbers = #tpu.dot_dimension_numbers<[1], [0], [0], [1], [0, 0, 1, 1], [], []>} : vector<6x32xbf16>, vector<32x8xbf16>, vector<6x8xf32> -> vector<6x8xf32>
    %c35_729 = arith.constant 35 : index
    %c0_730 = arith.constant 0 : index
    %c0_731 = arith.constant 0 : index
    %1260 = vector.load %arg18[%c35_729, %c0_730, %c0_731] : memref<48x1x8xf32, #tpu.memory_space<vmem>>, vector<1x1x8xf32>
    %1261 = vector.shape_cast %1260 : vector<1x1x8xf32> to vector<1x8xf32>
    %1262 = vector.broadcast %1261 : vector<1x8xf32> to vector<6x8xf32>
    %1263 = arith.addf %1259, %1262 : vector<6x8xf32>
    %1264 = arith.truncf %1247 : vector<6x8xf32> to vector<6x8xbf16>
    %1265 = arith.truncf %1255 : vector<6x8xf32> to vector<6x8xbf16>
    %cst_732 = arith.constant dense<0.000000e+00> : vector<6x6xf32>
    %1266 = tpu.matmul %1264, %1265, %cst_732 {dimension_numbers = #tpu.dot_dimension_numbers<[1], [1], [0], [0], [0, 0, 1, 0], [], []>} : vector<6x8xbf16>, vector<6x8xbf16>, vector<6x6xf32> -> vector<6x6xf32>
    %1267 = arith.addf %1266, %19 : vector<6x6xf32>
    %cst_733 = arith.constant dense<0xFF800000> : vector<6xf32>
    %1268 = vector.multi_reduction <maximumf>, %1267, %cst_733 [1] : vector<6x6xf32> to vector<6xf32>
    %1269 = vector.shape_cast %1268 : vector<6xf32> to vector<6x1xf32>
    %1270 = vector.broadcast %1269 : vector<6x1xf32> to vector<6x6xf32>
    %1271 = arith.subf %1267, %1270 : vector<6x6xf32>
    %1272 = math.exp %1271 : vector<6x6xf32>
    %cst_734 = arith.constant dense<0.000000e+00> : vector<6xf32>
    %1273 = vector.multi_reduction <add>, %1272, %cst_734 [1] : vector<6x6xf32> to vector<6xf32>
    %1274 = vector.shape_cast %1273 : vector<6xf32> to vector<6x1xf32>
    %cst_735 = arith.constant 1.000000e-30 : f32
    %1275 = vector.broadcast %cst_735 : f32 to vector<6x1xf32>
    %1276 = arith.maximumf %1274, %1275 : vector<6x1xf32>
    %1277 = tpu.reciprocal %1276 {approx = true} : vector<6x1xf32> -> vector<6x1xf32>
    %1278 = arith.truncf %1272 : vector<6x6xf32> to vector<6x6xbf16>
    %1279 = arith.truncf %1263 : vector<6x8xf32> to vector<6x8xbf16>
    %cst_736 = arith.constant dense<0.000000e+00> : vector<6x8xf32>
    %1280 = tpu.matmul %1278, %1279, %cst_736 {dimension_numbers = #tpu.dot_dimension_numbers<[1], [0], [0], [1], [0, 0, 1, 1], [], []>} : vector<6x6xbf16>, vector<6x8xbf16>, vector<6x8xf32> -> vector<6x8xf32>
    %1281 = vector.broadcast %1277 : vector<6x1xf32> to vector<6x8xf32>
    %1282 = arith.mulf %1280, %1281 : vector<6x8xf32>
    %c11_737 = arith.constant 11 : index
    %c0_738 = arith.constant 0 : index
    %c0_739 = arith.constant 0 : index
    %1283 = vector.load %arg19[%c11_737, %c0_738, %c0_739] : memref<16x8x32xbf16, #tpu.memory_space<vmem>>, vector<1x8x32xbf16>
    %1284 = vector.shape_cast %1283 : vector<1x8x32xbf16> to vector<8x32xbf16>
    %1285 = arith.truncf %1282 : vector<6x8xf32> to vector<6x8xbf16>
    %cst_740 = arith.constant dense<0.000000e+00> : vector<6x32xf32>
    %1286 = tpu.matmul %1285, %1284, %cst_740 {dimension_numbers = #tpu.dot_dimension_numbers<[1], [0], [0], [1], [0, 0, 1, 1], [], []>} : vector<6x8xbf16>, vector<8x32xbf16>, vector<6x32xf32> -> vector<6x32xf32>
    %1287 = arith.addf %1239, %1286 : vector<6x32xf32>
    %c2_741 = arith.constant 2 : index
    %c0_742 = arith.constant 0 : index
    %c0_743 = arith.constant 0 : index
    %1288 = vector.load %arg20[%c2_741, %c0_742, %c0_743] : memref<4x1x32xf32, #tpu.memory_space<vmem>>, vector<1x1x32xf32>
    %1289 = vector.shape_cast %1288 : vector<1x1x32xf32> to vector<1x32xf32>
    %1290 = vector.broadcast %1289 : vector<1x32xf32> to vector<6x32xf32>
    %1291 = arith.addf %1287, %1290 : vector<6x32xf32>
    %1292 = arith.addf %1094, %1291 : vector<6x32xf32>
    %c3_744 = arith.constant 3 : index
    %c0_745 = arith.constant 0 : index
    %c0_746 = arith.constant 0 : index
    %1293 = vector.load %arg21[%c3_744, %c0_745, %c0_746] : memref<6x1x32xf32, #tpu.memory_space<vmem>>, vector<1x1x32xf32>
    %1294 = vector.shape_cast %1293 : vector<1x1x32xf32> to vector<1x32xf32>
    %c3_747 = arith.constant 3 : index
    %c0_748 = arith.constant 0 : index
    %c0_749 = arith.constant 0 : index
    %1295 = vector.load %arg22[%c3_747, %c0_748, %c0_749] : memref<6x1x32xf32, #tpu.memory_space<vmem>>, vector<1x1x32xf32>
    %1296 = vector.shape_cast %1295 : vector<1x1x32xf32> to vector<1x32xf32>
    %cst_750 = arith.constant dense<0.000000e+00> : vector<6xf32>
    %1297 = vector.multi_reduction <add>, %1292, %cst_750 [1] : vector<6x32xf32> to vector<6xf32>
    %1298 = vector.shape_cast %1297 : vector<6xf32> to vector<6x1xf32>
    %cst_751 = arith.constant 3.200000e+01 : f32
    %1299 = vector.broadcast %cst_751 : f32 to vector<6x1xf32>
    %1300 = arith.divf %1298, %1299 : vector<6x1xf32>
    %1301 = vector.broadcast %1300 : vector<6x1xf32> to vector<6x32xf32>
    %1302 = arith.subf %1292, %1301 : vector<6x32xf32>
    %1303 = arith.mulf %1302, %1302 : vector<6x32xf32>
    %cst_752 = arith.constant dense<0.000000e+00> : vector<6xf32>
    %1304 = vector.multi_reduction <add>, %1303, %cst_752 [1] : vector<6x32xf32> to vector<6xf32>
    %1305 = vector.shape_cast %1304 : vector<6xf32> to vector<6x1xf32>
    %cst_753 = arith.constant 3.200000e+01 : f32
    %1306 = vector.broadcast %cst_753 : f32 to vector<6x1xf32>
    %1307 = arith.divf %1305, %1306 : vector<6x1xf32>
    %cst_754 = arith.constant 9.99999974E-6 : f32
    %1308 = vector.broadcast %cst_754 : f32 to vector<6x1xf32>
    %1309 = arith.addf %1307, %1308 : vector<6x1xf32>
    %1310 = math.rsqrt %1309 : vector<6x1xf32>
    %1311 = vector.broadcast %1310 : vector<6x1xf32> to vector<6x32xf32>
    %1312 = arith.mulf %1302, %1311 : vector<6x32xf32>
    %1313 = vector.broadcast %1294 : vector<1x32xf32> to vector<6x32xf32>
    %1314 = arith.mulf %1312, %1313 : vector<6x32xf32>
    %1315 = vector.broadcast %1296 : vector<1x32xf32> to vector<6x32xf32>
    %1316 = arith.addf %1314, %1315 : vector<6x32xf32>
    %cst_755 = arith.constant 0.000000e+00 : f32
    %1317 = vector.broadcast %cst_755 : f32 to vector<6x32xf32>
    %c36 = arith.constant 36 : index
    %c0_756 = arith.constant 0 : index
    %c0_757 = arith.constant 0 : index
    %1318 = vector.load %arg17[%c36, %c0_756, %c0_757] : memref<48x32x8xbf16, #tpu.memory_space<vmem>>, vector<1x32x8xbf16>
    %1319 = vector.shape_cast %1318 : vector<1x32x8xbf16> to vector<32x8xbf16>
    %1320 = arith.truncf %1316 : vector<6x32xf32> to vector<6x32xbf16>
    %cst_758 = arith.constant dense<0.000000e+00> : vector<6x8xf32>
    %1321 = tpu.matmul %1320, %1319, %cst_758 {dimension_numbers = #tpu.dot_dimension_numbers<[1], [0], [0], [1], [0, 0, 1, 1], [], []>} : vector<6x32xbf16>, vector<32x8xbf16>, vector<6x8xf32> -> vector<6x8xf32>
    %c36_759 = arith.constant 36 : index
    %c0_760 = arith.constant 0 : index
    %c0_761 = arith.constant 0 : index
    %1322 = vector.load %arg18[%c36_759, %c0_760, %c0_761] : memref<48x1x8xf32, #tpu.memory_space<vmem>>, vector<1x1x8xf32>
    %1323 = vector.shape_cast %1322 : vector<1x1x8xf32> to vector<1x8xf32>
    %1324 = vector.broadcast %1323 : vector<1x8xf32> to vector<6x8xf32>
    %1325 = arith.addf %1321, %1324 : vector<6x8xf32>
    %c40 = arith.constant 40 : index
    %c0_762 = arith.constant 0 : index
    %c0_763 = arith.constant 0 : index
    %1326 = vector.load %arg17[%c40, %c0_762, %c0_763] : memref<48x32x8xbf16, #tpu.memory_space<vmem>>, vector<1x32x8xbf16>
    %1327 = vector.shape_cast %1326 : vector<1x32x8xbf16> to vector<32x8xbf16>
    %1328 = arith.truncf %597 : vector<8x32xf32> to vector<8x32xbf16>
    %cst_764 = arith.constant dense<0.000000e+00> : vector<8x8xf32>
    %1329 = tpu.matmul %1328, %1327, %cst_764 {dimension_numbers = #tpu.dot_dimension_numbers<[1], [0], [0], [1], [0, 0, 1, 1], [], []>} : vector<8x32xbf16>, vector<32x8xbf16>, vector<8x8xf32> -> vector<8x8xf32>
    %c40_765 = arith.constant 40 : index
    %c0_766 = arith.constant 0 : index
    %c0_767 = arith.constant 0 : index
    %1330 = vector.load %arg18[%c40_765, %c0_766, %c0_767] : memref<48x1x8xf32, #tpu.memory_space<vmem>>, vector<1x1x8xf32>
    %1331 = vector.shape_cast %1330 : vector<1x1x8xf32> to vector<1x8xf32>
    %1332 = vector.broadcast %1331 : vector<1x8xf32> to vector<8x8xf32>
    %1333 = arith.addf %1329, %1332 : vector<8x8xf32>
    %c44 = arith.constant 44 : index
    %c0_768 = arith.constant 0 : index
    %c0_769 = arith.constant 0 : index
    %1334 = vector.load %arg17[%c44, %c0_768, %c0_769] : memref<48x32x8xbf16, #tpu.memory_space<vmem>>, vector<1x32x8xbf16>
    %1335 = vector.shape_cast %1334 : vector<1x32x8xbf16> to vector<32x8xbf16>
    %1336 = arith.truncf %597 : vector<8x32xf32> to vector<8x32xbf16>
    %cst_770 = arith.constant dense<0.000000e+00> : vector<8x8xf32>
    %1337 = tpu.matmul %1336, %1335, %cst_770 {dimension_numbers = #tpu.dot_dimension_numbers<[1], [0], [0], [1], [0, 0, 1, 1], [], []>} : vector<8x32xbf16>, vector<32x8xbf16>, vector<8x8xf32> -> vector<8x8xf32>
    %c44_771 = arith.constant 44 : index
    %c0_772 = arith.constant 0 : index
    %c0_773 = arith.constant 0 : index
    %1338 = vector.load %arg18[%c44_771, %c0_772, %c0_773] : memref<48x1x8xf32, #tpu.memory_space<vmem>>, vector<1x1x8xf32>
    %1339 = vector.shape_cast %1338 : vector<1x1x8xf32> to vector<1x8xf32>
    %1340 = vector.broadcast %1339 : vector<1x8xf32> to vector<8x8xf32>
    %1341 = arith.addf %1337, %1340 : vector<8x8xf32>
    %1342 = arith.truncf %1325 : vector<6x8xf32> to vector<6x8xbf16>
    %1343 = arith.truncf %1333 : vector<8x8xf32> to vector<8x8xbf16>
    %cst_774 = arith.constant dense<0.000000e+00> : vector<6x8xf32>
    %1344 = tpu.matmul %1342, %1343, %cst_774 {dimension_numbers = #tpu.dot_dimension_numbers<[1], [1], [0], [0], [0, 0, 1, 0], [], []>} : vector<6x8xbf16>, vector<8x8xbf16>, vector<6x8xf32> -> vector<6x8xf32>
    %cst_775 = arith.constant dense<0xFF800000> : vector<6xf32>
    %1345 = vector.multi_reduction <maximumf>, %1344, %cst_775 [1] : vector<6x8xf32> to vector<6xf32>
    %1346 = vector.shape_cast %1345 : vector<6xf32> to vector<6x1xf32>
    %1347 = vector.broadcast %1346 : vector<6x1xf32> to vector<6x8xf32>
    %1348 = arith.subf %1344, %1347 : vector<6x8xf32>
    %1349 = math.exp %1348 : vector<6x8xf32>
    %cst_776 = arith.constant dense<0.000000e+00> : vector<6xf32>
    %1350 = vector.multi_reduction <add>, %1349, %cst_776 [1] : vector<6x8xf32> to vector<6xf32>
    %1351 = vector.shape_cast %1350 : vector<6xf32> to vector<6x1xf32>
    %cst_777 = arith.constant 1.000000e-30 : f32
    %1352 = vector.broadcast %cst_777 : f32 to vector<6x1xf32>
    %1353 = arith.maximumf %1351, %1352 : vector<6x1xf32>
    %1354 = tpu.reciprocal %1353 {approx = true} : vector<6x1xf32> -> vector<6x1xf32>
    %1355 = arith.truncf %1349 : vector<6x8xf32> to vector<6x8xbf16>
    %1356 = arith.truncf %1341 : vector<8x8xf32> to vector<8x8xbf16>
    %cst_778 = arith.constant dense<0.000000e+00> : vector<6x8xf32>
    %1357 = tpu.matmul %1355, %1356, %cst_778 {dimension_numbers = #tpu.dot_dimension_numbers<[1], [0], [0], [1], [0, 0, 1, 1], [], []>} : vector<6x8xbf16>, vector<8x8xbf16>, vector<6x8xf32> -> vector<6x8xf32>
    %1358 = vector.broadcast %1354 : vector<6x1xf32> to vector<6x8xf32>
    %1359 = arith.mulf %1357, %1358 : vector<6x8xf32>
    %c12_779 = arith.constant 12 : index
    %c0_780 = arith.constant 0 : index
    %c0_781 = arith.constant 0 : index
    %1360 = vector.load %arg19[%c12_779, %c0_780, %c0_781] : memref<16x8x32xbf16, #tpu.memory_space<vmem>>, vector<1x8x32xbf16>
    %1361 = vector.shape_cast %1360 : vector<1x8x32xbf16> to vector<8x32xbf16>
    %1362 = arith.truncf %1359 : vector<6x8xf32> to vector<6x8xbf16>
    %cst_782 = arith.constant dense<0.000000e+00> : vector<6x32xf32>
    %1363 = tpu.matmul %1362, %1361, %cst_782 {dimension_numbers = #tpu.dot_dimension_numbers<[1], [0], [0], [1], [0, 0, 1, 1], [], []>} : vector<6x8xbf16>, vector<8x32xbf16>, vector<6x32xf32> -> vector<6x32xf32>
    %1364 = arith.addf %1317, %1363 : vector<6x32xf32>
    %c37 = arith.constant 37 : index
    %c0_783 = arith.constant 0 : index
    %c0_784 = arith.constant 0 : index
    %1365 = vector.load %arg17[%c37, %c0_783, %c0_784] : memref<48x32x8xbf16, #tpu.memory_space<vmem>>, vector<1x32x8xbf16>
    %1366 = vector.shape_cast %1365 : vector<1x32x8xbf16> to vector<32x8xbf16>
    %1367 = arith.truncf %1316 : vector<6x32xf32> to vector<6x32xbf16>
    %cst_785 = arith.constant dense<0.000000e+00> : vector<6x8xf32>
    %1368 = tpu.matmul %1367, %1366, %cst_785 {dimension_numbers = #tpu.dot_dimension_numbers<[1], [0], [0], [1], [0, 0, 1, 1], [], []>} : vector<6x32xbf16>, vector<32x8xbf16>, vector<6x8xf32> -> vector<6x8xf32>
    %c37_786 = arith.constant 37 : index
    %c0_787 = arith.constant 0 : index
    %c0_788 = arith.constant 0 : index
    %1369 = vector.load %arg18[%c37_786, %c0_787, %c0_788] : memref<48x1x8xf32, #tpu.memory_space<vmem>>, vector<1x1x8xf32>
    %1370 = vector.shape_cast %1369 : vector<1x1x8xf32> to vector<1x8xf32>
    %1371 = vector.broadcast %1370 : vector<1x8xf32> to vector<6x8xf32>
    %1372 = arith.addf %1368, %1371 : vector<6x8xf32>
    %c41 = arith.constant 41 : index
    %c0_789 = arith.constant 0 : index
    %c0_790 = arith.constant 0 : index
    %1373 = vector.load %arg17[%c41, %c0_789, %c0_790] : memref<48x32x8xbf16, #tpu.memory_space<vmem>>, vector<1x32x8xbf16>
    %1374 = vector.shape_cast %1373 : vector<1x32x8xbf16> to vector<32x8xbf16>
    %1375 = arith.truncf %597 : vector<8x32xf32> to vector<8x32xbf16>
    %cst_791 = arith.constant dense<0.000000e+00> : vector<8x8xf32>
    %1376 = tpu.matmul %1375, %1374, %cst_791 {dimension_numbers = #tpu.dot_dimension_numbers<[1], [0], [0], [1], [0, 0, 1, 1], [], []>} : vector<8x32xbf16>, vector<32x8xbf16>, vector<8x8xf32> -> vector<8x8xf32>
    %c41_792 = arith.constant 41 : index
    %c0_793 = arith.constant 0 : index
    %c0_794 = arith.constant 0 : index
    %1377 = vector.load %arg18[%c41_792, %c0_793, %c0_794] : memref<48x1x8xf32, #tpu.memory_space<vmem>>, vector<1x1x8xf32>
    %1378 = vector.shape_cast %1377 : vector<1x1x8xf32> to vector<1x8xf32>
    %1379 = vector.broadcast %1378 : vector<1x8xf32> to vector<8x8xf32>
    %1380 = arith.addf %1376, %1379 : vector<8x8xf32>
    %c45 = arith.constant 45 : index
    %c0_795 = arith.constant 0 : index
    %c0_796 = arith.constant 0 : index
    %1381 = vector.load %arg17[%c45, %c0_795, %c0_796] : memref<48x32x8xbf16, #tpu.memory_space<vmem>>, vector<1x32x8xbf16>
    %1382 = vector.shape_cast %1381 : vector<1x32x8xbf16> to vector<32x8xbf16>
    %1383 = arith.truncf %597 : vector<8x32xf32> to vector<8x32xbf16>
    %cst_797 = arith.constant dense<0.000000e+00> : vector<8x8xf32>
    %1384 = tpu.matmul %1383, %1382, %cst_797 {dimension_numbers = #tpu.dot_dimension_numbers<[1], [0], [0], [1], [0, 0, 1, 1], [], []>} : vector<8x32xbf16>, vector<32x8xbf16>, vector<8x8xf32> -> vector<8x8xf32>
    %c45_798 = arith.constant 45 : index
    %c0_799 = arith.constant 0 : index
    %c0_800 = arith.constant 0 : index
    %1385 = vector.load %arg18[%c45_798, %c0_799, %c0_800] : memref<48x1x8xf32, #tpu.memory_space<vmem>>, vector<1x1x8xf32>
    %1386 = vector.shape_cast %1385 : vector<1x1x8xf32> to vector<1x8xf32>
    %1387 = vector.broadcast %1386 : vector<1x8xf32> to vector<8x8xf32>
    %1388 = arith.addf %1384, %1387 : vector<8x8xf32>
    %1389 = arith.truncf %1372 : vector<6x8xf32> to vector<6x8xbf16>
    %1390 = arith.truncf %1380 : vector<8x8xf32> to vector<8x8xbf16>
    %cst_801 = arith.constant dense<0.000000e+00> : vector<6x8xf32>
    %1391 = tpu.matmul %1389, %1390, %cst_801 {dimension_numbers = #tpu.dot_dimension_numbers<[1], [1], [0], [0], [0, 0, 1, 0], [], []>} : vector<6x8xbf16>, vector<8x8xbf16>, vector<6x8xf32> -> vector<6x8xf32>
    %cst_802 = arith.constant dense<0xFF800000> : vector<6xf32>
    %1392 = vector.multi_reduction <maximumf>, %1391, %cst_802 [1] : vector<6x8xf32> to vector<6xf32>
    %1393 = vector.shape_cast %1392 : vector<6xf32> to vector<6x1xf32>
    %1394 = vector.broadcast %1393 : vector<6x1xf32> to vector<6x8xf32>
    %1395 = arith.subf %1391, %1394 : vector<6x8xf32>
    %1396 = math.exp %1395 : vector<6x8xf32>
    %cst_803 = arith.constant dense<0.000000e+00> : vector<6xf32>
    %1397 = vector.multi_reduction <add>, %1396, %cst_803 [1] : vector<6x8xf32> to vector<6xf32>
    %1398 = vector.shape_cast %1397 : vector<6xf32> to vector<6x1xf32>
    %cst_804 = arith.constant 1.000000e-30 : f32
    %1399 = vector.broadcast %cst_804 : f32 to vector<6x1xf32>
    %1400 = arith.maximumf %1398, %1399 : vector<6x1xf32>
    %1401 = tpu.reciprocal %1400 {approx = true} : vector<6x1xf32> -> vector<6x1xf32>
    %1402 = arith.truncf %1396 : vector<6x8xf32> to vector<6x8xbf16>
    %1403 = arith.truncf %1388 : vector<8x8xf32> to vector<8x8xbf16>
    %cst_805 = arith.constant dense<0.000000e+00> : vector<6x8xf32>
    %1404 = tpu.matmul %1402, %1403, %cst_805 {dimension_numbers = #tpu.dot_dimension_numbers<[1], [0], [0], [1], [0, 0, 1, 1], [], []>} : vector<6x8xbf16>, vector<8x8xbf16>, vector<6x8xf32> -> vector<6x8xf32>
    %1405 = vector.broadcast %1401 : vector<6x1xf32> to vector<6x8xf32>
    %1406 = arith.mulf %1404, %1405 : vector<6x8xf32>
    %c13_806 = arith.constant 13 : index
    %c0_807 = arith.constant 0 : index
    %c0_808 = arith.constant 0 : index
    %1407 = vector.load %arg19[%c13_806, %c0_807, %c0_808] : memref<16x8x32xbf16, #tpu.memory_space<vmem>>, vector<1x8x32xbf16>
    %1408 = vector.shape_cast %1407 : vector<1x8x32xbf16> to vector<8x32xbf16>
    %1409 = arith.truncf %1406 : vector<6x8xf32> to vector<6x8xbf16>
    %cst_809 = arith.constant dense<0.000000e+00> : vector<6x32xf32>
    %1410 = tpu.matmul %1409, %1408, %cst_809 {dimension_numbers = #tpu.dot_dimension_numbers<[1], [0], [0], [1], [0, 0, 1, 1], [], []>} : vector<6x8xbf16>, vector<8x32xbf16>, vector<6x32xf32> -> vector<6x32xf32>
    %1411 = arith.addf %1364, %1410 : vector<6x32xf32>
    %c38 = arith.constant 38 : index
    %c0_810 = arith.constant 0 : index
    %c0_811 = arith.constant 0 : index
    %1412 = vector.load %arg17[%c38, %c0_810, %c0_811] : memref<48x32x8xbf16, #tpu.memory_space<vmem>>, vector<1x32x8xbf16>
    %1413 = vector.shape_cast %1412 : vector<1x32x8xbf16> to vector<32x8xbf16>
    %1414 = arith.truncf %1316 : vector<6x32xf32> to vector<6x32xbf16>
    %cst_812 = arith.constant dense<0.000000e+00> : vector<6x8xf32>
    %1415 = tpu.matmul %1414, %1413, %cst_812 {dimension_numbers = #tpu.dot_dimension_numbers<[1], [0], [0], [1], [0, 0, 1, 1], [], []>} : vector<6x32xbf16>, vector<32x8xbf16>, vector<6x8xf32> -> vector<6x8xf32>
    %c38_813 = arith.constant 38 : index
    %c0_814 = arith.constant 0 : index
    %c0_815 = arith.constant 0 : index
    %1416 = vector.load %arg18[%c38_813, %c0_814, %c0_815] : memref<48x1x8xf32, #tpu.memory_space<vmem>>, vector<1x1x8xf32>
    %1417 = vector.shape_cast %1416 : vector<1x1x8xf32> to vector<1x8xf32>
    %1418 = vector.broadcast %1417 : vector<1x8xf32> to vector<6x8xf32>
    %1419 = arith.addf %1415, %1418 : vector<6x8xf32>
    %c42 = arith.constant 42 : index
    %c0_816 = arith.constant 0 : index
    %c0_817 = arith.constant 0 : index
    %1420 = vector.load %arg17[%c42, %c0_816, %c0_817] : memref<48x32x8xbf16, #tpu.memory_space<vmem>>, vector<1x32x8xbf16>
    %1421 = vector.shape_cast %1420 : vector<1x32x8xbf16> to vector<32x8xbf16>
    %1422 = arith.truncf %597 : vector<8x32xf32> to vector<8x32xbf16>
    %cst_818 = arith.constant dense<0.000000e+00> : vector<8x8xf32>
    %1423 = tpu.matmul %1422, %1421, %cst_818 {dimension_numbers = #tpu.dot_dimension_numbers<[1], [0], [0], [1], [0, 0, 1, 1], [], []>} : vector<8x32xbf16>, vector<32x8xbf16>, vector<8x8xf32> -> vector<8x8xf32>
    %c42_819 = arith.constant 42 : index
    %c0_820 = arith.constant 0 : index
    %c0_821 = arith.constant 0 : index
    %1424 = vector.load %arg18[%c42_819, %c0_820, %c0_821] : memref<48x1x8xf32, #tpu.memory_space<vmem>>, vector<1x1x8xf32>
    %1425 = vector.shape_cast %1424 : vector<1x1x8xf32> to vector<1x8xf32>
    %1426 = vector.broadcast %1425 : vector<1x8xf32> to vector<8x8xf32>
    %1427 = arith.addf %1423, %1426 : vector<8x8xf32>
    %c46 = arith.constant 46 : index
    %c0_822 = arith.constant 0 : index
    %c0_823 = arith.constant 0 : index
    %1428 = vector.load %arg17[%c46, %c0_822, %c0_823] : memref<48x32x8xbf16, #tpu.memory_space<vmem>>, vector<1x32x8xbf16>
    %1429 = vector.shape_cast %1428 : vector<1x32x8xbf16> to vector<32x8xbf16>
    %1430 = arith.truncf %597 : vector<8x32xf32> to vector<8x32xbf16>
    %cst_824 = arith.constant dense<0.000000e+00> : vector<8x8xf32>
    %1431 = tpu.matmul %1430, %1429, %cst_824 {dimension_numbers = #tpu.dot_dimension_numbers<[1], [0], [0], [1], [0, 0, 1, 1], [], []>} : vector<8x32xbf16>, vector<32x8xbf16>, vector<8x8xf32> -> vector<8x8xf32>
    %c46_825 = arith.constant 46 : index
    %c0_826 = arith.constant 0 : index
    %c0_827 = arith.constant 0 : index
    %1432 = vector.load %arg18[%c46_825, %c0_826, %c0_827] : memref<48x1x8xf32, #tpu.memory_space<vmem>>, vector<1x1x8xf32>
    %1433 = vector.shape_cast %1432 : vector<1x1x8xf32> to vector<1x8xf32>
    %1434 = vector.broadcast %1433 : vector<1x8xf32> to vector<8x8xf32>
    %1435 = arith.addf %1431, %1434 : vector<8x8xf32>
    %1436 = arith.truncf %1419 : vector<6x8xf32> to vector<6x8xbf16>
    %1437 = arith.truncf %1427 : vector<8x8xf32> to vector<8x8xbf16>
    %cst_828 = arith.constant dense<0.000000e+00> : vector<6x8xf32>
    %1438 = tpu.matmul %1436, %1437, %cst_828 {dimension_numbers = #tpu.dot_dimension_numbers<[1], [1], [0], [0], [0, 0, 1, 0], [], []>} : vector<6x8xbf16>, vector<8x8xbf16>, vector<6x8xf32> -> vector<6x8xf32>
    %cst_829 = arith.constant dense<0xFF800000> : vector<6xf32>
    %1439 = vector.multi_reduction <maximumf>, %1438, %cst_829 [1] : vector<6x8xf32> to vector<6xf32>
    %1440 = vector.shape_cast %1439 : vector<6xf32> to vector<6x1xf32>
    %1441 = vector.broadcast %1440 : vector<6x1xf32> to vector<6x8xf32>
    %1442 = arith.subf %1438, %1441 : vector<6x8xf32>
    %1443 = math.exp %1442 : vector<6x8xf32>
    %cst_830 = arith.constant dense<0.000000e+00> : vector<6xf32>
    %1444 = vector.multi_reduction <add>, %1443, %cst_830 [1] : vector<6x8xf32> to vector<6xf32>
    %1445 = vector.shape_cast %1444 : vector<6xf32> to vector<6x1xf32>
    %cst_831 = arith.constant 1.000000e-30 : f32
    %1446 = vector.broadcast %cst_831 : f32 to vector<6x1xf32>
    %1447 = arith.maximumf %1445, %1446 : vector<6x1xf32>
    %1448 = tpu.reciprocal %1447 {approx = true} : vector<6x1xf32> -> vector<6x1xf32>
    %1449 = arith.truncf %1443 : vector<6x8xf32> to vector<6x8xbf16>
    %1450 = arith.truncf %1435 : vector<8x8xf32> to vector<8x8xbf16>
    %cst_832 = arith.constant dense<0.000000e+00> : vector<6x8xf32>
    %1451 = tpu.matmul %1449, %1450, %cst_832 {dimension_numbers = #tpu.dot_dimension_numbers<[1], [0], [0], [1], [0, 0, 1, 1], [], []>} : vector<6x8xbf16>, vector<8x8xbf16>, vector<6x8xf32> -> vector<6x8xf32>
    %1452 = vector.broadcast %1448 : vector<6x1xf32> to vector<6x8xf32>
    %1453 = arith.mulf %1451, %1452 : vector<6x8xf32>
    %c14_833 = arith.constant 14 : index
    %c0_834 = arith.constant 0 : index
    %c0_835 = arith.constant 0 : index
    %1454 = vector.load %arg19[%c14_833, %c0_834, %c0_835] : memref<16x8x32xbf16, #tpu.memory_space<vmem>>, vector<1x8x32xbf16>
    %1455 = vector.shape_cast %1454 : vector<1x8x32xbf16> to vector<8x32xbf16>
    %1456 = arith.truncf %1453 : vector<6x8xf32> to vector<6x8xbf16>
    %cst_836 = arith.constant dense<0.000000e+00> : vector<6x32xf32>
    %1457 = tpu.matmul %1456, %1455, %cst_836 {dimension_numbers = #tpu.dot_dimension_numbers<[1], [0], [0], [1], [0, 0, 1, 1], [], []>} : vector<6x8xbf16>, vector<8x32xbf16>, vector<6x32xf32> -> vector<6x32xf32>
    %1458 = arith.addf %1411, %1457 : vector<6x32xf32>
    %c39 = arith.constant 39 : index
    %c0_837 = arith.constant 0 : index
    %c0_838 = arith.constant 0 : index
    %1459 = vector.load %arg17[%c39, %c0_837, %c0_838] : memref<48x32x8xbf16, #tpu.memory_space<vmem>>, vector<1x32x8xbf16>
    %1460 = vector.shape_cast %1459 : vector<1x32x8xbf16> to vector<32x8xbf16>
    %1461 = arith.truncf %1316 : vector<6x32xf32> to vector<6x32xbf16>
    %cst_839 = arith.constant dense<0.000000e+00> : vector<6x8xf32>
    %1462 = tpu.matmul %1461, %1460, %cst_839 {dimension_numbers = #tpu.dot_dimension_numbers<[1], [0], [0], [1], [0, 0, 1, 1], [], []>} : vector<6x32xbf16>, vector<32x8xbf16>, vector<6x8xf32> -> vector<6x8xf32>
    %c39_840 = arith.constant 39 : index
    %c0_841 = arith.constant 0 : index
    %c0_842 = arith.constant 0 : index
    %1463 = vector.load %arg18[%c39_840, %c0_841, %c0_842] : memref<48x1x8xf32, #tpu.memory_space<vmem>>, vector<1x1x8xf32>
    %1464 = vector.shape_cast %1463 : vector<1x1x8xf32> to vector<1x8xf32>
    %1465 = vector.broadcast %1464 : vector<1x8xf32> to vector<6x8xf32>
    %1466 = arith.addf %1462, %1465 : vector<6x8xf32>
    %c43 = arith.constant 43 : index
    %c0_843 = arith.constant 0 : index
    %c0_844 = arith.constant 0 : index
    %1467 = vector.load %arg17[%c43, %c0_843, %c0_844] : memref<48x32x8xbf16, #tpu.memory_space<vmem>>, vector<1x32x8xbf16>
    %1468 = vector.shape_cast %1467 : vector<1x32x8xbf16> to vector<32x8xbf16>
    %1469 = arith.truncf %597 : vector<8x32xf32> to vector<8x32xbf16>
    %cst_845 = arith.constant dense<0.000000e+00> : vector<8x8xf32>
    %1470 = tpu.matmul %1469, %1468, %cst_845 {dimension_numbers = #tpu.dot_dimension_numbers<[1], [0], [0], [1], [0, 0, 1, 1], [], []>} : vector<8x32xbf16>, vector<32x8xbf16>, vector<8x8xf32> -> vector<8x8xf32>
    %c43_846 = arith.constant 43 : index
    %c0_847 = arith.constant 0 : index
    %c0_848 = arith.constant 0 : index
    %1471 = vector.load %arg18[%c43_846, %c0_847, %c0_848] : memref<48x1x8xf32, #tpu.memory_space<vmem>>, vector<1x1x8xf32>
    %1472 = vector.shape_cast %1471 : vector<1x1x8xf32> to vector<1x8xf32>
    %1473 = vector.broadcast %1472 : vector<1x8xf32> to vector<8x8xf32>
    %1474 = arith.addf %1470, %1473 : vector<8x8xf32>
    %c47 = arith.constant 47 : index
    %c0_849 = arith.constant 0 : index
    %c0_850 = arith.constant 0 : index
    %1475 = vector.load %arg17[%c47, %c0_849, %c0_850] : memref<48x32x8xbf16, #tpu.memory_space<vmem>>, vector<1x32x8xbf16>
    %1476 = vector.shape_cast %1475 : vector<1x32x8xbf16> to vector<32x8xbf16>
    %1477 = arith.truncf %597 : vector<8x32xf32> to vector<8x32xbf16>
    %cst_851 = arith.constant dense<0.000000e+00> : vector<8x8xf32>
    %1478 = tpu.matmul %1477, %1476, %cst_851 {dimension_numbers = #tpu.dot_dimension_numbers<[1], [0], [0], [1], [0, 0, 1, 1], [], []>} : vector<8x32xbf16>, vector<32x8xbf16>, vector<8x8xf32> -> vector<8x8xf32>
    %c47_852 = arith.constant 47 : index
    %c0_853 = arith.constant 0 : index
    %c0_854 = arith.constant 0 : index
    %1479 = vector.load %arg18[%c47_852, %c0_853, %c0_854] : memref<48x1x8xf32, #tpu.memory_space<vmem>>, vector<1x1x8xf32>
    %1480 = vector.shape_cast %1479 : vector<1x1x8xf32> to vector<1x8xf32>
    %1481 = vector.broadcast %1480 : vector<1x8xf32> to vector<8x8xf32>
    %1482 = arith.addf %1478, %1481 : vector<8x8xf32>
    %1483 = arith.truncf %1466 : vector<6x8xf32> to vector<6x8xbf16>
    %1484 = arith.truncf %1474 : vector<8x8xf32> to vector<8x8xbf16>
    %cst_855 = arith.constant dense<0.000000e+00> : vector<6x8xf32>
    %1485 = tpu.matmul %1483, %1484, %cst_855 {dimension_numbers = #tpu.dot_dimension_numbers<[1], [1], [0], [0], [0, 0, 1, 0], [], []>} : vector<6x8xbf16>, vector<8x8xbf16>, vector<6x8xf32> -> vector<6x8xf32>
    %cst_856 = arith.constant dense<0xFF800000> : vector<6xf32>
    %1486 = vector.multi_reduction <maximumf>, %1485, %cst_856 [1] : vector<6x8xf32> to vector<6xf32>
    %1487 = vector.shape_cast %1486 : vector<6xf32> to vector<6x1xf32>
    %1488 = vector.broadcast %1487 : vector<6x1xf32> to vector<6x8xf32>
    %1489 = arith.subf %1485, %1488 : vector<6x8xf32>
    %1490 = math.exp %1489 : vector<6x8xf32>
    %cst_857 = arith.constant dense<0.000000e+00> : vector<6xf32>
    %1491 = vector.multi_reduction <add>, %1490, %cst_857 [1] : vector<6x8xf32> to vector<6xf32>
    %1492 = vector.shape_cast %1491 : vector<6xf32> to vector<6x1xf32>
    %cst_858 = arith.constant 1.000000e-30 : f32
    %1493 = vector.broadcast %cst_858 : f32 to vector<6x1xf32>
    %1494 = arith.maximumf %1492, %1493 : vector<6x1xf32>
    %1495 = tpu.reciprocal %1494 {approx = true} : vector<6x1xf32> -> vector<6x1xf32>
    %1496 = arith.truncf %1490 : vector<6x8xf32> to vector<6x8xbf16>
    %1497 = arith.truncf %1482 : vector<8x8xf32> to vector<8x8xbf16>
    %cst_859 = arith.constant dense<0.000000e+00> : vector<6x8xf32>
    %1498 = tpu.matmul %1496, %1497, %cst_859 {dimension_numbers = #tpu.dot_dimension_numbers<[1], [0], [0], [1], [0, 0, 1, 1], [], []>} : vector<6x8xbf16>, vector<8x8xbf16>, vector<6x8xf32> -> vector<6x8xf32>
    %1499 = vector.broadcast %1495 : vector<6x1xf32> to vector<6x8xf32>
    %1500 = arith.mulf %1498, %1499 : vector<6x8xf32>
    %c15_860 = arith.constant 15 : index
    %c0_861 = arith.constant 0 : index
    %c0_862 = arith.constant 0 : index
    %1501 = vector.load %arg19[%c15_860, %c0_861, %c0_862] : memref<16x8x32xbf16, #tpu.memory_space<vmem>>, vector<1x8x32xbf16>
    %1502 = vector.shape_cast %1501 : vector<1x8x32xbf16> to vector<8x32xbf16>
    %1503 = arith.truncf %1500 : vector<6x8xf32> to vector<6x8xbf16>
    %cst_863 = arith.constant dense<0.000000e+00> : vector<6x32xf32>
    %1504 = tpu.matmul %1503, %1502, %cst_863 {dimension_numbers = #tpu.dot_dimension_numbers<[1], [0], [0], [1], [0, 0, 1, 1], [], []>} : vector<6x8xbf16>, vector<8x32xbf16>, vector<6x32xf32> -> vector<6x32xf32>
    %1505 = arith.addf %1458, %1504 : vector<6x32xf32>
    %c3_864 = arith.constant 3 : index
    %c0_865 = arith.constant 0 : index
    %c0_866 = arith.constant 0 : index
    %1506 = vector.load %arg20[%c3_864, %c0_865, %c0_866] : memref<4x1x32xf32, #tpu.memory_space<vmem>>, vector<1x1x32xf32>
    %1507 = vector.shape_cast %1506 : vector<1x1x32xf32> to vector<1x32xf32>
    %1508 = vector.broadcast %1507 : vector<1x32xf32> to vector<6x32xf32>
    %1509 = arith.addf %1505, %1508 : vector<6x32xf32>
    %1510 = arith.addf %1316, %1509 : vector<6x32xf32>
    %c4_867 = arith.constant 4 : index
    %c0_868 = arith.constant 0 : index
    %c0_869 = arith.constant 0 : index
    %1511 = vector.load %arg21[%c4_867, %c0_868, %c0_869] : memref<6x1x32xf32, #tpu.memory_space<vmem>>, vector<1x1x32xf32>
    %1512 = vector.shape_cast %1511 : vector<1x1x32xf32> to vector<1x32xf32>
    %c4_870 = arith.constant 4 : index
    %c0_871 = arith.constant 0 : index
    %c0_872 = arith.constant 0 : index
    %1513 = vector.load %arg22[%c4_870, %c0_871, %c0_872] : memref<6x1x32xf32, #tpu.memory_space<vmem>>, vector<1x1x32xf32>
    %1514 = vector.shape_cast %1513 : vector<1x1x32xf32> to vector<1x32xf32>
    %cst_873 = arith.constant dense<0.000000e+00> : vector<6xf32>
    %1515 = vector.multi_reduction <add>, %1510, %cst_873 [1] : vector<6x32xf32> to vector<6xf32>
    %1516 = vector.shape_cast %1515 : vector<6xf32> to vector<6x1xf32>
    %cst_874 = arith.constant 3.200000e+01 : f32
    %1517 = vector.broadcast %cst_874 : f32 to vector<6x1xf32>
    %1518 = arith.divf %1516, %1517 : vector<6x1xf32>
    %1519 = vector.broadcast %1518 : vector<6x1xf32> to vector<6x32xf32>
    %1520 = arith.subf %1510, %1519 : vector<6x32xf32>
    %1521 = arith.mulf %1520, %1520 : vector<6x32xf32>
    %cst_875 = arith.constant dense<0.000000e+00> : vector<6xf32>
    %1522 = vector.multi_reduction <add>, %1521, %cst_875 [1] : vector<6x32xf32> to vector<6xf32>
    %1523 = vector.shape_cast %1522 : vector<6xf32> to vector<6x1xf32>
    %cst_876 = arith.constant 3.200000e+01 : f32
    %1524 = vector.broadcast %cst_876 : f32 to vector<6x1xf32>
    %1525 = arith.divf %1523, %1524 : vector<6x1xf32>
    %cst_877 = arith.constant 9.99999974E-6 : f32
    %1526 = vector.broadcast %cst_877 : f32 to vector<6x1xf32>
    %1527 = arith.addf %1525, %1526 : vector<6x1xf32>
    %1528 = math.rsqrt %1527 : vector<6x1xf32>
    %1529 = vector.broadcast %1528 : vector<6x1xf32> to vector<6x32xf32>
    %1530 = arith.mulf %1520, %1529 : vector<6x32xf32>
    %1531 = vector.broadcast %1512 : vector<1x32xf32> to vector<6x32xf32>
    %1532 = arith.mulf %1530, %1531 : vector<6x32xf32>
    %1533 = vector.broadcast %1514 : vector<1x32xf32> to vector<6x32xf32>
    %1534 = arith.addf %1532, %1533 : vector<6x32xf32>
    %c1_878 = arith.constant 1 : index
    %c0_879 = arith.constant 0 : index
    %c0_880 = arith.constant 0 : index
    %1535 = vector.load %arg23[%c1_878, %c0_879, %c0_880] : memref<2x32x64xbf16, #tpu.memory_space<vmem>>, vector<1x32x64xbf16>
    %1536 = vector.shape_cast %1535 : vector<1x32x64xbf16> to vector<32x64xbf16>
    %1537 = arith.truncf %1534 : vector<6x32xf32> to vector<6x32xbf16>
    %cst_881 = arith.constant dense<0.000000e+00> : vector<6x64xf32>
    %1538 = tpu.matmul %1537, %1536, %cst_881 {dimension_numbers = #tpu.dot_dimension_numbers<[1], [0], [0], [1], [0, 0, 1, 1], [], []>} : vector<6x32xbf16>, vector<32x64xbf16>, vector<6x64xf32> -> vector<6x64xf32>
    %c1_882 = arith.constant 1 : index
    %c0_883 = arith.constant 0 : index
    %c0_884 = arith.constant 0 : index
    %1539 = vector.load %arg24[%c1_882, %c0_883, %c0_884] : memref<2x1x64xf32, #tpu.memory_space<vmem>>, vector<1x1x64xf32>
    %1540 = vector.shape_cast %1539 : vector<1x1x64xf32> to vector<1x64xf32>
    %1541 = vector.broadcast %1540 : vector<1x64xf32> to vector<6x64xf32>
    %1542 = arith.addf %1538, %1541 : vector<6x64xf32>
    %cst_885 = arith.constant 0.000000e+00 : f32
    %1543 = vector.broadcast %cst_885 : f32 to vector<6x64xf32>
    %1544 = arith.maximumf %1542, %1543 : vector<6x64xf32>
    %c1_886 = arith.constant 1 : index
    %c0_887 = arith.constant 0 : index
    %c0_888 = arith.constant 0 : index
    %1545 = vector.load %arg25[%c1_886, %c0_887, %c0_888] : memref<2x64x32xbf16, #tpu.memory_space<vmem>>, vector<1x64x32xbf16>
    %1546 = vector.shape_cast %1545 : vector<1x64x32xbf16> to vector<64x32xbf16>
    %1547 = arith.truncf %1544 : vector<6x64xf32> to vector<6x64xbf16>
    %cst_889 = arith.constant dense<0.000000e+00> : vector<6x32xf32>
    %1548 = tpu.matmul %1547, %1546, %cst_889 {dimension_numbers = #tpu.dot_dimension_numbers<[1], [0], [0], [1], [0, 0, 1, 1], [], []>} : vector<6x64xbf16>, vector<64x32xbf16>, vector<6x32xf32> -> vector<6x32xf32>
    %c1_890 = arith.constant 1 : index
    %c0_891 = arith.constant 0 : index
    %c0_892 = arith.constant 0 : index
    %1549 = vector.load %arg26[%c1_890, %c0_891, %c0_892] : memref<2x1x32xf32, #tpu.memory_space<vmem>>, vector<1x1x32xf32>
    %1550 = vector.shape_cast %1549 : vector<1x1x32xf32> to vector<1x32xf32>
    %1551 = vector.broadcast %1550 : vector<1x32xf32> to vector<6x32xf32>
    %1552 = arith.addf %1548, %1551 : vector<6x32xf32>
    %1553 = arith.addf %1534, %1552 : vector<6x32xf32>
    %c5_893 = arith.constant 5 : index
    %c0_894 = arith.constant 0 : index
    %c0_895 = arith.constant 0 : index
    %1554 = vector.load %arg21[%c5_893, %c0_894, %c0_895] : memref<6x1x32xf32, #tpu.memory_space<vmem>>, vector<1x1x32xf32>
    %1555 = vector.shape_cast %1554 : vector<1x1x32xf32> to vector<1x32xf32>
    %c5_896 = arith.constant 5 : index
    %c0_897 = arith.constant 0 : index
    %c0_898 = arith.constant 0 : index
    %1556 = vector.load %arg22[%c5_896, %c0_897, %c0_898] : memref<6x1x32xf32, #tpu.memory_space<vmem>>, vector<1x1x32xf32>
    %1557 = vector.shape_cast %1556 : vector<1x1x32xf32> to vector<1x32xf32>
    %cst_899 = arith.constant dense<0.000000e+00> : vector<6xf32>
    %1558 = vector.multi_reduction <add>, %1553, %cst_899 [1] : vector<6x32xf32> to vector<6xf32>
    %1559 = vector.shape_cast %1558 : vector<6xf32> to vector<6x1xf32>
    %cst_900 = arith.constant 3.200000e+01 : f32
    %1560 = vector.broadcast %cst_900 : f32 to vector<6x1xf32>
    %1561 = arith.divf %1559, %1560 : vector<6x1xf32>
    %1562 = vector.broadcast %1561 : vector<6x1xf32> to vector<6x32xf32>
    %1563 = arith.subf %1553, %1562 : vector<6x32xf32>
    %1564 = arith.mulf %1563, %1563 : vector<6x32xf32>
    %cst_901 = arith.constant dense<0.000000e+00> : vector<6xf32>
    %1565 = vector.multi_reduction <add>, %1564, %cst_901 [1] : vector<6x32xf32> to vector<6xf32>
    %1566 = vector.shape_cast %1565 : vector<6xf32> to vector<6x1xf32>
    %cst_902 = arith.constant 3.200000e+01 : f32
    %1567 = vector.broadcast %cst_902 : f32 to vector<6x1xf32>
    %1568 = arith.divf %1566, %1567 : vector<6x1xf32>
    %cst_903 = arith.constant 9.99999974E-6 : f32
    %1569 = vector.broadcast %cst_903 : f32 to vector<6x1xf32>
    %1570 = arith.addf %1568, %1569 : vector<6x1xf32>
    %1571 = math.rsqrt %1570 : vector<6x1xf32>
    %1572 = vector.broadcast %1571 : vector<6x1xf32> to vector<6x32xf32>
    %1573 = arith.mulf %1563, %1572 : vector<6x32xf32>
    %1574 = vector.broadcast %1555 : vector<1x32xf32> to vector<6x32xf32>
    %1575 = arith.mulf %1573, %1574 : vector<6x32xf32>
    %1576 = vector.broadcast %1557 : vector<1x32xf32> to vector<6x32xf32>
    %1577 = arith.addf %1575, %1576 : vector<6x32xf32>
    %c1_904 = arith.constant 1 : index
    %c0_905 = arith.constant 0 : index
    %c0_906 = arith.constant 0 : index
    %1578 = vector.load %arg27[%c1_904, %c0_905, %c0_906] : memref<2x1x32xf32, #tpu.memory_space<vmem>>, vector<1x1x32xf32>
    %1579 = vector.shape_cast %1578 : vector<1x1x32xf32> to vector<1x32xf32>
    %c1_907 = arith.constant 1 : index
    %c0_908 = arith.constant 0 : index
    %c0_909 = arith.constant 0 : index
    %1580 = vector.load %arg28[%c1_907, %c0_908, %c0_909] : memref<2x1x32xf32, #tpu.memory_space<vmem>>, vector<1x1x32xf32>
    %1581 = vector.shape_cast %1580 : vector<1x1x32xf32> to vector<1x32xf32>
    %cst_910 = arith.constant dense<0.000000e+00> : vector<6xf32>
    %1582 = vector.multi_reduction <add>, %1577, %cst_910 [1] : vector<6x32xf32> to vector<6xf32>
    %1583 = vector.shape_cast %1582 : vector<6xf32> to vector<6x1xf32>
    %cst_911 = arith.constant 3.200000e+01 : f32
    %1584 = vector.broadcast %cst_911 : f32 to vector<6x1xf32>
    %1585 = arith.divf %1583, %1584 : vector<6x1xf32>
    %1586 = vector.broadcast %1585 : vector<6x1xf32> to vector<6x32xf32>
    %1587 = arith.subf %1577, %1586 : vector<6x32xf32>
    %1588 = arith.mulf %1587, %1587 : vector<6x32xf32>
    %cst_912 = arith.constant dense<0.000000e+00> : vector<6xf32>
    %1589 = vector.multi_reduction <add>, %1588, %cst_912 [1] : vector<6x32xf32> to vector<6xf32>
    %1590 = vector.shape_cast %1589 : vector<6xf32> to vector<6x1xf32>
    %cst_913 = arith.constant 3.200000e+01 : f32
    %1591 = vector.broadcast %cst_913 : f32 to vector<6x1xf32>
    %1592 = arith.divf %1590, %1591 : vector<6x1xf32>
    %cst_914 = arith.constant 9.99999974E-6 : f32
    %1593 = vector.broadcast %cst_914 : f32 to vector<6x1xf32>
    %1594 = arith.addf %1592, %1593 : vector<6x1xf32>
    %1595 = math.rsqrt %1594 : vector<6x1xf32>
    %1596 = vector.broadcast %1595 : vector<6x1xf32> to vector<6x32xf32>
    %1597 = arith.mulf %1587, %1596 : vector<6x32xf32>
    %1598 = vector.broadcast %1579 : vector<1x32xf32> to vector<6x32xf32>
    %1599 = arith.mulf %1597, %1598 : vector<6x32xf32>
    %1600 = vector.broadcast %1581 : vector<1x32xf32> to vector<6x32xf32>
    %1601 = arith.addf %1599, %1600 : vector<6x32xf32>
    %c0_915 = arith.constant 0 : index
    %c0_916 = arith.constant 0 : index
    %1602 = vector.load %arg29[%c0_915, %c0_916] : memref<32x64xbf16, #tpu.memory_space<vmem>>, vector<32x64xbf16>
    %1603 = arith.truncf %1601 : vector<6x32xf32> to vector<6x32xbf16>
    %cst_917 = arith.constant dense<0.000000e+00> : vector<6x64xf32>
    %1604 = tpu.matmul %1603, %1602, %cst_917 {dimension_numbers = #tpu.dot_dimension_numbers<[1], [0], [0], [1], [0, 0, 1, 1], [], []>} : vector<6x32xbf16>, vector<32x64xbf16>, vector<6x64xf32> -> vector<6x64xf32>
    %c0_918 = arith.constant 0 : index
    %c0_919 = arith.constant 0 : index
    %1605 = vector.load %arg30[%c0_918, %c0_919] : memref<1x64xf32, #tpu.memory_space<vmem>>, vector<1x64xf32>
    %1606 = vector.broadcast %1605 : vector<1x64xf32> to vector<6x64xf32>
    %1607 = arith.addf %1604, %1606 : vector<6x64xf32>
    %c0_920 = arith.constant 0 : index
    %c0_921 = arith.constant 0 : index
    %c0_922 = arith.constant 0 : index
    %1608 = vector.load %arg31[%c0_920, %c0_921, %c0_922] : memref<1x6x64xf32, #tpu.memory_space<vmem>>, vector<1x6x64xf32>
    %1609 = vector.shape_cast %1608 : vector<1x6x64xf32> to vector<6x64xf32>
    %1610 = vector.shape_cast %1607 : vector<6x64xf32> to vector<1x6x64xf32>
    tpu.vector_store %arg31[%c0_920, %c0_921, %c0_922], %1610 {strides = array<i32>} : memref<1x6x64xf32, #tpu.memory_space<vmem>>, vector<1x6x64xf32>,
    return
  }
  func.func @transform_0(%arg0: i32) -> (i32, i32, i32) {
    %c0_i32 = arith.constant 0 : i32
    %c0_i32_0 = arith.constant 0 : i32
    %c0_i32_1 = arith.constant 0 : i32
    return %arg0, %c0_i32, %c0_i32_0 : i32, i32, i32
  }
  func.func @transform_1(%arg0: i32) -> (i32, i32, i32) {
    %c0_i32 = arith.constant 0 : i32
    %c0_i32_0 = arith.constant 0 : i32
    %c0_i32_1 = arith.constant 0 : i32
    return %arg0, %c0_i32, %c0_i32_0 : i32, i32, i32
  }
  func.func @transform_2(%arg0: i32) -> (i32, i32, i32) {
    %c0_i32 = arith.constant 0 : i32
    %c0_i32_0 = arith.constant 0 : i32
    %c0_i32_1 = arith.constant 0 : i32
    return %arg0, %c0_i32, %c0_i32_0 : i32, i32, i32
  }
  func.func @transform_3(%arg0: i32) -> (i32, i32, i32) {
    %c0_i32 = arith.constant 0 : i32
    %c0_i32_0 = arith.constant 0 : i32
    %c0_i32_1 = arith.constant 0 : i32
    return %arg0, %c0_i32, %c0_i32_0 : i32, i32, i32
  }
  func.func @transform_4(%arg0: i32) -> (i32, i32, i32) {
    %c0_i32 = arith.constant 0 : i32
    %c0_i32_0 = arith.constant 0 : i32
    %c0_i32_1 = arith.constant 0 : i32
    return %arg0, %c0_i32, %c0_i32_0 : i32, i32, i32
  }
  func.func @transform_5(%arg0: i32) -> (i32, i32, i32) {
    %c0_i32 = arith.constant 0 : i32
    %c0_i32_0 = arith.constant 0 : i32
    %c0_i32_1 = arith.constant 0 : i32
    %c0_i32_2 = arith.constant 0 : i32
    return %c0_i32, %c0_i32_0, %c0_i32_1 : i32, i32, i32
  }
  func.func @transform_6(%arg0: i32) -> (i32, i32, i32) {
    %c0_i32 = arith.constant 0 : i32
    %c0_i32_0 = arith.constant 0 : i32
    %c0_i32_1 = arith.constant 0 : i32
    %c0_i32_2 = arith.constant 0 : i32
    return %c0_i32, %c0_i32_0, %c0_i32_1 : i32, i32, i32
  }
  func.func @transform_7(%arg0: i32) -> (i32, i32, i32) {
    %c0_i32 = arith.constant 0 : i32
    %c0_i32_0 = arith.constant 0 : i32
    %c0_i32_1 = arith.constant 0 : i32
    %c0_i32_2 = arith.constant 0 : i32
    return %c0_i32, %c0_i32_0, %c0_i32_1 : i32, i32, i32
  }
  func.func @transform_8(%arg0: i32) -> (i32, i32, i32) {
    %c0_i32 = arith.constant 0 : i32
    %c0_i32_0 = arith.constant 0 : i32
    %c0_i32_1 = arith.constant 0 : i32
    %c0_i32_2 = arith.constant 0 : i32
    return %c0_i32, %c0_i32_0, %c0_i32_1 : i32, i32, i32
  }
  func.func @transform_9(%arg0: i32) -> (i32, i32, i32) {
    %c0_i32 = arith.constant 0 : i32
    %c0_i32_0 = arith.constant 0 : i32
    %c0_i32_1 = arith.constant 0 : i32
    %c0_i32_2 = arith.constant 0 : i32
    return %c0_i32, %c0_i32_0, %c0_i32_1 : i32, i32, i32
  }
  func.func @transform_10(%arg0: i32) -> (i32, i32, i32) {
    %c0_i32 = arith.constant 0 : i32
    %c0_i32_0 = arith.constant 0 : i32
    %c0_i32_1 = arith.constant 0 : i32
    %c0_i32_2 = arith.constant 0 : i32
    return %c0_i32, %c0_i32_0, %c0_i32_1 : i32, i32, i32
  }
  func.func @transform_11(%arg0: i32) -> (i32, i32, i32) {
    %c0_i32 = arith.constant 0 : i32
    %c0_i32_0 = arith.constant 0 : i32
    %c0_i32_1 = arith.constant 0 : i32
    %c0_i32_2 = arith.constant 0 : i32
    return %c0_i32, %c0_i32_0, %c0_i32_1 : i32, i32, i32
  }
  func.func @transform_12(%arg0: i32) -> (i32, i32, i32) {
    %c0_i32 = arith.constant 0 : i32
    %c0_i32_0 = arith.constant 0 : i32
    %c0_i32_1 = arith.constant 0 : i32
    %c0_i32_2 = arith.constant 0 : i32
    return %c0_i32, %c0_i32_0, %c0_i32_1 : i32, i32, i32
  }
  func.func @transform_13(%arg0: i32) -> (i32, i32, i32) {
    %c0_i32 = arith.constant 0 : i32
    %c0_i32_0 = arith.constant 0 : i32
    %c0_i32_1 = arith.constant 0 : i32
    %c0_i32_2 = arith.constant 0 : i32
    return %c0_i32, %c0_i32_0, %c0_i32_1 : i32, i32, i32
  }
  func.func @transform_14(%arg0: i32) -> (i32, i32, i32) {
    %c0_i32 = arith.constant 0 : i32
    %c0_i32_0 = arith.constant 0 : i32
    %c0_i32_1 = arith.constant 0 : i32
    %c0_i32_2 = arith.constant 0 : i32
    return %c0_i32, %c0_i32_0, %c0_i32_1 : i32, i32, i32
  }
  func.func @transform_15(%arg0: i32) -> (i32, i32, i32) {
    %c0_i32 = arith.constant 0 : i32
    %c0_i32_0 = arith.constant 0 : i32
    %c0_i32_1 = arith.constant 0 : i32
    %c0_i32_2 = arith.constant 0 : i32
    return %c0_i32, %c0_i32_0, %c0_i32_1 : i32, i32, i32
  }
  func.func @transform_16(%arg0: i32) -> (i32, i32, i32) {
    %c0_i32 = arith.constant 0 : i32
    %c0_i32_0 = arith.constant 0 : i32
    %c0_i32_1 = arith.constant 0 : i32
    %c0_i32_2 = arith.constant 0 : i32
    return %c0_i32, %c0_i32_0, %c0_i32_1 : i32, i32, i32
  }
  func.func @transform_17(%arg0: i32) -> (i32, i32, i32) {
    %c0_i32 = arith.constant 0 : i32
    %c0_i32_0 = arith.constant 0 : i32
    %c0_i32_1 = arith.constant 0 : i32
    %c0_i32_2 = arith.constant 0 : i32
    return %c0_i32, %c0_i32_0, %c0_i32_1 : i32, i32, i32
  }
  func.func @transform_18(%arg0: i32) -> (i32, i32, i32) {
    %c0_i32 = arith.constant 0 : i32
    %c0_i32_0 = arith.constant 0 : i32
    %c0_i32_1 = arith.constant 0 : i32
    %c0_i32_2 = arith.constant 0 : i32
    return %c0_i32, %c0_i32_0, %c0_i32_1 : i32, i32, i32
  }
  func.func @transform_19(%arg0: i32) -> (i32, i32, i32) {
    %c0_i32 = arith.constant 0 : i32
    %c0_i32_0 = arith.constant 0 : i32
    %c0_i32_1 = arith.constant 0 : i32
    %c0_i32_2 = arith.constant 0 : i32
    return %c0_i32, %c0_i32_0, %c0_i32_1 : i32, i32, i32
  }
  func.func @transform_20(%arg0: i32) -> (i32, i32, i32) {
    %c0_i32 = arith.constant 0 : i32
    %c0_i32_0 = arith.constant 0 : i32
    %c0_i32_1 = arith.constant 0 : i32
    %c0_i32_2 = arith.constant 0 : i32
    return %c0_i32, %c0_i32_0, %c0_i32_1 : i32, i32, i32
  }
  func.func @transform_21(%arg0: i32) -> (i32, i32, i32) {
    %c0_i32 = arith.constant 0 : i32
    %c0_i32_0 = arith.constant 0 : i32
    %c0_i32_1 = arith.constant 0 : i32
    %c0_i32_2 = arith.constant 0 : i32
    return %c0_i32, %c0_i32_0, %c0_i32_1 : i32, i32, i32
  }
  func.func @transform_22(%arg0: i32) -> (i32, i32, i32) {
    %c0_i32 = arith.constant 0 : i32
    %c0_i32_0 = arith.constant 0 : i32
    %c0_i32_1 = arith.constant 0 : i32
    %c0_i32_2 = arith.constant 0 : i32
    return %c0_i32, %c0_i32_0, %c0_i32_1 : i32, i32, i32
  }
  func.func @transform_23(%arg0: i32) -> (i32, i32, i32) {
    %c0_i32 = arith.constant 0 : i32
    %c0_i32_0 = arith.constant 0 : i32
    %c0_i32_1 = arith.constant 0 : i32
    %c0_i32_2 = arith.constant 0 : i32
    return %c0_i32, %c0_i32_0, %c0_i32_1 : i32, i32, i32
  }
  func.func @transform_24(%arg0: i32) -> (i32, i32, i32) {
    %c0_i32 = arith.constant 0 : i32
    %c0_i32_0 = arith.constant 0 : i32
    %c0_i32_1 = arith.constant 0 : i32
    %c0_i32_2 = arith.constant 0 : i32
    return %c0_i32, %c0_i32_0, %c0_i32_1 : i32, i32, i32
  }
  func.func @transform_25(%arg0: i32) -> (i32, i32, i32) {
    %c0_i32 = arith.constant 0 : i32
    %c0_i32_0 = arith.constant 0 : i32
    %c0_i32_1 = arith.constant 0 : i32
    %c0_i32_2 = arith.constant 0 : i32
    return %c0_i32, %c0_i32_0, %c0_i32_1 : i32, i32, i32
  }
  func.func @transform_26(%arg0: i32) -> (i32, i32, i32) {
    %c0_i32 = arith.constant 0 : i32
    %c0_i32_0 = arith.constant 0 : i32
    %c0_i32_1 = arith.constant 0 : i32
    %c0_i32_2 = arith.constant 0 : i32
    return %c0_i32, %c0_i32_0, %c0_i32_1 : i32, i32, i32
  }
  func.func @transform_27(%arg0: i32) -> (i32, i32, i32) {
    %c0_i32 = arith.constant 0 : i32
    %c0_i32_0 = arith.constant 0 : i32
    %c0_i32_1 = arith.constant 0 : i32
    %c0_i32_2 = arith.constant 0 : i32
    return %c0_i32, %c0_i32_0, %c0_i32_1 : i32, i32, i32
  }
  func.func @transform_28(%arg0: i32) -> (i32, i32) {
    %c0_i32 = arith.constant 0 : i32
    %c0_i32_0 = arith.constant 0 : i32
    %c0_i32_1 = arith.constant 0 : i32
    return %c0_i32, %c0_i32_0 : i32, i32
  }
  func.func @transform_29(%arg0: i32) -> (i32, i32) {
    %c0_i32 = arith.constant 0 : i32
    %c0_i32_0 = arith.constant 0 : i32
    %c0_i32_1 = arith.constant 0 : i32
    return %c0_i32, %c0_i32_0 : i32, i32
  }
  func.func @transform_30(%arg0: i32) -> (i32, i32, i32) {
    %c0_i32 = arith.constant 0 : i32
    %c0_i32_0 = arith.constant 0 : i32
    %c0_i32_1 = arith.constant 0 : i32
    return %arg0, %c0_i32, %c0_i32_0 : i32, i32, i32
  }
}

</mosaic_0001>

<bundles_post_ra>
// kernel: seq2seq_forward.1
= control target key start
LH: loop header
LB: loop body
LE: loop exit
PB: predicated region body
PF: predicated region fallthrough
CT: control target
= control target key end

     0   :  { %s13719_s6 = smov 1   ;;  %s13720_s10 = smov 2   ;;  %s15300_s0 = inlined_call_operand.smem [shape: u32[31], index: -1, kind: input, shape index: {}] }
   0x1   :  { %s13762_s5 = sld [smem:[%s15300_s0]]   ;;  %s13721_s14 = smov 3  }
   0x2   :  { %s13767_s9 = sld [smem:[%s15300_s0 + %s13719_s6]]   ;;  %s13722_s18 = smov 4  }
   0x3   :  { %s13772_s13 = sld [smem:[%s15300_s0 + %s13720_s10]]   ;;  %s13723_s22 = smov 5  }
   0x4   :  { %s13777_s17 = sld [smem:[%s15300_s0 + %s13721_s14]]   ;;  %s13724_s26 = smov 6  }
   0x5   :  { %s13782_s21 = sld [smem:[%s15300_s0 + %s13722_s18]]   ;;  %s13725_s30 = smov 7  }
   0x6   :  { %s13787_s25 = sld [smem:[%s15300_s0 + %s13723_s22]]   ;;  %s13726_s4 = smov 8  }
   0x7   :  { %s13792_s29 = sld [smem:[%s15300_s0 + %s13724_s26]]   ;;  %s13727_s10 = smov 9  }
   0x8   :  { %s13797_s3 = sld [smem:[%s15300_s0 + %s13725_s30]]   ;;  %s13728_s15 = smov 10  }
   0x9   :  { %s13802_s8 = sld [smem:[%s15300_s0 + %s13726_s4]]   ;;  %s13729_s20 = smov 11  }
   0xa   :  { %15315 = sst [smem:[#allocation2_spill]] %s13777_s17  ;;  %s13730_s26 = smov 12  }
   0xb   :  { %s13807_s14 = sld [smem:[%s15300_s0 + %s13727_s10]]   ;;  %s13731_s1 = smov 13  }
   0xc   :  { %s13812_s19 = sld [smem:[%s15300_s0 + %s13728_s15]]   ;;  %s13732_s7 = smov 14  }
   0xd   :  { %s13817_s24 = sld [smem:[%s15300_s0 + %s13729_s20]]   ;;  %s13733_s15 = smov 15  }
   0xe   :  { %15316 = sst [smem:[#allocation3_spill]] %s13797_s3  ;;  %s13734_s22 = smov 16  }
   0xf   :  { %s13822_s30 = sld [smem:[%s15300_s0 + %s13730_s26]]   ;;  %s13735_s28 = smov 17  }
  0x10   :  { %s13827_s6 = sld [smem:[%s15300_s0 + %s13731_s1]]  }
  0x11   :  { %s13832_s12 = sld [smem:[%s15300_s0 + %s13732_s7]]   ;;  %s13736_s7 = smov 18  }
  0x12   :  { %s13837_s20 = sld [smem:[%s15300_s0 + %s13733_s15]]   ;;  %s13737_s15 = smov 19  }
  0x13   :  { %s13842_s27 = sld [smem:[%s15300_s0 + %s13734_s22]]   ;;  %s13738_s22 = smov 20  }
  0x14   :  { %s13847_s4 = sld [smem:[%s15300_s0 + %s13735_s28]]   ;;  %s13739_s28 = smov 21  }
  0x15   :  { %s13852_s17 = sld [smem:[%s15300_s0 + %s13736_s7]]   ;;  %s13740_s7 = smov 22  }
  0x18   :  { %15317 = sst [smem:[#allocation4_spill]] %s13837_s20 }
  0x19   :  { %15318 = sst [smem:[#allocation5_spill]] %s13842_s27 }
  0x1a   :  { %15319 = sst [smem:[#allocation6_spill]] %s13847_s4 }
  0x1b   :  { %15320 = sst [smem:[#allocation7_spill]] %s13852_s17 }
  0x1c   :  { %s13857_s20 = sld [smem:[%s15300_s0 + %s13737_s15]]   ;;  %s13741_s15 = smov 23  }
  0x1d   :  { %s13862_s27 = sld [smem:[%s15300_s0 + %s13738_s22]]   ;;  %s13742_s22 = smov 24  }
  0x1e   :  { %s13867_s4 = sld [smem:[%s15300_s0 + %s13739_s28]]   ;;  %s13743_s28 = smov 25  }
  0x1f   :  { %s13872_s17 = sld [smem:[%s15300_s0 + %s13740_s7]]   ;;  %s13744_s7 = smov 26  }
  0x22   :  { %15321 = sst [smem:[#allocation8_spill]] %s13857_s20 }
  0x23   :  { %15322 = sst [smem:[#allocation9_spill]] %s13862_s27 }
  0x24   :  { %15323 = sst [smem:[#allocation10_spill]] %s13867_s4 }
  0x25   :  { %15324 = sst [smem:[#allocation11_spill]] %s13872_s17 }
  0x26   :  { %s13877_s20 = sld [smem:[%s15300_s0 + %s13741_s15]]   ;;  %s13745_s15 = smov 27  }
  0x27   :  { %s13882_s27 = sld [smem:[%s15300_s0 + %s13742_s22]]   ;;  %s13746_s22 = smov 28  }
  0x28   :  { %s13887_s4 = sld [smem:[%s15300_s0 + %s13743_s28]]   ;;  %s13747_s28 = smov 29  }
  0x29   :  { %s13892_s17 = sld [smem:[%s15300_s0 + %s13744_s7]]   ;;  %s13748_s7 = smov 30  }
  0x2c   :  { %15325 = sst [smem:[#allocation12_spill]] %s13877_s20 }
  0x2d   :  { %15326 = sst [smem:[#allocation13_spill]] %s13882_s27 }
  0x2e   :  { %15327 = sst [smem:[#allocation14_spill]] %s13887_s4 }
  0x2f   :  { %15328 = sst [smem:[#allocation15_spill]] %s13892_s17 }
  0x30   :  { %s13897_s20 = sld [smem:[%s15300_s0 + %s13745_s15]]   ;;  %s13914_s15 = smov 0  }
  0x31   :  { %s13902_s27 = sld [smem:[%s15300_s0 + %s13746_s22]]  }
  0x32   :  { %s13907_s4 = sld [smem:[%s15300_s0 + %s13747_s28]]  }
  0x33   :  { %s13912_s17 = sld [smem:[%s15300_s0 + %s13748_s7]]  }
  0x34 LB: > { %s15329_s3 = sld [smem:[#allocation3_spill]]  ;;  %s10924_s16 = sadd.s32 4294967295, %s13717_s15   ;;  %s13717_s15 = sphi %s13914_s15, %s71_s15  }
  0x35   : > { %p10928_p0 = scmp.ge.s32.totalorder %s13717_s15, 1  ;;  %p875_p1 = scmp.lt.s32.totalorder %s13717_s15, 3 }
  0x37   : > { %p876_p2 = pnand %p10928_p0, %p875_p1 }
  0x38   : > { %p964_p3 = scmp.lt.s32.totalorder (!%p876_p2), %s10924_s16, 1  ;;  %v1009_v0 = vld [vmem:[%s13787_s25] sm:$0xff] (!%p876_p2)  ;;  %v1010_v1 = vld [vmem:[%s13787_s25 + $0x8] sm:$0xff] (!%p876_p2)  ;;  %v1011_v2 = vld [vmem:[%s13787_s25 + $0x10] sm:$0xff] (!%p876_p2)  ;;  %v994_v3 = vlaneseq (!%p876_p2)  ;;  %v13749_v4 = vmov (!%p876_p2), 0   ;;  %v13750_v5 = vmov (!%p876_p2), 0.0|0.0  }
  0x39   : > { %879 = sbr.rel (%p876_p2) target bundleno = 24951 (0x6177), region = 140  ;;  %13419 = vset.pattern.permute.xlu0 (!%p876_p2), %v13749_v4  ;;  %13352 = vmatprep.subr.bf16.mxu0 (!%p876_p2), %v13750_v5  ;;  %v13353_v6 = vpack.c.bf16 (!%p876_p2), %v1010_v1, %v1009_v0  ;;  %v1012_v7 = vld [vmem:[%s13787_s25 + $0x18] sm:$0xff] (!%p876_p2)  ;;  %v1013_v8 = vld [vmem:[%s13787_s25 + $0x20] sm:$0xff] (!%p876_p2)  ;;  %v13751_v11 = vmov (!%p876_p2), 0.0   ;;  %v1014_v13 = vld [vmem:[%s13787_s25 + $0x28] sm:$0xff] (!%p876_p2)  ;;  %v13752_v15 = vmov (!%p876_p2), -inf  }
  0x3a   : > { %v995_v9 = vshrl.u32 (!%p876_p2), %v994_v3, 7  ;;  %v13930_v10 = vand.u32 (!%p876_p2), 127, %v994_v3  ;;  %12237 = vmatprep.subr.bf16.mxu1 (!%p876_p2), %v13751_v11  ;;  %v13356_v12 = vpack.c.bf16 (!%p876_p2), %v1012_v7, %v1011_v2  ;;  %v1015_v19 = vld [vmem:[%s13787_s25 + $0x30] sm:$0xff] (!%p876_p2)  ;;  %v13359_v20 = vpack.c.bf16 (!%p876_p2), %v1014_v13, %v1013_v8  ;;  %v1016_v23 = vld [vmem:[%s13787_s25 + $0x38] sm:$0xff] (!%p876_p2)  ;;  %v13420_v31 = vld [vmem:[%s13792_s29] sm:$0xff] (!%p876_p2)   ;;  %s15330_s28 = sld [smem:[#allocation4_spill]] (!%p876_p2) }
  0x3b   : > { %13354 = vmatpush3.bf16.msra.mxu0 (!%p876_p2), %v13353_v6  ;;  %vm13753_vm3 = vmmov (!%p876_p2), 0   ;;  %v13362_v28 = vpack.c.bf16 (!%p876_p2), %v1016_v23, %v1015_v19  ;;  %vm1023_vm4 = vcmask (!%p876_p2), 523264   ;;  %v13421_v32 = vld [vmem:[%s13792_s29 + $0x80] sm:$0xff] (!%p876_p2)   ;;  %12238 = vmatpush3.bf16.msra.mxu1 (!%p876_p2), %v13420_v31  ;;  %v13422_v33 = vld [vmem:[%s13792_s29 + $0x8] sm:$0xff] (!%p876_p2)   ;;  %vm1129_vm6 = vcmask (!%p876_p2), 261120   ;;  %v13426_v1 = vld [vmem:[%s13792_s29 + $0x10] sm:$0xff] (!%p876_p2)  }
  0x3c   : > { %13355 = vmatprep.subr.bf16.mxu0 (!%p876_p2), %v13750_v5  ;;  %vm998_vm0 = vcmp.ge.s32.totalorder (!%p876_p2), %v995_v9, %v13930_v10  ;;  %v1003_v17 = vsub.s32 (!%p876_p2), 0, %v995_v9  ;;  %12234 = vmatprep.mubr.msk.f32.mxu0 (!%p876_p2), %vm13753_vm3, %v13751_v11  ;;  %v13423_v34 = vld [vmem:[%s13792_s29 + $0x88] sm:$0xff] (!%p876_p2)   ;;  %v13424_v40 = vld [vmem:[%s13792_s29 + $0x40] sm:$0xff] (!%p876_p2)   ;;  %vm1374_vm7 = vcmask (!%p876_p2), 1043456   ;;  %vm1311_vm8 = vcmask (!%p876_p2), 64512   ;;  %v13427_v3 = vld [vmem:[%s13792_s29 + $0x18] sm:$0xff] (!%p876_p2)  }
  0x3d   : > { %v999_v16 = vsel (!%p876_p2), %vm998_vm0, 0.0, %v13752_v15  ;;  %12241 = vmatprep.mubr.msk.bf16.mxu1 (!%p876_p2), %vm13753_vm3, %v13751_v11  ;;  %12239 = vmatprep.subr.bf16.mxu1 (!%p876_p2), %v13751_v11  ;;  %v13425_v42 = vld [vmem:[%s13792_s29 + $0x48] sm:$0xff] (!%p876_p2)   ;;  %v10946_v55 = vld [vmem:[%s15329_s3 + $0x4] ss:$0 sm:$0xff] (!%p876_p2)  ;;  %v10937_v62 = vld [vmem:[%s15329_s3] ss:$0 sm:$0xff] (!%p876_p2) }
  0x3e   : > { %v10955_v43 = vld [vmem:[%s15329_s3 + $0x8] ss:$0 sm:$0xff] (!%p876_p2)  ;;  %v13428_v4 = vld [vmem:[%s13792_s29 + $0x90] sm:$0xff] (!%p876_p2)   ;;  %v13429_v6 = vld [vmem:[%s13792_s29 + $0x98] sm:$0xff] (!%p876_p2)   ;;  %s15331_s1 = sld [smem:[#allocation2_spill]] (!%p876_p2)  ;;  %s15332_s7 = sld [smem:[#allocation5_spill]] (!%p876_p2) }
  0x3f   : > { %13357 = vmatpush3.bf16.msra.mxu0 (!%p876_p2), %v13356_v12  ;;  %12240 = vmatpush3.bf16.msra.mxu1 (!%p876_p2), %v13422_v33  ;;  %v10984_v19 = vld [vmem:[%s15329_s3 + $0x9] ss:$0 sm:$0xff] (!%p876_p2)  ;;  %v13430_v33 = vld [vmem:[%s13792_s29 + $0x50] sm:$0xff] (!%p876_p2)   ;;  %s15333_s10 = sld [smem:[#allocation6_spill]] (!%p876_p2)  ;;  %vm4772_vm10 = vcmask (!%p876_p2), 1042432   ;;  %vm4754_vm11 = vcmask (!%p876_p2), 46080  }
  0x40   : > { %s15344_s16 = smov (!%p964_p3, %s10924_s16), 1  ;;  %13358 = vmatprep.subr.bf16.mxu0 %v13750_v5  ;;  %12245 = vmatprep.subr.bf16.mxu1 %v13751_v11  ;;  %vm4768_vm12 = vcmask 48128   ;;  %s15334_s11 = sld [smem:[#allocation7_spill]]  ;;  %vm5934_vm13 = vcmask 259072   ;;  %vm6213_vm14 = vcmask 62464   ;;  %vm10800_vm15 = vcmask 521216  }
  0x41   : > { %s13934_s0 = sshll.u32 %s15344_s16, 3  ;;  %s973_s18 = scalar_lea.vmem %s13772_s13, %s15344_s16 }
  0x42   : > { %s970_s22 = scalar_lea.vmem %s13767_s9, %s13934_s0  ;;  %v987_v14 = vld [vmem:[%s973_s18] sm:$0x1]  ;;  %s966_s23 = scalar_lea.vmem %s13762_s5, %s15344_s16 }
  0x43   : > { %v1008_v18 = vld [vmem:[%s970_s22] sm:$0xff]  ;;  %vm991_vm1 = vcmp.eq.s32.totalorder %v987_v14, 1  ;;  %13360 = vmatpush3.bf16.msra.mxu0 %v13359_v20  ;;  %s13975_s26 = scalar_lea.vmem %s13782_s21, %s15344_s16  ;;  %s15335_s16 = sld [smem:[#allocation8_spill]] }
  0x44   : > { %1018 = vperm.xlu0 %13419, %v1008_v18   ;;  %v10933_v21 = vsel %vm991_vm1, 1.0, %v13751_v11  ;;  %v986_v22 = vld [vmem:[%s966_s23] sm:$0x1]  ;;  %13361 = vmatprep.subr.bf16.mxu0 %v13750_v5  ;;  %s977_s2 = scalar_lea.vmem %s15331_s1, %s13934_s0  ;;  %s15336_s18 = sld [smem:[#allocation15_spill]] }
  0x45   : > { %v1004_v24 = vrot.slane %v10933_v21, %v1003_v17  ;;  %vm988_vm2 = vcmp.eq.s32.totalorder %v986_v22, 1  ;;  %v10936_v35 = vld [vmem:[%s13975_s26] ss:$0 sm:$0xff]  ;;  %s15337_s22 = sld [smem:[#allocation9_spill]]  ;;  %s15338_s23 = sld [smem:[#allocation10_spill]] }
  0x46   : > { %v10932_v25 = vsel %vm988_vm2, 1.0, %v13751_v11  ;;  %s15340_s1 = sld [smem:[#allocation13_spill]] }
  0x47   : > { %v13954_v26 = vadd.f32 %v1004_v24, %v999_v16  ;;  %v13956_v27 = vrot.slane %v10932_v25, %v1003_v17  ;;  %13363 = vmatpush3.bf16.msra.mxu0 %v13362_v28 }
  0x48   : > { %12253 = vmatprep.subr.bf16.mxu0 %v13751_v11 }
  0xc3   : > { %v1019_v29 = vpop.permute.xlu0 %1018 }
  0xc4   : > { %vm1020_vm5 = vcmp.eq.s32.totalorder %v1019_v29, %v13930_v10 }
  0xc5   : > { %v10934_v30 = vsel %vm1020_vm5, 1.0, %v13751_v11 }
  0xc6   : > { %12235 = vmatmul.mubr.msk.f32.vlgmr.msra.gmra.mrb[0].mxu0 %vm1023_vm4, %v10934_v30 }
  0xc7   : > { %12257 = vmatprep.mubr.msk.bf16.mxu0 %vm13753_vm3, %v13751_v11  ;;  %12254 = vmatpush3.bf16.msra.mxu0 %v13421_v32 }
  0xc8   : > { %12255 = vmatprep.subr.bf16.mxu0 %v13751_v11 }
  0xcb   : > { %12256 = vmatpush3.bf16.msra.mxu0 %v13423_v34 }
  0xcc   : > { %12267 = vmatprep.subr.bf16.mxu0 %v13751_v11 }
 0x199   : > { %v1093_v36 = vpop.f32.mrb[0].mxu0 }
 0x19a   : > { %v1097_v37 = vmul.f32 5.656854, %v1093_v36  ;;  %v12236_v38 = vpop.f32.mrb[1].mxu0 }
 0x19c   : > { %v13978_v39 = vadd.f32 %v10936_v35, %v1097_v37  ;;  %v13431_v35 = vld [vmem:[%s13792_s29 + $0x58] sm:$0xff]  }
 0x19e   : > { %v13983_v41 = vpack.c.bf16 %v13978_v39, %v13978_v39 }
 0x1a0   : > { %12242 = vmatmul.mubr.msk.bf16.vlgmr.msra.gmra.mrb[0].mxu1 %vm1129_vm6, %v13983_v41  ;;  %12258 = vmatmul.mubr.msk.bf16.vlgmr.msra.gmra.mrb[4].mxu0 %vm1129_vm6, %v13983_v41 }
 0x1a1   : > { %12246 = vmatpush3.bf16.msra.mxu1 %v13424_v40  ;;  %12249 = vmatprep.mubr.msk.bf16.mxu1 %vm13753_vm3, %v13751_v11 }
 0x1a2   : > { %12247 = vmatprep.subr.bf16.mxu1 %v13751_v11  ;;  %12269 = vmatprep.mubr.msk.bf16.mxu0 %vm13753_vm3, %v13751_v11 }
 0x1a5   : > { %12248 = vmatpush3.bf16.msra.mxu1 %v13425_v42  ;;  %v10975_v42 = vld [vmem:[%s15329_s3 + $0x5] ss:$0 sm:$0xff] }
 0x1a6   : > { %12261 = vmatprep.subr.bf16.mxu1 %v13751_v11 }
 0x1a8   : > { %12250 = vmatmul.mubr.msk.bf16.vlgmr.msra.gmra.mrb[4].mxu1 %vm1129_vm6, %v13983_v41 }
 0x1a9   : > { %12263 = vmatprep.mubr.msk.bf16.mxu1 %vm13753_vm3, %v13751_v11 }
 0x273   : > { %v1167_v44 = vpop.f32.mrb[0].mxu1  ;;  %v1297_v45 = vpop.f32.mrb[4].mxu0 }
 0x274   : > { %v1298_v46 = vadd.f32 %v10955_v43, %v1297_v45  ;;  %v12243_v47 = vpop.f32.mrb[1].mxu1  ;;  %v12259_v48 = vpop.f32.mrb[5].mxu0  ;;  %v1168_v0 = vadd.f32 %v10937_v62, %v1167_v44 }
 0x275   : > { %v1170_v49 = vpop.f32.mrb[2].mxu1  ;;  %v1300_v50 = vpop.f32.mrb[6].mxu0 }
 0x276   : > { %v1370_v51 = vpack.c.bf16 %v1298_v46, %v1298_v46  ;;  %v12244_v52 = vpop.f32.mrb[3].mxu1  ;;  %v12260_v53 = vpop.f32.mrb[7].mxu0  ;;  %v1303_v2 = vpack.c.bf16 %v1168_v0, %v1168_v0  ;;  %v10966_v49 = vld [vmem:[%s15329_s3 + $0x1] ss:$0 sm:$0xff] }
 0x278   : > { %v1376_v54 = vsel %vm1374_vm7, %v1370_v51, 0 }
 0x279   : > { %12268 = vmatpush3.bf16.msra.mxu0 %v1376_v54 }
 0x27a   : > { %12281 = vmatprep.subr.bf16.mxu0 %v13751_v11 }
 0x27b   : > { %v1232_v56 = vpop.f32.mrb[4].mxu1 }
 0x27c   : > { %v1233_v57 = vadd.f32 %v10946_v55, %v1232_v56  ;;  %v12251_v58 = vpop.f32.mrb[5].mxu1 }
 0x27d   : > { %v1235_v59 = vpop.f32.mrb[6].mxu1 }
 0x27e   : > { %v1304_v60 = vpack.c.bf16 %v1233_v57, %v1233_v57  ;;  %v12252_v61 = vpop.f32.mrb[7].mxu1 }
 0x280   : > { %v1316_v63 = vsel %vm1311_vm8, %v1304_v60, 0 }
 0x281   : > { %12262 = vmatpush3.bf16.xpose.msra.mxu1 %v1316_v63 }
 0x282   : > { %12273 = vmatprep.subr.bf16.mxu1 %v13751_v11 }
 0x288   : > { %12264 = vmatmul.mubr.msk.bf16.vlgmr.msra.gmra.mrb[8].mxu1 %vm1311_vm8, %v1303_v2 }
 0x289   : > { %12274 = vmatpush3.bf16.msra.mxu1 %v13426_v1  ;;  %12277 = vmatprep.mubr.msk.bf16.mxu1 %vm13753_vm3, %v13751_v11  ;;  %v1419_v1 = vld [vmem:[%s13802_s8] sm:$0xf] }
 0x28a   : > { %12275 = vmatprep.subr.bf16.mxu1 %v13751_v11 }
 0x28d   : > { %12276 = vmatpush3.bf16.msra.mxu1 %v13427_v3 }
 0x28e   : > { %12289 = vmatprep.subr.bf16.mxu1 %v13751_v11 }
 0x290   : > { %12278 = vmatmul.mubr.msk.bf16.vlgmr.msra.gmra.mrb[12].mxu1 %vm1129_vm6, %v13983_v41 }
 0x291   : > { %12290 = vmatpush3.bf16.msra.mxu1 %v13428_v4  ;;  %12293 = vmatprep.mubr.msk.bf16.mxu1 %vm13753_vm3, %v13751_v11 }
 0x292   : > { %12291 = vmatprep.subr.bf16.mxu1 %v13751_v11 }
 0x295   : > { %12292 = vmatpush3.bf16.msra.mxu1 %v13429_v6  ;;  %v1777_v6 = vsel %vm1374_vm7, %v1419_v1, 0 }
 0x296   : > { %12303 = vmatprep.subr.bf16.mxu1 %v13751_v11 }
 0x298   : > { %12294 = vmatmul.mubr.msk.bf16.vlgmr.msra.gmra.mrb[16].mxu1 %vm1129_vm6, %v13983_v41 }
 0x299   : > { %12305 = vmatprep.mubr.msk.bf16.mxu1 %vm13753_vm3, %v13751_v11 }
 0x35b   : > { %v1352_v7 = vpop.f32.mrb[8].mxu1 }
 0x35c   : > { %v12265_v8 = vpop.f32.mrb[9].mxu1  ;;  %v1353_v9 = vadd.f32 %v1352_v7, %v13956_v27 }
 0x35d   : > { %v1355_v12 = vpop.f32.mrb[10].mxu1 }
 0x35e   : > { %v12266_v13 = vpop.f32.mrb[11].mxu1  ;;  %v1358_v14 = vsel %vm1311_vm8, %v1353_v9, -inf }
 0x35f   : > { %1359 = vmax.xlane.f32.xlu0 %v1358_v14  ;;  %v13433_v13 = vld [vmem:[%s13792_s29 + $0x68] sm:$0xff]   ;;  %v10990_v14 = vld [vmem:[%s13802_s8 + $0x4] sm:$0xf] }
 0x363   : > { %v1480_v15 = vpop.f32.mrb[12].mxu1 }
 0x364   : > { %v12279_v16 = vpop.f32.mrb[13].mxu1  ;;  %v1481_v51 = vadd.f32 %v10966_v49, %v1480_v15  ;;  %v1731_v15 = vsel %vm1374_vm7, %v10990_v14, 0  ;;  %v13438_v14 = vld [vmem:[%s13792_s29 + $0x30] sm:$0xff]  }
 0x365   : > { %v1483_v17 = vpop.f32.mrb[14].mxu1 }
 0x366   : > { %v12280_v18 = vpop.f32.mrb[15].mxu1  ;;  %v1616_v52 = vpack.c.bf16 %v1481_v51, %v1481_v51 }
 0x36b   : > { %v1610_v20 = vpop.f32.mrb[16].mxu1 }
 0x36c   : > { %v1611_v21 = vadd.f32 %v10984_v19, %v1610_v20  ;;  %v12295_v22 = vpop.f32.mrb[17].mxu1 }
 0x36d   : > { %v1613_v23 = vpop.f32.mrb[18].mxu1 }
 0x36e   : > { %v1676_v24 = vpack.c.bf16 %v1611_v21, %v1611_v21  ;;  %v12296_v25 = vpop.f32.mrb[19].mxu1  ;;  %v13434_v23 = vld [vmem:[%s13792_s29 + $0x20] sm:$0xff]  }
 0x370   : > { %v1681_v28 = vsel %vm1374_vm7, %v1676_v24, 0 }
 0x371   : > { %12304 = vmatpush3.bf16.msra.mxu1 %v1681_v28  ;;  %v13435_v28 = vld [vmem:[%s13792_s29 + $0x28] sm:$0xff]  }
 0x372   : > { %12315 = vmatprep.subr.bf16.mxu1 %v13751_v11 }
 0x3ec   : > { %v1360_v29 = vpop.xlane.xlu0 %1359 }
 0x3ed   : > { %v1361_v30 = vsub.f32 %v1353_v9, %v1360_v29  ;;  %v13432_v9 = vld [vmem:[%s13792_s29 + $0x60] sm:$0xff]  }
 0x3ef   : > { %v1362_v31 = vmul.f32 1.442695, %v1361_v30 }
 0x3f1   : > { %13590 = vpow2.f32 %v1362_v31 }
 0x3fb   : > { %v13591_v32 = vpop.eup %13590 }
 0x3fc   : > { %v1369_v34 = vpack.c.bf16 %v13591_v32, %v13591_v32  ;;  %v1364_v59 = vsel %vm1311_vm8, %v13591_v32, 0.0  ;;  %v13436_v32 = vld [vmem:[%s13792_s29 + $0xa0] sm:$0xff]  }
 0x3fe   : > { %12270 = vmatmul.mubr.msk.bf16.vlgmr.msra.gmra.mrb[8].mxu0 %vm1311_vm8, %v1369_v34  ;;  %v11007_v34 = vld [vmem:[%s15329_s3 + $0x6] ss:$0 sm:$0xff] }
 0x3ff   : > { %12282 = vmatpush3.bf16.msra.mxu0 %v13430_v33  ;;  %12285 = vmatprep.mubr.msk.bf16.mxu0 %vm13753_vm3, %v13751_v11 }
 0x400   : > { %12283 = vmatprep.subr.bf16.mxu0 %v13751_v11 }
 0x403   : > { %12284 = vmatpush3.bf16.msra.mxu0 %v13431_v35  ;;  %v13437_v35 = vld [vmem:[%s13792_s29 + $0xa8] sm:$0xff]  }
 0x404   : > { %12297 = vmatprep.subr.bf16.mxu0 %v13751_v11 }
 0x406   : > { %12286 = vmatmul.mubr.msk.bf16.vlgmr.msra.gmra.mrb[12].mxu0 %vm1129_vm6, %v13983_v41 }
 0x407   : > { %12299 = vmatprep.mubr.msk.bf16.mxu0 %vm13753_vm3, %v13751_v11 }
 0x4d1   : > { %v1412_v36 = vpop.f32.mrb[8].mxu0 }
 0x4d2   : > { %v12271_v37 = vpop.f32.mrb[9].mxu0 }
 0x4d3   : > { %v1415_v38 = vpop.f32.mrb[10].mxu0 }
 0x4d4   : > { %v12272_v40 = vpop.f32.mrb[11].mxu0 }
 0x4d9   : > { %v1545_v43 = vpop.f32.mrb[12].mxu0 }
 0x4da   : > { %v1546_v44 = vadd.f32 %v10975_v42, %v1545_v43  ;;  %v12287_v45 = vpop.f32.mrb[13].mxu0 }
 0x4db   : > { %v1548_v46 = vpop.f32.mrb[14].mxu0 }
 0x4dc   : > { %v1617_v47 = vpack.c.bf16 %v1546_v44, %v1546_v44  ;;  %v12288_v48 = vpop.f32.mrb[15].mxu0 }
 0x4de   : > { %v1622_v50 = vsel %vm1311_vm8, %v1617_v47, 0 }
 0x4df   : > { %12298 = vmatpush3.bf16.xpose.msra.mxu0 %v1622_v50  ;;  %v10998_v50 = vld [vmem:[%s15329_s3 + $0x2] ss:$0 sm:$0xff] }
 0x4e0   : > { %12309 = vmatprep.subr.bf16.mxu0 %v13751_v11 }
 0x4e6   : > { %12300 = vmatmul.mubr.msk.bf16.vlgmr.msra.gmra.mrb[16].mxu0 %vm1311_vm8, %v1616_v52 }
 0x4e7   : > { %12311 = vmatprep.mubr.msk.bf16.mxu0 %vm13753_vm3, %v13751_v11  ;;  %12310 = vmatpush3.bf16.msra.mxu0 %v1731_v15 }
 0x4e8   : > { %12321 = vmatprep.subr.bf16.mxu0 %v13751_v11 }
 0x5b9   : > { %v1658_v53 = vpop.f32.mrb[16].mxu0 }
 0x5ba   : > { %v12301_v54 = vpop.f32.mrb[17].mxu0  ;;  %v1659_v55 = vadd.f32 %v1658_v53, %v13956_v27 }
 0x5bb   : > { %v1661_v56 = vpop.f32.mrb[18].mxu0 }
 0x5bc   : > { %v12302_v57 = vpop.f32.mrb[19].mxu0  ;;  %v1664_v58 = vsel %vm1311_vm8, %v1659_v55, -inf }
 0x5bd   : > { %1665 = vmax.xlane.f32.xlu1 %v1664_v58  ;;  %v11016_v57 = vld [vmem:[%s15329_s3 + $0xa] ss:$0 sm:$0xff] }
 0x5c1   : > { %1365 = vadd.xlane.f32.xlu1 %v1364_v59 }
 0x64a   : > { %v1666_v60 = vpop.xlane.xlu1 %1665 }
 0x64b   : > { %v1667_v61 = vsub.f32 %v1659_v55, %v1666_v60 }
 0x64d   : > { %v1668_v62 = vmul.f32 1.442695, %v1667_v61 }
 0x64e   : > { %v1366_v63 = vpop.xlane.xlu1 %1365 }
 0x64f   : > { %13592 = vpow2.f32 %v1668_v62  ;;  %v1367_v0 = vmax.f32 %v1366_v63, 1e-30 }
 0x651   : > { %13594 = vrcp.f32 %v1367_v0 }
 0x659   : > { %v13593_v2 = vpop.eup %13592 }
 0x65a   : > { %v1670_v3 = vsel %vm1311_vm8, %v13593_v2, 0.0  ;;  %v1675_v4 = vpack.c.bf16 %v13593_v2, %v13593_v2 }
 0x65b   : > { %v13595_v7 = vpop.eup %13594  ;;  %1671 = vadd.xlane.f32.xlu1 %v1670_v3 }
 0x65c   : > { %12306 = vmatmul.mubr.msk.bf16.vlgmr.msra.gmra.mrb[20].mxu1 %vm1311_vm8, %v1675_v4  ;;  %v1418_v8 = vmul.f32 %v13595_v7, %v1412_v36 }
 0x65d   : > { %12316 = vmatpush3.bf16.msra.mxu1 %v1777_v6  ;;  %12317 = vmatprep.mubr.msk.bf16.mxu1 %vm13753_vm3, %v13751_v11 }
 0x65e   : > { %12329 = vmatprep.subr.bf16.mxu1 %v13751_v11  ;;  %v1420_v12 = vpack.c.bf16 %v1418_v8, %v1418_v8 }
 0x664   : > { %12318 = vmatmul.mubr.msk.bf16.vlgmr.msra.gmra.mrb[24].mxu1 %vm1311_vm8, %v1420_v12 }
 0x665   : > { %12330 = vmatpush3.bf16.msra.mxu1 %v13432_v9  ;;  %12333 = vmatprep.mubr.msk.bf16.mxu1 %vm13753_vm3, %v13751_v11 }
 0x666   : > { %12331 = vmatprep.subr.bf16.mxu1 %v13751_v11 }
 0x669   : > { %12332 = vmatpush3.bf16.msra.mxu1 %v13433_v13 }
 0x66a   : > { %12345 = vmatprep.subr.bf16.mxu1 %v13751_v11 }
 0x66c   : > { %12334 = vmatmul.mubr.msk.bf16.vlgmr.msra.gmra.mrb[28].mxu1 %vm1129_vm6, %v13983_v41 }
 0x66d   : > { %12347 = vmatprep.mubr.msk.bf16.mxu1 %vm13753_vm3, %v13751_v11 }
 0x6e8   : > { %v1672_v16 = vpop.xlane.xlu1 %1671 }
 0x6e9   : > { %v1673_v17 = vmax.f32 %v1672_v16, 1e-30 }
 0x6eb   : > { %13596 = vrcp.f32 %v1673_v17  ;;  %v13439_v17 = vld [vmem:[%s13792_s29 + $0x38] sm:$0xff]  }
 0x6f5   : > { %v13597_v18 = vpop.eup %13596 }
 0x72f   : > { %v1717_v19 = vpop.f32.mrb[20].mxu1 }
 0x730   : > { %v1723_v20 = vmul.f32 %v13597_v18, %v1717_v19  ;;  %v12307_v21 = vpop.f32.mrb[21].mxu1  ;;  %v13440_v18 = vld [vmem:[%s13792_s29 + $0xb0] sm:$0xff]   ;;  %v13441_v19 = vld [vmem:[%s13792_s29 + $0xb8] sm:$0xff]  }
 0x731   : > { %v1720_v22 = vpop.f32.mrb[22].mxu1 }
 0x732   : > { %v1726_v24 = vpack.c.bf16 %v1723_v20, %v1723_v20  ;;  %v12308_v25 = vpop.f32.mrb[23].mxu1  ;;  %v11022_v20 = vld [vmem:[%s13802_s8 + $0x8] sm:$0xf] }
 0x733   : > { %v2129_v21 = vsel %vm1374_vm7, %v11022_v20, 0 }
 0x734   : > { %12312 = vmatmul.mubr.msk.bf16.vlgmr.msra.gmra.mrb[20].mxu0 %vm1311_vm8, %v1726_v24 }
 0x735   : > { %12322 = vmatpush3.bf16.msra.mxu0 %v13434_v23  ;;  %12325 = vmatprep.mubr.msk.bf16.mxu0 %vm13753_vm3, %v13751_v11 }
 0x736   : > { %12323 = vmatprep.subr.bf16.mxu0 %v13751_v11 }
 0x737   : > { %v1813_v29 = vpop.f32.mrb[24].mxu1 }
 0x738   : > { %v12319_v30 = vpop.f32.mrb[25].mxu1 }
 0x739   : > { %v1816_v31 = vpop.f32.mrb[26].mxu1  ;;  %12324 = vmatpush3.bf16.msra.mxu0 %v13435_v28 }
 0x73a   : > { %v12320_v33 = vpop.f32.mrb[27].mxu1  ;;  %12337 = vmatprep.subr.bf16.mxu0 %v13751_v11  ;;  %v13442_v31 = vld [vmem:[%s13792_s29 + $0x70] sm:$0xff]  }
 0x73c   : > { %12326 = vmatmul.mubr.msk.bf16.vlgmr.msra.gmra.mrb[24].mxu0 %vm1129_vm6, %v13983_v41 }
 0x73d   : > { %12338 = vmatpush3.bf16.msra.mxu0 %v13436_v32  ;;  %12341 = vmatprep.mubr.msk.bf16.mxu0 %vm13753_vm3, %v13751_v11 }
 0x73e   : > { %12339 = vmatprep.subr.bf16.mxu0 %v13751_v11 }
 0x73f   : > { %v1943_v36 = vpop.f32.mrb[28].mxu1 }
 0x740   : > { %v1944_v37 = vadd.f32 %v11007_v34, %v1943_v36  ;;  %v12335_v38 = vpop.f32.mrb[29].mxu1  ;;  %v13443_v34 = vld [vmem:[%s13792_s29 + $0x78] sm:$0xff]  }
 0x741   : > { %v1946_v40 = vpop.f32.mrb[30].mxu1  ;;  %12340 = vmatpush3.bf16.msra.mxu0 %v13437_v35 }
 0x742   : > { %v2015_v42 = vpack.c.bf16 %v1944_v37, %v1944_v37  ;;  %v12336_v43 = vpop.f32.mrb[31].mxu1  ;;  %12351 = vmatprep.subr.bf16.mxu0 %v13751_v11  ;;  %v11047_v40 = vld [vmem:[%s15329_s3 + $0xb] ss:$0 sm:$0xff] }
 0x744   : > { %12342 = vmatmul.mubr.msk.bf16.vlgmr.msra.gmra.mrb[28].mxu0 %vm1129_vm6, %v13983_v41  ;;  %v2020_v44 = vsel %vm1311_vm8, %v2015_v42, 0 }
 0x745   : > { %12346 = vmatpush3.bf16.xpose.msra.mxu1 %v2020_v44  ;;  %12353 = vmatprep.mubr.msk.bf16.mxu0 %vm13753_vm3, %v13751_v11 }
 0x746   : > { %12357 = vmatprep.subr.bf16.mxu1 %v13751_v11 }
 0x807   : > { %v1767_v45 = vpop.f32.mrb[20].mxu0 }
 0x808   : > { %v14095_v46 = vadd.f32 %v1813_v29, %v1767_v45  ;;  %v12313_v47 = vpop.f32.mrb[21].mxu0 }
 0x809   : > { %v1770_v48 = vpop.f32.mrb[22].mxu0 }
 0x80a   : > { %v12314_v49 = vpop.f32.mrb[23].mxu0 }
 0x80f   : > { %v1878_v51 = vpop.f32.mrb[24].mxu0 }
 0x810   : > { %v1879_v52 = vadd.f32 %v10998_v50, %v1878_v51  ;;  %v12327_v53 = vpop.f32.mrb[25].mxu0 }
 0x811   : > { %v1881_v54 = vpop.f32.mrb[26].mxu0 }
 0x812   : > { %v2014_v55 = vpack.c.bf16 %v1879_v52, %v1879_v52  ;;  %v12328_v56 = vpop.f32.mrb[27].mxu0  ;;  %v11038_v54 = vld [vmem:[%s15329_s3 + $0x7] ss:$0 sm:$0xff] }
 0x814   : > { %12348 = vmatmul.mubr.msk.bf16.vlgmr.msra.gmra.mrb[32].mxu1 %vm1311_vm8, %v2014_v55 }
 0x815   : > { %12359 = vmatprep.mubr.msk.bf16.mxu1 %vm13753_vm3, %v13751_v11  ;;  %12358 = vmatpush3.bf16.msra.mxu1 %v2129_v21 }
 0x816   : > { %12371 = vmatprep.subr.bf16.mxu1 %v13751_v11 }
 0x817   : > { %v2008_v58 = vpop.f32.mrb[28].mxu0 }
 0x818   : > { %v2009_v59 = vadd.f32 %v11016_v57, %v2008_v58  ;;  %v12343_v60 = vpop.f32.mrb[29].mxu0 }
 0x819   : > { %v2011_v61 = vpop.f32.mrb[30].mxu0 }
 0x81a   : > { %v2074_v62 = vpack.c.bf16 %v2009_v59, %v2009_v59  ;;  %v12344_v63 = vpop.f32.mrb[31].mxu0  ;;  %v11029_v61 = vld [vmem:[%s15329_s3 + $0x3] ss:$0 sm:$0xff] }
 0x81c   : > { %v2079_v0 = vsel %vm1374_vm7, %v2074_v62, 0 }
 0x81d   : > { %12352 = vmatpush3.bf16.msra.mxu0 %v2079_v0 }
 0x81e   : > { %12363 = vmatprep.subr.bf16.mxu0 %v13751_v11 }
 0x8e7   : > { %v2056_v1 = vpop.f32.mrb[32].mxu1 }
 0x8e8   : > { %v12349_v2 = vpop.f32.mrb[33].mxu1  ;;  %v2057_v3 = vadd.f32 %v2056_v1, %v13956_v27 }
 0x8e9   : > { %v2059_v4 = vpop.f32.mrb[34].mxu1 }
 0x8ea   : > { %v12350_v6 = vpop.f32.mrb[35].mxu1  ;;  %v2062_v7 = vsel %vm1311_vm8, %v2057_v3, -inf }
 0x8eb   : > { %2063 = vmax.xlane.f32.xlu1 %v2062_v7 }
 0x978   : > { %v2064_v8 = vpop.xlane.xlu1 %2063 }
 0x979   : > { %v2065_v9 = vsub.f32 %v2057_v3, %v2064_v8 }
 0x97b   : > { %v2066_v12 = vmul.f32 1.442695, %v2065_v9 }
 0x97d   : > { %13598 = vpow2.f32 %v2066_v12 }
 0x987   : > { %v13599_v13 = vpop.eup %13598 }
 0x988   : > { %v2068_v15 = vsel %vm1311_vm8, %v13599_v13, 0.0  ;;  %v2073_v16 = vpack.c.bf16 %v13599_v13, %v13599_v13 }
 0x989   : > { %2069 = vadd.xlane.f32.xlu1 %v2068_v15  ;;  %v11053_v15 = vld [vmem:[%s13802_s8 + $0xc] sm:$0xf] }
 0x98a   : > { %12354 = vmatmul.mubr.msk.bf16.vlgmr.msra.gmra.mrb[32].mxu0 %vm1311_vm8, %v2073_v16  ;;  %v2482_v16 = vsel %vm1374_vm7, %v11053_v15, 0 }
 0x98b   : > { %12364 = vmatpush3.bf16.msra.mxu0 %v13438_v14  ;;  %12367 = vmatprep.mubr.msk.bf16.mxu0 %vm13753_vm3, %v13751_v11 }
 0x98c   : > { %12365 = vmatprep.subr.bf16.mxu0 %v13751_v11 }
 0x98f   : > { %12366 = vmatpush3.bf16.msra.mxu0 %v13439_v17 }
 0x990   : > { %12379 = vmatprep.subr.bf16.mxu0 %v13751_v11 }
 0x992   : > { %12368 = vmatmul.mubr.msk.bf16.vlgmr.msra.gmra.mrb[36].mxu0 %vm1129_vm6, %v13983_v41 }
 0x993   : > { %12380 = vmatpush3.bf16.msra.mxu0 %v13440_v18  ;;  %12383 = vmatprep.mubr.msk.bf16.mxu0 %vm13753_vm3, %v13751_v11 }
 0x994   : > { %12381 = vmatprep.subr.bf16.mxu0 %v13751_v11 }
 0x997   : > { %12382 = vmatpush3.bf16.msra.mxu0 %v13441_v19 }
 0x998   : > { %12393 = vmatprep.subr.bf16.mxu0 %v13751_v11 }
 0x99a   : > { %12384 = vmatmul.mubr.msk.bf16.vlgmr.msra.gmra.mrb[40].mxu0 %vm1129_vm6, %v13983_v41 }
 0x99b   : > { %12395 = vmatprep.mubr.msk.bf16.mxu0 %vm13753_vm3, %v13751_v11 }
 0xa16   : > { %v2070_v22 = vpop.xlane.xlu1 %2069 }
 0xa17   : > { %v2071_v23 = vmax.f32 %v2070_v22, 1e-30 }
 0xa19   : > { %13600 = vrcp.f32 %v2071_v23 }
 0xa23   : > { %v13601_v24 = vpop.eup %13600 }
 0xa5d   : > { %v2115_v25 = vpop.f32.mrb[32].mxu0 }
 0xa5e   : > { %v2121_v28 = vmul.f32 %v13601_v24, %v2115_v25  ;;  %v12355_v29 = vpop.f32.mrb[33].mxu0 }
 0xa5f   : > { %v2118_v30 = vpop.f32.mrb[34].mxu0  ;;  %v11055_v29 = vld [vmem:[%s13807_s14] ss:$0 sm:$0xff] }
 0xa60   : > { %v2124_v32 = vpack.c.bf16 %v2121_v28, %v2121_v28  ;;  %v12356_v33 = vpop.f32.mrb[35].mxu0 }
 0xa62   : > { %12360 = vmatmul.mubr.msk.bf16.vlgmr.msra.gmra.mrb[36].mxu1 %vm1311_vm8, %v2124_v32 }
 0xa63   : > { %12372 = vmatpush3.bf16.msra.mxu1 %v13442_v31  ;;  %12375 = vmatprep.mubr.msk.bf16.mxu1 %vm13753_vm3, %v13751_v11 }
 0xa64   : > { %12373 = vmatprep.subr.bf16.mxu1 %v13751_v11 }
 0xa65   : > { %v2231_v35 = vpop.f32.mrb[36].mxu0 }
 0xa66   : > { %v12369_v36 = vpop.f32.mrb[37].mxu0  ;;  %v2232_v63 = vadd.f32 %v11029_v61, %v2231_v35 }
 0xa67   : > { %v2234_v37 = vpop.f32.mrb[38].mxu0  ;;  %12374 = vmatpush3.bf16.msra.mxu1 %v13443_v34 }
 0xa68   : > { %v12370_v38 = vpop.f32.mrb[39].mxu0  ;;  %12387 = vmatprep.subr.bf16.mxu1 %v13751_v11  ;;  %v2367_v0 = vpack.c.bf16 %v2232_v63, %v2232_v63 }
 0xa6a   : > { %12376 = vmatmul.mubr.msk.bf16.vlgmr.msra.gmra.mrb[40].mxu1 %vm1129_vm6, %v13983_v41 }
 0xa6b   : > { %12389 = vmatprep.mubr.msk.bf16.mxu1 %vm13753_vm3, %v13751_v11 }
 0xa6d   : > { %v2361_v42 = vpop.f32.mrb[40].mxu0 }
 0xa6e   : > { %v2362_v43 = vadd.f32 %v11047_v40, %v2361_v42  ;;  %v12385_v44 = vpop.f32.mrb[41].mxu0 }
 0xa6f   : > { %v2364_v45 = vpop.f32.mrb[42].mxu0  ;;  %v13444_v44 = vld [vmem:[%s13822_s30] sm:$0xff]  }
 0xa70   : > { %v2427_v47 = vpack.c.bf16 %v2362_v43, %v2362_v43  ;;  %v12386_v48 = vpop.f32.mrb[43].mxu0  ;;  %v13445_v45 = vld [vmem:[%s13822_s30 + $0x8] sm:$0xff]  }
 0xa72   : > { %v2432_v49 = vsel %vm1374_vm7, %v2427_v47, 0  ;;  %v13447_v47 = vld [vmem:[%s13832_s12 + $0x8] sm:$0xff]  }
 0xa73   : > { %12394 = vmatpush3.bf16.msra.mxu0 %v2432_v49 }
 0xa74   : > { %12405 = vmatprep.subr.bf16.mxu0 %v13751_v11 }
 0xb35   : > { %v2165_v50 = vpop.f32.mrb[36].mxu1 }
 0xb36   : > { %v2171_v41 = vadd.f32 %v2165_v50, %v14095_v46  ;;  %v12361_v51 = vpop.f32.mrb[37].mxu1 }
 0xb37   : > { %v2168_v52 = vpop.f32.mrb[38].mxu1  ;;  %v11056_v51 = vld [vmem:[%s13812_s19] ss:$0 sm:$0xff] }
 0xb38   : > { %v12362_v53 = vpop.f32.mrb[39].mxu1 }
 0xb39   : > { %v11057_v53 = vld [vmem:[%s13817_s24] ss:$0 sm:$0xff] }
 0xb3d   : > { %v2296_v55 = vpop.f32.mrb[40].mxu1 }
 0xb3e   : > { %v2297_v56 = vadd.f32 %v11038_v54, %v2296_v55  ;;  %v12377_v57 = vpop.f32.mrb[41].mxu1 }
 0xb3f   : > { %v2299_v58 = vpop.f32.mrb[42].mxu1  ;;  %v13448_v57 = vld [vmem:[%s13832_s12 + $0x10] sm:$0xff]  }
 0xb40   : > { %v2368_v59 = vpack.c.bf16 %v2297_v56, %v2297_v56  ;;  %v12378_v60 = vpop.f32.mrb[43].mxu1  ;;  %v13449_v58 = vld [vmem:[%s13832_s12 + $0x18] sm:$0xff]  }
 0xb42   : > { %v2373_v62 = vsel %vm1311_vm8, %v2368_v59, 0  ;;  %v11058_v59 = vld [vmem:[%s13827_s6] ss:$0 sm:$0xff] }
 0xb43   : > { %12388 = vmatpush3.bf16.xpose.msra.mxu1 %v2373_v62 }
 0xb44   : > { %12399 = vmatprep.subr.bf16.mxu1 %v13751_v11 }
 0xb4a   : > { %12390 = vmatmul.mubr.msk.bf16.vlgmr.msra.gmra.mrb[44].mxu1 %vm1311_vm8, %v2367_v0 }
 0xb4b   : > { %12401 = vmatprep.mubr.msk.bf16.mxu1 %vm13753_vm3, %v13751_v11  ;;  %12400 = vmatpush3.bf16.msra.mxu1 %v2482_v16 }
 0xb4c   : > { %12413 = vmatprep.subr.bf16.mxu1 %v13751_v11 }
 0xc1d   : > { %v2409_v46 = vpop.f32.mrb[44].mxu1 }
 0xc1e   : > { %v12391_v1 = vpop.f32.mrb[45].mxu1  ;;  %v2410_v2 = vadd.f32 %v2409_v46, %v13956_v27 }
 0xc1f   : > { %v2412_v3 = vpop.f32.mrb[46].mxu1 }
 0xc20   : > { %v12392_v4 = vpop.f32.mrb[47].mxu1  ;;  %v2415_v6 = vsel %vm1311_vm8, %v2410_v2, -inf }
 0xc21   : > { %2416 = vmax.xlane.f32.xlu1 %v2415_v6 }
 0xcae   : > { %v2417_v7 = vpop.xlane.xlu1 %2416 }
 0xcaf   : > { %v2418_v8 = vsub.f32 %v2410_v2, %v2417_v7  ;;  %v11062_v2 = vld [vmem:[%s15330_s28] ss:$0 sm:$0xff] }
 0xcb1   : > { %v2419_v9 = vmul.f32 1.442695, %v2418_v8 }
 0xcb3   : > { %13602 = vpow2.f32 %v2419_v9 }
 0xcbd   : > { %v13603_v12 = vpop.eup %13602 }
 0xcbe   : > { %v2421_v13 = vsel %vm1311_vm8, %v13603_v12, 0.0  ;;  %v2426_v14 = vpack.c.bf16 %v13603_v12, %v13603_v12 }
 0xcbf   : > { %2422 = vadd.xlane.f32.xlu1 %v2421_v13 }
 0xcc0   : > { %12396 = vmatmul.mubr.msk.bf16.vlgmr.msra.gmra.mrb[44].mxu0 %vm1311_vm8, %v2426_v14 }
 0xcc1   : > { %12409 = vmatprep.mubr.msk.bf16.mxu0 %vm13753_vm3, %v13751_v11  ;;  %12406 = vmatpush3.bf16.msra.mxu0 %v13444_v44 }
 0xcc2   : > { %12407 = vmatprep.subr.bf16.mxu0 %v13751_v11 }
 0xcc5   : > { %12408 = vmatpush3.bf16.msra.mxu0 %v13445_v45 }
 0xcc6   : > { %12425 = vmatprep.subr.bf16.mxu0 %v13751_v11 }
 0xd4c   : > { %v2423_v17 = vpop.xlane.xlu1 %2422 }
 0xd4d   : > { %v2424_v18 = vmax.f32 %v2423_v17, 1e-30 }
 0xd4f   : > { %13604 = vrcp.f32 %v2424_v18  ;;  %v13450_v18 = vld [vmem:[%s13792_s29 + $0xc0] sm:$0xff]  }
 0xd59   : > { %v13605_v19 = vpop.eup %13604 }
 0xd93   : > { %v2468_v20 = vpop.f32.mrb[44].mxu0 }
 0xd94   : > { %v2474_v21 = vmul.f32 %v13605_v19, %v2468_v20  ;;  %v12397_v22 = vpop.f32.mrb[45].mxu0  ;;  %v13451_v19 = vld [vmem:[%s13792_s29 + $0x140] sm:$0xff]   ;;  %v13452_v20 = vld [vmem:[%s13792_s29 + $0xc8] sm:$0xff]  }
 0xd95   : > { %v2471_v23 = vpop.f32.mrb[46].mxu0 }
 0xd96   : > { %v2477_v24 = vpack.c.bf16 %v2474_v21, %v2474_v21  ;;  %v12398_v25 = vpop.f32.mrb[47].mxu0  ;;  %v13453_v21 = vld [vmem:[%s13792_s29 + $0x148] sm:$0xff]  }
 0xd98   : > { %12402 = vmatmul.mubr.msk.bf16.vlgmr.msra.gmra.mrb[48].mxu1 %vm1311_vm8, %v2477_v24 }
 0xd99   : > { %12421 = vmatprep.mubr.msk.bf16.mxu1 %vm13753_vm3, %v13751_v11 }
 0xe6b   : > { %v2518_v28 = vpop.f32.mrb[48].mxu1 }
 0xe6c   : > { %v2524_v30 = vadd.f32 %v2518_v28, %v2171_v41  ;;  %v12403_v31 = vpop.f32.mrb[49].mxu1  ;;  %v11070_v28 = vld [vmem:[%s13812_s19 + $0x1] ss:$0 sm:$0xff] }
 0xe6d   : > { %v2521_v32 = vpop.f32.mrb[50].mxu1 }
 0xe6e   : > { %v12404_v33 = vpop.f32.mrb[51].mxu1  ;;  %v2532_v34 = vadd.f32 %v11055_v29, %v2524_v30  ;;  %v11071_v30 = vld [vmem:[%s13817_s24 + $0x1] ss:$0 sm:$0xff] }
 0xe6f   : > { %v13454_v33 = vld [vmem:[%s13792_s29 + $0x100] sm:$0xff]  }
 0xe70   : > { %v2533_v35 = vadd.f32 %v2532_v34, %v13978_v39  ;;  %v13446_v39 = vld [vmem:[%s13832_s12] sm:$0xff]  }
 0xe71   : > { %12414 = vmatpush3.bf16.msra.mxu1 %v13446_v39 }
 0xe72   : > { %v2536_v36 = vsel %vm1129_vm6, %v2533_v35, 0.0  ;;  %12415 = vmatprep.subr.bf16.mxu1 %v13751_v11 }
 0xe73   : > { %2537 = vadd.xlane.f32.xlu1 %v2536_v36  ;;  %v11095_v36 = vld [vmem:[%s15329_s3 + $0x14] ss:$0 sm:$0xff] }
 0xe75   : > { %12416 = vmatpush3.bf16.msra.mxu1 %v13447_v47 }
 0xe76   : > { %12417 = vmatprep.subr.bf16.mxu1 %v13751_v11 }
 0xe79   : > { %12418 = vmatpush3.bf16.msra.mxu1 %v13448_v57 }
 0xe7a   : > { %12419 = vmatprep.subr.bf16.mxu1 %v13751_v11 }
 0xe7d   : > { %12420 = vmatpush3.bf16.msra.mxu1 %v13449_v58 }
 0xe7e   : > { %12441 = vmatprep.subr.bf16.mxu1 %v13751_v11 }
 0xf00   : > { %v2538_v37 = vpop.xlane.xlu1 %2537 }
 0xf01   : > { %v2540_v38 = vmul.f32 0.03125, %v2538_v37 }
 0xf03   : > { %v2541_v40 = vsub.f32 %v2533_v35, %v2540_v38  ;;  %v13455_v35 = vld [vmem:[%s13792_s29 + $0x108] sm:$0xff]  }
 0xf05   : > { %v2542_v42 = vmul.f32 %v2541_v40, %v2541_v40 }
 0xf07   : > { %v2543_v43 = vsel %vm1129_vm6, %v2542_v42, 0.0 }
 0xf08   : > { %2544 = vadd.xlane.f32.xlu1 %v2543_v43 }
 0xf95   : > { %v2545_v48 = vpop.xlane.xlu1 %2544 }
 0xf96   : > { %v2546_v49 = vmul.f32 0.03125, %v2545_v48 }
 0xf98   : > { %v2547_v50 = vadd.f32 1e-05, %v2546_v49 }
 0xf9a   : > { %13606 = vrsqrt.f32 %v2547_v50  ;;  %v11086_v50 = vld [vmem:[%s15329_s3 + $0x10] ss:$0 sm:$0xff] }
 0xfa4   : > { %v13607_v41 = vpop.eup %13606 }
 0xfa5   : > { %v2549_v52 = vmul.f32 %v13607_v41, %v2541_v40 }
 0xfa7   : > { %v2556_v54 = vmul.f32 %v11056_v51, %v2549_v52 }
 0xfa9   : > { %v2563_v55 = vadd.f32 %v11057_v53, %v2556_v54 }
 0xfab   : > { %v2568_v56 = vpack.c.bf16 %v2563_v55, %v2563_v55 }
 0xfad   : > { %12410 = vmatmul.mubr.msk.bf16.vlgmr.msra.gmra.mrb[48].mxu0 %vm1129_vm6, %v2568_v56  ;;  %v11077_v56 = vld [vmem:[%s15329_s3 + $0xc] ss:$0 sm:$0xff] }
 0xfae   : > { %12429 = vmatprep.mubr.msk.bf16.mxu0 %vm13753_vm3, %v13751_v11  ;;  %12426 = vmatpush3.bf16.msra.mxu0 %v13450_v18 }
 0xfaf   : > { %12427 = vmatprep.subr.bf16.mxu0 %v13751_v11 }
 0xfb2   : > { %12428 = vmatpush3.bf16.msra.mxu0 %v13452_v20 }
 0xfb3   : > { %12433 = vmatprep.subr.bf16.mxu0 %v13751_v11 }
0x1080   : > { %v2625_v60 = vpop.f32.mrb[48].mxu0 }
0x1081   : > { %v2626_v61 = vadd.f32 %v11058_v59, %v2625_v60  ;;  %v12411_v62 = vpop.f32.mrb[49].mxu0  ;;  %v13456_v59 = vld [vmem:[%s13792_s29 + $0xd0] sm:$0xff]  }
0x1082   : > { %v2628_v63 = vpop.f32.mrb[50].mxu0  ;;  %v13458_v62 = vld [vmem:[%s13792_s29 + $0x150] sm:$0xff]  }
0x1083   : > { %v2631_v0 = vmax.f32 %v2626_v61, 0.0  ;;  %v12412_v46 = vpop.f32.mrb[51].mxu0  ;;  %v13457_v61 = vld [vmem:[%s13792_s29 + $0xd8] sm:$0xff]  }
0x1084   : > { %v13459_v63 = vld [vmem:[%s13792_s29 + $0x158] sm:$0xff]  }
0x1085   : > { %v2640_v1 = vpack.c.bf16 %v2631_v0, %v2631_v0 }
0x1087   : > { %12422 = vmatmul.mubr.msk.bf16.vlgmr.msra.gmra.mrb[52].mxu1 %vm1023_vm4, %v2640_v1 }
0x1088   : > { %12445 = vmatprep.mubr.msk.bf16.mxu1 %vm13753_vm3, %v13751_v11  ;;  %12442 = vmatpush3.bf16.msra.mxu1 %v13451_v19 }
0x1089   : > { %12443 = vmatprep.subr.bf16.mxu1 %v13751_v11 }
0x108c   : > { %12444 = vmatpush3.bf16.msra.mxu1 %v13453_v21 }
0x108d   : > { %12455 = vmatprep.subr.bf16.mxu1 %v13751_v11 }
0x115a   : > { %v2709_v3 = vpop.f32.mrb[52].mxu1 }
0x115b   : > { %v2710_v4 = vadd.f32 %v11062_v2, %v2709_v3  ;;  %v12423_v6 = vpop.f32.mrb[53].mxu1 }
0x115c   : > { %v2712_v7 = vpop.f32.mrb[54].mxu1 }
0x115d   : > { %v12424_v8 = vpop.f32.mrb[55].mxu1  ;;  %v2715_v9 = vadd.f32 %v2710_v4, %v2563_v55 }
0x115f   : > { %v2720_v12 = vsel %vm1129_vm6, %v2715_v9, 0.0 }
0x1160   : > { %2721 = vadd.xlane.f32.xlu0 %v2720_v12  ;;  %v11125_v12 = vld [vmem:[%s15329_s3 + $0x15] ss:$0 sm:$0xff] }
0x11ed   : > { %v2722_v13 = vpop.xlane.xlu0 %2721 }
0x11ee   : > { %v2723_v14 = vmul.f32 0.03125, %v2722_v13 }
0x11f0   : > { %v2724_v15 = vsub.f32 %v2715_v9, %v2723_v14 }
0x11f2   : > { %v2725_v16 = vmul.f32 %v2724_v15, %v2724_v15 }
0x11f4   : > { %v2726_v17 = vsel %vm1129_vm6, %v2725_v16, 0.0 }
0x11f5   : > { %2727 = vadd.xlane.f32.xlu1 %v2726_v17 }
0x1282   : > { %v2728_v22 = vpop.xlane.xlu1 %2727 }
0x1283   : > { %v2729_v23 = vmul.f32 0.03125, %v2728_v22 }
0x1285   : > { %v2730_v24 = vadd.f32 1e-05, %v2729_v23 }
0x1287   : > { %13608 = vrsqrt.f32 %v2730_v24  ;;  %v13460_v24 = vld [vmem:[%s13792_s29 + $0x110] sm:$0xff]  }
0x1291   : > { %v13609_v25 = vpop.eup %13608 }
0x1292   : > { %v2732_v29 = vmul.f32 %v13609_v25, %v2724_v15 }
0x1294   : > { %v2739_v31 = vmul.f32 %v11070_v28, %v2732_v29  ;;  %v13461_v29 = vld [vmem:[%s13792_s29 + $0x118] sm:$0xff]  }
0x1296   : > { %v14201_v32 = vadd.f32 %v11071_v30, %v2739_v31 }
0x1298   : > { %v14206_v34 = vpack.c.bf16 %v14201_v32, %v14201_v32 }
0x129a   : > { %12430 = vmatmul.mubr.msk.bf16.vlgmr.msra.gmra.mrb[52].mxu0 %vm1129_vm6, %v14206_v34  ;;  %12446 = vmatmul.mubr.msk.bf16.vlgmr.msra.gmra.mrb[56].mxu1 %vm1129_vm6, %v14206_v34 }
0x129b   : > { %12434 = vmatpush3.bf16.msra.mxu0 %v13454_v33  ;;  %12437 = vmatprep.mubr.msk.bf16.mxu0 %vm13753_vm3, %v13751_v11 }
0x129c   : > { %12435 = vmatprep.subr.bf16.mxu0 %v13751_v11  ;;  %12457 = vmatprep.mubr.msk.bf16.mxu1 %vm13753_vm3, %v13751_v11 }
0x129f   : > { %12436 = vmatpush3.bf16.msra.mxu0 %v13455_v35 }
0x12a0   : > { %12449 = vmatprep.subr.bf16.mxu0 %v13751_v11 }
0x12a2   : > { %12438 = vmatmul.mubr.msk.bf16.vlgmr.msra.gmra.mrb[56].mxu0 %vm1129_vm6, %v14206_v34 }
0x12a3   : > { %12451 = vmatprep.mubr.msk.bf16.mxu0 %vm13753_vm3, %v13751_v11 }
0x136d   : > { %v2810_v37 = vpop.f32.mrb[52].mxu0  ;;  %v2940_v38 = vpop.f32.mrb[56].mxu1 }
0x136e   : > { %v2941_v40 = vadd.f32 %v11095_v36, %v2940_v38  ;;  %v12431_v42 = vpop.f32.mrb[53].mxu0  ;;  %v12447_v43 = vpop.f32.mrb[57].mxu1  ;;  %v2811_v58 = vadd.f32 %v11077_v56, %v2810_v37  ;;  %v11116_v36 = vld [vmem:[%s15329_s3 + $0x11] ss:$0 sm:$0xff] }
0x136f   : > { %v2813_v44 = vpop.f32.mrb[54].mxu0  ;;  %v2943_v45 = vpop.f32.mrb[58].mxu1 }
0x1370   : > { %v3006_v39 = vpack.c.bf16 %v2941_v40, %v2941_v40  ;;  %v12432_v47 = vpop.f32.mrb[55].mxu0  ;;  %v12448_v48 = vpop.f32.mrb[59].mxu1  ;;  %v2946_v60 = vpack.c.bf16 %v2811_v58, %v2811_v58  ;;  %v11107_v45 = vld [vmem:[%s15329_s3 + $0xd] ss:$0 sm:$0xff] }
0x1372   : > { %v3011_v49 = vsel %vm1374_vm7, %v3006_v39, 0 }
0x1373   : > { %12456 = vmatpush3.bf16.msra.mxu1 %v3011_v49 }
0x1374   : > { %12469 = vmatprep.subr.bf16.mxu1 %v13751_v11 }
0x1375   : > { %v2875_v41 = vpop.f32.mrb[56].mxu0 }
0x1376   : > { %v2876_v51 = vadd.f32 %v11086_v50, %v2875_v41  ;;  %v12439_v52 = vpop.f32.mrb[57].mxu0 }
0x1377   : > { %v2878_v53 = vpop.f32.mrb[58].mxu0 }
0x1378   : > { %v2947_v54 = vpack.c.bf16 %v2876_v51, %v2876_v51  ;;  %v12440_v55 = vpop.f32.mrb[59].mxu0 }
0x137a   : > { %v2952_v57 = vsel %vm1311_vm8, %v2947_v54, 0 }
0x137b   : > { %12450 = vmatpush3.bf16.xpose.msra.mxu0 %v2952_v57 }
0x137c   : > { %12461 = vmatprep.subr.bf16.mxu0 %v13751_v11 }
0x1382   : > { %12452 = vmatmul.mubr.msk.bf16.vlgmr.msra.gmra.mrb[60].mxu0 %vm1311_vm8, %v2946_v60 }
0x1383   : > { %12462 = vmatpush3.bf16.msra.mxu0 %v13456_v59  ;;  %12465 = vmatprep.mubr.msk.bf16.mxu0 %vm13753_vm3, %v13751_v11  ;;  %v11101_v59 = vld [vmem:[%s13802_s8 + $0x10] sm:$0xf] }
0x1384   : > { %12463 = vmatprep.subr.bf16.mxu0 %v13751_v11 }
0x1387   : > { %12464 = vmatpush3.bf16.msra.mxu0 %v13457_v61 }
0x1388   : > { %12477 = vmatprep.subr.bf16.mxu0 %v13751_v11 }
0x138a   : > { %12466 = vmatmul.mubr.msk.bf16.vlgmr.msra.gmra.mrb[64].mxu0 %vm1129_vm6, %v14206_v34 }
0x138b   : > { %12478 = vmatpush3.bf16.msra.mxu0 %v13458_v62  ;;  %12481 = vmatprep.mubr.msk.bf16.mxu0 %vm13753_vm3, %v13751_v11 }
0x138c   : > { %12479 = vmatprep.subr.bf16.mxu0 %v13751_v11 }
0x138f   : > { %12480 = vmatpush3.bf16.msra.mxu0 %v13459_v63  ;;  %v3413_v63 = vsel %vm1374_vm7, %v11101_v59, 0 }
0x1390   : > { %12491 = vmatprep.subr.bf16.mxu0 %v13751_v11 }
0x1392   : > { %12482 = vmatmul.mubr.msk.bf16.vlgmr.msra.gmra.mrb[68].mxu0 %vm1129_vm6, %v14206_v34 }
0x1393   : > { %12493 = vmatprep.mubr.msk.bf16.mxu0 %vm13753_vm3, %v13751_v11 }
0x1455   : > { %v2988_v0 = vpop.f32.mrb[60].mxu0 }
0x1456   : > { %v2989_v46 = vadd.f32 %v2988_v0, %v13956_v27  ;;  %v12453_v1 = vpop.f32.mrb[61].mxu0 }
0x1457   : > { %v2991_v2 = vpop.f32.mrb[62].mxu0  ;;  %v13462_v1 = vld [vmem:[%s13792_s29 + $0x120] sm:$0xff]  }
0x1458   : > { %v12454_v3 = vpop.f32.mrb[63].mxu0  ;;  %v2994_v4 = vsel %vm1311_vm8, %v2989_v46, -inf }
0x1459   : > { %2995 = vmax.xlane.f32.xlu0 %v2994_v4  ;;  %v13463_v3 = vld [vmem:[%s13792_s29 + $0x128] sm:$0xff]   ;;  %v11131_v4 = vld [vmem:[%s13802_s8 + $0x14] sm:$0xf] }
0x145d   : > { %v3116_v6 = vpop.f32.mrb[64].mxu0 }
0x145e   : > { %v12467_v7 = vpop.f32.mrb[65].mxu0  ;;  %v3117_v47 = vadd.f32 %v11107_v45, %v3116_v6  ;;  %v3367_v6 = vsel %vm1374_vm7, %v11131_v4, 0  ;;  %v11139_v45 = vld [vmem:[%s15329_s3 + $0xe] ss:$0 sm:$0xff]  ;;  %v13468_v4 = vld [vmem:[%s13792_s29 + $0xf0] sm:$0xff]  }
0x145f   : > { %v3119_v8 = vpop.f32.mrb[66].mxu0 }
0x1460   : > { %v12468_v9 = vpop.f32.mrb[67].mxu0  ;;  %v3252_v48 = vpack.c.bf16 %v3117_v47, %v3117_v47 }
0x1465   : > { %v3246_v13 = vpop.f32.mrb[68].mxu0 }
0x1466   : > { %v3247_v14 = vadd.f32 %v11125_v12, %v3246_v13  ;;  %v12483_v15 = vpop.f32.mrb[69].mxu0 }
0x1467   : > { %v3249_v16 = vpop.f32.mrb[70].mxu0 }
0x1468   : > { %v3312_v17 = vpack.c.bf16 %v3247_v14, %v3247_v14  ;;  %v12484_v18 = vpop.f32.mrb[71].mxu0  ;;  %v13464_v16 = vld [vmem:[%s13792_s29 + $0xe0] sm:$0xff]  }
0x146a   : > { %v3317_v19 = vsel %vm1374_vm7, %v3312_v17, 0 }
0x146b   : > { %12492 = vmatpush3.bf16.msra.mxu0 %v3317_v19  ;;  %v13465_v19 = vld [vmem:[%s13792_s29 + $0xe8] sm:$0xff]  }
0x146c   : > { %12503 = vmatprep.subr.bf16.mxu0 %v13751_v11 }
0x14e6   : > { %v2996_v20 = vpop.xlane.xlu0 %2995 }
0x14e7   : > { %v2997_v21 = vsub.f32 %v2989_v46, %v2996_v20 }
0x14e9   : > { %v2998_v22 = vmul.f32 1.442695, %v2997_v21 }
0x14eb   : > { %13610 = vpow2.f32 %v2998_v22 }
0x14f5   : > { %v13611_v23 = vpop.eup %13610 }
0x14f6   : > { %v3000_v25 = vsel %vm1311_vm8, %v13611_v23, 0.0  ;;  %v3005_v28 = vpack.c.bf16 %v13611_v23, %v13611_v23  ;;  %v13466_v23 = vld [vmem:[%s13792_s29 + $0x160] sm:$0xff]  }
0x14f7   : > { %3001 = vadd.xlane.f32.xlu0 %v3000_v25  ;;  %v11148_v25 = vld [vmem:[%s15329_s3 + $0x12] ss:$0 sm:$0xff] }
0x14f8   : > { %12458 = vmatmul.mubr.msk.bf16.vlgmr.msra.gmra.mrb[60].mxu1 %vm1311_vm8, %v3005_v28  ;;  %v13467_v28 = vld [vmem:[%s13792_s29 + $0x168] sm:$0xff]  }
0x14f9   : > { %12470 = vmatpush3.bf16.msra.mxu1 %v13460_v24  ;;  %12473 = vmatprep.mubr.msk.bf16.mxu1 %vm13753_vm3, %v13751_v11 }
0x14fa   : > { %12471 = vmatprep.subr.bf16.mxu1 %v13751_v11 }
0x14fd   : > { %12472 = vmatpush3.bf16.msra.mxu1 %v13461_v29 }
0x14fe   : > { %12485 = vmatprep.subr.bf16.mxu1 %v13751_v11 }
0x1500   : > { %12474 = vmatmul.mubr.msk.bf16.vlgmr.msra.gmra.mrb[64].mxu1 %vm1129_vm6, %v14206_v34 }
0x1501   : > { %12487 = vmatprep.mubr.msk.bf16.mxu1 %vm13753_vm3, %v13751_v11 }
0x1584   : > { %v3002_v56 = vpop.xlane.xlu0 %3001 }
0x1585   : > { %v3003_v58 = vmax.f32 %v3002_v56, 1e-30 }
0x15cb   : > { %v3047_v30 = vpop.f32.mrb[60].mxu1 }
0x15cc   : > { %v12459_v31 = vpop.f32.mrb[61].mxu1 }
0x15cd   : > { %v3050_v33 = vpop.f32.mrb[62].mxu1 }
0x15ce   : > { %v12460_v35 = vpop.f32.mrb[63].mxu1 }
0x15d3   : > { %v3181_v37 = vpop.f32.mrb[64].mxu1 }
0x15d4   : > { %v3182_v38 = vadd.f32 %v11116_v36, %v3181_v37  ;;  %v12475_v40 = vpop.f32.mrb[65].mxu1 }
0x15d5   : > { %v3184_v42 = vpop.f32.mrb[66].mxu1 }
0x15d6   : > { %v3253_v43 = vpack.c.bf16 %v3182_v38, %v3182_v38  ;;  %v12476_v44 = vpop.f32.mrb[67].mxu1 }
0x15d8   : > { %v3258_v39 = vsel %vm1311_vm8, %v3253_v43, 0 }
0x15d9   : > { %12486 = vmatpush3.bf16.xpose.msra.mxu1 %v3258_v39 }
0x15da   : > { %12497 = vmatprep.subr.bf16.mxu1 %v13751_v11 }
0x15e0   : > { %12488 = vmatmul.mubr.msk.bf16.vlgmr.msra.gmra.mrb[68].mxu1 %vm1311_vm8, %v3252_v48 }
0x15e1   : > { %12499 = vmatprep.mubr.msk.bf16.mxu1 %vm13753_vm3, %v13751_v11  ;;  %12498 = vmatpush3.bf16.msra.mxu1 %v3367_v6 }
0x15e2   : > { %12509 = vmatprep.subr.bf16.mxu1 %v13751_v11 }
0x16b3   : > { %v3294_v49 = vpop.f32.mrb[68].mxu1 }
0x16b4   : > { %v3295_v50 = vadd.f32 %v3294_v49, %v13956_v27  ;;  %v12489_v41 = vpop.f32.mrb[69].mxu1 }
0x16b5   : > { %v3297_v51 = vpop.f32.mrb[70].mxu1 }
0x16b6   : > { %v12490_v52 = vpop.f32.mrb[71].mxu1  ;;  %v3300_v53 = vsel %vm1311_vm8, %v3295_v50, -inf  ;;  %v11157_v51 = vld [vmem:[%s15329_s3 + $0x16] ss:$0 sm:$0xff] }
0x16b7   : > { %3301 = vmax.xlane.f32.xlu1 %v3300_v53 }
0x1744   : > { %v3302_v54 = vpop.xlane.xlu1 %3301 }
0x1745   : > { %v3303_v55 = vsub.f32 %v3295_v50, %v3302_v54 }
0x1747   : > { %v3304_v57 = vmul.f32 1.442695, %v3303_v55 }
0x1749   : > { %13612 = vpow2.f32 %v3304_v57 }
0x174a   : > { %13614 = vrcp.f32 %v3003_v58 }
0x1753   : > { %v13613_v60 = vpop.eup %13612 }
0x1754   : > { %v3306_v61 = vsel %vm1311_vm8, %v13613_v60, 0.0  ;;  %v3311_v62 = vpack.c.bf16 %v13613_v60, %v13613_v60  ;;  %v13615_v0 = vpop.eup %13614 }
0x1755   : > { %3307 = vadd.xlane.f32.xlu1 %v3306_v61  ;;  %v3053_v46 = vmul.f32 %v13615_v0, %v3047_v30 }
0x1756   : > { %12494 = vmatmul.mubr.msk.bf16.vlgmr.msra.gmra.mrb[72].mxu0 %vm1311_vm8, %v3311_v62 }
0x1757   : > { %12504 = vmatpush3.bf16.msra.mxu0 %v3413_v63  ;;  %12505 = vmatprep.mubr.msk.bf16.mxu0 %vm13753_vm3, %v13751_v11  ;;  %v3056_v2 = vpack.c.bf16 %v3053_v46, %v3053_v46 }
0x1758   : > { %12517 = vmatprep.subr.bf16.mxu0 %v13751_v11 }
0x175e   : > { %12506 = vmatmul.mubr.msk.bf16.vlgmr.msra.gmra.mrb[76].mxu0 %vm1311_vm8, %v3056_v2 }
0x175f   : > { %12518 = vmatpush3.bf16.msra.mxu0 %v13462_v1  ;;  %12521 = vmatprep.mubr.msk.bf16.mxu0 %vm13753_vm3, %v13751_v11 }
0x1760   : > { %12519 = vmatprep.subr.bf16.mxu0 %v13751_v11 }
0x1763   : > { %12520 = vmatpush3.bf16.msra.mxu0 %v13463_v3 }
0x1764   : > { %12533 = vmatprep.subr.bf16.mxu0 %v13751_v11 }
0x1766   : > { %12522 = vmatmul.mubr.msk.bf16.vlgmr.msra.gmra.mrb[80].mxu0 %vm1129_vm6, %v14206_v34 }
0x1767   : > { %12535 = vmatprep.mubr.msk.bf16.mxu0 %vm13753_vm3, %v13751_v11 }
0x17e2   : > { %v3308_v7 = vpop.xlane.xlu1 %3307 }
0x17e3   : > { %v3309_v8 = vmax.f32 %v3308_v7, 1e-30 }
0x17e5   : > { %13616 = vrcp.f32 %v3309_v8  ;;  %v13469_v8 = vld [vmem:[%s13792_s29 + $0xf8] sm:$0xff]  }
0x17ef   : > { %v13617_v9 = vpop.eup %13616 }
0x1829   : > { %v3353_v12 = vpop.f32.mrb[72].mxu0 }
0x182a   : > { %v3359_v13 = vmul.f32 %v13617_v9, %v3353_v12  ;;  %v12495_v14 = vpop.f32.mrb[73].mxu0  ;;  %v13470_v9 = vld [vmem:[%s13792_s29 + $0x170] sm:$0xff]   ;;  %v13471_v12 = vld [vmem:[%s13792_s29 + $0x178] sm:$0xff]  }
0x182b   : > { %v3356_v15 = vpop.f32.mrb[74].mxu0 }
0x182c   : > { %v3362_v17 = vpack.c.bf16 %v3359_v13, %v3359_v13  ;;  %v12496_v18 = vpop.f32.mrb[75].mxu0  ;;  %v11163_v13 = vld [vmem:[%s13802_s8 + $0x18] sm:$0xf] }
0x182d   : > { %v3765_v14 = vsel %vm1374_vm7, %v11163_v13, 0 }
0x182e   : > { %12500 = vmatmul.mubr.msk.bf16.vlgmr.msra.gmra.mrb[72].mxu1 %vm1311_vm8, %v3362_v17 }
0x182f   : > { %12510 = vmatpush3.bf16.msra.mxu1 %v13464_v16  ;;  %12513 = vmatprep.mubr.msk.bf16.mxu1 %vm13753_vm3, %v13751_v11 }
0x1830   : > { %12511 = vmatprep.subr.bf16.mxu1 %v13751_v11 }
0x1831   : > { %v3449_v20 = vpop.f32.mrb[76].mxu0 }
0x1832   : > { %v12507_v21 = vpop.f32.mrb[77].mxu0 }
0x1833   : > { %v3452_v22 = vpop.f32.mrb[78].mxu0  ;;  %12512 = vmatpush3.bf16.msra.mxu1 %v13465_v19 }
0x1834   : > { %v12508_v24 = vpop.f32.mrb[79].mxu0  ;;  %12525 = vmatprep.subr.bf16.mxu1 %v13751_v11  ;;  %v13472_v22 = vld [vmem:[%s13792_s29 + $0x130] sm:$0xff]  }
0x1836   : > { %12514 = vmatmul.mubr.msk.bf16.vlgmr.msra.gmra.mrb[76].mxu1 %vm1129_vm6, %v14206_v34 }
0x1837   : > { %12526 = vmatpush3.bf16.msra.mxu1 %v13466_v23  ;;  %12529 = vmatprep.mubr.msk.bf16.mxu1 %vm13753_vm3, %v13751_v11 }
0x1838   : > { %12527 = vmatprep.subr.bf16.mxu1 %v13751_v11 }
0x1839   : > { %v3579_v29 = vpop.f32.mrb[80].mxu0 }
0x183a   : > { %v3580_v30 = vadd.f32 %v11148_v25, %v3579_v29  ;;  %v12523_v31 = vpop.f32.mrb[81].mxu0  ;;  %v13473_v25 = vld [vmem:[%s13792_s29 + $0x138] sm:$0xff]  }
0x183b   : > { %v3582_v33 = vpop.f32.mrb[82].mxu0  ;;  %12528 = vmatpush3.bf16.msra.mxu1 %v13467_v28 }
0x183c   : > { %v3651_v35 = vpack.c.bf16 %v3580_v30, %v3580_v30  ;;  %v12524_v36 = vpop.f32.mrb[83].mxu0  ;;  %12539 = vmatprep.subr.bf16.mxu1 %v13751_v11  ;;  %v11188_v33 = vld [vmem:[%s15329_s3 + $0x17] ss:$0 sm:$0xff] }
0x183e   : > { %v3656_v37 = vsel %vm1311_vm8, %v3651_v35, 0  ;;  %12530 = vmatmul.mubr.msk.bf16.vlgmr.msra.gmra.mrb[80].mxu1 %vm1129_vm6, %v14206_v34 }
0x183f   : > { %12534 = vmatpush3.bf16.xpose.msra.mxu0 %v3656_v37  ;;  %12541 = vmatprep.mubr.msk.bf16.mxu1 %vm13753_vm3, %v13751_v11 }
0x1840   : > { %12545 = vmatprep.subr.bf16.mxu0 %v13751_v11 }
0x1901   : > { %v3403_v38 = vpop.f32.mrb[72].mxu1 }
0x1902   : > { %v14318_v40 = vadd.f32 %v3449_v20, %v3403_v38  ;;  %v12501_v42 = vpop.f32.mrb[73].mxu1 }
0x1903   : > { %v3406_v43 = vpop.f32.mrb[74].mxu1 }
0x1904   : > { %v12502_v44 = vpop.f32.mrb[75].mxu1 }
0x1909   : > { %v3514_v39 = vpop.f32.mrb[76].mxu1 }
0x190a   : > { %v3515_v47 = vadd.f32 %v11139_v45, %v3514_v39  ;;  %v12515_v48 = vpop.f32.mrb[77].mxu1 }
0x190b   : > { %v3517_v49 = vpop.f32.mrb[78].mxu1 }
0x190c   : > { %v3650_v50 = vpack.c.bf16 %v3515_v47, %v3515_v47  ;;  %v12516_v41 = vpop.f32.mrb[79].mxu1  ;;  %v11179_v49 = vld [vmem:[%s15329_s3 + $0x13] ss:$0 sm:$0xff] }
0x190e   : > { %12536 = vmatmul.mubr.msk.bf16.vlgmr.msra.gmra.mrb[84].mxu0 %vm1311_vm8, %v3650_v50 }
0x190f   : > { %12547 = vmatprep.mubr.msk.bf16.mxu0 %vm13753_vm3, %v13751_v11  ;;  %12546 = vmatpush3.bf16.msra.mxu0 %v3765_v14 }
0x1910   : > { %12559 = vmatprep.subr.bf16.mxu0 %v13751_v11 }
0x1911   : > { %v3644_v52 = vpop.f32.mrb[80].mxu1 }
0x1912   : > { %v3645_v53 = vadd.f32 %v11157_v51, %v3644_v52  ;;  %v12531_v54 = vpop.f32.mrb[81].mxu1 }
0x1913   : > { %v3647_v55 = vpop.f32.mrb[82].mxu1 }
0x1914   : > { %v3710_v56 = vpack.c.bf16 %v3645_v53, %v3645_v53  ;;  %v12532_v57 = vpop.f32.mrb[83].mxu1  ;;  %v11170_v55 = vld [vmem:[%s15329_s3 + $0xf] ss:$0 sm:$0xff]  ;;  %s15342_s3 = sld [smem:[#allocation14_spill]] }
0x1916   : > { %v3715_v58 = vsel %vm1374_vm7, %v3710_v56, 0 }
0x1917   : > { %12540 = vmatpush3.bf16.msra.mxu1 %v3715_v58 }
0x1918   : > { %12551 = vmatprep.subr.bf16.mxu1 %v13751_v11 }
0x19e1   : > { %v3692_v59 = vpop.f32.mrb[84].mxu0 }
0x19e2   : > { %v3693_v60 = vadd.f32 %v3692_v59, %v13956_v27  ;;  %v12537_v61 = vpop.f32.mrb[85].mxu0 }
0x19e3   : > { %v3695_v62 = vpop.f32.mrb[86].mxu0 }
0x19e4   : > { %v12538_v63 = vpop.f32.mrb[87].mxu0  ;;  %v3698_v0 = vsel %vm1311_vm8, %v3693_v60, -inf }
0x19e5   : > { %3699 = vmax.xlane.f32.xlu0 %v3698_v0 }
0x1a72   : > { %v3700_v46 = vpop.xlane.xlu0 %3699 }
0x1a73   : > { %v3701_v1 = vsub.f32 %v3693_v60, %v3700_v46 }
0x1a75   : > { %v3702_v2 = vmul.f32 1.442695, %v3701_v1 }
0x1a77   : > { %13618 = vpow2.f32 %v3702_v2 }
0x1a81   : > { %v13619_v3 = vpop.eup %13618 }
0x1a82   : > { %v3704_v6 = vsel %vm1311_vm8, %v13619_v3, 0.0  ;;  %v3709_v7 = vpack.c.bf16 %v13619_v3, %v13619_v3 }
0x1a83   : > { %3705 = vadd.xlane.f32.xlu1 %v3704_v6 }
0x1a84   : > { %12542 = vmatmul.mubr.msk.bf16.vlgmr.msra.gmra.mrb[84].mxu1 %vm1311_vm8, %v3709_v7 }
0x1a85   : > { %12552 = vmatpush3.bf16.msra.mxu1 %v13468_v4  ;;  %12555 = vmatprep.mubr.msk.bf16.mxu1 %vm13753_vm3, %v13751_v11 }
0x1a86   : > { %12553 = vmatprep.subr.bf16.mxu1 %v13751_v11 }
0x1a89   : > { %12554 = vmatpush3.bf16.msra.mxu1 %v13469_v8 }
0x1a8a   : > { %12567 = vmatprep.subr.bf16.mxu1 %v13751_v11 }
0x1a8c   : > { %12556 = vmatmul.mubr.msk.bf16.vlgmr.msra.gmra.mrb[88].mxu1 %vm1129_vm6, %v14206_v34 }
0x1a8d   : > { %12568 = vmatpush3.bf16.msra.mxu1 %v13470_v9  ;;  %12571 = vmatprep.mubr.msk.bf16.mxu1 %vm13753_vm3, %v13751_v11 }
0x1a8e   : > { %12569 = vmatprep.subr.bf16.mxu1 %v13751_v11 }
0x1a91   : > { %12570 = vmatpush3.bf16.msra.mxu1 %v13471_v12 }
0x1a92   : > { %12581 = vmatprep.subr.bf16.mxu1 %v13751_v11 }
0x1a94   : > { %12572 = vmatmul.mubr.msk.bf16.vlgmr.msra.gmra.mrb[92].mxu1 %vm1129_vm6, %v14206_v34 }
0x1a95   : > { %12583 = vmatprep.mubr.msk.bf16.mxu1 %vm13753_vm3, %v13751_v11 }
0x1b10   : > { %v3706_v15 = vpop.xlane.xlu1 %3705 }
0x1b11   : > { %v3707_v16 = vmax.f32 %v3706_v15, 1e-30 }
0x1b13   : > { %13620 = vrcp.f32 %v3707_v16 }
0x1b1d   : > { %v13621_v17 = vpop.eup %13620 }
0x1b57   : > { %v3751_v18 = vpop.f32.mrb[84].mxu1 }
0x1b58   : > { %v3757_v19 = vmul.f32 %v13621_v17, %v3751_v18  ;;  %v12543_v20 = vpop.f32.mrb[85].mxu1 }
0x1b59   : > { %v3754_v21 = vpop.f32.mrb[86].mxu1 }
0x1b5a   : > { %v3760_v23 = vpack.c.bf16 %v3757_v19, %v3757_v19  ;;  %v12544_v24 = vpop.f32.mrb[87].mxu1  ;;  %v11197_v19 = vld [vmem:[%s13807_s14 + $0x1] ss:$0 sm:$0xff] }
0x1b5c   : > { %12548 = vmatmul.mubr.msk.bf16.vlgmr.msra.gmra.mrb[88].mxu0 %vm1311_vm8, %v3760_v23 }
0x1b5d   : > { %12560 = vmatpush3.bf16.msra.mxu0 %v13472_v22  ;;  %12563 = vmatprep.mubr.msk.bf16.mxu0 %vm13753_vm3, %v13751_v11 }
0x1b5e   : > { %12561 = vmatprep.subr.bf16.mxu0 %v13751_v11 }
0x1b5f   : > { %v3867_v28 = vpop.f32.mrb[88].mxu1 }
0x1b60   : > { %v12557_v29 = vpop.f32.mrb[89].mxu1  ;;  %v3868_v57 = vadd.f32 %v11170_v55, %v3867_v28  ;;  %v11235_v55 = vld [vmem:[%s13787_s25 + $0x58] sm:$0xff] }
0x1b61   : > { %v3870_v30 = vpop.f32.mrb[90].mxu1  ;;  %12562 = vmatpush3.bf16.msra.mxu0 %v13473_v25  ;;  %v4418_v29 = vld [vmem:[%s977_s2] sm:$0x3f]  ;;  %s15341_s2 = sld [smem:[#allocation12_spill]] }
0x1b62   : > { %v12558_v31 = vpop.f32.mrb[91].mxu1  ;;  %12575 = vmatprep.subr.bf16.mxu0 %v13751_v11  ;;  %v4003_v58 = vpack.c.bf16 %v3868_v57, %v3868_v57  ;;  %v11236_v57 = vld [vmem:[%s13787_s25 + $0x60] sm:$0xff] }
0x1b64   : > { %12564 = vmatmul.mubr.msk.bf16.vlgmr.msra.gmra.mrb[92].mxu0 %vm1129_vm6, %v14206_v34 }
0x1b65   : > { %12577 = vmatprep.mubr.msk.bf16.mxu0 %vm13753_vm3, %v13751_v11 }
0x1b67   : > { %v3997_v35 = vpop.f32.mrb[92].mxu1 }
0x1b68   : > { %v3998_v36 = vadd.f32 %v11188_v33, %v3997_v35  ;;  %v12573_v37 = vpop.f32.mrb[93].mxu1 }
0x1b69   : > { %v4000_v38 = vpop.f32.mrb[94].mxu1  ;;  %v13474_v37 = vld [vmem:[%s13822_s30 + $0x10] sm:$0xff]  }
0x1b6a   : > { %v4063_v42 = vpack.c.bf16 %v3998_v36, %v3998_v36  ;;  %v12574_v43 = vpop.f32.mrb[95].mxu1  ;;  %v13476_v38 = vld [vmem:[%s13832_s12 + $0x20] sm:$0xff]  }
0x1b6c   : > { %v4068_v44 = vsel %vm1374_vm7, %v4063_v42, 0  ;;  %v13477_v42 = vld [vmem:[%s13832_s12 + $0x28] sm:$0xff]  }
0x1b6d   : > { %12582 = vmatpush3.bf16.msra.mxu1 %v4068_v44 }
0x1b6e   : > { %12593 = vmatprep.subr.bf16.mxu1 %v13751_v11 }
0x1c2f   : > { %v3801_v45 = vpop.f32.mrb[88].mxu0 }
0x1c30   : > { %v3807_v34 = vadd.f32 %v3801_v45, %v14318_v40  ;;  %v12549_v39 = vpop.f32.mrb[89].mxu0 }
0x1c31   : > { %v3804_v47 = vpop.f32.mrb[90].mxu0  ;;  %v11200_v39 = vld [vmem:[%s13812_s19 + $0x2] ss:$0 sm:$0xff] }
0x1c32   : > { %v12550_v48 = vpop.f32.mrb[91].mxu0 }
0x1c33   : > { %v11201_v48 = vld [vmem:[%s13817_s24 + $0x2] ss:$0 sm:$0xff] }
0x1c37   : > { %v3932_v50 = vpop.f32.mrb[92].mxu0 }
0x1c38   : > { %v3933_v41 = vadd.f32 %v11179_v49, %v3932_v50  ;;  %v12565_v51 = vpop.f32.mrb[93].mxu0  ;;  %v11232_v50 = vld [vmem:[%s13787_s25 + $0x40] sm:$0xff] }
0x1c39   : > { %v3935_v52 = vpop.f32.mrb[94].mxu0 }
0x1c3a   : > { %v4004_v53 = vpack.c.bf16 %v3933_v41, %v3933_v41  ;;  %v12566_v54 = vpop.f32.mrb[95].mxu0  ;;  %v11233_v41 = vld [vmem:[%s13787_s25 + $0x48] sm:$0xff] }
0x1c3b   : > { %v13365_v52 = vpack.c.bf16 %v11233_v41, %v11232_v50  ;;  %v11234_v54 = vld [vmem:[%s13787_s25 + $0x50] sm:$0xff] }
0x1c3c   : > { %v4009_v56 = vsel %vm1311_vm8, %v4004_v53, 0 }
0x1c3d   : > { %12576 = vmatpush3.bf16.xpose.msra.mxu0 %v4009_v56  ;;  %v13368_v56 = vpack.c.bf16 %v11235_v55, %v11234_v54  ;;  %v13487_v54 = vld [vmem:[%s15332_s7 + $0x18] sm:$0xff]   ;;  %v13488_v55 = vld [vmem:[%s15332_s7 + $0x90] sm:$0xff]  }
0x1c3e   : > { %12587 = vmatprep.subr.bf16.mxu0 %v13751_v11 }
0x1c44   : > { %12578 = vmatmul.mubr.msk.bf16.vlgmr.msra.gmra.mrb[96].mxu0 %vm1311_vm8, %v4003_v58  ;;  %v11237_v58 = vld [vmem:[%s13787_s25 + $0x68] sm:$0xff] }
0x1c45   : > { %12589 = vmatprep.mubr.msk.bf16.mxu0 %vm13753_vm3, %v13751_v11 }
0x1d17   : > { %v4045_v40 = vpop.f32.mrb[96].mxu0 }
0x1d18   : > { %v4046_v59 = vadd.f32 %v4045_v40, %v13956_v27  ;;  %v12579_v60 = vpop.f32.mrb[97].mxu0  ;;  %v11194_v27 = vld [vmem:[%s13802_s8 + $0x1c] sm:$0xf]  ;;  %v13371_v40 = vpack.c.bf16 %v11237_v58, %v11236_v57 }
0x1d19   : > { %v4048_v61 = vpop.f32.mrb[98].mxu0  ;;  %v4118_v6 = vsel %vm1374_vm7, %v11194_v27, 0  ;;  %v11239_v60 = vld [vmem:[%s13787_s25 + $0x78] sm:$0xff] }
0x1d1a   : > { %v12580_v62 = vpop.f32.mrb[99].mxu0  ;;  %v4051_v63 = vsel %vm1311_vm8, %v4046_v59, -inf  ;;  %12588 = vmatpush3.bf16.msra.mxu0 %v4118_v6 }
0x1d1b   : > { %4052 = vmax.xlane.f32.xlu0 %v4051_v63  ;;  %12601 = vmatprep.subr.bf16.mxu0 %v13751_v11 }
0x1da8   : > { %v4053_v0 = vpop.xlane.xlu0 %4052 }
0x1da9   : > { %v4054_v46 = vsub.f32 %v4046_v59, %v4053_v0  ;;  %v11238_v59 = vld [vmem:[%s13787_s25 + $0x70] sm:$0xff] }
0x1daa   : > { %v13374_v62 = vpack.c.bf16 %v11239_v60, %v11238_v59  ;;  %v13478_v0 = vld [vmem:[%s13832_s12 + $0x30] sm:$0xff]  }
0x1dab   : > { %v4055_v1 = vmul.f32 1.442695, %v4054_v46  ;;  %v13479_v46 = vld [vmem:[%s13832_s12 + $0x38] sm:$0xff]  }
0x1dad   : > { %13622 = vpow2.f32 %v4055_v1  ;;  %v11207_v1 = vld [vmem:[%s13827_s6 + $0x1] ss:$0 sm:$0xff] }
0x1db7   : > { %v13623_v2 = vpop.eup %13622 }
0x1db8   : > { %v4057_v3 = vsel %vm1311_vm8, %v13623_v2, 0.0  ;;  %v4062_v4 = vpack.c.bf16 %v13623_v2, %v13623_v2 }
0x1db9   : > { %4058 = vadd.xlane.f32.xlu1 %v4057_v3 }
0x1dba   : > { %12584 = vmatmul.mubr.msk.bf16.vlgmr.msra.gmra.mrb[96].mxu1 %vm1311_vm8, %v4062_v4 }
0x1dbb   : > { %12597 = vmatprep.mubr.msk.bf16.mxu1 %vm13753_vm3, %v13751_v11  ;;  %12594 = vmatpush3.bf16.msra.mxu1 %v13474_v37 }
0x1dbc   : > { %12595 = vmatprep.subr.bf16.mxu1 %v13751_v11 }
0x1e46   : > { %v4059_v7 = vpop.xlane.xlu1 %4058 }
0x1e47   : > { %v4060_v8 = vmax.f32 %v4059_v7, 1e-30 }
0x1e49   : > { %13624 = vrcp.f32 %v4060_v8  ;;  %v13480_v8 = vld [vmem:[%s15332_s7] sm:$0xff]  }
0x1e53   : > { %v13625_v9 = vpop.eup %13624 }
0x1e8d   : > { %v4104_v12 = vpop.f32.mrb[96].mxu1 }
0x1e8e   : > { %v4110_v13 = vmul.f32 %v13625_v9, %v4104_v12  ;;  %v12585_v14 = vpop.f32.mrb[97].mxu1  ;;  %v13482_v12 = vld [vmem:[%s15332_s7 + $0x8] sm:$0xff]  }
0x1e8f   : > { %v4107_v15 = vpop.f32.mrb[98].mxu1 }
0x1e90   : > { %v4113_v16 = vpack.c.bf16 %v4110_v13, %v4110_v13  ;;  %v12586_v17 = vpop.f32.mrb[99].mxu1 }
0x1e92   : > { %12590 = vmatmul.mubr.msk.bf16.vlgmr.msra.gmra.mrb[100].mxu0 %vm1311_vm8, %v4113_v16  ;;  %v13710_v16 = vld [vmem:[%s13975_s26] ss:$0 sm:$0xff]  ;;  %s15339_s26 = sld [smem:[#allocation11_spill]] }
0x1e93   : > { %12609 = vmatprep.mubr.msk.bf16.mxu0 %vm13753_vm3, %v13751_v11  ;;  %12602 = vmatpush3.bf16.msra.mxu0 %v13476_v38 }
0x1e94   : > { %12603 = vmatprep.subr.bf16.mxu0 %v13751_v11 }
0x1e97   : > { %12604 = vmatpush3.bf16.msra.mxu0 %v13477_v42  ;;  %v11242_v42 = vld [vmem:[%s15333_s10] ss:$0 sm:$0xff] }
0x1e98   : > { %12605 = vmatprep.subr.bf16.mxu0 %v13751_v11 }
0x1e9b   : > { %12606 = vmatpush3.bf16.msra.mxu0 %v13478_v0 }
0x1e9c   : > { %12607 = vmatprep.subr.bf16.mxu0 %v13751_v11 }
0x1e9f   : > { %12608 = vmatpush3.bf16.msra.mxu0 %v13479_v46 }
0x1ea0   : > { %12632 = vmatprep.subr.bf16.mxu0 %v13751_v11 }
0x1f65   : > { %v4154_v18 = vpop.f32.mrb[100].mxu0 }
0x1f66   : > { %v4160_v20 = vadd.f32 %v4154_v18, %v3807_v34  ;;  %v12591_v21 = vpop.f32.mrb[101].mxu0  ;;  %v13484_v18 = vld [vmem:[%s15332_s7 + $0x80] sm:$0xff]  }
0x1f67   : > { %v4157_v22 = vpop.f32.mrb[102].mxu0 }
0x1f68   : > { %v4169_v23 = vadd.f32 %v11197_v19, %v4160_v20  ;;  %v12592_v24 = vpop.f32.mrb[103].mxu0  ;;  %v13485_v20 = vld [vmem:[%s15332_s7 + $0x88] sm:$0xff]  }
0x1f6a   : > { %v4170_v25 = vadd.f32 %v4169_v23, %v14201_v32  ;;  %v13475_v32 = vld [vmem:[%s13822_s30 + $0x18] sm:$0xff]  }
0x1f6b   : > { %12596 = vmatpush3.bf16.msra.mxu1 %v13475_v32 }
0x1f6c   : > { %v4175_v28 = vsel %vm1129_vm6, %v4170_v25, 0.0  ;;  %13364 = vmatprep.subr.bf16.mxu1 %v13750_v5 }
0x1f6d   : > { %4176 = vadd.xlane.f32.xlu0 %v4175_v28 }
0x1f83   : > { %4429 = vperm.xlu0 %13419, %v4418_v29  }
0x1ffa   : > { %v4177_v30 = vpop.xlane.xlu0 %4176 }
0x1ffb   : > { %v4178_v31 = vmul.f32 0.03125, %v4177_v30 }
0x1ffd   : > { %v4179_v33 = vsub.f32 %v4170_v25, %v4178_v31  ;;  %v11251_v25 = vld [vmem:[%s15333_s10 + $0x4] ss:$0 sm:$0xff] }
0x1fff   : > { %v4180_v35 = vmul.f32 %v4179_v33, %v4179_v33 }
0x2001   : > { %v4181_v36 = vsel %vm1129_vm6, %v4180_v35, 0.0 }
0x2002   : > { %4182 = vadd.xlane.f32.xlu1 %v4181_v36  ;;  %v4430_v61 = vpop.permute.xlu0 %4429 }
0x2003   : > { %vm4431_vm9 = vcmp.eq.s32.totalorder %v4430_v61, %v13930_v10  ;;  %v13483_v10 = vld [vmem:[%s15332_s7 + $0x48] sm:$0xff]  }
0x2004   : > { %v11240_v63 = vsel %vm4431_vm9, 1.0, %v13751_v11 }
0x208f   : > { %v4183_v43 = vpop.xlane.xlu1 %4182 }
0x2090   : > { %v4184_v44 = vmul.f32 0.03125, %v4183_v43 }
0x2092   : > { %v4185_v45 = vadd.f32 1e-05, %v4184_v44  ;;  %v11260_v44 = vld [vmem:[%s15333_s10 + $0x8] ss:$0 sm:$0xff] }
0x2094   : > { %13626 = vrsqrt.f32 %v4185_v45 }
0x209e   : > { %v13627_v34 = vpop.eup %13626 }
0x209f   : > { %v4187_v47 = vmul.f32 %v13627_v34, %v4179_v33 }
0x20a1   : > { %v4194_v49 = vmul.f32 %v11200_v39, %v4187_v47 }
0x20a3   : > { %v14404_v51 = vadd.f32 %v11201_v48, %v4194_v49  ;;  %v13486_v49 = vld [vmem:[%s15332_s7 + $0x10] sm:$0xff]  }
0x20a5   : > { %v4207_v53 = vpack.c.bf16 %v14404_v51, %v14404_v51 }
0x20a7   : > { %12598 = vmatmul.mubr.msk.bf16.vlgmr.msra.gmra.mrb[100].mxu1 %vm1129_vm6, %v4207_v53 }
0x20a8   : > { %13366 = vmatpush3.bf16.msra.mxu1 %v13365_v52  ;;  %12629 = vmatprep.mubr.msk.f32.mxu1 %vm13753_vm3, %v13751_v11 }
0x20a9   : > { %13367 = vmatprep.subr.bf16.mxu1 %v13750_v5 }
0x20ac   : > { %13369 = vmatpush3.bf16.msra.mxu1 %v13368_v56  ;;  %v13489_v56 = vld [vmem:[%s15332_s7 + $0x98] sm:$0xff]  }
0x20ad   : > { %13370 = vmatprep.subr.bf16.mxu1 %v13750_v5 }
0x20b0   : > { %13372 = vmatpush3.bf16.msra.mxu1 %v13371_v40 }
0x20b1   : > { %13373 = vmatprep.subr.bf16.mxu1 %v13750_v5  ;;  %v13481_v5 = vld [vmem:[%s15332_s7 + $0x40] sm:$0xff]  }
0x20b4   : > { %13375 = vmatpush3.bf16.msra.mxu1 %v13374_v62 }
0x20b5   : > { %12640 = vmatprep.subr.bf16.mxu1 %v13751_v11 }
0x20b7   : > { %12630 = vmatmul.mubr.msk.f32.vlgmr.msra.gmra.mrb[104].mxu1 %vm1023_vm4, %v11240_v63 }
0x20b8   : > { %12644 = vmatprep.mubr.msk.bf16.mxu1 %vm13753_vm3, %v13751_v11  ;;  %12641 = vmatpush3.bf16.msra.mxu1 %v13481_v5  ;;  %v11289_v5 = vld [vmem:[%s15333_s10 + $0x9] ss:$0 sm:$0xff] }
0x20b9   : > { %12642 = vmatprep.subr.bf16.mxu1 %v13751_v11 }
0x20bc   : > { %12643 = vmatpush3.bf16.msra.mxu1 %v13483_v10 }
0x20bd   : > { %12656 = vmatprep.subr.bf16.mxu1 %v13751_v11 }
0x217a   : > { %v4265_v2 = vpop.f32.mrb[100].mxu1 }
0x217b   : > { %v4266_v3 = vadd.f32 %v11207_v1, %v4265_v2  ;;  %v12599_v4 = vpop.f32.mrb[101].mxu1 }
0x217c   : > { %v4268_v27 = vpop.f32.mrb[102].mxu1 }
0x217d   : > { %v4271_v6 = vmax.f32 %v4266_v3, 0.0  ;;  %v12600_v7 = vpop.f32.mrb[103].mxu1 }
0x217f   : > { %v4281_v9 = vpack.c.bf16 %v4271_v6, %v4271_v6 }
0x2181   : > { %12610 = vmatmul.mubr.msk.bf16.vlgmr.msra.gmra.mrb[104].mxu0 %vm1023_vm4, %v4281_v9 }
0x2182   : > { %12633 = vmatpush3.bf16.msra.mxu0 %v13480_v8  ;;  %12636 = vmatprep.mubr.msk.bf16.mxu0 %vm13753_vm3, %v13751_v11 }
0x2183   : > { %12634 = vmatprep.subr.bf16.mxu0 %v13751_v11 }
0x2186   : > { %12635 = vmatpush3.bf16.msra.mxu0 %v13482_v12 }
0x2187   : > { %12648 = vmatprep.subr.bf16.mxu0 %v13751_v11 }
0x218a   : > { %v4503_v13 = vpop.f32.mrb[104].mxu1 }
0x218b   : > { %v4507_v14 = vmul.f32 5.656854, %v4503_v13  ;;  %v12631_v15 = vpop.f32.mrb[105].mxu1  ;;  %v13490_v13 = vld [vmem:[%s15332_s7 + $0x50] sm:$0xff]  }
0x218c   : > { %v13491_v15 = vld [vmem:[%s15332_s7 + $0x58] sm:$0xff]  }
0x218d   : > { %v14443_v17 = vadd.f32 %v13710_v16, %v4507_v14 }
0x218f   : > { %v14448_v19 = vpack.c.bf16 %v14443_v17, %v14443_v17 }
0x2191   : > { %12637 = vmatmul.mubr.msk.bf16.vlgmr.msra.gmra.mrb[108].mxu0 %vm1129_vm6, %v14448_v19  ;;  %12645 = vmatmul.mubr.msk.bf16.vlgmr.msra.gmra.mrb[108].mxu1 %vm1129_vm6, %v14448_v19 }
0x2192   : > { %12649 = vmatpush3.bf16.msra.mxu0 %v13484_v18  ;;  %12652 = vmatprep.mubr.msk.bf16.mxu0 %vm13753_vm3, %v13751_v11 }
0x2193   : > { %12650 = vmatprep.subr.bf16.mxu0 %v13751_v11  ;;  %12658 = vmatprep.mubr.msk.bf16.mxu1 %vm13753_vm3, %v13751_v11 }
0x2196   : > { %12651 = vmatpush3.bf16.msra.mxu0 %v13485_v20 }
0x2197   : > { %12662 = vmatprep.subr.bf16.mxu0 %v13751_v11 }
0x2199   : > { %12653 = vmatmul.mubr.msk.bf16.vlgmr.msra.gmra.mrb[112].mxu0 %vm1129_vm6, %v14448_v19 }
0x219a   : > { %12664 = vmatprep.mubr.msk.bf16.mxu0 %vm13753_vm3, %v13751_v11 }
0x2254   : > { %v14465_v21 = vpop.f32.mrb[104].mxu0 }
0x2255   : > { %v12611_v22 = vpop.f32.mrb[105].mxu0 }
0x2256   : > { %v4354_v23 = vpop.f32.mrb[106].mxu0 }
0x2257   : > { %v12612_v24 = vpop.f32.mrb[107].mxu0  ;;  %v11280_v23 = vld [vmem:[%s15333_s10 + $0x5] ss:$0 sm:$0xff] }
0x2264   : > { %v4570_v28 = vpop.f32.mrb[108].mxu0  ;;  %v4635_v29 = vpop.f32.mrb[108].mxu1 }
0x2265   : > { %v4636_v30 = vadd.f32 %v11251_v25, %v4635_v29  ;;  %v12638_v31 = vpop.f32.mrb[109].mxu0  ;;  %v12646_v33 = vpop.f32.mrb[109].mxu1  ;;  %v4571_v45 = vadd.f32 %v11242_v42, %v4570_v28 }
0x2266   : > { %v4573_v35 = vpop.f32.mrb[110].mxu0  ;;  %v4638_v36 = vpop.f32.mrb[110].mxu1  ;;  %v11271_v33 = vld [vmem:[%s15333_s10 + $0x1] ss:$0 sm:$0xff] }
0x2267   : > { %v4707_v37 = vpack.c.bf16 %v4636_v30, %v4636_v30  ;;  %v12639_v32 = vpop.f32.mrb[111].mxu0  ;;  %v12647_v38 = vpop.f32.mrb[111].mxu1  ;;  %v4706_v50 = vpack.c.bf16 %v4571_v45, %v4571_v45 }
0x2269   : > { %v4712_v43 = vsel %vm1311_vm8, %v4707_v37, 0 }
0x226a   : > { %12657 = vmatpush3.bf16.xpose.msra.mxu1 %v4712_v43 }
0x226b   : > { %12668 = vmatprep.subr.bf16.mxu1 %v13751_v11 }
0x226c   : > { %v4700_v34 = vpop.f32.mrb[112].mxu0 }
0x226d   : > { %v4701_v39 = vadd.f32 %v11260_v44, %v4700_v34  ;;  %v12654_v47 = vpop.f32.mrb[113].mxu0 }
0x226e   : > { %v4703_v48 = vpop.f32.mrb[114].mxu0 }
0x226f   : > { %v4767_v41 = vpack.c.bf16 %v4701_v39, %v4701_v39  ;;  %v12655_v52 = vpop.f32.mrb[115].mxu0 }
0x2271   : > { %v4774_v53 = vsel %vm4772_vm10, %v4767_v41, 0  ;;  %12659 = vmatmul.mubr.msk.bf16.vlgmr.msra.gmra.mrb[112].mxu1 %vm1311_vm8, %v4706_v50  ;;  %v4817_v41 = vld [vmem:[%s15334_s11] sm:$0xf] }
0x2272   : > { %12663 = vmatpush3.bf16.msra.mxu0 %v4774_v53  ;;  %12669 = vmatpush3.bf16.msra.mxu1 %v13486_v49 }
0x2273   : > { %12670 = vmatprep.subr.bf16.mxu1 %v13751_v11  ;;  %12672 = vmatprep.mubr.msk.bf16.mxu1 %vm13753_vm3, %v13751_v11 }
0x2274   : > { %12676 = vmatprep.subr.bf16.mxu0 %v13751_v11 }
0x2276   : > { %12671 = vmatpush3.bf16.msra.mxu1 %v13487_v54 }
0x2277   : > { %12684 = vmatprep.subr.bf16.mxu1 %v13751_v11 }
0x2279   : > { %12673 = vmatmul.mubr.msk.bf16.vlgmr.msra.gmra.mrb[116].mxu1 %vm1129_vm6, %v14448_v19 }
0x227a   : > { %12685 = vmatpush3.bf16.msra.mxu1 %v13488_v55  ;;  %12688 = vmatprep.mubr.msk.bf16.mxu1 %vm13753_vm3, %v13751_v11  ;;  %v5175_v55 = vsel %vm1374_vm7, %v4817_v41, 0 }
0x227b   : > { %12686 = vmatprep.subr.bf16.mxu1 %v13751_v11 }
0x227e   : > { %12687 = vmatpush3.bf16.msra.mxu1 %v13489_v56 }
0x227f   : > { %12698 = vmatprep.subr.bf16.mxu1 %v13751_v11 }
0x2281   : > { %12689 = vmatmul.mubr.msk.bf16.vlgmr.msra.gmra.mrb[120].mxu1 %vm1129_vm6, %v14448_v19 }
0x2282   : > { %12700 = vmatprep.mubr.msk.bf16.mxu1 %vm13753_vm3, %v13751_v11 }
0x2344   : > { %v4748_v57 = vpop.f32.mrb[112].mxu1 }
0x2345   : > { %v4749_v58 = vadd.f32 %v4748_v57, %v13954_v26  ;;  %v12660_v40 = vpop.f32.mrb[113].mxu1 }
0x2346   : > { %v4751_v59 = vpop.f32.mrb[114].mxu1 }
0x2347   : > { %v12661_v60 = vpop.f32.mrb[115].mxu1  ;;  %v4755_v61 = vsel %vm4754_vm11, %v4749_v58, -inf  ;;  %v13493_v59 = vld [vmem:[%s15332_s7 + $0x68] sm:$0xff]  }
0x2348   : > { %4756 = vmax.xlane.f32.xlu1 %v4755_v61  ;;  %v11295_v60 = vld [vmem:[%s15334_s11 + $0x4] sm:$0xf] }
0x2349   : > { %v5129_v61 = vsel %vm1374_vm7, %v11295_v60, 0 }
0x234c   : > { %v4878_v62 = vpop.f32.mrb[116].mxu1 }
0x234d   : > { %v12674_v63 = vpop.f32.mrb[117].mxu1  ;;  %v4879_v36 = vadd.f32 %v11271_v33, %v4878_v62  ;;  %v11303_v33 = vld [vmem:[%s15333_s10 + $0x2] ss:$0 sm:$0xff] }
0x234e   : > { %v4881_v0 = vpop.f32.mrb[118].mxu1 }
0x234f   : > { %v12675_v46 = vpop.f32.mrb[119].mxu1  ;;  %v5014_v37 = vpack.c.bf16 %v4879_v36, %v4879_v36 }
0x2354   : > { %v5008_v10 = vpop.f32.mrb[120].mxu1 }
0x2355   : > { %v5009_v1 = vadd.f32 %v11289_v5, %v5008_v10  ;;  %v12690_v2 = vpop.f32.mrb[121].mxu1 }
0x2356   : > { %v5011_v3 = vpop.f32.mrb[122].mxu1  ;;  %v13494_v2 = vld [vmem:[%s15332_s7 + $0x20] sm:$0xff]  }
0x2357   : > { %v5074_v4 = vpack.c.bf16 %v5009_v1, %v5009_v1  ;;  %v12691_v27 = vpop.f32.mrb[123].mxu1 }
0x2358   : > { %v13495_v27 = vld [vmem:[%s15332_s7 + $0x28] sm:$0xff]  }
0x2359   : > { %v5079_v6 = vsel %vm4772_vm10, %v5074_v4, 0 }
0x235a   : > { %12699 = vmatpush3.bf16.msra.mxu1 %v5079_v6 }
0x235b   : > { %12710 = vmatprep.subr.bf16.mxu1 %v13751_v11 }
0x23d5   : > { %v4757_v7 = vpop.xlane.xlu1 %4756 }
0x23d6   : > { %v4758_v8 = vsub.f32 %v4749_v58, %v4757_v7  ;;  %v13492_v58 = vld [vmem:[%s15332_s7 + $0x60] sm:$0xff]  }
0x23d8   : > { %v4759_v9 = vmul.f32 1.442695, %v4758_v8 }
0x23da   : > { %13628 = vpow2.f32 %v4759_v9  ;;  %v13496_v9 = vld [vmem:[%s15332_s7 + $0xa0] sm:$0xff]  }
0x23e4   : > { %v13629_v12 = vpop.eup %13628 }
0x23e5   : > { %v4766_v14 = vpack.c.bf16 %v13629_v12, %v13629_v12  ;;  %v4761_v34 = vsel %vm4754_vm11, %v13629_v12, 0.0 }
0x23e7   : > { %12665 = vmatmul.mubr.msk.bf16.vlgmr.msra.gmra.mrb[116].mxu0 %vm4768_vm12, %v4766_v14  ;;  %v13497_v14 = vld [vmem:[%s15332_s7 + $0xa8] sm:$0xff]  }
0x23e8   : > { %12677 = vmatpush3.bf16.msra.mxu0 %v13490_v13  ;;  %12680 = vmatprep.mubr.msk.bf16.mxu0 %vm13753_vm3, %v13751_v11  ;;  %v11312_v13 = vld [vmem:[%s15333_s10 + $0x6] ss:$0 sm:$0xff] }
0x23e9   : > { %12678 = vmatprep.subr.bf16.mxu0 %v13751_v11 }
0x23ec   : > { %12679 = vmatpush3.bf16.msra.mxu0 %v13491_v15 }
0x23ed   : > { %12692 = vmatprep.subr.bf16.mxu0 %v13751_v11 }
0x23ef   : > { %12681 = vmatmul.mubr.msk.bf16.vlgmr.msra.gmra.mrb[120].mxu0 %vm1129_vm6, %v14448_v19 }
0x23f0   : > { %12694 = vmatprep.mubr.msk.bf16.mxu0 %vm13753_vm3, %v13751_v11 }
0x24ba   : > { %v4810_v16 = vpop.f32.mrb[116].mxu0 }
0x24bb   : > { %v12666_v18 = vpop.f32.mrb[117].mxu0 }
0x24bc   : > { %v4813_v20 = vpop.f32.mrb[118].mxu0 }
0x24bd   : > { %v12667_v22 = vpop.f32.mrb[119].mxu0 }
0x24c2   : > { %v4943_v24 = vpop.f32.mrb[120].mxu0 }
0x24c3   : > { %v4944_v25 = vadd.f32 %v11280_v23, %v4943_v24  ;;  %v12682_v28 = vpop.f32.mrb[121].mxu0 }
0x24c4   : > { %v4946_v29 = vpop.f32.mrb[122].mxu0 }
0x24c5   : > { %v5015_v30 = vpack.c.bf16 %v4944_v25, %v4944_v25  ;;  %v12683_v31 = vpop.f32.mrb[123].mxu0 }
0x24c7   : > { %v5020_v35 = vsel %vm1311_vm8, %v5015_v30, 0 }
0x24c8   : > { %12693 = vmatpush3.bf16.xpose.msra.mxu0 %v5020_v35 }
0x24c9   : > { %12704 = vmatprep.subr.bf16.mxu0 %v13751_v11 }
0x24cf   : > { %12695 = vmatmul.mubr.msk.bf16.vlgmr.msra.gmra.mrb[124].mxu0 %vm1311_vm8, %v5014_v37 }
0x24d0   : > { %12706 = vmatprep.mubr.msk.bf16.mxu0 %vm13753_vm3, %v13751_v11  ;;  %12705 = vmatpush3.bf16.msra.mxu0 %v5129_v61 }
0x24d1   : > { %12716 = vmatprep.subr.bf16.mxu0 %v13751_v11 }
0x25a2   : > { %v5056_v32 = vpop.f32.mrb[124].mxu0 }
0x25a3   : > { %v5057_v38 = vadd.f32 %v5056_v32, %v13954_v26  ;;  %v12696_v42 = vpop.f32.mrb[125].mxu0 }
0x25a4   : > { %v5059_v43 = vpop.f32.mrb[126].mxu0 }
0x25a5   : > { %v12697_v44 = vpop.f32.mrb[127].mxu0  ;;  %v5062_v45 = vsel %vm4754_vm11, %v5057_v38, -inf  ;;  %v11321_v43 = vld [vmem:[%s15333_s10 + $0xa] ss:$0 sm:$0xff] }
0x25a6   : > { %5063 = vmax.xlane.f32.xlu1 %v5062_v45 }
0x25aa   : > { %4762 = vadd.xlane.f32.xlu1 %v4761_v34 }
0x2633   : > { %v5064_v39 = vpop.xlane.xlu1 %5063 }
0x2634   : > { %v5065_v47 = vsub.f32 %v5057_v38, %v5064_v39 }
0x2636   : > { %v5066_v48 = vmul.f32 1.442695, %v5065_v47 }
0x2637   : > { %v4763_v49 = vpop.xlane.xlu1 %4762 }
0x2638   : > { %13630 = vpow2.f32 %v5066_v48  ;;  %v4764_v50 = vmax.f32 %v4763_v49, 1e-30 }
0x263a   : > { %13632 = vrcp.f32 %v4764_v50 }
0x2642   : > { %v13631_v52 = vpop.eup %13630 }
0x2643   : > { %v5068_v53 = vsel %vm4754_vm11, %v13631_v52, 0.0  ;;  %v5073_v54 = vpack.c.bf16 %v13631_v52, %v13631_v52 }
0x2644   : > { %v13633_v56 = vpop.eup %13632  ;;  %5069 = vadd.xlane.f32.xlu1 %v5068_v53 }
0x2645   : > { %12701 = vmatmul.mubr.msk.bf16.vlgmr.msra.gmra.mrb[124].mxu1 %vm4768_vm12, %v5073_v54  ;;  %v4816_v57 = vmul.f32 %v13633_v56, %v4810_v16 }
0x2646   : > { %12711 = vmatpush3.bf16.msra.mxu1 %v5175_v55  ;;  %12712 = vmatprep.mubr.msk.bf16.mxu1 %vm13753_vm3, %v13751_v11 }
0x2647   : > { %12724 = vmatprep.subr.bf16.mxu1 %v13751_v11  ;;  %v4818_v40 = vpack.c.bf16 %v4816_v57, %v4816_v57 }
0x264d   : > { %12713 = vmatmul.mubr.msk.bf16.vlgmr.msra.gmra.mrb[128].mxu1 %vm1311_vm8, %v4818_v40 }
0x264e   : > { %12725 = vmatpush3.bf16.msra.mxu1 %v13492_v58  ;;  %12728 = vmatprep.mubr.msk.bf16.mxu1 %vm13753_vm3, %v13751_v11 }
0x264f   : > { %12726 = vmatprep.subr.bf16.mxu1 %v13751_v11 }
0x2652   : > { %12727 = vmatpush3.bf16.msra.mxu1 %v13493_v59  ;;  %v13498_v59 = vld [vmem:[%s15332_s7 + $0x30] sm:$0xff]  }
0x2653   : > { %12740 = vmatprep.subr.bf16.mxu1 %v13751_v11 }
0x2655   : > { %12729 = vmatmul.mubr.msk.bf16.vlgmr.msra.gmra.mrb[132].mxu1 %vm1129_vm6, %v14448_v19 }
0x2656   : > { %12742 = vmatprep.mubr.msk.bf16.mxu1 %vm13753_vm3, %v13751_v11 }
0x26d1   : > { %v5070_v62 = vpop.xlane.xlu1 %5069 }
0x26d2   : > { %v5071_v63 = vmax.f32 %v5070_v62, 1e-30  ;;  %v13499_v62 = vld [vmem:[%s15332_s7 + $0x38] sm:$0xff]  }
0x26d4   : > { %13634 = vrcp.f32 %v5071_v63  ;;  %v13500_v63 = vld [vmem:[%s15332_s7 + $0xb0] sm:$0xff]  }
0x26de   : > { %v13635_v0 = vpop.eup %13634 }
0x2718   : > { %v5115_v46 = vpop.f32.mrb[124].mxu1 }
0x2719   : > { %v5121_v5 = vmul.f32 %v13635_v0, %v5115_v46  ;;  %v12702_v10 = vpop.f32.mrb[125].mxu1  ;;  %v13501_v0 = vld [vmem:[%s15332_s7 + $0xb8] sm:$0xff]   ;;  %v11327_v46 = vld [vmem:[%s15334_s11 + $0x8] sm:$0xf] }
0x271a   : > { %v5118_v1 = vpop.f32.mrb[126].mxu1 }
0x271b   : > { %v5124_v3 = vpack.c.bf16 %v5121_v5, %v5121_v5  ;;  %v12703_v4 = vpop.f32.mrb[127].mxu1  ;;  %v5527_v5 = vsel %vm1374_vm7, %v11327_v46, 0 }
0x271d   : > { %12707 = vmatmul.mubr.msk.bf16.vlgmr.msra.gmra.mrb[128].mxu0 %vm1311_vm8, %v5124_v3 }
0x271e   : > { %12717 = vmatpush3.bf16.msra.mxu0 %v13494_v2  ;;  %12720 = vmatprep.mubr.msk.bf16.mxu0 %vm13753_vm3, %v13751_v11 }
0x271f   : > { %12718 = vmatprep.subr.bf16.mxu0 %v13751_v11 }
0x2720   : > { %v5211_v6 = vpop.f32.mrb[128].mxu1 }
0x2721   : > { %v12714_v7 = vpop.f32.mrb[129].mxu1 }
0x2722   : > { %v5214_v8 = vpop.f32.mrb[130].mxu1  ;;  %12719 = vmatpush3.bf16.msra.mxu0 %v13495_v27  ;;  %v13502_v7 = vld [vmem:[%s15332_s7 + $0x70] sm:$0xff]  }
0x2723   : > { %v12715_v12 = vpop.f32.mrb[131].mxu1  ;;  %12732 = vmatprep.subr.bf16.mxu0 %v13751_v11 }
0x2724   : > { %v13503_v12 = vld [vmem:[%s15332_s7 + $0x78] sm:$0xff]  }
0x2725   : > { %12721 = vmatmul.mubr.msk.bf16.vlgmr.msra.gmra.mrb[132].mxu0 %vm1129_vm6, %v14448_v19 }
0x2726   : > { %12733 = vmatpush3.bf16.msra.mxu0 %v13496_v9  ;;  %12736 = vmatprep.mubr.msk.bf16.mxu0 %vm13753_vm3, %v13751_v11 }
0x2727   : > { %12734 = vmatprep.subr.bf16.mxu0 %v13751_v11 }
0x2728   : > { %v5341_v15 = vpop.f32.mrb[132].mxu1 }
0x2729   : > { %v5342_v16 = vadd.f32 %v11312_v13, %v5341_v15  ;;  %v12730_v18 = vpop.f32.mrb[133].mxu1 }
0x272a   : > { %v5344_v20 = vpop.f32.mrb[134].mxu1  ;;  %12735 = vmatpush3.bf16.msra.mxu0 %v13497_v14  ;;  %v11352_v18 = vld [vmem:[%s15333_s10 + $0xb] ss:$0 sm:$0xff] }
0x272b   : > { %v5413_v22 = vpack.c.bf16 %v5342_v16, %v5342_v16  ;;  %v12731_v23 = vpop.f32.mrb[135].mxu1  ;;  %12746 = vmatprep.subr.bf16.mxu0 %v13751_v11 }
0x272d   : > { %v5418_v24 = vsel %vm1311_vm8, %v5413_v22, 0  ;;  %12737 = vmatmul.mubr.msk.bf16.vlgmr.msra.gmra.mrb[136].mxu0 %vm1129_vm6, %v14448_v19 }
0x272e   : > { %12741 = vmatpush3.bf16.xpose.msra.mxu1 %v5418_v24  ;;  %12748 = vmatprep.mubr.msk.bf16.mxu0 %vm13753_vm3, %v13751_v11 }
0x272f   : > { %12752 = vmatprep.subr.bf16.mxu1 %v13751_v11 }
0x27f0   : > { %v5165_v25 = vpop.f32.mrb[128].mxu0 }
0x27f1   : > { %v14562_v28 = vadd.f32 %v5211_v6, %v5165_v25  ;;  %v12708_v29 = vpop.f32.mrb[129].mxu0 }
0x27f2   : > { %v5168_v30 = vpop.f32.mrb[130].mxu0 }
0x27f3   : > { %v12709_v31 = vpop.f32.mrb[131].mxu0 }
0x27f8   : > { %v5276_v35 = vpop.f32.mrb[132].mxu0 }
0x27f9   : > { %v5277_v36 = vadd.f32 %v11303_v33, %v5276_v35  ;;  %v12722_v37 = vpop.f32.mrb[133].mxu0 }
0x27fa   : > { %v5279_v32 = vpop.f32.mrb[134].mxu0  ;;  %v11343_v37 = vld [vmem:[%s15333_s10 + $0x7] ss:$0 sm:$0xff] }
0x27fb   : > { %v5412_v38 = vpack.c.bf16 %v5277_v36, %v5277_v36  ;;  %v12723_v42 = vpop.f32.mrb[135].mxu0 }
0x27fd   : > { %12743 = vmatmul.mubr.msk.bf16.vlgmr.msra.gmra.mrb[136].mxu1 %vm1311_vm8, %v5412_v38 }
0x27fe   : > { %12754 = vmatprep.mubr.msk.bf16.mxu1 %vm13753_vm3, %v13751_v11  ;;  %12753 = vmatpush3.bf16.msra.mxu1 %v5527_v5 }
0x27ff   : > { %12766 = vmatprep.subr.bf16.mxu1 %v13751_v11 }
0x2800   : > { %v5406_v44 = vpop.f32.mrb[136].mxu0 }
0x2801   : > { %v5407_v45 = vadd.f32 %v11321_v43, %v5406_v44  ;;  %v12738_v34 = vpop.f32.mrb[137].mxu0 }
0x2802   : > { %v5409_v39 = vpop.f32.mrb[138].mxu0  ;;  %v11334_v34 = vld [vmem:[%s15333_s10 + $0x3] ss:$0 sm:$0xff] }
0x2803   : > { %v5472_v47 = vpack.c.bf16 %v5407_v45, %v5407_v45  ;;  %v12739_v48 = vpop.f32.mrb[139].mxu0 }
0x2805   : > { %v5477_v49 = vsel %vm4772_vm10, %v5472_v47, 0 }
0x2806   : > { %12747 = vmatpush3.bf16.msra.mxu0 %v5477_v49 }
0x2807   : > { %12758 = vmatprep.subr.bf16.mxu0 %v13751_v11 }
0x28d0   : > { %v5454_v50 = vpop.f32.mrb[136].mxu1 }
0x28d1   : > { %v5455_v41 = vadd.f32 %v5454_v50, %v13954_v26  ;;  %v12744_v52 = vpop.f32.mrb[137].mxu1 }
0x28d2   : > { %v5457_v53 = vpop.f32.mrb[138].mxu1 }
0x28d3   : > { %v12745_v54 = vpop.f32.mrb[139].mxu1  ;;  %v5460_v55 = vsel %vm4754_vm11, %v5455_v41, -inf }
0x28d4   : > { %5461 = vmax.xlane.f32.xlu1 %v5460_v55 }
0x2961   : > { %v5462_v56 = vpop.xlane.xlu1 %5461 }
0x2962   : > { %v5463_v57 = vsub.f32 %v5455_v41, %v5462_v56 }
0x2964   : > { %v5464_v58 = vmul.f32 1.442695, %v5463_v57  ;;  %v11220_v57 = vld [vmem:[%s15330_s28 + $0x1] ss:$0 sm:$0xff] }
0x2966   : > { %13636 = vpow2.f32 %v5464_v58  ;;  %v4352_v58 = vadd.f32 %v11220_v57, %v14465_v21  ;;  %v11231_v57 = vld [vmem:[%s13897_s20] ss:$0 sm:$0xff] }
0x2970   : > { %v13637_v40 = vpop.eup %13636 }
0x2971   : > { %v5466_v60 = vsel %vm4754_vm11, %v13637_v40, 0.0  ;;  %v5471_v61 = vpack.c.bf16 %v13637_v40, %v13637_v40 }
0x2972   : > { %5467 = vadd.xlane.f32.xlu1 %v5466_v60 }
0x2973   : > { %12749 = vmatmul.mubr.msk.bf16.vlgmr.msra.gmra.mrb[140].mxu0 %vm4768_vm12, %v5471_v61  ;;  %v4357_v61 = vadd.f32 %v4352_v58, %v14404_v51 }
0x2974   : > { %12759 = vmatpush3.bf16.msra.mxu0 %v13498_v59  ;;  %12762 = vmatprep.mubr.msk.bf16.mxu0 %vm13753_vm3, %v13751_v11 }
0x2975   : > { %12760 = vmatprep.subr.bf16.mxu0 %v13751_v11 }
0x2978   : > { %12761 = vmatpush3.bf16.msra.mxu0 %v13499_v62  ;;  %v4362_v62 = vsel %vm1129_vm6, %v4357_v61, 0.0 }
0x2979   : > { %12774 = vmatprep.subr.bf16.mxu0 %v13751_v11 }
0x297b   : > { %12763 = vmatmul.mubr.msk.bf16.vlgmr.msra.gmra.mrb[144].mxu0 %vm1129_vm6, %v14448_v19 }
0x297c   : > { %12775 = vmatpush3.bf16.msra.mxu0 %v13500_v63  ;;  %12778 = vmatprep.mubr.msk.bf16.mxu0 %vm13753_vm3, %v13751_v11  ;;  %v11358_v63 = vld [vmem:[%s15334_s11 + $0xc] sm:$0xf] }
0x297d   : > { %12776 = vmatprep.subr.bf16.mxu0 %v13751_v11 }
0x2980   : > { %12777 = vmatpush3.bf16.msra.mxu0 %v13501_v0  ;;  %v5880_v0 = vsel %vm1374_vm7, %v11358_v63, 0 }
0x2981   : > { %12788 = vmatprep.subr.bf16.mxu0 %v13751_v11 }
0x2983   : > { %12779 = vmatmul.mubr.msk.bf16.vlgmr.msra.gmra.mrb[148].mxu0 %vm1129_vm6, %v14448_v19 }
0x2984   : > { %12790 = vmatprep.mubr.msk.bf16.mxu0 %vm13753_vm3, %v13751_v11 }
0x29ff   : > { %v5468_v10 = vpop.xlane.xlu1 %5467 }
0x2a00   : > { %v5469_v1 = vmax.f32 %v5468_v10, 1e-30 }
0x2a02   : > { %13638 = vrcp.f32 %v5469_v1 }
0x2a0c   : > { %v13639_v2 = vpop.eup %13638 }
0x2a46   : > { %v5513_v3 = vpop.f32.mrb[140].mxu0 }
0x2a47   : > { %v5519_v4 = vmul.f32 %v13639_v2, %v5513_v3  ;;  %v12750_v27 = vpop.f32.mrb[141].mxu0 }
0x2a48   : > { %v5516_v6 = vpop.f32.mrb[142].mxu0 }
0x2a49   : > { %v5522_v8 = vpack.c.bf16 %v5519_v4, %v5519_v4  ;;  %v12751_v9 = vpop.f32.mrb[143].mxu0 }
0x2a4b   : > { %12755 = vmatmul.mubr.msk.bf16.vlgmr.msra.gmra.mrb[140].mxu1 %vm1311_vm8, %v5522_v8 }
0x2a4c   : > { %12767 = vmatpush3.bf16.msra.mxu1 %v13502_v7  ;;  %12770 = vmatprep.mubr.msk.bf16.mxu1 %vm13753_vm3, %v13751_v11 }
0x2a4d   : > { %12768 = vmatprep.subr.bf16.mxu1 %v13751_v11 }
0x2a4e   : > { %v5629_v13 = vpop.f32.mrb[144].mxu0 }
0x2a4f   : > { %v12764_v14 = vpop.f32.mrb[145].mxu0  ;;  %v5630_v47 = vadd.f32 %v11334_v34, %v5629_v13  ;;  %v13504_v34 = vld [vmem:[%s15332_s7 + $0x100] sm:$0xff]  }
0x2a50   : > { %v5632_v15 = vpop.f32.mrb[146].mxu0  ;;  %12769 = vmatpush3.bf16.msra.mxu1 %v13503_v12 }
0x2a51   : > { %v12765_v16 = vpop.f32.mrb[147].mxu0  ;;  %12782 = vmatprep.subr.bf16.mxu1 %v13751_v11 }
0x2a52   : > { %v11228_v16 = vld [vmem:[%s13812_s19 + $0x3] ss:$0 sm:$0xff] }
0x2a53   : > { %12771 = vmatmul.mubr.msk.bf16.vlgmr.msra.gmra.mrb[144].mxu1 %vm1129_vm6, %v14448_v19 }
0x2a54   : > { %12784 = vmatprep.mubr.msk.bf16.mxu1 %vm13753_vm3, %v13751_v11 }
0x2a56   : > { %v5759_v20 = vpop.f32.mrb[148].mxu0 }
0x2a57   : > { %v5760_v22 = vadd.f32 %v11352_v18, %v5759_v20  ;;  %v12780_v23 = vpop.f32.mrb[149].mxu0  ;;  %v11229_v20 = vld [vmem:[%s13817_s24 + $0x3] ss:$0 sm:$0xff] }
0x2a58   : > { %v5762_v24 = vpop.f32.mrb[150].mxu0 }
0x2a59   : > { %v5825_v25 = vpack.c.bf16 %v5760_v22, %v5760_v22  ;;  %v12781_v29 = vpop.f32.mrb[151].mxu0 }
0x2a5a   : > { %v11360_v29 = vld [vmem:[%s15335_s16] ss:$0 sm:$0xff] }
0x2a5b   : > { %v5830_v30 = vsel %vm4772_vm10, %v5825_v25, 0 }
0x2a5c   : > { %12789 = vmatpush3.bf16.msra.mxu0 %v5830_v30 }
0x2a5d   : > { %12800 = vmatprep.subr.bf16.mxu0 %v13751_v11 }
0x2b1e   : > { %v5563_v31 = vpop.f32.mrb[140].mxu1 }
0x2b1f   : > { %v14611_v19 = vadd.f32 %v5563_v31, %v14562_v28  ;;  %v12756_v33 = vpop.f32.mrb[141].mxu1  ;;  %v5765_v28 = vpack.c.bf16 %v5630_v47, %v5630_v47 }
0x2b20   : > { %v5566_v35 = vpop.f32.mrb[142].mxu1 }
0x2b21   : > { %v12757_v36 = vpop.f32.mrb[143].mxu1 }
0x2b26   : > { %v5694_v32 = vpop.f32.mrb[144].mxu1 }
0x2b27   : > { %v5695_v38 = vadd.f32 %v11343_v37, %v5694_v32  ;;  %v12772_v42 = vpop.f32.mrb[145].mxu1 }
0x2b28   : > { %v5697_v43 = vpop.f32.mrb[146].mxu1 }
0x2b29   : > { %v5766_v44 = vpack.c.bf16 %v5695_v38, %v5695_v38  ;;  %v12773_v45 = vpop.f32.mrb[147].mxu1 }
0x2b2b   : > { %v5771_v39 = vsel %vm1311_vm8, %v5766_v44, 0 }
0x2b2c   : > { %12783 = vmatpush3.bf16.xpose.msra.mxu1 %v5771_v39 }
0x2b2d   : > { %12794 = vmatprep.subr.bf16.mxu1 %v13751_v11 }
0x2b33   : > { %12785 = vmatmul.mubr.msk.bf16.vlgmr.msra.gmra.mrb[148].mxu1 %vm1311_vm8, %v5765_v28 }
0x2b34   : > { %12796 = vmatprep.mubr.msk.bf16.mxu1 %vm13753_vm3, %v13751_v11  ;;  %12795 = vmatpush3.bf16.msra.mxu1 %v5880_v0  ;;  %v11361_v0 = vld [vmem:[%s15337_s22] ss:$0 sm:$0xff] }
0x2b35   : > { %12808 = vmatprep.subr.bf16.mxu1 %v13751_v11 }
0x2c06   : > { %v5807_v48 = vpop.f32.mrb[148].mxu1 }
0x2c07   : > { %v5808_v49 = vadd.f32 %v5807_v48, %v13954_v26  ;;  %v12786_v50 = vpop.f32.mrb[149].mxu1 }
0x2c08   : > { %v5810_v41 = vpop.f32.mrb[150].mxu1 }
0x2c09   : > { %v12787_v52 = vpop.f32.mrb[151].mxu1  ;;  %v5813_v53 = vsel %vm4754_vm11, %v5808_v49, -inf }
0x2c0a   : > { %5814 = vmax.xlane.f32.xlu0 %v5813_v53  ;;  %v13506_v52 = vld [vmem:[%s15332_s7 + $0xc0] sm:$0xff]   ;;  %v13507_v53 = vld [vmem:[%s15332_s7 + $0xc8] sm:$0xff]  }
0x2c97   : > { %v5815_v54 = vpop.xlane.xlu0 %5814 }
0x2c98   : > { %v5816_v55 = vsub.f32 %v5808_v49, %v5815_v54 }
0x2c9a   : > { %v5817_v56 = vmul.f32 1.442695, %v5816_v55  ;;  %v11230_v55 = vld [vmem:[%s15336_s18] ss:$0 sm:$0xff] }
0x2c9c   : > { %13640 = vpow2.f32 %v5817_v56 }
0x2ca6   : > { %v13641_v40 = vpop.eup %13640 }
0x2ca7   : > { %v5819_v59 = vsel %vm4754_vm11, %v13641_v40, 0.0  ;;  %v5824_v60 = vpack.c.bf16 %v13641_v40, %v13641_v40 }
0x2ca8   : > { %5820 = vadd.xlane.f32.xlu1 %v5819_v59 }
0x2ca9   : > { %12791 = vmatmul.mubr.msk.bf16.vlgmr.msra.gmra.mrb[152].mxu0 %vm4768_vm12, %v5824_v60 }
0x2caa   : > { %12804 = vmatprep.mubr.msk.bf16.mxu0 %vm13753_vm3, %v13751_v11  ;;  %12801 = vmatpush3.bf16.msra.mxu0 %v13506_v52 }
0x2cab   : > { %12802 = vmatprep.subr.bf16.mxu0 %v13751_v11 }
0x2cac   : > { %4363 = vadd.xlane.f32.xlu1 %v4362_v62 }
0x2cae   : > { %12803 = vmatpush3.bf16.msra.mxu0 %v13507_v53 }
0x2caf   : > { %12816 = vmatprep.subr.bf16.mxu0 %v13751_v11 }
0x2d35   : > { %v5821_v21 = vpop.xlane.xlu1 %5820 }
0x2d36   : > { %v5822_v2 = vmax.f32 %v5821_v21, 1e-30 }
0x2d38   : > { %13642 = vrcp.f32 %v5822_v2  ;;  %v13509_v2 = vld [vmem:[%s15332_s7 + $0x148] sm:$0xff]  }
0x2d39   : > { %v4364_v46 = vpop.xlane.xlu1 %4363 }
0x2d3a   : > { %v4365_v5 = vmul.f32 0.03125, %v4364_v46  ;;  %v11362_v46 = vld [vmem:[%s15338_s23] ss:$0 sm:$0xff] }
0x2d3c   : > { %v4366_v10 = vsub.f32 %v4357_v61, %v4365_v5 }
0x2d3e   : > { %v4367_v51 = vmul.f32 %v4366_v10, %v4366_v10 }
0x2d40   : > { %v4368_v1 = vsel %vm1129_vm6, %v4367_v51, 0.0  ;;  %v13508_v51 = vld [vmem:[%s15332_s7 + $0x140] sm:$0xff]  }
0x2d41   : > { %4369 = vadd.xlane.f32.xlu1 %v4368_v1 }
0x2d42   : > { %v13643_v3 = vpop.eup %13642 }
0x2d7c   : > { %v5866_v4 = vpop.f32.mrb[152].mxu0 }
0x2d7d   : > { %v5872_v27 = vmul.f32 %v13643_v3, %v5866_v4  ;;  %v12792_v6 = vpop.f32.mrb[153].mxu0  ;;  %v11377_v3 = vld [vmem:[%s15333_s10 + $0x10] ss:$0 sm:$0xff] }
0x2d7e   : > { %v5869_v7 = vpop.f32.mrb[154].mxu0 }
0x2d7f   : > { %v5875_v8 = vpack.c.bf16 %v5872_v27, %v5872_v27  ;;  %v12793_v9 = vpop.f32.mrb[155].mxu0 }
0x2d81   : > { %12797 = vmatmul.mubr.msk.bf16.vlgmr.msra.gmra.mrb[152].mxu1 %vm1311_vm8, %v5875_v8 }
0x2d82   : > { %12812 = vmatprep.mubr.msk.bf16.mxu1 %vm13753_vm3, %v13751_v11  ;;  %12809 = vmatpush3.bf16.msra.mxu1 %v13504_v34 }
0x2d83   : > { %12810 = vmatprep.subr.bf16.mxu1 %v13751_v11 }
0x2dce   : > { %v4370_v12 = vpop.xlane.xlu1 %4369 }
0x2dcf   : > { %v4371_v13 = vmul.f32 0.03125, %v4370_v12 }
0x2dd1   : > { %v4372_v14 = vadd.f32 1e-05, %v4371_v13  ;;  %v11368_v13 = vld [vmem:[%s15333_s10 + $0xc] ss:$0 sm:$0xff] }
0x2dd3   : > { %13644 = vrsqrt.f32 %v4372_v14 }
0x2ddd   : > { %v13645_v15 = vpop.eup %13644 }
0x2dde   : > { %v4374_v18 = vmul.f32 %v13645_v15, %v4366_v10 }
0x2de0   : > { %v4381_v22 = vmul.f32 %v11228_v16, %v4374_v18 }
0x2de2   : > { %v4388_v23 = vadd.f32 %v11229_v20, %v4381_v22  ;;  %v13510_v20 = vld [vmem:[%s15332_s7 + $0xd0] sm:$0xff]  }
0x2de4   : > { %v4391_v24 = vsel %vm1129_vm6, %v4388_v23, 0.0 }
0x2de5   : > { %4392 = vadd.xlane.f32.xlu1 %v4391_v24  ;;  %v11386_v24 = vld [vmem:[%s15333_s10 + $0x14] ss:$0 sm:$0xff] }
0x2e54   : > { %v5916_v25 = vpop.f32.mrb[152].mxu1 }
0x2e55   : > { %v5922_v30 = vadd.f32 %v5916_v25, %v14611_v19  ;;  %v12798_v31 = vpop.f32.mrb[153].mxu1  ;;  %v13505_v19 = vld [vmem:[%s15332_s7 + $0x108] sm:$0xff]   ;;  %v13511_v25 = vld [vmem:[%s15332_s7 + $0xd8] sm:$0xff]  }
0x2e56   : > { %v5919_v33 = vpop.f32.mrb[154].mxu1  ;;  %12811 = vmatpush3.bf16.msra.mxu1 %v13505_v19 }
0x2e57   : > { %v5930_v35 = vadd.f32 %v11360_v29, %v5922_v30  ;;  %v12799_v36 = vpop.f32.mrb[155].mxu1  ;;  %12824 = vmatprep.subr.bf16.mxu1 %v13751_v11 }
0x2e59   : > { %v5931_v37 = vadd.f32 %v5930_v35, %v14443_v17  ;;  %v13512_v35 = vld [vmem:[%s15332_s7 + $0x150] sm:$0xff]  }
0x2e5b   : > { %v5935_v32 = vsel %vm5934_vm13, %v5931_v37, 0.0 }
0x2e5c   : > { %5936 = vadd.xlane.f32.xlu1 %v5935_v32 }
0x2e72   : > { %v4393_v38 = vpop.xlane.xlu1 %4392 }
0x2e73   : > { %v4394_v42 = vmul.f32 0.03125, %v4393_v38  ;;  %v13513_v38 = vld [vmem:[%s15332_s7 + $0x158] sm:$0xff]  }
0x2e75   : > { %v4395_v43 = vsub.f32 %v4388_v23, %v4394_v42 }
0x2e77   : > { %v4396_v44 = vmul.f32 %v4395_v43, %v4395_v43 }
0x2e79   : > { %v4397_v45 = vsel %vm1129_vm6, %v4396_v44, 0.0 }
0x2e7a   : > { %4398 = vadd.xlane.f32.xlu1 %v4397_v45 }
0x2ee9   : > { %v5937_v17 = vpop.xlane.xlu1 %5936 }
0x2eea   : > { %v5938_v39 = vmul.f32 0.03125, %v5937_v17 }
0x2eec   : > { %v5939_v47 = vsub.f32 %v5931_v37, %v5938_v39 }
0x2eee   : > { %v5940_v28 = vmul.f32 %v5939_v47, %v5939_v47 }
0x2ef0   : > { %v5941_v48 = vsel %vm5934_vm13, %v5940_v28, 0.0  ;;  %v11416_v28 = vld [vmem:[%s15333_s10 + $0x15] ss:$0 sm:$0xff] }
0x2ef1   : > { %5942 = vadd.xlane.f32.xlu1 %v5941_v48 }
0x2f07   : > { %v4399_v49 = vpop.xlane.xlu1 %4398 }
0x2f08   : > { %v4400_v50 = vmul.f32 0.03125, %v4399_v49 }
0x2f0a   : > { %v4401_v41 = vadd.f32 1e-05, %v4400_v50 }
0x2f0c   : > { %13646 = vrsqrt.f32 %v4401_v41 }
0x2f16   : > { %v13647_v54 = vpop.eup %13646 }
0x2f17   : > { %v4403_v56 = vmul.f32 %v13647_v54, %v4395_v43 }
0x2f19   : > { %v4410_v58 = vmul.f32 %v11230_v55, %v4403_v56 }
0x2f1b   : > { %v4417_v40 = vadd.f32 %v11231_v57, %v4410_v58 }
0x2f1d   : > { %v14656_v59 = vpack.c.bf16 %v4417_v40, %v4417_v40  ;;  %v13514_v40 = vld [vmem:[%s15332_s7 + $0x110] sm:$0xff]  }
0x2f1f   : > { %12813 = vmatmul.mubr.msk.bf16.vlgmr.msra.gmra.mrb[156].mxu1 %vm1129_vm6, %v14656_v59 }
0x2f20   : > { %12826 = vmatprep.mubr.msk.bf16.mxu1 %vm13753_vm3, %v13751_v11 }
0x2f7e   : > { %v5943_v60 = vpop.xlane.xlu1 %5942 }
0x2f7f   : > { %v5944_v61 = vmul.f32 0.03125, %v5943_v60 }
0x2f81   : > { %v5945_v62 = vadd.f32 1e-05, %v5944_v61 }
0x2f83   : > { %13648 = vrsqrt.f32 %v5945_v62  ;;  %v13515_v62 = vld [vmem:[%s15332_s7 + $0x118] sm:$0xff]  }
0x2f8d   : > { %v13649_v63 = vpop.eup %13648 }
0x2f8e   : > { %v5947_v21 = vmul.f32 %v13649_v63, %v5939_v47 }
0x2f90   : > { %v5954_v5 = vmul.f32 %v11361_v0, %v5947_v21 }
0x2f92   : > { %v14664_v10 = vadd.f32 %v11362_v46, %v5954_v5  ;;  %v11407_v5 = vld [vmem:[%s15333_s10 + $0x11] ss:$0 sm:$0xff] }
0x2f94   : > { %v14669_v1 = vpack.c.bf16 %v14664_v10, %v14664_v10 }
0x2f96   : > { %12805 = vmatmul.mubr.msk.bf16.vlgmr.msra.gmra.mrb[156].mxu0 %vm1129_vm6, %v14669_v1 }
0x2f97   : > { %12817 = vmatpush3.bf16.msra.mxu0 %v13508_v51  ;;  %12820 = vmatprep.mubr.msk.bf16.mxu0 %vm13753_vm3, %v13751_v11 }
0x2f98   : > { %12818 = vmatprep.subr.bf16.mxu0 %v13751_v11 }
0x2f9b   : > { %12819 = vmatpush3.bf16.msra.mxu0 %v13509_v2 }
0x2f9c   : > { %12830 = vmatprep.subr.bf16.mxu0 %v13751_v11 }
0x2f9e   : > { %12821 = vmatmul.mubr.msk.bf16.vlgmr.msra.gmra.mrb[160].mxu0 %vm1129_vm6, %v14656_v59 }
0x2f9f   : > { %12832 = vmatprep.mubr.msk.bf16.mxu0 %vm13753_vm3, %v13751_v11 }
0x2ff2   : > { %v6094_v4 = vpop.f32.mrb[156].mxu1 }
0x2ff3   : > { %v6095_v27 = vadd.f32 %v11377_v3, %v6094_v4  ;;  %v12814_v6 = vpop.f32.mrb[157].mxu1 }
0x2ff4   : > { %v6097_v7 = vpop.f32.mrb[158].mxu1 }
0x2ff5   : > { %v6166_v8 = vpack.c.bf16 %v6095_v27, %v6095_v27  ;;  %v12815_v9 = vpop.f32.mrb[159].mxu1  ;;  %v11398_v7 = vld [vmem:[%s15333_s10 + $0xd] ss:$0 sm:$0xff] }
0x2ff7   : > { %v6171_v12 = vsel %vm1311_vm8, %v6166_v8, 0 }
0x2ff8   : > { %12825 = vmatpush3.bf16.xpose.msra.mxu1 %v6171_v12 }
0x2ff9   : > { %12836 = vmatprep.subr.bf16.mxu1 %v13751_v11 }
0x3069   : > { %v6025_v14 = vpop.f32.mrb[156].mxu0 }
0x306a   : > { %v6026_v15 = vadd.f32 %v11368_v13, %v6025_v14  ;;  %v12806_v16 = vpop.f32.mrb[157].mxu0 }
0x306b   : > { %v6028_v18 = vpop.f32.mrb[158].mxu0 }
0x306c   : > { %v6165_v22 = vpack.c.bf16 %v6026_v15, %v6026_v15  ;;  %v12807_v23 = vpop.f32.mrb[159].mxu0 }
0x306e   : > { %12827 = vmatmul.mubr.msk.bf16.vlgmr.msra.gmra.mrb[160].mxu1 %vm1311_vm8, %v6165_v22 }
0x306f   : > { %12837 = vmatpush3.bf16.msra.mxu1 %v13510_v20  ;;  %12840 = vmatprep.mubr.msk.bf16.mxu1 %vm13753_vm3, %v13751_v11 }
0x3070   : > { %12838 = vmatprep.subr.bf16.mxu1 %v13751_v11 }
0x3071   : > { %v6159_v29 = vpop.f32.mrb[160].mxu0 }
0x3072   : > { %v6160_v30 = vadd.f32 %v11386_v24, %v6159_v29  ;;  %v12822_v31 = vpop.f32.mrb[161].mxu0  ;;  %v11392_v29 = vld [vmem:[%s15334_s11 + $0x10] sm:$0xf] }
0x3073   : > { %v6162_v33 = vpop.f32.mrb[162].mxu0  ;;  %12839 = vmatpush3.bf16.msra.mxu1 %v13511_v25 }
0x3074   : > { %v6226_v36 = vpack.c.bf16 %v6160_v30, %v6160_v30  ;;  %v12823_v37 = vpop.f32.mrb[163].mxu0  ;;  %12852 = vmatprep.subr.bf16.mxu1 %v13751_v11 }
0x3076   : > { %v6231_v32 = vsel %vm1374_vm7, %v6226_v36, 0  ;;  %12841 = vmatmul.mubr.msk.bf16.vlgmr.msra.gmra.mrb[164].mxu1 %vm1129_vm6, %v14669_v1 }
0x3077   : > { %12831 = vmatpush3.bf16.msra.mxu0 %v6231_v32  ;;  %12853 = vmatpush3.bf16.msra.mxu1 %v13512_v35  ;;  %v6633_v35 = vsel %vm1374_vm7, %v11392_v29, 0  ;;  %v13516_v32 = vld [vmem:[%s15332_s7 + $0x120] sm:$0xff]  }
0x3078   : > { %12854 = vmatprep.subr.bf16.mxu1 %v13751_v11  ;;  %12856 = vmatprep.mubr.msk.bf16.mxu1 %vm13753_vm3, %v13751_v11 }
0x3079   : > { %12844 = vmatprep.subr.bf16.mxu0 %v13751_v11 }
0x307b   : > { %12855 = vmatpush3.bf16.msra.mxu1 %v13513_v38 }
0x307c   : > { %12866 = vmatprep.subr.bf16.mxu1 %v13751_v11 }
0x307e   : > { %12857 = vmatmul.mubr.msk.bf16.vlgmr.msra.gmra.mrb[168].mxu1 %vm1129_vm6, %v14656_v59 }
0x307f   : > { %12868 = vmatprep.mubr.msk.bf16.mxu1 %vm13753_vm3, %v13751_v11 }
0x3141   : > { %v6207_v42 = vpop.f32.mrb[160].mxu1 }
0x3142   : > { %v12828_v43 = vpop.f32.mrb[161].mxu1  ;;  %v6214_v44 = vsel %vm6213_vm14, %v6207_v42, -inf }
0x3143   : > { %6215 = vmax.xlane.f32.xlu0 %v6214_v44  ;;  %v6210_v45 = vpop.f32.mrb[162].mxu1  ;;  %v11422_v43 = vld [vmem:[%s15334_s11 + $0x14] sm:$0xf] }
0x3144   : > { %v12829_v34 = vpop.f32.mrb[163].mxu1  ;;  %v6587_v44 = vsel %vm1374_vm7, %v11422_v43, 0  ;;  %v13523_v43 = vld [vmem:[%s15332_s7 + $0xf8] sm:$0xff]  }
0x3149   : > { %v6336_v19 = vpop.f32.mrb[164].mxu1 }
0x314a   : > { %v12842_v17 = vpop.f32.mrb[165].mxu1  ;;  %v6337_v9 = vadd.f32 %v11398_v7, %v6336_v19 }
0x314b   : > { %v6339_v39 = vpop.f32.mrb[166].mxu1 }
0x314c   : > { %v12843_v47 = vpop.f32.mrb[167].mxu1  ;;  %v6472_v12 = vpack.c.bf16 %v6337_v9, %v6337_v9 }
0x3151   : > { %v6466_v48 = vpop.f32.mrb[168].mxu1 }
0x3152   : > { %v6467_v49 = vadd.f32 %v11416_v28, %v6466_v48  ;;  %v12858_v50 = vpop.f32.mrb[169].mxu1  ;;  %v13518_v48 = vld [vmem:[%s15332_s7 + $0xe0] sm:$0xff]  }
0x3153   : > { %v6469_v41 = vpop.f32.mrb[170].mxu1 }
0x3154   : > { %v6532_v52 = vpack.c.bf16 %v6467_v49, %v6467_v49  ;;  %v12859_v53 = vpop.f32.mrb[171].mxu1  ;;  %v13519_v41 = vld [vmem:[%s15332_s7 + $0xe8] sm:$0xff]  }
0x3156   : > { %v6537_v54 = vsel %vm1374_vm7, %v6532_v52, 0 }
0x3157   : > { %12867 = vmatpush3.bf16.msra.mxu1 %v6537_v54 }
0x3158   : > { %12878 = vmatprep.subr.bf16.mxu1 %v13751_v11 }
0x31d0   : > { %v6216_v55 = vpop.xlane.xlu0 %6215 }
0x31d1   : > { %v6217_v56 = vsub.f32 %v6207_v42, %v6216_v55  ;;  %v13517_v42 = vld [vmem:[%s15332_s7 + $0x128] sm:$0xff]   ;;  %v13520_v55 = vld [vmem:[%s15332_s7 + $0x160] sm:$0xff]  }
0x31d3   : > { %v6218_v57 = vmul.f32 1.442695, %v6217_v56 }
0x31d5   : > { %13650 = vpow2.f32 %v6218_v57  ;;  %v11439_v57 = vld [vmem:[%s15333_s10 + $0x12] ss:$0 sm:$0xff] }
0x31df   : > { %v13651_v58 = vpop.eup %13650 }
0x31e0   : > { %v6220_v60 = vsel %vm6213_vm14, %v13651_v58, 0.0  ;;  %v6225_v61 = vpack.c.bf16 %v13651_v58, %v13651_v58  ;;  %v13521_v58 = vld [vmem:[%s15332_s7 + $0x168] sm:$0xff]  }
0x31e1   : > { %6221 = vadd.xlane.f32.xlu0 %v6220_v60 }
0x31e2   : > { %12833 = vmatmul.mubr.msk.bf16.vlgmr.msra.gmra.mrb[164].mxu0 %vm1311_vm8, %v6225_v61 }
0x31e3   : > { %12845 = vmatpush3.bf16.msra.mxu0 %v13514_v40  ;;  %12848 = vmatprep.mubr.msk.bf16.mxu0 %vm13753_vm3, %v13751_v11 }
0x31e4   : > { %12846 = vmatprep.subr.bf16.mxu0 %v13751_v11 }
0x31e7   : > { %12847 = vmatpush3.bf16.msra.mxu0 %v13515_v62 }
0x31e8   : > { %12860 = vmatprep.subr.bf16.mxu0 %v13751_v11 }
0x31ea   : > { %12849 = vmatmul.mubr.msk.bf16.vlgmr.msra.gmra.mrb[168].mxu0 %vm1129_vm6, %v14656_v59 }
0x31eb   : > { %12862 = vmatprep.mubr.msk.bf16.mxu0 %vm13753_vm3, %v13751_v11 }
0x326e   : > { %v6222_v23 = vpop.xlane.xlu0 %6221 }
0x326f   : > { %v6223_v25 = vmax.f32 %v6222_v23, 1e-30 }
0x32b5   : > { %v6267_v63 = vpop.f32.mrb[164].mxu0 }
0x32b6   : > { %v12834_v0 = vpop.f32.mrb[165].mxu0 }
0x32b7   : > { %v6270_v21 = vpop.f32.mrb[166].mxu0 }
0x32b8   : > { %v12835_v46 = vpop.f32.mrb[167].mxu0 }
0x32bd   : > { %v6401_v51 = vpop.f32.mrb[168].mxu0 }
0x32be   : > { %v6402_v2 = vadd.f32 %v11407_v5, %v6401_v51  ;;  %v12850_v3 = vpop.f32.mrb[169].mxu0 }
0x32bf   : > { %v6404_v4 = vpop.f32.mrb[170].mxu0 }
0x32c0   : > { %v6473_v27 = vpack.c.bf16 %v6402_v2, %v6402_v2  ;;  %v12851_v6 = vpop.f32.mrb[171].mxu0  ;;  %v11430_v4 = vld [vmem:[%s15333_s10 + $0xe] ss:$0 sm:$0xff] }
0x32c2   : > { %v6478_v8 = vsel %vm1311_vm8, %v6473_v27, 0 }
0x32c3   : > { %12861 = vmatpush3.bf16.xpose.msra.mxu0 %v6478_v8 }
0x32c4   : > { %12872 = vmatprep.subr.bf16.mxu0 %v13751_v11 }
0x32ca   : > { %12863 = vmatmul.mubr.msk.bf16.vlgmr.msra.gmra.mrb[172].mxu0 %vm1311_vm8, %v6472_v12 }
0x32cb   : > { %12874 = vmatprep.mubr.msk.bf16.mxu0 %vm13753_vm3, %v13751_v11  ;;  %12873 = vmatpush3.bf16.msra.mxu0 %v6587_v44  ;;  %v13524_v44 = vld [vmem:[%s15332_s7 + $0x170] sm:$0xff]  }
0x32cc   : > { %12884 = vmatprep.subr.bf16.mxu0 %v13751_v11 }
0x339d   : > { %v6514_v13 = vpop.f32.mrb[172].mxu0 }
0x339e   : > { %v12864_v14 = vpop.f32.mrb[173].mxu0  ;;  %v6520_v15 = vsel %vm6213_vm14, %v6514_v13, -inf }
0x339f   : > { %6521 = vmax.xlane.f32.xlu1 %v6520_v15  ;;  %v6517_v16 = vpop.f32.mrb[174].mxu0 }
0x33a0   : > { %v12865_v18 = vpop.f32.mrb[175].mxu0 }
0x342c   : > { %v6522_v20 = vpop.xlane.xlu1 %6521 }
0x342d   : > { %v6523_v22 = vsub.f32 %v6514_v13, %v6522_v20  ;;  %v11448_v13 = vld [vmem:[%s15333_s10 + $0x16] ss:$0 sm:$0xff] }
0x342f   : > { %v6524_v24 = vmul.f32 1.442695, %v6523_v22 }
0x3431   : > { %13652 = vpow2.f32 %v6524_v24 }
0x3432   : > { %13654 = vrcp.f32 %v6223_v25 }
0x343b   : > { %v13653_v30 = vpop.eup %13652 }
0x343c   : > { %v6526_v31 = vsel %vm6213_vm14, %v13653_v30, 0.0  ;;  %v6531_v33 = vpack.c.bf16 %v13653_v30, %v13653_v30  ;;  %v13655_v36 = vpop.eup %13654 }
0x343d   : > { %6527 = vadd.xlane.f32.xlu1 %v6526_v31  ;;  %v6273_v37 = vmul.f32 %v13655_v36, %v6267_v63 }
0x343e   : > { %12869 = vmatmul.mubr.msk.bf16.vlgmr.msra.gmra.mrb[172].mxu1 %vm1311_vm8, %v6531_v33 }
0x343f   : > { %12879 = vmatpush3.bf16.msra.mxu1 %v6633_v35  ;;  %12880 = vmatprep.mubr.msk.bf16.mxu1 %vm13753_vm3, %v13751_v11  ;;  %v6276_v38 = vpack.c.bf16 %v6273_v37, %v6273_v37 }
0x3440   : > { %12892 = vmatprep.subr.bf16.mxu1 %v13751_v11 }
0x3446   : > { %12881 = vmatmul.mubr.msk.bf16.vlgmr.msra.gmra.mrb[176].mxu1 %vm1311_vm8, %v6276_v38 }
0x3447   : > { %12893 = vmatpush3.bf16.msra.mxu1 %v13516_v32  ;;  %12896 = vmatprep.mubr.msk.bf16.mxu1 %vm13753_vm3, %v13751_v11  ;;  %v13522_v32 = vld [vmem:[%s15332_s7 + $0xf0] sm:$0xff]  }
0x3448   : > { %12894 = vmatprep.subr.bf16.mxu1 %v13751_v11 }
0x344b   : > { %12895 = vmatpush3.bf16.msra.mxu1 %v13517_v42 }
0x344c   : > { %12908 = vmatprep.subr.bf16.mxu1 %v13751_v11 }
0x344e   : > { %12897 = vmatmul.mubr.msk.bf16.vlgmr.msra.gmra.mrb[180].mxu1 %vm1129_vm6, %v14656_v59 }
0x344f   : > { %12910 = vmatprep.mubr.msk.bf16.mxu1 %vm13753_vm3, %v13751_v11 }
0x34ca   : > { %v6528_v45 = vpop.xlane.xlu1 %6527 }
0x34cb   : > { %v6529_v34 = vmax.f32 %v6528_v45, 1e-30  ;;  %v13525_v45 = vld [vmem:[%s15332_s7 + $0x178] sm:$0xff]  }
0x34cd   : > { %13656 = vrcp.f32 %v6529_v34  ;;  %v11454_v34 = vld [vmem:[%s15334_s11 + $0x18] sm:$0xf] }
0x34d7   : > { %v13657_v19 = vpop.eup %13656 }
0x3511   : > { %v6573_v17 = vpop.f32.mrb[172].mxu1 }
0x3512   : > { %v6579_v39 = vmul.f32 %v13657_v19, %v6573_v17  ;;  %v12870_v47 = vpop.f32.mrb[173].mxu1  ;;  %v6985_v19 = vsel %vm1374_vm7, %v11454_v34, 0 }
0x3513   : > { %v6576_v28 = vpop.f32.mrb[174].mxu1 }
0x3514   : > { %v6582_v49 = vpack.c.bf16 %v6579_v39, %v6579_v39  ;;  %v12871_v50 = vpop.f32.mrb[175].mxu1 }
0x3515   : > { %v13526_v50 = vld [vmem:[%s15332_s7 + $0x130] sm:$0xff]  }
0x3516   : > { %12875 = vmatmul.mubr.msk.bf16.vlgmr.msra.gmra.mrb[176].mxu0 %vm1311_vm8, %v6582_v49 }
0x3517   : > { %12885 = vmatpush3.bf16.msra.mxu0 %v13518_v48  ;;  %12888 = vmatprep.mubr.msk.bf16.mxu0 %vm13753_vm3, %v13751_v11 }
0x3518   : > { %12886 = vmatprep.subr.bf16.mxu0 %v13751_v11 }
0x3519   : > { %v6669_v52 = vpop.f32.mrb[176].mxu1 }
0x351a   : > { %v12882_v53 = vpop.f32.mrb[177].mxu1 }
0x351b   : > { %v6672_v54 = vpop.f32.mrb[178].mxu1  ;;  %12887 = vmatpush3.bf16.msra.mxu0 %v13519_v41  ;;  %v13527_v53 = vld [vmem:[%s15332_s7 + $0x138] sm:$0xff]  }
0x351c   : > { %v12883_v56 = vpop.f32.mrb[179].mxu1  ;;  %12900 = vmatprep.subr.bf16.mxu0 %v13751_v11 }
0x351e   : > { %12889 = vmatmul.mubr.msk.bf16.vlgmr.msra.gmra.mrb[180].mxu0 %vm1129_vm6, %v14669_v1 }
0x351f   : > { %12901 = vmatpush3.bf16.msra.mxu0 %v13520_v55  ;;  %12904 = vmatprep.mubr.msk.bf16.mxu0 %vm13753_vm3, %v13751_v11 }
0x3520   : > { %12902 = vmatprep.subr.bf16.mxu0 %v13751_v11 }
0x3521   : > { %v6799_v40 = vpop.f32.mrb[180].mxu1 }
0x3522   : > { %v6800_v60 = vadd.f32 %v11439_v57, %v6799_v40  ;;  %v12898_v61 = vpop.f32.mrb[181].mxu1 }
0x3523   : > { %v6802_v62 = vpop.f32.mrb[182].mxu1  ;;  %12903 = vmatpush3.bf16.msra.mxu0 %v13521_v58  ;;  %v11479_v58 = vld [vmem:[%s15333_s10 + $0x17] ss:$0 sm:$0xff] }
0x3524   : > { %v6871_v63 = vpack.c.bf16 %v6800_v60, %v6800_v60  ;;  %v12899_v0 = vpop.f32.mrb[183].mxu1  ;;  %12914 = vmatprep.subr.bf16.mxu0 %v13751_v11 }
0x3526   : > { %v6876_v21 = vsel %vm1311_vm8, %v6871_v63, 0  ;;  %12905 = vmatmul.mubr.msk.bf16.vlgmr.msra.gmra.mrb[184].mxu0 %vm1129_vm6, %v14656_v59 }
0x3527   : > { %12909 = vmatpush3.bf16.xpose.msra.mxu1 %v6876_v21  ;;  %12916 = vmatprep.mubr.msk.bf16.mxu0 %vm13753_vm3, %v13751_v11 }
0x3528   : > { %12920 = vmatprep.subr.bf16.mxu1 %v13751_v11 }
0x35e9   : > { %v6623_v46 = vpop.f32.mrb[176].mxu0 }
0x35ea   : > { %v14775_v5 = vadd.f32 %v6669_v52, %v6623_v46  ;;  %v12876_v51 = vpop.f32.mrb[177].mxu0 }
0x35eb   : > { %v6626_v2 = vpop.f32.mrb[178].mxu0 }
0x35ec   : > { %v12877_v3 = vpop.f32.mrb[179].mxu0 }
0x35f1   : > { %v6734_v27 = vpop.f32.mrb[180].mxu0 }
0x35f2   : > { %v6735_v6 = vadd.f32 %v11430_v4, %v6734_v27  ;;  %v12890_v7 = vpop.f32.mrb[181].mxu0  ;;  %v11470_v27 = vld [vmem:[%s15333_s10 + $0x13] ss:$0 sm:$0xff] }
0x35f3   : > { %v6737_v8 = vpop.f32.mrb[182].mxu0 }
0x35f4   : > { %v6870_v9 = vpack.c.bf16 %v6735_v6, %v6735_v6  ;;  %v12891_v12 = vpop.f32.mrb[183].mxu0 }
0x35f6   : > { %12911 = vmatmul.mubr.msk.bf16.vlgmr.msra.gmra.mrb[184].mxu1 %vm1311_vm8, %v6870_v9 }
0x35f7   : > { %12922 = vmatprep.mubr.msk.bf16.mxu1 %vm13753_vm3, %v13751_v11  ;;  %12921 = vmatpush3.bf16.msra.mxu1 %v6985_v19 }
0x35f8   : > { %12934 = vmatprep.subr.bf16.mxu1 %v13751_v11 }
0x35f9   : > { %v6864_v14 = vpop.f32.mrb[184].mxu0 }
0x35fa   : > { %v6865_v15 = vadd.f32 %v11448_v13, %v6864_v14  ;;  %v12906_v16 = vpop.f32.mrb[185].mxu0  ;;  %v11461_v14 = vld [vmem:[%s15333_s10 + $0xf] ss:$0 sm:$0xff] }
0x35fb   : > { %v6867_v18 = vpop.f32.mrb[186].mxu0 }
0x35fc   : > { %v6930_v20 = vpack.c.bf16 %v6865_v15, %v6865_v15  ;;  %v12907_v22 = vpop.f32.mrb[187].mxu0 }
0x35fe   : > { %v6935_v23 = vsel %vm1374_vm7, %v6930_v20, 0 }
0x35ff   : > { %12915 = vmatpush3.bf16.msra.mxu0 %v6935_v23 }
0x3600   : > { %12926 = vmatprep.subr.bf16.mxu0 %v13751_v11 }
0x36c9   : > { %v6912_v24 = vpop.f32.mrb[184].mxu1 }
0x36ca   : > { %v12912_v25 = vpop.f32.mrb[185].mxu1  ;;  %v6918_v29 = vsel %vm6213_vm14, %v6912_v24, -inf }
0x36cb   : > { %6919 = vmax.xlane.f32.xlu0 %v6918_v29  ;;  %v6915_v30 = vpop.f32.mrb[186].mxu1 }
0x36cc   : > { %v12913_v31 = vpop.f32.mrb[187].mxu1 }
0x3758   : > { %v6920_v33 = vpop.xlane.xlu0 %6919 }
0x3759   : > { %v6921_v35 = vsub.f32 %v6912_v24, %v6920_v33 }
0x375b   : > { %v6922_v36 = vmul.f32 1.442695, %v6921_v35 }
0x375d   : > { %13658 = vpow2.f32 %v6922_v36  ;;  %v11485_v36 = vld [vmem:[%s15334_s11 + $0x1c] sm:$0xf] }
0x3767   : > { %v13659_v37 = vpop.eup %13658 }
0x3768   : > { %v6924_v38 = vsel %vm6213_vm14, %v13659_v37, 0.0  ;;  %v6929_v42 = vpack.c.bf16 %v13659_v37, %v13659_v37  ;;  %v7338_v37 = vsel %vm1374_vm7, %v11485_v36, 0 }
0x3769   : > { %6925 = vadd.xlane.f32.xlu1 %v6924_v38 }
0x376a   : > { %12917 = vmatmul.mubr.msk.bf16.vlgmr.msra.gmra.mrb[188].mxu0 %vm1311_vm8, %v6929_v42 }
0x376b   : > { %12927 = vmatpush3.bf16.msra.mxu0 %v13522_v32  ;;  %12930 = vmatprep.mubr.msk.bf16.mxu0 %vm13753_vm3, %v13751_v11 }
0x376c   : > { %12928 = vmatprep.subr.bf16.mxu0 %v13751_v11 }
0x376f   : > { %12929 = vmatpush3.bf16.msra.mxu0 %v13523_v43 }
0x3770   : > { %12942 = vmatprep.subr.bf16.mxu0 %v13751_v11 }
0x3772   : > { %12931 = vmatmul.mubr.msk.bf16.vlgmr.msra.gmra.mrb[192].mxu0 %vm1129_vm6, %v14669_v1 }
0x3773   : > { %12943 = vmatpush3.bf16.msra.mxu0 %v13524_v44  ;;  %12946 = vmatprep.mubr.msk.bf16.mxu0 %vm13753_vm3, %v13751_v11 }
0x3774   : > { %12944 = vmatprep.subr.bf16.mxu0 %v13751_v11 }
0x3777   : > { %12945 = vmatpush3.bf16.msra.mxu0 %v13525_v45 }
0x3778   : > { %12956 = vmatprep.subr.bf16.mxu0 %v13751_v11 }
0x377a   : > { %12947 = vmatmul.mubr.msk.bf16.vlgmr.msra.gmra.mrb[196].mxu0 %vm1129_vm6, %v14656_v59 }
0x377b   : > { %12958 = vmatprep.mubr.msk.bf16.mxu0 %vm13753_vm3, %v13751_v11 }
0x37f6   : > { %v6926_v1 = vpop.xlane.xlu1 %6925 }
0x37f7   : > { %v6927_v17 = vmax.f32 %v6926_v1, 1e-30 }
0x37f9   : > { %13660 = vrcp.f32 %v6927_v17 }
0x3803   : > { %v13661_v39 = vpop.eup %13660 }
0x383d   : > { %v6971_v47 = vpop.f32.mrb[188].mxu0 }
0x383e   : > { %v6977_v28 = vmul.f32 %v13661_v39, %v6971_v47  ;;  %v12918_v48 = vpop.f32.mrb[189].mxu0  ;;  %v11488_v39 = vld [vmem:[%s15335_s16 + $0x1] ss:$0 sm:$0xff] }
0x383f   : > { %v6974_v49 = vpop.f32.mrb[190].mxu0 }
0x3840   : > { %v6980_v41 = vpack.c.bf16 %v6977_v28, %v6977_v28  ;;  %v12919_v52 = vpop.f32.mrb[191].mxu0 }
0x3842   : > { %12923 = vmatmul.mubr.msk.bf16.vlgmr.msra.gmra.mrb[188].mxu1 %vm1311_vm8, %v6980_v41 }
0x3843   : > { %12935 = vmatpush3.bf16.msra.mxu1 %v13526_v50  ;;  %12938 = vmatprep.mubr.msk.bf16.mxu1 %vm13753_vm3, %v13751_v11 }
0x3844   : > { %12936 = vmatprep.subr.bf16.mxu1 %v13751_v11 }
0x3845   : > { %v7087_v54 = vpop.f32.mrb[192].mxu0 }
0x3846   : > { %v12932_v55 = vpop.f32.mrb[193].mxu0  ;;  %v7088_v16 = vadd.f32 %v11461_v14, %v7087_v54 }
0x3847   : > { %v7090_v56 = vpop.f32.mrb[194].mxu0  ;;  %12937 = vmatpush3.bf16.msra.mxu1 %v13527_v53 }
0x3848   : > { %v12933_v57 = vpop.f32.mrb[195].mxu0  ;;  %12950 = vmatprep.subr.bf16.mxu1 %v13751_v11  ;;  %v7223_v18 = vpack.c.bf16 %v7088_v16, %v7088_v16 }
0x384a   : > { %12939 = vmatmul.mubr.msk.bf16.vlgmr.msra.gmra.mrb[192].mxu1 %vm1129_vm6, %v14656_v59 }
0x384b   : > { %12952 = vmatprep.mubr.msk.bf16.mxu1 %vm13753_vm3, %v13751_v11 }
0x384d   : > { %v7217_v40 = vpop.f32.mrb[196].mxu0 }
0x384e   : > { %v7218_v60 = vadd.f32 %v11479_v58, %v7217_v40  ;;  %v12948_v61 = vpop.f32.mrb[197].mxu0  ;;  %v13528_v58 = vld [vmem:[%s15339_s26] sm:$0xff]   ;;  %v13529_v40 = vld [vmem:[%s15339_s26 + $0x8] sm:$0xff]  }
0x384f   : > { %v7220_v62 = vpop.f32.mrb[198].mxu0 }
0x3850   : > { %v7283_v63 = vpack.c.bf16 %v7218_v60, %v7218_v60  ;;  %v12949_v0 = vpop.f32.mrb[199].mxu0  ;;  %v13531_v60 = vld [vmem:[%s15340_s1 + $0x8] sm:$0xff]  }
0x3852   : > { %v7288_v21 = vsel %vm1374_vm7, %v7283_v63, 0 }
0x3853   : > { %12957 = vmatpush3.bf16.msra.mxu0 %v7288_v21  ;;  %v11491_v21 = vld [vmem:[%s15337_s22 + $0x1] ss:$0 sm:$0xff] }
0x3854   : > { %12968 = vmatprep.subr.bf16.mxu0 %v13751_v11 }
0x3915   : > { %v7021_v46 = vpop.f32.mrb[188].mxu1 }
0x3916   : > { %v7027_v51 = vadd.f32 %v7021_v46, %v14775_v5  ;;  %v12924_v2 = vpop.f32.mrb[189].mxu1 }
0x3917   : > { %v7024_v3 = vpop.f32.mrb[190].mxu1 }
0x3918   : > { %v12925_v4 = vpop.f32.mrb[191].mxu1 }
0x391d   : > { %v7152_v6 = vpop.f32.mrb[192].mxu1 }
0x391e   : > { %v7153_v7 = vadd.f32 %v11470_v27, %v7152_v6  ;;  %v12940_v8 = vpop.f32.mrb[193].mxu1  ;;  %v13532_v27 = vld [vmem:[%s15340_s1 + $0x10] sm:$0xff]   ;;  %v13533_v6 = vld [vmem:[%s15340_s1 + $0x18] sm:$0xff]  }
0x391f   : > { %v7155_v9 = vpop.f32.mrb[194].mxu1 }
0x3920   : > { %v7224_v12 = vpack.c.bf16 %v7153_v7, %v7153_v7  ;;  %v12941_v13 = vpop.f32.mrb[195].mxu1  ;;  %v11493_v7 = vld [vmem:[%s15341_s2] ss:$0 sm:$0xff] }
0x3922   : > { %v7229_v15 = vsel %vm1311_vm8, %v7224_v12, 0 }
0x3923   : > { %12951 = vmatpush3.bf16.xpose.msra.mxu1 %v7229_v15 }
0x3924   : > { %12962 = vmatprep.subr.bf16.mxu1 %v13751_v11 }
0x392a   : > { %12953 = vmatmul.mubr.msk.bf16.vlgmr.msra.gmra.mrb[196].mxu1 %vm1311_vm8, %v7223_v18  ;;  %v11497_v18 = vld [vmem:[%s15342_s3] ss:$0 sm:$0xff] }
0x392b   : > { %12964 = vmatprep.mubr.msk.bf16.mxu1 %vm13753_vm3, %v13751_v11  ;;  %12963 = vmatpush3.bf16.msra.mxu1 %v7338_v37  ;;  %v13534_v37 = vld [vmem:[%s15332_s7 + $0x180] sm:$0xff]  }
0x392c   : > { %12976 = vmatprep.subr.bf16.mxu1 %v13751_v11 }
0x39fd   : > { %v7265_v5 = vpop.f32.mrb[196].mxu1 }
0x39fe   : > { %v12954_v20 = vpop.f32.mrb[197].mxu1  ;;  %v7271_v22 = vsel %vm6213_vm14, %v7265_v5, -inf }
0x39ff   : > { %7272 = vmax.xlane.f32.xlu0 %v7271_v22  ;;  %v7268_v23 = vpop.f32.mrb[198].mxu1 }
0x3a00   : > { %v12955_v24 = vpop.f32.mrb[199].mxu1 }
0x3a8c   : > { %v7273_v25 = vpop.xlane.xlu0 %7272 }
0x3a8d   : > { %v7274_v29 = vsub.f32 %v7265_v5, %v7273_v25 }
0x3a8f   : > { %v7275_v30 = vmul.f32 1.442695, %v7274_v29 }
0x3a91   : > { %13662 = vpow2.f32 %v7275_v30 }
0x3a9b   : > { %v13663_v31 = vpop.eup %13662 }
0x3a9c   : > { %v7277_v33 = vsel %vm6213_vm14, %v13663_v31, 0.0  ;;  %v7282_v35 = vpack.c.bf16 %v13663_v31, %v13663_v31 }
0x3a9d   : > { %7278 = vadd.xlane.f32.xlu1 %v7277_v33 }
0x3a9e   : > { %12959 = vmatmul.mubr.msk.bf16.vlgmr.msra.gmra.mrb[200].mxu0 %vm1311_vm8, %v7282_v35 }
0x3a9f   : > { %12972 = vmatprep.mubr.msk.bf16.mxu0 %vm13753_vm3, %v13751_v11  ;;  %12969 = vmatpush3.bf16.msra.mxu0 %v13528_v58 }
0x3aa0   : > { %12970 = vmatprep.subr.bf16.mxu0 %v13751_v11 }
0x3aa3   : > { %12971 = vmatpush3.bf16.msra.mxu0 %v13529_v40 }
0x3aa4   : > { %12988 = vmatprep.subr.bf16.mxu0 %v13751_v11 }
0x3b2a   : > { %v7279_v32 = vpop.xlane.xlu1 %7278 }
0x3b2b   : > { %v7280_v38 = vmax.f32 %v7279_v32, 1e-30  ;;  %v13535_v32 = vld [vmem:[%s15332_s7 + $0x200] sm:$0xff]  }
0x3b2d   : > { %13664 = vrcp.f32 %v7280_v38  ;;  %v13536_v38 = vld [vmem:[%s15332_s7 + $0x188] sm:$0xff]  }
0x3b37   : > { %v13665_v42 = vpop.eup %13664 }
0x3b71   : > { %v7324_v43 = vpop.f32.mrb[200].mxu0 }
0x3b72   : > { %v7330_v44 = vmul.f32 %v13665_v42, %v7324_v43  ;;  %v12960_v45 = vpop.f32.mrb[201].mxu0  ;;  %v13537_v42 = vld [vmem:[%s15332_s7 + $0x208] sm:$0xff]  }
0x3b73   : > { %v7327_v34 = vpop.f32.mrb[202].mxu0 }
0x3b74   : > { %v7333_v19 = vpack.c.bf16 %v7330_v44, %v7330_v44  ;;  %v12961_v1 = vpop.f32.mrb[203].mxu0 }
0x3b76   : > { %12965 = vmatmul.mubr.msk.bf16.vlgmr.msra.gmra.mrb[200].mxu1 %vm1311_vm8, %v7333_v19  ;;  %v11505_v19 = vld [vmem:[%s15337_s22 + $0x2] ss:$0 sm:$0xff] }
0x3b77   : > { %12984 = vmatprep.mubr.msk.bf16.mxu1 %vm13753_vm3, %v13751_v11 }
0x3c49   : > { %v7374_v17 = vpop.f32.mrb[200].mxu1 }
0x3c4a   : > { %v7380_v47 = vadd.f32 %v7374_v17, %v7027_v51  ;;  %v12966_v28 = vpop.f32.mrb[201].mxu1  ;;  %v11492_v51 = vld [vmem:[%s15338_s23 + $0x1] ss:$0 sm:$0xff]  ;;  %v11506_v17 = vld [vmem:[%s15338_s23 + $0x2] ss:$0 sm:$0xff] }
0x3c4b   : > { %v7377_v48 = vpop.f32.mrb[202].mxu1  ;;  %v13538_v28 = vld [vmem:[%s15332_s7 + $0x1c0] sm:$0xff]  }
0x3c4c   : > { %v7389_v49 = vadd.f32 %v11488_v39, %v7380_v47  ;;  %v12967_v50 = vpop.f32.mrb[203].mxu1 }
0x3c4d   : > { %v11530_v50 = vld [vmem:[%s15333_s10 + $0x20] ss:$0 sm:$0xff] }
0x3c4e   : > { %v7390_v41 = vadd.f32 %v7389_v49, %v14664_v10  ;;  %v13530_v10 = vld [vmem:[%s15340_s1] sm:$0xff]   ;;  %v13539_v49 = vld [vmem:[%s15332_s7 + $0x1c8] sm:$0xff]  }
0x3c4f   : > { %12977 = vmatpush3.bf16.msra.mxu1 %v13530_v10 }
0x3c50   : > { %v7395_v52 = vsel %vm5934_vm13, %v7390_v41, 0.0  ;;  %12978 = vmatprep.subr.bf16.mxu1 %v13751_v11 }
0x3c51   : > { %7396 = vadd.xlane.f32.xlu0 %v7395_v52 }
0x3c53   : > { %12979 = vmatpush3.bf16.msra.mxu1 %v13531_v60 }
0x3c54   : > { %12980 = vmatprep.subr.bf16.mxu1 %v13751_v11 }
0x3c57   : > { %12981 = vmatpush3.bf16.msra.mxu1 %v13532_v27  ;;  %v13540_v27 = vld [vmem:[%s15332_s7 + $0x190] sm:$0xff]  }
0x3c58   : > { %12982 = vmatprep.subr.bf16.mxu1 %v13751_v11 }
0x3c5b   : > { %12983 = vmatpush3.bf16.msra.mxu1 %v13533_v6 }
0x3c5c   : > { %13004 = vmatprep.subr.bf16.mxu1 %v13751_v11 }
0x3cde   : > { %v7397_v53 = vpop.xlane.xlu0 %7396 }
0x3cdf   : > { %v7398_v54 = vmul.f32 0.03125, %v7397_v53 }
0x3ce1   : > { %v7399_v55 = vsub.f32 %v7390_v41, %v7398_v54 }
0x3ce3   : > { %v7400_v56 = vmul.f32 %v7399_v55, %v7399_v55 }
0x3ce5   : > { %v7401_v57 = vsel %vm5934_vm13, %v7400_v56, 0.0 }
0x3ce6   : > { %7402 = vadd.xlane.f32.xlu1 %v7401_v57 }
0x3d73   : > { %v7403_v61 = vpop.xlane.xlu1 %7402 }
0x3d74   : > { %v7404_v62 = vmul.f32 0.03125, %v7403_v61  ;;  %v11521_v61 = vld [vmem:[%s15333_s10 + $0x1c] ss:$0 sm:$0xff] }
0x3d76   : > { %v7405_v63 = vadd.f32 1e-05, %v7404_v62 }
0x3d78   : > { %13666 = vrsqrt.f32 %v7405_v63 }
0x3d82   : > { %v13667_v0 = vpop.eup %13666 }
0x3d83   : > { %v7407_v46 = vmul.f32 %v13667_v0, %v7399_v55 }
0x3d85   : > { %v7414_v2 = vmul.f32 %v11491_v21, %v7407_v46 }
0x3d87   : > { %v7421_v3 = vadd.f32 %v11492_v51, %v7414_v2  ;;  %v11512_v2 = vld [vmem:[%s15333_s10 + $0x18] ss:$0 sm:$0xff] }
0x3d89   : > { %v7426_v4 = vpack.c.bf16 %v7421_v3, %v7421_v3 }
0x3d8b   : > { %12973 = vmatmul.mubr.msk.bf16.vlgmr.msra.gmra.mrb[204].mxu0 %vm1129_vm6, %v7426_v4 }
0x3d8c   : > { %12992 = vmatprep.mubr.msk.bf16.mxu0 %vm13753_vm3, %v13751_v11  ;;  %12989 = vmatpush3.bf16.msra.mxu0 %v13534_v37 }
0x3d8d   : > { %12990 = vmatprep.subr.bf16.mxu0 %v13751_v11 }
0x3d90   : > { %12991 = vmatpush3.bf16.msra.mxu0 %v13536_v38 }
0x3d91   : > { %12996 = vmatprep.subr.bf16.mxu0 %v13751_v11 }
0x3e5e   : > { %v7483_v8 = vpop.f32.mrb[204].mxu0 }
0x3e5f   : > { %v7484_v9 = vadd.f32 %v11493_v7, %v7483_v8  ;;  %v12974_v12 = vpop.f32.mrb[205].mxu0  ;;  %v13541_v7 = vld [vmem:[%s15332_s7 + $0x198] sm:$0xff]   ;;  %v13542_v8 = vld [vmem:[%s15332_s7 + $0x210] sm:$0xff]  }
0x3e60   : > { %v7486_v13 = vpop.f32.mrb[206].mxu0 }
0x3e61   : > { %v7489_v14 = vmax.f32 %v7484_v9, 0.0  ;;  %v12975_v15 = vpop.f32.mrb[207].mxu0  ;;  %v13543_v9 = vld [vmem:[%s15332_s7 + $0x218] sm:$0xff]  }
0x3e63   : > { %v7498_v16 = vpack.c.bf16 %v7489_v14, %v7489_v14 }
0x3e65   : > { %12985 = vmatmul.mubr.msk.bf16.vlgmr.msra.gmra.mrb[204].mxu1 %vm1023_vm4, %v7498_v16 }
0x3e66   : > { %13008 = vmatprep.mubr.msk.bf16.mxu1 %vm13753_vm3, %v13751_v11  ;;  %13005 = vmatpush3.bf16.msra.mxu1 %v13535_v32 }
0x3e67   : > { %13006 = vmatprep.subr.bf16.mxu1 %v13751_v11 }
0x3e6a   : > { %13007 = vmatpush3.bf16.msra.mxu1 %v13537_v42 }
0x3e6b   : > { %13018 = vmatprep.subr.bf16.mxu1 %v13751_v11 }
0x3f38   : > { %v7567_v5 = vpop.f32.mrb[204].mxu1 }
0x3f39   : > { %v7568_v20 = vadd.f32 %v11497_v18, %v7567_v5  ;;  %v12986_v22 = vpop.f32.mrb[205].mxu1 }
0x3f3a   : > { %v7570_v23 = vpop.f32.mrb[206].mxu1 }
0x3f3b   : > { %v12987_v24 = vpop.f32.mrb[207].mxu1  ;;  %v7573_v25 = vadd.f32 %v7568_v20, %v7421_v3 }
0x3f3c   : > { %v11560_v24 = vld [vmem:[%s15333_s10 + $0x21] ss:$0 sm:$0xff] }
0x3f3d   : > { %v7578_v29 = vsel %vm5934_vm13, %v7573_v25, 0.0 }
0x3f3e   : > { %7579 = vadd.xlane.f32.xlu0 %v7578_v29 }
0x3fcb   : > { %v7580_v30 = vpop.xlane.xlu0 %7579 }
0x3fcc   : > { %v7581_v31 = vmul.f32 0.03125, %v7580_v30 }
0x3fce   : > { %v7582_v33 = vsub.f32 %v7573_v25, %v7581_v31 }
0x3fd0   : > { %v7583_v35 = vmul.f32 %v7582_v33, %v7582_v33 }
0x3fd2   : > { %v7584_v36 = vsel %vm5934_vm13, %v7583_v35, 0.0 }
0x3fd3   : > { %7585 = vadd.xlane.f32.xlu1 %v7584_v36 }
0x4060   : > { %v7586_v43 = vpop.xlane.xlu1 %7585 }
0x4061   : > { %v7587_v44 = vmul.f32 0.03125, %v7586_v43  ;;  %v13544_v43 = vld [vmem:[%s15332_s7 + $0x1d0] sm:$0xff]  }
0x4063   : > { %v7588_v45 = vadd.f32 1e-05, %v7587_v44 }
0x4065   : > { %13668 = vrsqrt.f32 %v7588_v45 }
0x406f   : > { %v13669_v34 = vpop.eup %13668 }
0x4070   : > { %v7590_v1 = vmul.f32 %v13669_v34, %v7582_v33  ;;  %v13545_v34 = vld [vmem:[%s15332_s7 + $0x1d8] sm:$0xff]  }
0x4072   : > { %v7597_v39 = vmul.f32 %v11505_v19, %v7590_v1 }
0x4074   : > { %v14879_v47 = vadd.f32 %v11506_v17, %v7597_v39 }
0x4076   : > { %v14884_v48 = vpack.c.bf16 %v14879_v47, %v14879_v47 }
0x4078   : > { %12993 = vmatmul.mubr.msk.bf16.vlgmr.msra.gmra.mrb[208].mxu0 %vm1129_vm6, %v14884_v48  ;;  %13009 = vmatmul.mubr.msk.bf16.vlgmr.msra.gmra.mrb[208].mxu1 %vm1129_vm6, %v14884_v48 }
0x4079   : > { %12997 = vmatpush3.bf16.msra.mxu0 %v13538_v28  ;;  %13000 = vmatprep.mubr.msk.bf16.mxu0 %vm13753_vm3, %v13751_v11  ;;  %v11551_v28 = vld [vmem:[%s15333_s10 + $0x1d] ss:$0 sm:$0xff] }
0x407a   : > { %12998 = vmatprep.subr.bf16.mxu0 %v13751_v11  ;;  %13020 = vmatprep.mubr.msk.bf16.mxu1 %vm13753_vm3, %v13751_v11 }
0x407d   : > { %12999 = vmatpush3.bf16.msra.mxu0 %v13539_v49 }
0x407e   : > { %13012 = vmatprep.subr.bf16.mxu0 %v13751_v11 }
0x4080   : > { %13001 = vmatmul.mubr.msk.bf16.vlgmr.msra.gmra.mrb[212].mxu0 %vm1129_vm6, %v14884_v48 }
0x4081   : > { %13014 = vmatprep.mubr.msk.bf16.mxu0 %vm13753_vm3, %v13751_v11 }
0x414b   : > { %v7668_v41 = vpop.f32.mrb[208].mxu0  ;;  %v7798_v52 = vpop.f32.mrb[208].mxu1 }
0x414c   : > { %v7799_v53 = vadd.f32 %v11530_v50, %v7798_v52  ;;  %v12994_v54 = vpop.f32.mrb[209].mxu0  ;;  %v13010_v55 = vpop.f32.mrb[209].mxu1  ;;  %v7669_v4 = vadd.f32 %v11512_v2, %v7668_v41 }
0x414d   : > { %v7671_v56 = vpop.f32.mrb[210].mxu0  ;;  %v7801_v57 = vpop.f32.mrb[210].mxu1  ;;  %v11542_v55 = vld [vmem:[%s15333_s10 + $0x19] ss:$0 sm:$0xff] }
0x414e   : > { %v7864_v58 = vpack.c.bf16 %v7799_v53, %v7799_v53  ;;  %v12995_v40 = vpop.f32.mrb[211].mxu0  ;;  %v13011_v10 = vpop.f32.mrb[211].mxu1  ;;  %v7804_v6 = vpack.c.bf16 %v7669_v4, %v7669_v4 }
0x4150   : > { %v7869_v60 = vsel %vm4772_vm10, %v7864_v58, 0 }
0x4151   : > { %13019 = vmatpush3.bf16.msra.mxu1 %v7869_v60 }
0x4152   : > { %13032 = vmatprep.subr.bf16.mxu1 %v13751_v11 }
0x4153   : > { %v7733_v62 = vpop.f32.mrb[212].mxu0 }
0x4154   : > { %v7734_v63 = vadd.f32 %v11521_v61, %v7733_v62  ;;  %v13002_v0 = vpop.f32.mrb[213].mxu0 }
0x4155   : > { %v7736_v21 = vpop.f32.mrb[214].mxu0 }
0x4156   : > { %v7805_v46 = vpack.c.bf16 %v7734_v63, %v7734_v63  ;;  %v13003_v51 = vpop.f32.mrb[215].mxu0 }
0x4158   : > { %v7810_v3 = vsel %vm1311_vm8, %v7805_v46, 0 }
0x4159   : > { %13013 = vmatpush3.bf16.xpose.msra.mxu0 %v7810_v3  ;;  %v11536_v3 = vld [vmem:[%s15334_s11 + $0x20] sm:$0xf] }
0x415a   : > { %13024 = vmatprep.subr.bf16.mxu0 %v13751_v11 }
0x4160   : > { %13015 = vmatmul.mubr.msk.bf16.vlgmr.msra.gmra.mrb[216].mxu0 %vm1311_vm8, %v7804_v6 }
0x4161   : > { %13025 = vmatpush3.bf16.msra.mxu0 %v13540_v27  ;;  %13028 = vmatprep.mubr.msk.bf16.mxu0 %vm13753_vm3, %v13751_v11 }
0x4162   : > { %13026 = vmatprep.subr.bf16.mxu0 %v13751_v11 }
0x4165   : > { %13027 = vmatpush3.bf16.msra.mxu0 %v13541_v7  ;;  %v8271_v7 = vsel %vm1374_vm7, %v11536_v3, 0 }
0x4166   : > { %13040 = vmatprep.subr.bf16.mxu0 %v13751_v11 }
0x4168   : > { %13029 = vmatmul.mubr.msk.bf16.vlgmr.msra.gmra.mrb[220].mxu0 %vm1129_vm6, %v14884_v48 }
0x4169   : > { %13041 = vmatpush3.bf16.msra.mxu0 %v13542_v8  ;;  %13044 = vmatprep.mubr.msk.bf16.mxu0 %vm13753_vm3, %v13751_v11 }
0x416a   : > { %13042 = vmatprep.subr.bf16.mxu0 %v13751_v11 }
0x416d   : > { %13043 = vmatpush3.bf16.msra.mxu0 %v13543_v9 }
0x416e   : > { %13054 = vmatprep.subr.bf16.mxu0 %v13751_v11 }
0x4170   : > { %13045 = vmatmul.mubr.msk.bf16.vlgmr.msra.gmra.mrb[224].mxu0 %vm1129_vm6, %v14884_v48 }
0x4171   : > { %13056 = vmatprep.mubr.msk.bf16.mxu0 %vm13753_vm3, %v13751_v11 }
0x4233   : > { %v7846_v12 = vpop.f32.mrb[216].mxu0 }
0x4234   : > { %v7847_v13 = vadd.f32 %v7846_v12, %v13954_v26  ;;  %v13016_v14 = vpop.f32.mrb[217].mxu0  ;;  %v13546_v12 = vld [vmem:[%s15332_s7 + $0x1e0] sm:$0xff]  }
0x4235   : > { %v7849_v15 = vpop.f32.mrb[218].mxu0  ;;  %v13547_v14 = vld [vmem:[%s15332_s7 + $0x1e8] sm:$0xff]  }
0x4236   : > { %v13017_v16 = vpop.f32.mrb[219].mxu0  ;;  %v7852_v18 = vsel %vm4754_vm11, %v7847_v13, -inf  ;;  %v11566_v15 = vld [vmem:[%s15334_s11 + $0x24] sm:$0xf] }
0x4237   : > { %7853 = vmax.xlane.f32.xlu0 %v7852_v18  ;;  %v8225_v16 = vsel %vm1374_vm7, %v11566_v15, 0 }
0x423b   : > { %v7974_v5 = vpop.f32.mrb[220].mxu0 }
0x423c   : > { %v13030_v20 = vpop.f32.mrb[221].mxu0  ;;  %v7975_v57 = vadd.f32 %v11542_v55, %v7974_v5 }
0x423d   : > { %v7977_v22 = vpop.f32.mrb[222].mxu0 }
0x423e   : > { %v13031_v23 = vpop.f32.mrb[223].mxu0  ;;  %v8110_v58 = vpack.c.bf16 %v7975_v57, %v7975_v57 }
0x4243   : > { %v8104_v25 = vpop.f32.mrb[224].mxu0 }
0x4244   : > { %v8105_v29 = vadd.f32 %v11560_v24, %v8104_v25  ;;  %v13046_v30 = vpop.f32.mrb[225].mxu0 }
0x4245   : > { %v8107_v31 = vpop.f32.mrb[226].mxu0 }
0x4246   : > { %v8170_v33 = vpack.c.bf16 %v8105_v29, %v8105_v29  ;;  %v13047_v35 = vpop.f32.mrb[227].mxu0  ;;  %v13548_v29 = vld [vmem:[%s15332_s7 + $0x1a0] sm:$0xff]  }
0x4248   : > { %v8175_v36 = vsel %vm4772_vm10, %v8170_v33, 0  ;;  %v13549_v33 = vld [vmem:[%s15332_s7 + $0x1a8] sm:$0xff]  }
0x4249   : > { %13055 = vmatpush3.bf16.msra.mxu0 %v8175_v36 }
0x424a   : > { %13066 = vmatprep.subr.bf16.mxu0 %v13751_v11 }
0x42c4   : > { %v7854_v37 = vpop.xlane.xlu0 %7853 }
0x42c5   : > { %v7855_v32 = vsub.f32 %v7847_v13, %v7854_v37 }
0x42c7   : > { %v7856_v38 = vmul.f32 1.442695, %v7855_v32  ;;  %v13550_v32 = vld [vmem:[%s15332_s7 + $0x220] sm:$0xff]  }
0x42c9   : > { %13670 = vpow2.f32 %v7856_v38 }
0x42d3   : > { %v13671_v42 = vpop.eup %13670 }
0x42d4   : > { %v7858_v44 = vsel %vm4754_vm11, %v13671_v42, 0.0  ;;  %v7863_v45 = vpack.c.bf16 %v13671_v42, %v13671_v42  ;;  %v11583_v42 = vld [vmem:[%s15333_s10 + $0x1e] ss:$0 sm:$0xff] }
0x42d5   : > { %7859 = vadd.xlane.f32.xlu0 %v7858_v44 }
0x42d6   : > { %13021 = vmatmul.mubr.msk.bf16.vlgmr.msra.gmra.mrb[212].mxu1 %vm4768_vm12, %v7863_v45 }
0x42d7   : > { %13033 = vmatpush3.bf16.msra.mxu1 %v13544_v43  ;;  %13036 = vmatprep.mubr.msk.bf16.mxu1 %vm13753_vm3, %v13751_v11  ;;  %v13551_v43 = vld [vmem:[%s15332_s7 + $0x228] sm:$0xff]  }
0x42d8   : > { %13034 = vmatprep.subr.bf16.mxu1 %v13751_v11 }
0x42db   : > { %13035 = vmatpush3.bf16.msra.mxu1 %v13545_v34 }
0x42dc   : > { %13048 = vmatprep.subr.bf16.mxu1 %v13751_v11 }
0x42de   : > { %13037 = vmatmul.mubr.msk.bf16.vlgmr.msra.gmra.mrb[216].mxu1 %vm1129_vm6, %v14884_v48 }
0x42df   : > { %13050 = vmatprep.mubr.msk.bf16.mxu1 %vm13753_vm3, %v13751_v11 }
0x4362   : > { %v7860_v46 = vpop.xlane.xlu0 %7859 }
0x4363   : > { %v7861_v2 = vmax.f32 %v7860_v46, 1e-30 }
0x43a9   : > { %v7905_v19 = vpop.f32.mrb[212].mxu1 }
0x43aa   : > { %v13022_v1 = vpop.f32.mrb[213].mxu1 }
0x43ab   : > { %v7908_v17 = vpop.f32.mrb[214].mxu1 }
0x43ac   : > { %v13023_v39 = vpop.f32.mrb[215].mxu1 }
0x43b1   : > { %v8039_v49 = vpop.f32.mrb[216].mxu1 }
0x43b2   : > { %v8040_v50 = vadd.f32 %v11551_v28, %v8039_v49  ;;  %v13038_v41 = vpop.f32.mrb[217].mxu1 }
0x43b3   : > { %v8042_v52 = vpop.f32.mrb[218].mxu1 }
0x43b4   : > { %v8111_v53 = vpack.c.bf16 %v8040_v50, %v8040_v50  ;;  %v13039_v54 = vpop.f32.mrb[219].mxu1 }
0x43b6   : > { %v8116_v56 = vsel %vm1311_vm8, %v8111_v53, 0  ;;  %v11574_v53 = vld [vmem:[%s15333_s10 + $0x1a] ss:$0 sm:$0xff] }
0x43b7   : > { %13049 = vmatpush3.bf16.xpose.msra.mxu1 %v8116_v56 }
0x43b8   : > { %13060 = vmatprep.subr.bf16.mxu1 %v13751_v11 }
0x43be   : > { %13051 = vmatmul.mubr.msk.bf16.vlgmr.msra.gmra.mrb[220].mxu1 %vm1311_vm8, %v8110_v58 }
0x43bf   : > { %13062 = vmatprep.mubr.msk.bf16.mxu1 %vm13753_vm3, %v13751_v11  ;;  %13061 = vmatpush3.bf16.msra.mxu1 %v8225_v16  ;;  %v13553_v16 = vld [vmem:[%s15332_s7 + $0x1b8] sm:$0xff]  }
0x43c0   : > { %13072 = vmatprep.subr.bf16.mxu1 %v13751_v11 }
0x4491   : > { %v8152_v40 = vpop.f32.mrb[220].mxu1 }
0x4492   : > { %v8153_v10 = vadd.f32 %v8152_v40, %v13954_v26  ;;  %v13052_v60 = vpop.f32.mrb[221].mxu1 }
0x4493   : > { %v8155_v61 = vpop.f32.mrb[222].mxu1 }
0x4494   : > { %v13053_v62 = vpop.f32.mrb[223].mxu1  ;;  %v8158_v63 = vsel %vm4754_vm11, %v8153_v10, -inf }
0x4495   : > { %8159 = vmax.xlane.f32.xlu1 %v8158_v63 }
0x4522   : > { %v8160_v0 = vpop.xlane.xlu1 %8159 }
0x4523   : > { %v8161_v21 = vsub.f32 %v8153_v10, %v8160_v0  ;;  %v11592_v10 = vld [vmem:[%s15333_s10 + $0x22] ss:$0 sm:$0xff] }
0x4525   : > { %v8162_v51 = vmul.f32 1.442695, %v8161_v21 }
0x4527   : > { %13672 = vpow2.f32 %v8162_v51 }
0x4528   : > { %13674 = vrcp.f32 %v7861_v2 }
0x4531   : > { %v13673_v4 = vpop.eup %13672 }
0x4532   : > { %v8164_v27 = vsel %vm4754_vm11, %v13673_v4, 0.0  ;;  %v8169_v6 = vpack.c.bf16 %v13673_v4, %v13673_v4  ;;  %v13675_v8 = vpop.eup %13674 }
0x4533   : > { %8165 = vadd.xlane.f32.xlu1 %v8164_v27  ;;  %v7911_v9 = vmul.f32 %v13675_v8, %v7905_v19 }
0x4534   : > { %13057 = vmatmul.mubr.msk.bf16.vlgmr.msra.gmra.mrb[228].mxu0 %vm4768_vm12, %v8169_v6 }
0x4535   : > { %13067 = vmatpush3.bf16.msra.mxu0 %v8271_v7  ;;  %13068 = vmatprep.mubr.msk.bf16.mxu0 %vm13753_vm3, %v13751_v11  ;;  %v7914_v13 = vpack.c.bf16 %v7911_v9, %v7911_v9 }
0x4536   : > { %13080 = vmatprep.subr.bf16.mxu0 %v13751_v11 }
0x453c   : > { %13069 = vmatmul.mubr.msk.bf16.vlgmr.msra.gmra.mrb[232].mxu0 %vm1311_vm8, %v7914_v13  ;;  %v13552_v13 = vld [vmem:[%s15332_s7 + $0x1b0] sm:$0xff]  }
0x453d   : > { %13081 = vmatpush3.bf16.msra.mxu0 %v13546_v12  ;;  %13084 = vmatprep.mubr.msk.bf16.mxu0 %vm13753_vm3, %v13751_v11 }
0x453e   : > { %13082 = vmatprep.subr.bf16.mxu0 %v13751_v11 }
0x4541   : > { %13083 = vmatpush3.bf16.msra.mxu0 %v13547_v14 }
0x4542   : > { %13096 = vmatprep.subr.bf16.mxu0 %v13751_v11 }
0x4544   : > { %13085 = vmatmul.mubr.msk.bf16.vlgmr.msra.gmra.mrb[236].mxu0 %vm1129_vm6, %v14884_v48 }
0x4545   : > { %13098 = vmatprep.mubr.msk.bf16.mxu0 %vm13753_vm3, %v13751_v11 }
0x45c0   : > { %v8166_v18 = vpop.xlane.xlu1 %8165 }
0x45c1   : > { %v8167_v5 = vmax.f32 %v8166_v18, 1e-30  ;;  %v13554_v18 = vld [vmem:[%s15332_s7 + $0x230] sm:$0xff]  }
0x45c3   : > { %13676 = vrcp.f32 %v8167_v5  ;;  %v13555_v5 = vld [vmem:[%s15332_s7 + $0x238] sm:$0xff]  }
0x45cd   : > { %v13677_v20 = vpop.eup %13676 }
0x4607   : > { %v8211_v22 = vpop.f32.mrb[228].mxu0 }
0x4608   : > { %v8217_v23 = vmul.f32 %v13677_v20, %v8211_v22  ;;  %v13058_v24 = vpop.f32.mrb[229].mxu0  ;;  %v11598_v20 = vld [vmem:[%s15334_s11 + $0x28] sm:$0xf] }
0x4609   : > { %v8214_v25 = vpop.f32.mrb[230].mxu0  ;;  %v8623_v22 = vsel %vm1374_vm7, %v11598_v20, 0 }
0x460a   : > { %v8220_v30 = vpack.c.bf16 %v8217_v23, %v8217_v23  ;;  %v13059_v31 = vpop.f32.mrb[231].mxu0 }
0x460c   : > { %13063 = vmatmul.mubr.msk.bf16.vlgmr.msra.gmra.mrb[224].mxu1 %vm1311_vm8, %v8220_v30 }
0x460d   : > { %13073 = vmatpush3.bf16.msra.mxu1 %v13548_v29  ;;  %13076 = vmatprep.mubr.msk.bf16.mxu1 %vm13753_vm3, %v13751_v11 }
0x460e   : > { %13074 = vmatprep.subr.bf16.mxu1 %v13751_v11 }
0x460f   : > { %v8307_v35 = vpop.f32.mrb[232].mxu0 }
0x4610   : > { %v13070_v36 = vpop.f32.mrb[233].mxu0 }
0x4611   : > { %v8310_v37 = vpop.f32.mrb[234].mxu0  ;;  %13075 = vmatpush3.bf16.msra.mxu1 %v13549_v33 }
0x4612   : > { %v13071_v38 = vpop.f32.mrb[235].mxu0  ;;  %13088 = vmatprep.subr.bf16.mxu1 %v13751_v11 }
0x4614   : > { %13077 = vmatmul.mubr.msk.bf16.vlgmr.msra.gmra.mrb[228].mxu1 %vm1129_vm6, %v14884_v48 }
0x4615   : > { %13089 = vmatpush3.bf16.msra.mxu1 %v13550_v32  ;;  %13092 = vmatprep.mubr.msk.bf16.mxu1 %vm13753_vm3, %v13751_v11  ;;  %v13557_v32 = vld [vmem:[%s15332_s7 + $0x1f8] sm:$0xff]  }
0x4616   : > { %13090 = vmatprep.subr.bf16.mxu1 %v13751_v11 }
0x4617   : > { %v8437_v44 = vpop.f32.mrb[236].mxu0 }
0x4618   : > { %v8438_v45 = vadd.f32 %v11583_v42, %v8437_v44  ;;  %v13086_v34 = vpop.f32.mrb[237].mxu0 }
0x4619   : > { %v8440_v19 = vpop.f32.mrb[238].mxu0  ;;  %13091 = vmatpush3.bf16.msra.mxu1 %v13551_v43 }
0x461a   : > { %v8509_v1 = vpack.c.bf16 %v8438_v45, %v8438_v45  ;;  %v13087_v17 = vpop.f32.mrb[239].mxu0  ;;  %13102 = vmatprep.subr.bf16.mxu1 %v13751_v11  ;;  %v11623_v45 = vld [vmem:[%s15333_s10 + $0x23] ss:$0 sm:$0xff] }
0x461c   : > { %v8514_v39 = vsel %vm1311_vm8, %v8509_v1, 0  ;;  %13093 = vmatmul.mubr.msk.bf16.vlgmr.msra.gmra.mrb[232].mxu1 %vm1129_vm6, %v14884_v48 }
0x461d   : > { %13097 = vmatpush3.bf16.xpose.msra.mxu0 %v8514_v39  ;;  %13104 = vmatprep.mubr.msk.bf16.mxu1 %vm13753_vm3, %v13751_v11 }
0x461e   : > { %13108 = vmatprep.subr.bf16.mxu0 %v13751_v11 }
0x46df   : > { %v8261_v28 = vpop.f32.mrb[224].mxu1 }
0x46e0   : > { %v14996_v49 = vadd.f32 %v8307_v35, %v8261_v28  ;;  %v13064_v50 = vpop.f32.mrb[225].mxu1  ;;  %v13556_v35 = vld [vmem:[%s15332_s7 + $0x1f0] sm:$0xff]  }
0x46e1   : > { %v8264_v41 = vpop.f32.mrb[226].mxu1 }
0x46e2   : > { %v13065_v52 = vpop.f32.mrb[227].mxu1 }
0x46e7   : > { %v8372_v54 = vpop.f32.mrb[228].mxu1 }
0x46e8   : > { %v8373_v55 = vadd.f32 %v11574_v53, %v8372_v54  ;;  %v13078_v56 = vpop.f32.mrb[229].mxu1 }
0x46e9   : > { %v8375_v57 = vpop.f32.mrb[230].mxu1 }
0x46ea   : > { %v8508_v58 = vpack.c.bf16 %v8373_v55, %v8373_v55  ;;  %v13079_v40 = vpop.f32.mrb[231].mxu1  ;;  %v11614_v55 = vld [vmem:[%s15333_s10 + $0x1f] ss:$0 sm:$0xff] }
0x46ec   : > { %13099 = vmatmul.mubr.msk.bf16.vlgmr.msra.gmra.mrb[240].mxu0 %vm1311_vm8, %v8508_v58 }
0x46ed   : > { %13110 = vmatprep.mubr.msk.bf16.mxu0 %vm13753_vm3, %v13751_v11  ;;  %13109 = vmatpush3.bf16.msra.mxu0 %v8623_v22  ;;  %v13558_v22 = vld [vmem:[%s15332_s7 + $0x280] sm:$0xff]  }
0x46ee   : > { %13122 = vmatprep.subr.bf16.mxu0 %v13751_v11 }
0x46ef   : > { %v8502_v60 = vpop.f32.mrb[232].mxu1 }
0x46f0   : > { %v8503_v61 = vadd.f32 %v11592_v10, %v8502_v60  ;;  %v13094_v62 = vpop.f32.mrb[233].mxu1 }
0x46f1   : > { %v8505_v63 = vpop.f32.mrb[234].mxu1 }
0x46f2   : > { %v8568_v0 = vpack.c.bf16 %v8503_v61, %v8503_v61  ;;  %v13095_v21 = vpop.f32.mrb[235].mxu1  ;;  %v11605_v61 = vld [vmem:[%s15333_s10 + $0x1b] ss:$0 sm:$0xff] }
0x46f4   : > { %v8573_v46 = vsel %vm4772_vm10, %v8568_v0, 0 }
0x46f5   : > { %13103 = vmatpush3.bf16.msra.mxu1 %v8573_v46 }
0x46f6   : > { %13114 = vmatprep.subr.bf16.mxu1 %v13751_v11 }
0x47bf   : > { %v8550_v51 = vpop.f32.mrb[240].mxu0 }
0x47c0   : > { %v8551_v2 = vadd.f32 %v8550_v51, %v13954_v26  ;;  %v13100_v3 = vpop.f32.mrb[241].mxu0 }
0x47c1   : > { %v8553_v4 = vpop.f32.mrb[242].mxu0 }
0x47c2   : > { %v13101_v27 = vpop.f32.mrb[243].mxu0  ;;  %v8556_v6 = vsel %vm4754_vm11, %v8551_v2, -inf }
0x47c3   : > { %8557 = vmax.xlane.f32.xlu0 %v8556_v6 }
0x4850   : > { %v8558_v7 = vpop.xlane.xlu0 %8557 }
0x4851   : > { %v8559_v8 = vsub.f32 %v8551_v2, %v8558_v7 }
0x4853   : > { %v8560_v9 = vmul.f32 1.442695, %v8559_v8 }
0x4855   : > { %13678 = vpow2.f32 %v8560_v9 }
0x485f   : > { %v13679_v12 = vpop.eup %13678 }
0x4860   : > { %v8562_v14 = vsel %vm4754_vm11, %v13679_v12, 0.0  ;;  %v8567_v15 = vpack.c.bf16 %v13679_v12, %v13679_v12 }
0x4861   : > { %8563 = vadd.xlane.f32.xlu1 %v8562_v14 }
0x4862   : > { %13105 = vmatmul.mubr.msk.bf16.vlgmr.msra.gmra.mrb[236].mxu1 %vm4768_vm12, %v8567_v15 }
0x4863   : > { %13115 = vmatpush3.bf16.msra.mxu1 %v13552_v13  ;;  %13118 = vmatprep.mubr.msk.bf16.mxu1 %vm13753_vm3, %v13751_v11 }
0x4864   : > { %13116 = vmatprep.subr.bf16.mxu1 %v13751_v11 }
0x4867   : > { %13117 = vmatpush3.bf16.msra.mxu1 %v13553_v16 }
0x4868   : > { %13130 = vmatprep.subr.bf16.mxu1 %v13751_v11 }
0x486a   : > { %13119 = vmatmul.mubr.msk.bf16.vlgmr.msra.gmra.mrb[240].mxu1 %vm1129_vm6, %v14884_v48 }
0x486b   : > { %13131 = vmatpush3.bf16.msra.mxu1 %v13554_v18  ;;  %13134 = vmatprep.mubr.msk.bf16.mxu1 %vm13753_vm3, %v13751_v11 }
0x486c   : > { %13132 = vmatprep.subr.bf16.mxu1 %v13751_v11 }
0x486f   : > { %13133 = vmatpush3.bf16.msra.mxu1 %v13555_v5 }
0x4870   : > { %13144 = vmatprep.subr.bf16.mxu1 %v13751_v11 }
0x4872   : > { %13135 = vmatmul.mubr.msk.bf16.vlgmr.msra.gmra.mrb[244].mxu1 %vm1129_vm6, %v14884_v48 }
0x4873   : > { %13146 = vmatprep.mubr.msk.bf16.mxu1 %vm13753_vm3, %v13751_v11 }
0x48ee   : > { %v8564_v23 = vpop.xlane.xlu1 %8563 }
0x48ef   : > { %v8565_v24 = vmax.f32 %v8564_v23, 1e-30 }
0x48f1   : > { %13680 = vrcp.f32 %v8565_v24 }
0x48fb   : > { %v13681_v25 = vpop.eup %13680 }
0x4935   : > { %v8609_v29 = vpop.f32.mrb[236].mxu1 }
0x4936   : > { %v8615_v30 = vmul.f32 %v13681_v25, %v8609_v29  ;;  %v13106_v31 = vpop.f32.mrb[237].mxu1  ;;  %v13559_v25 = vld [vmem:[%s15332_s7 + $0x288] sm:$0xff]  }
0x4937   : > { %v8612_v33 = vpop.f32.mrb[238].mxu1 }
0x4938   : > { %v8618_v36 = vpack.c.bf16 %v8615_v30, %v8615_v30  ;;  %v13107_v37 = vpop.f32.mrb[239].mxu1  ;;  %v11632_v30 = vld [vmem:[%s15335_s16 + $0x2] ss:$0 sm:$0xff] }
0x493a   : > { %13111 = vmatmul.mubr.msk.bf16.vlgmr.msra.gmra.mrb[244].mxu0 %vm1311_vm8, %v8618_v36 }
0x493b   : > { %13123 = vmatpush3.bf16.msra.mxu0 %v13556_v35  ;;  %13126 = vmatprep.mubr.msk.bf16.mxu0 %vm13753_vm3, %v13751_v11 }
0x493c   : > { %13124 = vmatprep.subr.bf16.mxu0 %v13751_v11 }
0x493d   : > { %v8725_v38 = vpop.f32.mrb[240].mxu1 }
0x493e   : > { %v13120_v42 = vpop.f32.mrb[241].mxu1  ;;  %v8726_v63 = vadd.f32 %v11605_v61, %v8725_v38  ;;  %v11651_v38 = vld [vmem:[%s15333_s10 + $0x28] ss:$0 sm:$0xff]  ;;  %v13562_v61 = vld [vmem:[%s15332_s7 + $0x2c0] sm:$0xff]  }
0x493f   : > { %v8728_v43 = vpop.f32.mrb[242].mxu1  ;;  %13125 = vmatpush3.bf16.msra.mxu0 %v13557_v32 }
0x4940   : > { %v13121_v44 = vpop.f32.mrb[243].mxu1  ;;  %13138 = vmatprep.subr.bf16.mxu0 %v13751_v11  ;;  %v8861_v0 = vpack.c.bf16 %v8726_v63, %v8726_v63  ;;  %v13563_v63 = vld [vmem:[%s15332_s7 + $0x2c8] sm:$0xff]  }
0x4942   : > { %13127 = vmatmul.mubr.msk.bf16.vlgmr.msra.gmra.mrb[248].mxu0 %vm1129_vm6, %v14884_v48 }
0x4943   : > { %13140 = vmatprep.mubr.msk.bf16.mxu0 %vm13753_vm3, %v13751_v11 }
0x4945   : > { %v8855_v34 = vpop.f32.mrb[244].mxu1 }
0x4946   : > { %v8856_v19 = vadd.f32 %v11623_v45, %v8855_v34  ;;  %v13136_v1 = vpop.f32.mrb[245].mxu1 }
0x4947   : > { %v8858_v17 = vpop.f32.mrb[246].mxu1 }
0x4948   : > { %v8921_v39 = vpack.c.bf16 %v8856_v19, %v8856_v19  ;;  %v13137_v28 = vpop.f32.mrb[247].mxu1 }
0x494a   : > { %v8926_v50 = vsel %vm4772_vm10, %v8921_v39, 0 }
0x494b   : > { %13145 = vmatpush3.bf16.msra.mxu1 %v8926_v50 }
0x494c   : > { %13156 = vmatprep.subr.bf16.mxu1 %v13751_v11 }
0x4a0d   : > { %v8659_v41 = vpop.f32.mrb[244].mxu0 }
0x4a0e   : > { %v8665_v48 = vadd.f32 %v8659_v41, %v14996_v49  ;;  %v13112_v52 = vpop.f32.mrb[245].mxu0 }
0x4a0f   : > { %v8662_v53 = vpop.f32.mrb[246].mxu0  ;;  %v13561_v52 = vld [vmem:[%s15332_s7 + $0x248] sm:$0xff]  }
0x4a10   : > { %v13113_v54 = vpop.f32.mrb[247].mxu0 }
0x4a15   : > { %v8790_v56 = vpop.f32.mrb[248].mxu0 }
0x4a16   : > { %v8791_v57 = vadd.f32 %v11614_v55, %v8790_v56  ;;  %v13128_v58 = vpop.f32.mrb[249].mxu0 }
0x4a17   : > { %v8793_v40 = vpop.f32.mrb[250].mxu0 }
0x4a18   : > { %v8862_v10 = vpack.c.bf16 %v8791_v57, %v8791_v57  ;;  %v13129_v60 = vpop.f32.mrb[251].mxu0  ;;  %v11635_v57 = vld [vmem:[%s15337_s22 + $0x3] ss:$0 sm:$0xff] }
0x4a19   : > { %v11636_v40 = vld [vmem:[%s15338_s23 + $0x3] ss:$0 sm:$0xff] }
0x4a1a   : > { %v8867_v62 = vsel %vm1311_vm8, %v8862_v10, 0 }
0x4a1b   : > { %13139 = vmatpush3.bf16.xpose.msra.mxu0 %v8867_v62 }
0x4a1c   : > { %13150 = vmatprep.subr.bf16.mxu0 %v13751_v11 }
0x4a22   : > { %13141 = vmatmul.mubr.msk.bf16.vlgmr.msra.gmra.mrb[252].mxu0 %vm1311_vm8, %v8861_v0  ;;  %v11642_v0 = vld [vmem:[%s15333_s10 + $0x24] ss:$0 sm:$0xff] }
0x4a23   : > { %13152 = vmatprep.mubr.msk.bf16.mxu0 %vm13753_vm3, %v13751_v11 }
0x4af5   : > { %v8903_v49 = vpop.f32.mrb[252].mxu0 }
0x4af6   : > { %v8904_v21 = vadd.f32 %v8903_v49, %v13954_v26  ;;  %v13142_v46 = vpop.f32.mrb[253].mxu0  ;;  %v11629_v26 = vld [vmem:[%s15334_s11 + $0x2c] sm:$0xf] }
0x4af7   : > { %v8906_v51 = vpop.f32.mrb[254].mxu0  ;;  %v8976_v12 = vsel %vm1374_vm7, %v11629_v26, 0 }
0x4af8   : > { %v13143_v2 = vpop.f32.mrb[255].mxu0  ;;  %v8909_v3 = vsel %vm4754_vm11, %v8904_v21, -inf  ;;  %13151 = vmatpush3.bf16.msra.mxu0 %v8976_v12  ;;  %v13566_v12 = vld [vmem:[%s15332_s7 + $0x2d0] sm:$0xff]  }
0x4af9   : > { %8910 = vmax.xlane.f32.xlu0 %v8909_v3  ;;  %13164 = vmatprep.subr.bf16.mxu0 %v13751_v11  ;;  %v13564_v2 = vld [vmem:[%s15332_s7 + $0x250] sm:$0xff]  }
0x4b86   : > { %v8911_v4 = vpop.xlane.xlu0 %8910 }
0x4b87   : > { %v8912_v27 = vsub.f32 %v8904_v21, %v8911_v4 }
0x4b89   : > { %v8913_v6 = vmul.f32 1.442695, %v8912_v27  ;;  %v11660_v27 = vld [vmem:[%s15333_s10 + $0x2c] ss:$0 sm:$0xff] }
0x4b8b   : > { %13682 = vpow2.f32 %v8913_v6  ;;  %v13565_v6 = vld [vmem:[%s15332_s7 + $0x258] sm:$0xff]  }
0x4b95   : > { %v13683_v7 = vpop.eup %13682 }
0x4b96   : > { %v8915_v8 = vsel %vm4754_vm11, %v13683_v7, 0.0  ;;  %v8920_v9 = vpack.c.bf16 %v13683_v7, %v13683_v7 }
0x4b97   : > { %8916 = vadd.xlane.f32.xlu1 %v8915_v8 }
0x4b98   : > { %13147 = vmatmul.mubr.msk.bf16.vlgmr.msra.gmra.mrb[248].mxu1 %vm4768_vm12, %v8920_v9 }
0x4b99   : > { %13160 = vmatprep.mubr.msk.bf16.mxu1 %vm13753_vm3, %v13751_v11 }
0x4c24   : > { %v8917_v13 = vpop.xlane.xlu1 %8916 }
0x4c25   : > { %v8918_v14 = vmax.f32 %v8917_v13, 1e-30 }
0x4c27   : > { %13684 = vrcp.f32 %v8918_v14 }
0x4c31   : > { %v13685_v15 = vpop.eup %13684 }
0x4c6b   : > { %v8962_v16 = vpop.f32.mrb[248].mxu1 }
0x4c6c   : > { %v8968_v18 = vmul.f32 %v13685_v15, %v8962_v16  ;;  %v13148_v5 = vpop.f32.mrb[249].mxu1  ;;  %v13567_v16 = vld [vmem:[%s15332_s7 + $0x2d8] sm:$0xff]  }
0x4c6d   : > { %v8965_v20 = vpop.f32.mrb[250].mxu1 }
0x4c6e   : > { %v8971_v23 = vpack.c.bf16 %v8968_v18, %v8968_v18  ;;  %v13149_v24 = vpop.f32.mrb[251].mxu1 }
0x4c70   : > { %13153 = vmatmul.mubr.msk.bf16.vlgmr.msra.gmra.mrb[0].mxu0 %vm1311_vm8, %v8971_v23 }
0x4c71   : > { %13165 = vmatpush3.bf16.msra.mxu0 %v13558_v22  ;;  %13168 = vmatprep.mubr.msk.bf16.mxu0 %vm13753_vm3, %v13751_v11 }
0x4c72   : > { %13166 = vmatprep.subr.bf16.mxu0 %v13751_v11 }
0x4c75   : > { %13167 = vmatpush3.bf16.msra.mxu0 %v13559_v25 }
0x4c76   : > { %13180 = vmatprep.subr.bf16.mxu0 %v13751_v11 }
0x4c78   : > { %13169 = vmatmul.mubr.msk.bf16.vlgmr.msra.gmra.mrb[4].mxu0 %vm1129_vm6, %v14656_v59 }
0x4c79   : > { %13182 = vmatprep.mubr.msk.bf16.mxu0 %vm13753_vm3, %v13751_v11 }
0x4d43   : > { %v9012_v29 = vpop.f32.mrb[0].mxu0 }
0x4d44   : > { %v9018_v31 = vadd.f32 %v9012_v29, %v8665_v48  ;;  %v13154_v33 = vpop.f32.mrb[1].mxu0  ;;  %v13560_v48 = vld [vmem:[%s15332_s7 + $0x240] sm:$0xff]  }
0x4d45   : > { %v9015_v35 = vpop.f32.mrb[2].mxu0  ;;  %13157 = vmatpush3.bf16.msra.mxu1 %v13560_v48  ;;  %v11681_v48 = vld [vmem:[%s15333_s10 + $0x29] ss:$0 sm:$0xff] }
0x4d46   : > { %v9027_v36 = vadd.f32 %v11632_v30, %v9018_v31  ;;  %v13155_v37 = vpop.f32.mrb[3].mxu0  ;;  %13158 = vmatprep.subr.bf16.mxu1 %v13751_v11  ;;  %v11690_v31 = vld [vmem:[%s15333_s10 + $0x2d] ss:$0 sm:$0xff] }
0x4d48   : > { %v9028_v32 = vadd.f32 %v9027_v36, %v14879_v47 }
0x4d49   : > { %13159 = vmatpush3.bf16.msra.mxu1 %v13561_v52 }
0x4d4a   : > { %v9033_v42 = vsel %vm5934_vm13, %v9028_v32, 0.0  ;;  %13172 = vmatprep.subr.bf16.mxu1 %v13751_v11 }
0x4d4b   : > { %9034 = vadd.xlane.f32.xlu0 %v9033_v42  ;;  %v9188_v43 = vpop.f32.mrb[4].mxu0 }
0x4d4c   : > { %v9189_v44 = vadd.f32 %v11651_v38, %v9188_v43  ;;  %v13170_v45 = vpop.f32.mrb[5].mxu0 }
0x4d4d   : > { %v9191_v34 = vpop.f32.mrb[6].mxu0 }
0x4d4e   : > { %v9260_v19 = vpack.c.bf16 %v9189_v44, %v9189_v44  ;;  %v13171_v1 = vpop.f32.mrb[7].mxu0 }
0x4d50   : > { %v9265_v17 = vsel %vm1311_vm8, %v9260_v19, 0  ;;  %v13568_v19 = vld [vmem:[%s15332_s7 + $0x290] sm:$0xff]  }
0x4d51   : > { %13181 = vmatpush3.bf16.xpose.msra.mxu0 %v9265_v17 }
0x4d52   : > { %13192 = vmatprep.subr.bf16.mxu0 %v13751_v11 }
0x4dd8   : > { %v9035_v39 = vpop.xlane.xlu0 %9034 }
0x4dd9   : > { %v9036_v28 = vmul.f32 0.03125, %v9035_v39  ;;  %v13569_v39 = vld [vmem:[%s15332_s7 + $0x298] sm:$0xff]  }
0x4ddb   : > { %v9037_v47 = vsub.f32 %v9028_v32, %v9036_v28 }
0x4ddd   : > { %v9038_v50 = vmul.f32 %v9037_v47, %v9037_v47 }
0x4ddf   : > { %v9039_v41 = vsel %vm5934_vm13, %v9038_v50, 0.0 }
0x4de0   : > { %9040 = vadd.xlane.f32.xlu1 %v9039_v41 }
0x4e6d   : > { %v9041_v53 = vpop.xlane.xlu1 %9040 }
0x4e6e   : > { %v9042_v54 = vmul.f32 0.03125, %v9041_v53 }
0x4e70   : > { %v9043_v55 = vadd.f32 1e-05, %v9042_v54 }
0x4e72   : > { %13686 = vrsqrt.f32 %v9043_v55 }
0x4e7c   : > { %v13687_v56 = vpop.eup %13686 }
0x4e7d   : > { %v9045_v58 = vmul.f32 %v13687_v56, %v9037_v47 }
0x4e7f   : > { %v9052_v10 = vmul.f32 %v11635_v57, %v9045_v58  ;;  %v11672_v58 = vld [vmem:[%s15333_s10 + $0x25] ss:$0 sm:$0xff] }
0x4e81   : > { %v15085_v60 = vadd.f32 %v11636_v40, %v9052_v10 }
0x4e83   : > { %v15090_v62 = vpack.c.bf16 %v15085_v60, %v15085_v60 }
0x4e85   : > { %13161 = vmatmul.mubr.msk.bf16.vlgmr.msra.gmra.mrb[252].mxu1 %vm1129_vm6, %v15090_v62 }
0x4e86   : > { %13173 = vmatpush3.bf16.msra.mxu1 %v13562_v61  ;;  %13176 = vmatprep.mubr.msk.bf16.mxu1 %vm13753_vm3, %v13751_v11 }
0x4e87   : > { %13174 = vmatprep.subr.bf16.mxu1 %v13751_v11 }
0x4e8a   : > { %13175 = vmatpush3.bf16.msra.mxu1 %v13563_v63 }
0x4e8b   : > { %13186 = vmatprep.subr.bf16.mxu1 %v13751_v11 }
0x4e8d   : > { %13177 = vmatmul.mubr.msk.bf16.vlgmr.msra.gmra.mrb[0].mxu1 %vm1129_vm6, %v14656_v59 }
0x4e8e   : > { %13188 = vmatprep.mubr.msk.bf16.mxu1 %vm13753_vm3, %v13751_v11 }
0x4f58   : > { %v9123_v49 = vpop.f32.mrb[252].mxu1 }
0x4f59   : > { %v9124_v21 = vadd.f32 %v11642_v0, %v9123_v49  ;;  %v13162_v46 = vpop.f32.mrb[253].mxu1 }
0x4f5a   : > { %v9126_v51 = vpop.f32.mrb[254].mxu1 }
0x4f5b   : > { %v9259_v3 = vpack.c.bf16 %v9124_v21, %v9124_v21  ;;  %v13163_v4 = vpop.f32.mrb[255].mxu1 }
0x4f5d   : > { %13183 = vmatmul.mubr.msk.bf16.vlgmr.msra.gmra.mrb[8].mxu0 %vm1311_vm8, %v9259_v3 }
0x4f5e   : > { %13193 = vmatpush3.bf16.msra.mxu0 %v13564_v2  ;;  %13196 = vmatprep.mubr.msk.bf16.mxu0 %vm13753_vm3, %v13751_v11 }
0x4f5f   : > { %13194 = vmatprep.subr.bf16.mxu0 %v13751_v11 }
0x4f60   : > { %v9253_v7 = vpop.f32.mrb[0].mxu1 }
0x4f61   : > { %v9254_v8 = vadd.f32 %v11660_v27, %v9253_v7  ;;  %v13178_v9 = vpop.f32.mrb[1].mxu1 }
0x4f62   : > { %v9256_v26 = vpop.f32.mrb[2].mxu1  ;;  %13195 = vmatpush3.bf16.msra.mxu0 %v13565_v6  ;;  %v11666_v6 = vld [vmem:[%s15334_s11 + $0x30] sm:$0xf] }
0x4f63   : > { %v9319_v13 = vpack.c.bf16 %v9254_v8, %v9254_v8  ;;  %v13179_v14 = vpop.f32.mrb[3].mxu1  ;;  %13208 = vmatprep.subr.bf16.mxu0 %v13751_v11  ;;  %v9726_v26 = vsel %vm1374_vm7, %v11666_v6, 0 }
0x4f64   : > { %v13570_v14 = vld [vmem:[%s15332_s7 + $0x2a0] sm:$0xff]  }
0x4f65   : > { %v9324_v15 = vsel %vm1374_vm7, %v9319_v13, 0  ;;  %13197 = vmatmul.mubr.msk.bf16.vlgmr.msra.gmra.mrb[12].mxu0 %vm1129_vm6, %v15090_v62 }
0x4f66   : > { %13187 = vmatpush3.bf16.msra.mxu1 %v9324_v15  ;;  %13209 = vmatpush3.bf16.msra.mxu0 %v13566_v12 }
0x4f67   : > { %13210 = vmatprep.subr.bf16.mxu0 %v13751_v11  ;;  %13212 = vmatprep.mubr.msk.bf16.mxu0 %vm13753_vm3, %v13751_v11 }
0x4f68   : > { %13200 = vmatprep.subr.bf16.mxu1 %v13751_v11 }
0x4f6a   : > { %13211 = vmatpush3.bf16.msra.mxu0 %v13567_v16  ;;  %v13571_v16 = vld [vmem:[%s15332_s7 + $0x2a8] sm:$0xff]  }
0x4f6b   : > { %13222 = vmatprep.subr.bf16.mxu0 %v13751_v11 }
0x4f6d   : > { %13213 = vmatmul.mubr.msk.bf16.vlgmr.msra.gmra.mrb[16].mxu0 %vm1129_vm6, %v14656_v59 }
0x4f6e   : > { %13224 = vmatprep.mubr.msk.bf16.mxu0 %vm13753_vm3, %v13751_v11 }
0x5030   : > { %v9301_v18 = vpop.f32.mrb[8].mxu0 }
0x5031   : > { %v13184_v5 = vpop.f32.mrb[9].mxu0  ;;  %v9307_v20 = vsel %vm6213_vm14, %v9301_v18, -inf }
0x5032   : > { %9308 = vmax.xlane.f32.xlu0 %v9307_v20  ;;  %v9304_v22 = vpop.f32.mrb[10].mxu0 }
0x5033   : > { %v13185_v23 = vpop.f32.mrb[11].mxu0 }
0x5038   : > { %v9429_v24 = vpop.f32.mrb[12].mxu0 }
0x5039   : > { %v13198_v25 = vpop.f32.mrb[13].mxu0  ;;  %v9430_v10 = vadd.f32 %v11672_v58, %v9429_v24 }
0x503a   : > { %v9432_v29 = vpop.f32.mrb[14].mxu0 }
0x503b   : > { %v13199_v30 = vpop.f32.mrb[15].mxu0  ;;  %v9565_v61 = vpack.c.bf16 %v9430_v10, %v9430_v10 }
0x5040   : > { %v9559_v33 = vpop.f32.mrb[16].mxu0 }
0x5041   : > { %v9560_v35 = vadd.f32 %v11690_v31, %v9559_v33  ;;  %v13214_v36 = vpop.f32.mrb[17].mxu0  ;;  %v13572_v31 = vld [vmem:[%s15332_s7 + $0x260] sm:$0xff]  }
0x5042   : > { %v9562_v37 = vpop.f32.mrb[18].mxu0  ;;  %v13573_v36 = vld [vmem:[%s15332_s7 + $0x268] sm:$0xff]  }
0x5043   : > { %v9625_v32 = vpack.c.bf16 %v9560_v35, %v9560_v35  ;;  %v13215_v38 = vpop.f32.mrb[19].mxu0 }
0x5045   : > { %v9630_v42 = vsel %vm1374_vm7, %v9625_v32, 0 }
0x5046   : > { %13223 = vmatpush3.bf16.msra.mxu0 %v9630_v42  ;;  %v13574_v42 = vld [vmem:[%s15332_s7 + $0x2e0] sm:$0xff]  }
0x5047   : > { %13234 = vmatprep.subr.bf16.mxu0 %v13751_v11 }
0x50bf   : > { %v9309_v43 = vpop.xlane.xlu0 %9308 }
0x50c0   : > { %v9310_v44 = vsub.f32 %v9301_v18, %v9309_v43  ;;  %v11696_v18 = vld [vmem:[%s15334_s11 + $0x34] sm:$0xf] }
0x50c1   : > { %v9680_v5 = vsel %vm1374_vm7, %v11696_v18, 0  ;;  %v13578_v18 = vld [vmem:[%s15332_s7 + $0x2f0] sm:$0xff]  }
0x50c2   : > { %v9311_v45 = vmul.f32 1.442695, %v9310_v44  ;;  %v11713_v44 = vld [vmem:[%s15333_s10 + $0x2a] ss:$0 sm:$0xff] }
0x50c4   : > { %13688 = vpow2.f32 %v9311_v45  ;;  %v13575_v45 = vld [vmem:[%s15332_s7 + $0x2e8] sm:$0xff]  }
0x50ce   : > { %v13689_v34 = vpop.eup %13688 }
0x50cf   : > { %v9318_v1 = vpack.c.bf16 %v13689_v34, %v13689_v34  ;;  %v9313_v17 = vsel %vm6213_vm14, %v13689_v34, 0.0 }
0x50d0   : > { %9314 = vadd.xlane.f32.xlu0 %v9313_v17 }
0x50d1   : > { %13189 = vmatmul.mubr.msk.bf16.vlgmr.msra.gmra.mrb[4].mxu1 %vm1311_vm8, %v9318_v1 }
0x50d2   : > { %13201 = vmatpush3.bf16.msra.mxu1 %v13568_v19  ;;  %13204 = vmatprep.mubr.msk.bf16.mxu1 %vm13753_vm3, %v13751_v11 }
0x50d3   : > { %13202 = vmatprep.subr.bf16.mxu1 %v13751_v11 }
0x50d6   : > { %13203 = vmatpush3.bf16.msra.mxu1 %v13569_v39 }
0x50d7   : > { %13216 = vmatprep.subr.bf16.mxu1 %v13751_v11 }
0x50d9   : > { %13205 = vmatmul.mubr.msk.bf16.vlgmr.msra.gmra.mrb[8].mxu1 %vm1129_vm6, %v14656_v59 }
0x50da   : > { %13218 = vmatprep.mubr.msk.bf16.mxu1 %vm13753_vm3, %v13751_v11 }
0x515d   : > { %v9315_v3 = vpop.xlane.xlu0 %9314 }
0x515e   : > { %v9316_v27 = vmax.f32 %v9315_v3, 1e-30 }
0x51a4   : > { %v9360_v28 = vpop.f32.mrb[4].mxu1 }
0x51a5   : > { %v13190_v47 = vpop.f32.mrb[5].mxu1 }
0x51a6   : > { %v9363_v50 = vpop.f32.mrb[6].mxu1 }
0x51a7   : > { %v13191_v41 = vpop.f32.mrb[7].mxu1 }
0x51ac   : > { %v9494_v52 = vpop.f32.mrb[8].mxu1 }
0x51ad   : > { %v9495_v53 = vadd.f32 %v11681_v48, %v9494_v52  ;;  %v13206_v54 = vpop.f32.mrb[9].mxu1 }
0x51ae   : > { %v9497_v55 = vpop.f32.mrb[10].mxu1  ;;  %v11704_v54 = vld [vmem:[%s15333_s10 + $0x26] ss:$0 sm:$0xff] }
0x51af   : > { %v9566_v56 = vpack.c.bf16 %v9495_v53, %v9495_v53  ;;  %v13207_v57 = vpop.f32.mrb[11].mxu1 }
0x51b1   : > { %v9571_v40 = vsel %vm1311_vm8, %v9566_v56, 0 }
0x51b2   : > { %13217 = vmatpush3.bf16.xpose.msra.mxu1 %v9571_v40 }
0x51b3   : > { %13228 = vmatprep.subr.bf16.mxu1 %v13751_v11 }
0x51b9   : > { %13219 = vmatmul.mubr.msk.bf16.vlgmr.msra.gmra.mrb[12].mxu1 %vm1311_vm8, %v9565_v61  ;;  %v11722_v61 = vld [vmem:[%s15333_s10 + $0x2e] ss:$0 sm:$0xff] }
0x51ba   : > { %13230 = vmatprep.mubr.msk.bf16.mxu1 %vm13753_vm3, %v13751_v11  ;;  %13229 = vmatpush3.bf16.msra.mxu1 %v9680_v5  ;;  %v13579_v5 = vld [vmem:[%s15332_s7 + $0x2f8] sm:$0xff]  }
0x51bb   : > { %13240 = vmatprep.subr.bf16.mxu1 %v13751_v11 }
0x528c   : > { %v9607_v63 = vpop.f32.mrb[12].mxu1 }
0x528d   : > { %v13220_v0 = vpop.f32.mrb[13].mxu1  ;;  %v9613_v49 = vsel %vm6213_vm14, %v9607_v63, -inf }
0x528e   : > { %9614 = vmax.xlane.f32.xlu1 %v9613_v49  ;;  %v9610_v21 = vpop.f32.mrb[14].mxu1 }
0x528f   : > { %v13221_v46 = vpop.f32.mrb[15].mxu1 }
0x531b   : > { %v9615_v51 = vpop.xlane.xlu1 %9614 }
0x531c   : > { %v9616_v2 = vsub.f32 %v9607_v63, %v9615_v51 }
0x531e   : > { %v9617_v4 = vmul.f32 1.442695, %v9616_v2 }
0x5320   : > { %13690 = vpow2.f32 %v9617_v4 }
0x5321   : > { %13692 = vrcp.f32 %v9316_v27 }
0x532a   : > { %v13691_v7 = vpop.eup %13690 }
0x532b   : > { %v9624_v8 = vpack.c.bf16 %v13691_v7, %v13691_v7  ;;  %v9619_v9 = vsel %vm6213_vm14, %v13691_v7, 0.0  ;;  %v13693_v12 = vpop.eup %13692 }
0x532c   : > { %9620 = vadd.xlane.f32.xlu1 %v9619_v9  ;;  %v9366_v13 = vmul.f32 %v13693_v12, %v9360_v28 }
0x532d   : > { %13225 = vmatmul.mubr.msk.bf16.vlgmr.msra.gmra.mrb[20].mxu0 %vm1311_vm8, %v9624_v8 }
0x532e   : > { %13235 = vmatpush3.bf16.msra.mxu0 %v9726_v26  ;;  %13236 = vmatprep.mubr.msk.bf16.mxu0 %vm13753_vm3, %v13751_v11  ;;  %v9369_v15 = vpack.c.bf16 %v9366_v13, %v9366_v13  ;;  %v13576_v13 = vld [vmem:[%s15332_s7 + $0x270] sm:$0xff]  }
0x532f   : > { %13248 = vmatprep.subr.bf16.mxu0 %v13751_v11 }
0x5335   : > { %13237 = vmatmul.mubr.msk.bf16.vlgmr.msra.gmra.mrb[24].mxu0 %vm1311_vm8, %v9369_v15 }
0x5336   : > { %13249 = vmatpush3.bf16.msra.mxu0 %v13570_v14  ;;  %13252 = vmatprep.mubr.msk.bf16.mxu0 %vm13753_vm3, %v13751_v11 }
0x5337   : > { %13250 = vmatprep.subr.bf16.mxu0 %v13751_v11 }
0x533a   : > { %13251 = vmatpush3.bf16.msra.mxu0 %v13571_v16  ;;  %v13577_v16 = vld [vmem:[%s15332_s7 + $0x278] sm:$0xff]  }
0x533b   : > { %13264 = vmatprep.subr.bf16.mxu0 %v13751_v11 }
0x533d   : > { %13253 = vmatmul.mubr.msk.bf16.vlgmr.msra.gmra.mrb[28].mxu0 %vm1129_vm6, %v14656_v59 }
0x533e   : > { %13266 = vmatprep.mubr.msk.bf16.mxu0 %vm13753_vm3, %v13751_v11 }
0x53b9   : > { %v9621_v20 = vpop.xlane.xlu1 %9620 }
0x53ba   : > { %v9622_v22 = vmax.f32 %v9621_v20, 1e-30  ;;  %v11728_v20 = vld [vmem:[%s15334_s11 + $0x38] sm:$0xf] }
0x53bc   : > { %13694 = vrcp.f32 %v9622_v22  ;;  %v10078_v22 = vsel %vm1374_vm7, %v11728_v20, 0 }
0x53c6   : > { %v13695_v23 = vpop.eup %13694 }
0x5400   : > { %v9666_v24 = vpop.f32.mrb[20].mxu0 }
0x5401   : > { %v9672_v25 = vmul.f32 %v13695_v23, %v9666_v24  ;;  %v13226_v29 = vpop.f32.mrb[21].mxu0 }
0x5402   : > { %v9669_v30 = vpop.f32.mrb[22].mxu0 }
0x5403   : > { %v9675_v33 = vpack.c.bf16 %v9672_v25, %v9672_v25  ;;  %v13227_v35 = vpop.f32.mrb[23].mxu0 }
0x5405   : > { %13231 = vmatmul.mubr.msk.bf16.vlgmr.msra.gmra.mrb[16].mxu1 %vm1311_vm8, %v9675_v33  ;;  %v13580_v33 = vld [vmem:[%s15332_s7 + $0x2b0] sm:$0xff]  }
0x5406   : > { %13241 = vmatpush3.bf16.msra.mxu1 %v13572_v31  ;;  %13244 = vmatprep.mubr.msk.bf16.mxu1 %vm13753_vm3, %v13751_v11 }
0x5407   : > { %13242 = vmatprep.subr.bf16.mxu1 %v13751_v11 }
0x5408   : > { %v9762_v37 = vpop.f32.mrb[24].mxu0 }
0x5409   : > { %v13238_v32 = vpop.f32.mrb[25].mxu0 }
0x540a   : > { %v9765_v38 = vpop.f32.mrb[26].mxu0  ;;  %13243 = vmatpush3.bf16.msra.mxu1 %v13573_v36 }
0x540b   : > { %v13239_v43 = vpop.f32.mrb[27].mxu0  ;;  %13256 = vmatprep.subr.bf16.mxu1 %v13751_v11 }
0x540d   : > { %13245 = vmatmul.mubr.msk.bf16.vlgmr.msra.gmra.mrb[20].mxu1 %vm1129_vm6, %v15090_v62 }
0x540e   : > { %13257 = vmatpush3.bf16.msra.mxu1 %v13574_v42  ;;  %13260 = vmatprep.mubr.msk.bf16.mxu1 %vm13753_vm3, %v13751_v11 }
0x540f   : > { %13258 = vmatprep.subr.bf16.mxu1 %v13751_v11 }
0x5410   : > { %v9892_v34 = vpop.f32.mrb[28].mxu0 }
0x5411   : > { %v9893_v19 = vadd.f32 %v11713_v44, %v9892_v34  ;;  %v13254_v1 = vpop.f32.mrb[29].mxu0  ;;  %v11753_v44 = vld [vmem:[%s15333_s10 + $0x2f] ss:$0 sm:$0xff] }
0x5412   : > { %v9895_v17 = vpop.f32.mrb[30].mxu0  ;;  %13259 = vmatpush3.bf16.msra.mxu1 %v13575_v45 }
0x5413   : > { %v9964_v39 = vpack.c.bf16 %v9893_v19, %v9893_v19  ;;  %v13255_v28 = vpop.f32.mrb[31].mxu0  ;;  %13270 = vmatprep.subr.bf16.mxu1 %v13751_v11 }
0x5415   : > { %v9969_v47 = vsel %vm1311_vm8, %v9964_v39, 0  ;;  %13261 = vmatmul.mubr.msk.bf16.vlgmr.msra.gmra.mrb[24].mxu1 %vm1129_vm6, %v14656_v59 }
0x5416   : > { %13265 = vmatpush3.bf16.xpose.msra.mxu0 %v9969_v47  ;;  %13272 = vmatprep.mubr.msk.bf16.mxu1 %vm13753_vm3, %v13751_v11 }
0x5417   : > { %13276 = vmatprep.subr.bf16.mxu0 %v13751_v11 }
0x54d8   : > { %v9716_v50 = vpop.f32.mrb[16].mxu1 }
0x54d9   : > { %v15193_v41 = vadd.f32 %v9762_v37, %v9716_v50  ;;  %v13232_v48 = vpop.f32.mrb[17].mxu1  ;;  %v13581_v37 = vld [vmem:[%s15332_s7 + $0x2b8] sm:$0xff]  }
0x54da   : > { %v9719_v52 = vpop.f32.mrb[18].mxu1 }
0x54db   : > { %v13233_v53 = vpop.f32.mrb[19].mxu1 }
0x54dc   : > { %v11744_v53 = vld [vmem:[%s15333_s10 + $0x2b] ss:$0 sm:$0xff] }
0x54e0   : > { %v9827_v55 = vpop.f32.mrb[20].mxu1 }
0x54e1   : > { %v9828_v56 = vadd.f32 %v11704_v54, %v9827_v55  ;;  %v13246_v57 = vpop.f32.mrb[21].mxu1 }
0x54e2   : > { %v9830_v58 = vpop.f32.mrb[22].mxu1 }
0x54e3   : > { %v9963_v40 = vpack.c.bf16 %v9828_v56, %v9828_v56  ;;  %v13247_v10 = vpop.f32.mrb[23].mxu1 }
0x54e4   : > { %v11735_v10 = vld [vmem:[%s15333_s10 + $0x27] ss:$0 sm:$0xff] }
0x54e5   : > { %13267 = vmatmul.mubr.msk.bf16.vlgmr.msra.gmra.mrb[32].mxu0 %vm1311_vm8, %v9963_v40 }
0x54e6   : > { %13278 = vmatprep.mubr.msk.bf16.mxu0 %vm13753_vm3, %v13751_v11  ;;  %13277 = vmatpush3.bf16.msra.mxu0 %v10078_v22 }
0x54e7   : > { %13290 = vmatprep.subr.bf16.mxu0 %v13751_v11 }
0x54e8   : > { %v9957_v63 = vpop.f32.mrb[24].mxu1 }
0x54e9   : > { %v9958_v0 = vadd.f32 %v11722_v61, %v9957_v63  ;;  %v13262_v49 = vpop.f32.mrb[25].mxu1 }
0x54ea   : > { %v9960_v21 = vpop.f32.mrb[26].mxu1 }
0x54eb   : > { %v10023_v46 = vpack.c.bf16 %v9958_v0, %v9958_v0  ;;  %v13263_v51 = vpop.f32.mrb[27].mxu1 }
0x54ed   : > { %v10028_v2 = vsel %vm1374_vm7, %v10023_v46, 0 }
0x54ee   : > { %13271 = vmatpush3.bf16.msra.mxu1 %v10028_v2 }
0x54ef   : > { %13282 = vmatprep.subr.bf16.mxu1 %v13751_v11 }
0x55b8   : > { %v10005_v3 = vpop.f32.mrb[32].mxu0 }
0x55b9   : > { %v13268_v4 = vpop.f32.mrb[33].mxu0  ;;  %v10011_v27 = vsel %vm6213_vm14, %v10005_v3, -inf }
0x55ba   : > { %10012 = vmax.xlane.f32.xlu0 %v10011_v27  ;;  %v10008_v6 = vpop.f32.mrb[34].mxu0 }
0x55bb   : > { %v13269_v7 = vpop.f32.mrb[35].mxu0 }
0x5647   : > { %v10013_v8 = vpop.xlane.xlu0 %10012 }
0x5648   : > { %v10014_v9 = vsub.f32 %v10005_v3, %v10013_v8  ;;  %v11759_v8 = vld [vmem:[%s15334_s11 + $0x3c] sm:$0xf] }
0x564a   : > { %v10015_v26 = vmul.f32 1.442695, %v10014_v9  ;;  %v10431_v9 = vsel %vm1374_vm7, %v11759_v8, 0 }
0x564c   : > { %13696 = vpow2.f32 %v10015_v26 }
0x5656   : > { %v13697_v12 = vpop.eup %13696 }
0x5657   : > { %v10022_v14 = vpack.c.bf16 %v13697_v12, %v13697_v12  ;;  %v10017_v15 = vsel %vm6213_vm14, %v13697_v12, 0.0 }
0x5658   : > { %10018 = vadd.xlane.f32.xlu1 %v10017_v15 }
0x5659   : > { %13273 = vmatmul.mubr.msk.bf16.vlgmr.msra.gmra.mrb[28].mxu1 %vm1311_vm8, %v10022_v14 }
0x565a   : > { %13283 = vmatpush3.bf16.msra.mxu1 %v13576_v13  ;;  %13286 = vmatprep.mubr.msk.bf16.mxu1 %vm13753_vm3, %v13751_v11 }
0x565b   : > { %13284 = vmatprep.subr.bf16.mxu1 %v13751_v11 }
0x565e   : > { %13285 = vmatpush3.bf16.msra.mxu1 %v13577_v16 }
0x565f   : > { %13298 = vmatprep.subr.bf16.mxu1 %v13751_v11 }
0x5661   : > { %13287 = vmatmul.mubr.msk.bf16.vlgmr.msra.gmra.mrb[32].mxu1 %vm1129_vm6, %v15090_v62 }
0x5662   : > { %13299 = vmatpush3.bf16.msra.mxu1 %v13578_v18  ;;  %13302 = vmatprep.mubr.msk.bf16.mxu1 %vm13753_vm3, %v13751_v11 }
0x5663   : > { %13300 = vmatprep.subr.bf16.mxu1 %v13751_v11 }
0x5666   : > { %13301 = vmatpush3.bf16.msra.mxu1 %v13579_v5 }
0x5667   : > { %13312 = vmatprep.subr.bf16.mxu1 %v13751_v11 }
0x5669   : > { %13303 = vmatmul.mubr.msk.bf16.vlgmr.msra.gmra.mrb[36].mxu1 %vm1129_vm6, %v14656_v59 }
0x566a   : > { %13314 = vmatprep.mubr.msk.bf16.mxu1 %vm13753_vm3, %v13751_v11 }
0x56e5   : > { %v10019_v62 = vpop.xlane.xlu1 %10018 }
0x56e6   : > { %v10020_v23 = vmax.f32 %v10019_v62, 1e-30  ;;  %v11762_v62 = vld [vmem:[%s15335_s16 + $0x3] ss:$0 sm:$0xff] }
0x56e8   : > { %13698 = vrcp.f32 %v10020_v23 }
0x56f2   : > { %v13699_v24 = vpop.eup %13698 }
0x572c   : > { %v10064_v25 = vpop.f32.mrb[28].mxu1 }
0x572d   : > { %v10070_v29 = vmul.f32 %v13699_v24, %v10064_v25  ;;  %v13274_v30 = vpop.f32.mrb[29].mxu1 }
0x572e   : > { %v10067_v31 = vpop.f32.mrb[30].mxu1 }
0x572f   : > { %v10073_v35 = vpack.c.bf16 %v10070_v29, %v10070_v29  ;;  %v13275_v36 = vpop.f32.mrb[31].mxu1 }
0x5731   : > { %13279 = vmatmul.mubr.msk.bf16.vlgmr.msra.gmra.mrb[36].mxu0 %vm1311_vm8, %v10073_v35 }
0x5732   : > { %13291 = vmatpush3.bf16.msra.mxu0 %v13580_v33  ;;  %13294 = vmatprep.mubr.msk.bf16.mxu0 %vm13753_vm3, %v13751_v11 }
0x5733   : > { %13292 = vmatprep.subr.bf16.mxu0 %v13751_v11 }
0x5734   : > { %v10180_v32 = vpop.f32.mrb[32].mxu1 }
0x5735   : > { %v13288_v38 = vpop.f32.mrb[33].mxu1  ;;  %v10181_v63 = vadd.f32 %v11735_v10, %v10180_v32 }
0x5736   : > { %v10183_v42 = vpop.f32.mrb[34].mxu1  ;;  %13293 = vmatpush3.bf16.msra.mxu0 %v13581_v37 }
0x5737   : > { %v13289_v43 = vpop.f32.mrb[35].mxu1  ;;  %13306 = vmatprep.subr.bf16.mxu0 %v13751_v11  ;;  %v10316_v0 = vpack.c.bf16 %v10181_v63, %v10181_v63  ;;  %v13582_v42 = vld [vmem:[%s15339_s26 + $0x10] sm:$0xff]  }
0x5738   : > { %v13583_v43 = vld [vmem:[%s15339_s26 + $0x18] sm:$0xff]  }
0x5739   : > { %13295 = vmatmul.mubr.msk.bf16.vlgmr.msra.gmra.mrb[40].mxu0 %vm1129_vm6, %v14656_v59 }
0x573a   : > { %13308 = vmatprep.mubr.msk.bf16.mxu0 %vm13753_vm3, %v13751_v11 }
0x573c   : > { %v10310_v45 = vpop.f32.mrb[36].mxu1 }
0x573d   : > { %v10311_v34 = vadd.f32 %v11753_v44, %v10310_v45  ;;  %v13304_v19 = vpop.f32.mrb[37].mxu1  ;;  %v13585_v44 = vld [vmem:[%s15340_s1 + $0x28] sm:$0xff]  }
0x573e   : > { %v10313_v1 = vpop.f32.mrb[38].mxu1 }
0x573f   : > { %v10376_v17 = vpack.c.bf16 %v10311_v34, %v10311_v34  ;;  %v13305_v39 = vpop.f32.mrb[39].mxu1 }
0x5741   : > { %v10381_v28 = vsel %vm1374_vm7, %v10376_v17, 0  ;;  %v11765_v17 = vld [vmem:[%s15337_s22 + $0x4] ss:$0 sm:$0xff] }
0x5742   : > { %13313 = vmatpush3.bf16.msra.mxu1 %v10381_v28  ;;  %v11766_v28 = vld [vmem:[%s15338_s23 + $0x4] ss:$0 sm:$0xff] }
0x5743   : > { %13324 = vmatprep.subr.bf16.mxu1 %v13751_v11 }
0x5804   : > { %v10114_v47 = vpop.f32.mrb[36].mxu0 }
0x5805   : > { %v10120_v59 = vadd.f32 %v10114_v47, %v15193_v41  ;;  %v13280_v50 = vpop.f32.mrb[37].mxu0 }
0x5806   : > { %v10117_v48 = vpop.f32.mrb[38].mxu0 }
0x5807   : > { %v13281_v52 = vpop.f32.mrb[39].mxu0  ;;  %v13586_v48 = vld [vmem:[%s15340_s1 + $0x30] sm:$0xff]  }
0x5808   : > { %v13587_v52 = vld [vmem:[%s15340_s1 + $0x38] sm:$0xff]  }
0x580c   : > { %v10245_v54 = vpop.f32.mrb[40].mxu0 }
0x580d   : > { %v10246_v55 = vadd.f32 %v11744_v53, %v10245_v54  ;;  %v13296_v56 = vpop.f32.mrb[41].mxu0  ;;  %v11772_v53 = vld [vmem:[%s15341_s2 + $0x1] ss:$0 sm:$0xff] }
0x580e   : > { %v10248_v57 = vpop.f32.mrb[42].mxu0 }
0x580f   : > { %v10317_v58 = vpack.c.bf16 %v10246_v55, %v10246_v55  ;;  %v13297_v40 = vpop.f32.mrb[43].mxu0 }
0x5811   : > { %v10322_v61 = vsel %vm1311_vm8, %v10317_v58, 0 }
0x5812   : > { %13307 = vmatpush3.bf16.xpose.msra.mxu0 %v10322_v61  ;;  %v11785_v61 = vld [vmem:[%s15342_s3 + $0x1] ss:$0 sm:$0xff] }
0x5813   : > { %13318 = vmatprep.subr.bf16.mxu0 %v13751_v11 }
0x5819   : > { %13309 = vmatmul.mubr.msk.bf16.vlgmr.msra.gmra.mrb[44].mxu0 %vm1311_vm8, %v10316_v0 }
0x581a   : > { %13320 = vmatprep.mubr.msk.bf16.mxu0 %vm13753_vm3, %v13751_v11  ;;  %13319 = vmatpush3.bf16.msra.mxu0 %v10431_v9 }
0x581b   : > { %13332 = vmatprep.subr.bf16.mxu0 %v13751_v11 }
0x58ec   : > { %v10358_v41 = vpop.f32.mrb[44].mxu0 }
0x58ed   : > { %v13310_v49 = vpop.f32.mrb[45].mxu0  ;;  %v10364_v21 = vsel %vm6213_vm14, %v10358_v41, -inf }
0x58ee   : > { %10365 = vmax.xlane.f32.xlu0 %v10364_v21  ;;  %v10361_v46 = vpop.f32.mrb[46].mxu0 }
0x58ef   : > { %v13311_v51 = vpop.f32.mrb[47].mxu0 }
0x597b   : > { %v10366_v2 = vpop.xlane.xlu0 %10365 }
0x597c   : > { %v10367_v3 = vsub.f32 %v10358_v41, %v10366_v2 }
0x597e   : > { %v10368_v4 = vmul.f32 1.442695, %v10367_v3 }
0x5980   : > { %13700 = vpow2.f32 %v10368_v4 }
0x598a   : > { %v13701_v27 = vpop.eup %13700 }
0x598b   : > { %v10375_v6 = vpack.c.bf16 %v13701_v27, %v13701_v27  ;;  %v10370_v7 = vsel %vm6213_vm14, %v13701_v27, 0.0 }
0x598c   : > { %10371 = vadd.xlane.f32.xlu1 %v10370_v7 }
0x598d   : > { %13315 = vmatmul.mubr.msk.bf16.vlgmr.msra.gmra.mrb[40].mxu1 %vm1311_vm8, %v10375_v6 }
0x598e   : > { %13328 = vmatprep.mubr.msk.bf16.mxu1 %vm13753_vm3, %v13751_v11  ;;  %13325 = vmatpush3.bf16.msra.mxu1 %v13582_v42 }
0x598f   : > { %13326 = vmatprep.subr.bf16.mxu1 %v13751_v11 }
0x5992   : > { %13327 = vmatpush3.bf16.msra.mxu1 %v13583_v43  ;;  %v11799_v43 = vld [vmem:[%s13907_s4] ss:$0 sm:$0xff] }
0x5993   : > { %13344 = vmatprep.subr.bf16.mxu1 %v13751_v11 }
0x5a19   : > { %v10372_v26 = vpop.xlane.xlu1 %10371 }
0x5a1a   : > { %v10373_v12 = vmax.f32 %v10372_v26, 1e-30 }
0x5a1c   : > { %13702 = vrcp.f32 %v10373_v12  ;;  %v11793_v12 = vld [vmem:[%s15337_s22 + $0x5] ss:$0 sm:$0xff] }
0x5a26   : > { %v13703_v13 = vpop.eup %13702 }
0x5a60   : > { %v10417_v14 = vpop.f32.mrb[40].mxu1 }
0x5a61   : > { %v10423_v15 = vmul.f32 %v13703_v13, %v10417_v14  ;;  %v13316_v16 = vpop.f32.mrb[41].mxu1  ;;  %v11794_v14 = vld [vmem:[%s15338_s23 + $0x5] ss:$0 sm:$0xff] }
0x5a62   : > { %v10420_v18 = vpop.f32.mrb[42].mxu1 }
0x5a63   : > { %v10426_v5 = vpack.c.bf16 %v10423_v15, %v10423_v15  ;;  %v13317_v20 = vpop.f32.mrb[43].mxu1 }
0x5a65   : > { %13321 = vmatmul.mubr.msk.bf16.vlgmr.msra.gmra.mrb[48].mxu0 %vm1311_vm8, %v10426_v5 }
0x5a66   : > { %13340 = vmatprep.mubr.msk.bf16.mxu0 %vm13753_vm3, %v13751_v11 }
0x5b38   : > { %v10467_v22 = vpop.f32.mrb[48].mxu0 }
0x5b39   : > { %v10473_v23 = vadd.f32 %v10467_v22, %v10120_v59  ;;  %v13322_v24 = vpop.f32.mrb[49].mxu0 }
0x5b3a   : > { %v10470_v25 = vpop.f32.mrb[50].mxu0  ;;  %v13588_v24 = vld [vmem:[%s13902_s27] sm:$0xff]  }
0x5b3b   : > { %v10482_v29 = vadd.f32 %v11762_v62, %v10473_v23  ;;  %v13323_v30 = vpop.f32.mrb[51].mxu0  ;;  %v13589_v25 = vld [vmem:[%s13902_s27 + $0x8] sm:$0xff]  }
0x5b3d   : > { %v10483_v31 = vadd.f32 %v10482_v29, %v15085_v60  ;;  %v13584_v60 = vld [vmem:[%s15340_s1 + $0x20] sm:$0xff]   ;;  %s984_s1 = scalar_lea.vmem %s13912_s17, %s13934_s0 }
0x5b3e   : > { %13333 = vmatpush3.bf16.msra.mxu0 %v13584_v60 }
0x5b3f   : > { %v10488_v33 = vsel %vm5934_vm13, %v10483_v31, 0.0  ;;  %13334 = vmatprep.subr.bf16.mxu0 %v13751_v11 }
0x5b40   : > { %10489 = vadd.xlane.f32.xlu0 %v10488_v33 }
0x5b42   : > { %13335 = vmatpush3.bf16.msra.mxu0 %v13585_v44 }
0x5b43   : > { %13336 = vmatprep.subr.bf16.mxu0 %v13751_v11 }
0x5b46   : > { %13337 = vmatpush3.bf16.msra.mxu0 %v13586_v48 }
0x5b47   : > { %13338 = vmatprep.subr.bf16.mxu0 %v13751_v11 }
0x5b4a   : > { %13339 = vmatpush3.bf16.msra.mxu0 %v13587_v52 }
0x5bcd   : > { %v10490_v35 = vpop.xlane.xlu0 %10489 }
0x5bce   : > { %v10491_v36 = vmul.f32 0.03125, %v10490_v35  ;;  %v11797_v35 = vld [vmem:[%s15336_s18 + $0x1] ss:$0 sm:$0xff] }
0x5bd0   : > { %v10492_v37 = vsub.f32 %v10483_v31, %v10491_v36 }
0x5bd2   : > { %v10493_v32 = vmul.f32 %v10492_v37, %v10492_v37 }
0x5bd4   : > { %v10494_v38 = vsel %vm5934_vm13, %v10493_v32, 0.0 }
0x5bd5   : > { %10495 = vadd.xlane.f32.xlu1 %v10494_v38 }
0x5c62   : > { %v10496_v45 = vpop.xlane.xlu1 %10495 }
0x5c63   : > { %v10497_v34 = vmul.f32 0.03125, %v10496_v45 }
0x5c65   : > { %v10498_v19 = vadd.f32 1e-05, %v10497_v34 }
0x5c67   : > { %13704 = vrsqrt.f32 %v10498_v19 }
0x5c71   : > { %v13705_v1 = vpop.eup %13704 }
0x5c72   : > { %v10500_v39 = vmul.f32 %v13705_v1, %v10492_v37  ;;  %v11798_v37 = vld [vmem:[%s13897_s20 + $0x1] ss:$0 sm:$0xff] }
0x5c74   : > { %v10507_v47 = vmul.f32 %v11765_v17, %v10500_v39 }
0x5c76   : > { %v10514_v59 = vadd.f32 %v11766_v28, %v10507_v47 }
0x5c78   : > { %v10520_v50 = vpack.c.bf16 %v10514_v59, %v10514_v59 }
0x5c7a   : > { %13329 = vmatmul.mubr.msk.bf16.vlgmr.msra.gmra.mrb[44].mxu1 %vm1129_vm6, %v10520_v50 }
0x5c7b   : > { %13348 = vmatprep.mubr.msk.bf16.mxu1 %vm13753_vm3, %v13751_v11  ;;  %13345 = vmatpush3.bf16.msra.mxu1 %v13588_v24 }
0x5c7c   : > { %13346 = vmatprep.subr.bf16.mxu1 %v13751_v11 }
0x5c7f   : > { %13347 = vmatpush3.bf16.msra.mxu1 %v13589_v25 }
0x5d4d   : > { %v10578_v54 = vpop.f32.mrb[44].mxu1 }
0x5d4e   : > { %v10579_v55 = vadd.f32 %v11772_v53, %v10578_v54  ;;  %v13330_v56 = vpop.f32.mrb[45].mxu1 }
0x5d4f   : > { %v10581_v57 = vpop.f32.mrb[46].mxu1 }
0x5d50   : > { %v10584_v58 = vmax.f32 %v10579_v55, 0.0  ;;  %v13331_v40 = vpop.f32.mrb[47].mxu1 }
0x5d52   : > { %v10594_v10 = vpack.c.bf16 %v10584_v58, %v10584_v58 }
0x5d54   : > { %13341 = vmatmul.mubr.msk.bf16.vlgmr.msra.gmra.mrb[52].mxu0 %vm1023_vm4, %v10594_v10 }
0x5e27   : > { %v10664_v63 = vpop.f32.mrb[52].mxu0 }
0x5e28   : > { %v10665_v0 = vadd.f32 %v11785_v61, %v10664_v63  ;;  %v13342_v41 = vpop.f32.mrb[53].mxu0 }
0x5e29   : > { %v10667_v49 = vpop.f32.mrb[54].mxu0 }
0x5e2a   : > { %v13343_v21 = vpop.f32.mrb[55].mxu0  ;;  %v10670_v46 = vadd.f32 %v10665_v0, %v10514_v59 }
0x5e2c   : > { %v10675_v51 = vsel %vm5934_vm13, %v10670_v46, 0.0 }
0x5e2d   : > { %10676 = vadd.xlane.f32.xlu0 %v10675_v51 }
0x5eba   : > { %v10677_v2 = vpop.xlane.xlu0 %10676 }
0x5ebb   : > { %v10678_v3 = vmul.f32 0.03125, %v10677_v2 }
0x5ebd   : > { %v10679_v4 = vsub.f32 %v10670_v46, %v10678_v3 }
0x5ebf   : > { %v10680_v27 = vmul.f32 %v10679_v4, %v10679_v4 }
0x5ec1   : > { %v10681_v6 = vsel %vm5934_vm13, %v10680_v27, 0.0 }
0x5ec2   : > { %10682 = vadd.xlane.f32.xlu1 %v10681_v6 }
0x5f4f   : > { %v10683_v7 = vpop.xlane.xlu1 %10682 }
0x5f50   : > { %v10684_v8 = vmul.f32 0.03125, %v10683_v7 }
0x5f52   : > { %v10685_v9 = vadd.f32 1e-05, %v10684_v8 }
0x5f54   : > { %13706 = vrsqrt.f32 %v10685_v9 }
0x5f5e   : > { %v13707_v26 = vpop.eup %13706 }
0x5f5f   : > { %v10687_v13 = vmul.f32 %v13707_v26, %v10679_v4 }
0x5f61   : > { %v10694_v15 = vmul.f32 %v11793_v12, %v10687_v13 }
0x5f63   : > { %v10701_v16 = vadd.f32 %v11794_v14, %v10694_v15 }
0x5f65   : > { %v10706_v18 = vsel %vm5934_vm13, %v10701_v16, 0.0 }
0x5f66   : > { %10707 = vadd.xlane.f32.xlu0 %v10706_v18 }
0x5ff3   : > { %v10708_v5 = vpop.xlane.xlu0 %10707 }
0x5ff4   : > { %v10709_v20 = vmul.f32 0.03125, %v10708_v5 }
0x5ff6   : > { %v10710_v22 = vsub.f32 %v10701_v16, %v10709_v20 }
0x5ff8   : > { %v10711_v62 = vmul.f32 %v10710_v22, %v10710_v22 }
0x5ffa   : > { %v10712_v23 = vsel %vm5934_vm13, %v10711_v62, 0.0 }
0x5ffb   : > { %10713 = vadd.xlane.f32.xlu1 %v10712_v23 }
0x6088   : > { %v10714_v29 = vpop.xlane.xlu1 %10713 }
0x6089   : > { %v10715_v30 = vmul.f32 0.03125, %v10714_v29 }
0x608b   : > { %v10716_v31 = vadd.f32 1e-05, %v10715_v30 }
0x608d   : > { %13708 = vrsqrt.f32 %v10716_v31 }
0x6097   : > { %v13709_v33 = vpop.eup %13708 }
0x6098   : > { %v10718_v36 = vmul.f32 %v13709_v33, %v10710_v22 }
0x609a   : > { %v10725_v32 = vmul.f32 %v11797_v35, %v10718_v36 }
0x609c   : > { %v10732_v38 = vadd.f32 %v11798_v37, %v10725_v32 }
0x609e   : > { %v10737_v42 = vpack.c.bf16 %v10732_v38, %v10732_v38 }
0x60a0   : > { %13349 = vmatmul.mubr.msk.bf16.vlgmr.msra.gmra.mrb[48].mxu1 %vm1129_vm6, %v10737_v42 }
0x6173   : > { %v10794_v11 = vpop.f32.mrb[48].mxu1 }
0x6174   : > { %v10795_v60 = vadd.f32 %v11799_v43, %v10794_v11  ;;  %v13350_v44 = vpop.f32.mrb[49].mxu1 }
0x6175   : > { %v10797_v45 = vpop.f32.mrb[50].mxu1 }
0x6176   : > { %10801 = vst.msk [vmem:[%s984_s1] sm:$0x3f] %vm10800_vm15, %v10795_v60  ;;  %v13351_v34 = vpop.f32.mrb[51].mxu1 }
0x6177 PF: > { %s71_s15 = sadd.s32 1, %s13717_s15  }
0x6178   : > { %p68_p4 = scmp.ge.s32.totalorder %s71_s15, 4  }
0x617a   :  { %70 = sbr.rel (!%p68_p4) target bundleno = 52 (0x34), region = 405 }

</bundles_post_ra>
